<compile_context>
chip_gen: v6e
topology: v6e:2x2x1
jax: 0.10.0
libtpu: 0.0.40
codegen_flags: <defaults>
</compile_context>

<pallas_src>
import random

import jax
import jax.numpy as jnp
from jax.experimental import pallas as pl
from jax.experimental.pallas import tpu as pltpu


def _sigmoid(x):
    # sigmoid(x) = 0.5 * tanh(0.5 * x) + 0.5  -> single EUP op per element
    return 0.5 * jnp.tanh(0.5 * x) + 0.5


# --------------------------------------------------------------------------
# Fused Seq2Seq kernel: encoder LSTM + decoder LSTM + fc_out + argmax + TF
# --------------------------------------------------------------------------
def seq2seq_kernel(tf_ref,            # SMEM (T-1,) int32 (scalar prefetch)
                   x_ref,             # (S*B, E)      bf16  src embeddings
                   inp0_ref,          # (B, E)        bf16  emb of trg[0]
                   teach_ref,         # ((T-1)*B, E)  bf16  teacher embeddings
                   enc_wih_ref,       # (E, 4H)       bf16
                   enc_whh_ref,       # (H, 4H)       bf16
                   enc_b_ref,         # (1, 4H)       f32   (b_ih + b_hh)
                   dec_emb_ref,       # (V, E)        bf16
                   dec_wcat_ref,      # (E+H, 4H)     bf16  ([W_ih ; W_hh])
                   dec_b_ref,         # (1, 4H)       f32
                   dec_wout_ref,      # (H, V)        bf16
                   dec_bout_ref,      # (1, V)        f32
                   out_ref,           # ((T-1)*B, V)  f32   logits
                   gx_s,              # VMEM (S*B, 4H) f32  hoisted x@W_ih
                   xh_s):             # VMEM (B, E+H)  bf16 persistent [x | h]
    B, E = inp0_ref.shape
    H = enc_whh_ref.shape[0]
    V = dec_wout_ref.shape[1]
    S = x_ref.shape[0] // B
    Tm1 = out_ref.shape[0] // B

    def lstm_gates(gates, c):
        i = _sigmoid(gates[:, 0 * H:1 * H])
        f = _sigmoid(gates[:, 1 * H:2 * H])
        g = jnp.tanh(gates[:, 2 * H:3 * H])
        o = _sigmoid(gates[:, 3 * H:4 * H])
        c_new = f * c + i * g
        h_new = o * jnp.tanh(c_new)
        return h_new, c_new

    # ---- encoder, non-recurrent phase: hoisted x @ W_ih (+ folded bias) ----
    gx_s[...] = (jnp.dot(x_ref[...], enc_wih_ref[...],
                         preferred_element_type=jnp.float32)
                 + enc_b_ref[...])

    # ---- encoder recurrence: only h @ W_hh on the serial path --------------
    def enc_step(t, carry):
        h, c = carry
        row = pl.multiple_of(t * B, B)
        gates = (gx_s[pl.ds(row, B), :]
                 + jnp.dot(h.astype(jnp.bfloat16), enc_whh_ref[...],
                           preferred_element_type=jnp.float32))
        return lstm_gates(gates, c)

    z = jnp.zeros((B, H), jnp.float32)
    h, c = jax.lax.fori_loop(0, S, enc_step, (z, z), unroll=True)

    # ---- decoder loop: LSTM step + fc_out + argmax + teacher-forcing ------
    xh_s[:, 0:E] = inp0_ref[...]
    ids = jax.lax.broadcasted_iota(jnp.int32, (B, V), 1)   # hoisted iota

    def dec_step(j, carry):
        h, c = carry
        xh_s[:, E:E + H] = h.astype(jnp.bfloat16)
        gates = (jnp.dot(xh_s[...], dec_wcat_ref[...],
                         preferred_element_type=jnp.float32)
                 + dec_b_ref[...])
        h_new, c_new = lstm_gates(gates, c)

        logits = (jnp.dot(h_new.astype(jnp.bfloat16), dec_wout_ref[...],
                          preferred_element_type=jnp.float32)
                  + dec_bout_ref[...])
        row = pl.multiple_of(j * B, B)
        out_ref[pl.ds(row, B), :] = logits

        # greedy next token (first maximal index, like torch.argmax), then
        # embed via one-hot @ emb (exact: single nonzero term per row)
        m = jnp.max(logits, axis=1, keepdims=True)
        top1 = jnp.min(jnp.where(logits == m, ids, V), axis=1, keepdims=True)
        pred_emb = jnp.dot((ids == top1).astype(jnp.bfloat16),
                           dec_emb_ref[...],
                           preferred_element_type=jnp.float32)

        # select next input AFTER embedding (teacher emb vs. greedy emb)
        teach_x = teach_ref[pl.ds(row, B), :]
        x_next = jnp.where(tf_ref[j] == 1, teach_x,
                           pred_emb.astype(jnp.bfloat16))
        xh_s[:, 0:E] = x_next
        return (h_new, c_new)

    _ = jax.lax.fori_loop(0, Tm1, dec_step, (h, c), unroll=True)


def run_seq2seq(tf_flags, x2d, inp0, teach2d, params):
    B, E = inp0.shape
    H = params["enc_whh"].shape[0]
    V = params["dec_wout"].shape[1]
    S = x2d.shape[0] // B
    Tm1 = teach2d.shape[0] // B

    flops = (2 * S * B * E * 4 * H                      # hoisted x @ W_ih
             + S * 2 * B * H * 4 * H                    # encoder recurrence
             + Tm1 * (2 * B * (E + H) * 4 * H           # decoder gates
                      + 2 * B * H * V                   # fc_out
                      + 2 * B * V * E))                 # greedy embedding
    bytes_accessed = (
        2 * (x2d.size + inp0.size + teach2d.size
             + params["enc_wih"].size + params["enc_whh"].size
             + params["dec_emb"].size + params["dec_wcat"].size
             + params["dec_wout"].size)
        + 4 * (params["enc_b"].size + params["dec_b"].size
               + params["dec_bout"].size + Tm1 * B * V))
    cost = pl.CostEstimate(flops=flops,
                           transcendentals=5 * (S + Tm1) * B * H,
                           bytes_accessed=bytes_accessed)

    resident = lambda i, tf: (0, 0)     # every operand fully VMEM-resident
    grid_spec = pltpu.PrefetchScalarGridSpec(
        num_scalar_prefetch=1,
        grid=(1,),
        in_specs=[
            pl.BlockSpec(x2d.shape, resident),
            pl.BlockSpec(inp0.shape, resident),
            pl.BlockSpec(teach2d.shape, resident),
            pl.BlockSpec(params["enc_wih"].shape, resident),
            pl.BlockSpec(params["enc_whh"].shape, resident),
            pl.BlockSpec(params["enc_b"].shape, resident),
            pl.BlockSpec(params["dec_emb"].shape, resident),
            pl.BlockSpec(params["dec_wcat"].shape, resident),
            pl.BlockSpec(params["dec_b"].shape, resident),
            pl.BlockSpec(params["dec_wout"].shape, resident),
            pl.BlockSpec(params["dec_bout"].shape, resident),
        ],
        out_specs=pl.BlockSpec((Tm1 * B, V), resident),
        scratch_shapes=[pltpu.VMEM((S * B, 4 * H), jnp.float32),
                        pltpu.VMEM((B, E + H), jnp.bfloat16)],
    )
    out2d = pl.pallas_call(
        seq2seq_kernel,
        out_shape=jax.ShapeDtypeStruct((Tm1 * B, V), jnp.float32),
        grid_spec=grid_spec,
        compiler_params=pltpu.CompilerParams(
            dimension_semantics=("arbitrary",),
            vmem_limit_bytes=32 * 1024 * 1024),
        cost_estimate=cost,
    )(tf_flags, x2d, inp0, teach2d,
      params["enc_wih"], params["enc_whh"], params["enc_b"],
      params["dec_emb"], params["dec_wcat"], params["dec_b"],
      params["dec_wout"], params["dec_bout"])
    return out2d.reshape(Tm1, B, V)


# --------------------------------------------------------------------------
# Parameters (deterministic init; shapes implied by the forward)
# --------------------------------------------------------------------------
def init_params(key, input_dim, output_dim, emb_dim, hid_dim):
    ks = jax.random.split(key, 9)
    s = 0.1

    def n(k, shape, dtype=jnp.float32):
        return (jax.random.normal(k, shape, jnp.float32) * s).astype(dtype)

    return {
        # encoder: embedding + 1-layer LSTM (W_ih / W_hh kept separate so the
        # input projection can be hoisted out of the recurrence)
        "enc_emb":  n(ks[0], (input_dim, emb_dim), jnp.bfloat16),
        "enc_wih":  n(ks[1], (emb_dim, 4 * hid_dim), jnp.bfloat16),
        "enc_whh":  n(ks[2], (hid_dim, 4 * hid_dim), jnp.bfloat16),
        "enc_b":    n(ks[3], (1, 4 * hid_dim)),          # b_ih + b_hh folded
        # decoder: embedding + 1-layer LSTM ([W_ih ; W_hh] fused) + fc_out
        "dec_emb":  n(ks[4], (output_dim, emb_dim), jnp.bfloat16),
        "dec_wcat": n(ks[5], (emb_dim + hid_dim, 4 * hid_dim), jnp.bfloat16),
        "dec_b":    n(ks[6], (1, 4 * hid_dim)),          # b_ih + b_hh folded
        "dec_wout": n(ks[7], (hid_dim, output_dim), jnp.bfloat16),
        "dec_bout": n(ks[8], (1, output_dim)),
    }
# TODO(synk): the tutorial encoder/decoder use n_layers=2 + dropout; this uses
# a single LSTM layer in eval mode (dropout = identity), matching the forward
# semantics of the Seq2Seq wrapper itself.


# --------------------------------------------------------------------------
# Seq2Seq forward (mirrors the PyTorch module's forward)
# --------------------------------------------------------------------------
@jax.jit
def _forward_core(params, tf_flags, src, trg):
    S, B = src.shape
    V = params["dec_wout"].shape[1]
    # embeddings are gathered once, host/XLA-side, as bf16 slabs
    x2d = jnp.take(params["enc_emb"], src.reshape(-1), axis=0)       # (S*B,E)
    inp0 = jnp.take(params["dec_emb"], trg[0], axis=0)               # (B,E)
    teach2d = jnp.take(params["dec_emb"], trg[1:].reshape(-1), axis=0)
    logits = run_seq2seq(tf_flags, x2d, inp0, teach2d, params)       # (T-1,B,V)
    # outputs[0] stays zero, exactly like torch.zeros(...) in the reference
    zeros0 = jnp.zeros((1, B, V), jnp.float32)
    return jnp.concatenate([zeros0, logits], axis=0)                 # (T,B,V)


def seq2seq_forward(params, src, trg, teacher_forcing_ratio=0.5, py_rng=None):
    if py_rng is None:
        py_rng = random.Random(0)
    trg_len = trg.shape[0]
    # host-side teacher-forcing draws (same RNG stream / count as the
    # reference loop: one draw per decoded step)
    tf_flags = jnp.asarray(
        [1 if py_rng.random() < teacher_forcing_ratio else 0
         for _ in range(1, trg_len)], dtype=jnp.int32)
    return _forward_core(params, tf_flags, src, trg)


# --------------------------------------------------------------------------
if __name__ == "__main__":
    # small, lane-aligned TPU-friendly shapes
    SRC_LEN, TRG_LEN = 8, 8
    BATCH = 8
    INPUT_DIM = 128     # src vocab
    OUTPUT_DIM = 256    # trg vocab (= decoder.fc_out.out_features)
    EMB_DIM = 128
    HID_DIM = 128       # each gate slice is exactly one 128-lane tile

    key = jax.random.PRNGKey(0)
    kp, ks, kt = jax.random.split(key, 3)

    params = init_params(kp, INPUT_DIM, OUTPUT_DIM, EMB_DIM, HID_DIM)
    src = jax.random.randint(ks, (SRC_LEN, BATCH), 0, INPUT_DIM, jnp.int32)
    trg = jax.random.randint(kt, (TRG_LEN, BATCH), 0, OUTPUT_DIM, jnp.int32)

    out = seq2seq_forward(params, src, trg,
                          teacher_forcing_ratio=0.5,
                          py_rng=random.Random(0))
    out = jax.block_until_ready(out)

    assert out.shape == (TRG_LEN, BATCH, OUTPUT_DIM), out.shape
    assert bool(jnp.all(out[0] == 0.0))
    assert bool(jnp.all(jnp.isfinite(out)))
    print("KERNEL_OK")
</pallas_src>

<mosaic_0001>
module attributes {stable_mosaic.version = 11 : i64} {
  func.func @seq2seq_kernel(%arg0: i32, %arg1: memref<7xi32, #tpu.memory_space<smem>>, %arg2: memref<64x128xbf16, #tpu.memory_space<vmem>>, %arg3: memref<8x128xbf16, #tpu.memory_space<vmem>>, %arg4: memref<56x128xbf16, #tpu.memory_space<vmem>>, %arg5: memref<128x512xbf16, #tpu.memory_space<vmem>>, %arg6: memref<128x512xbf16, #tpu.memory_space<vmem>>, %arg7: memref<1x512xf32, #tpu.memory_space<vmem>>, %arg8: memref<256x128xbf16, #tpu.memory_space<vmem>>, %arg9: memref<256x512xbf16, #tpu.memory_space<vmem>>, %arg10: memref<1x512xf32, #tpu.memory_space<vmem>>, %arg11: memref<128x256xbf16, #tpu.memory_space<vmem>>, %arg12: memref<1x256xf32, #tpu.memory_space<vmem>>, %arg13: memref<56x256xf32, #tpu.memory_space<vmem>>, %arg14: memref<64x512xf32, #tpu.memory_space<vmem>>, %arg15: memref<8x256xbf16, #tpu.memory_space<vmem>>) attributes {dimension_semantics = [#tpu.dimension_semantics<arbitrary>], iteration_bounds = array<i64: 1>, scalar_prefetch = 1 : i64, scratch_operands = 2 : i64, tpu.core_type = #tpu.core_type<tc>, window_params = [{pipeline_mode = #tpu.pipeline_mode<synchronous>, transform_indices = @transform_0, window_bounds = array<i64: 64, 128>}, {pipeline_mode = #tpu.pipeline_mode<synchronous>, transform_indices = @transform_1, window_bounds = array<i64: 8, 128>}, {pipeline_mode = #tpu.pipeline_mode<synchronous>, transform_indices = @transform_2, window_bounds = array<i64: 56, 128>}, {pipeline_mode = #tpu.pipeline_mode<synchronous>, transform_indices = @transform_3, window_bounds = array<i64: 128, 512>}, {pipeline_mode = #tpu.pipeline_mode<synchronous>, transform_indices = @transform_4, window_bounds = array<i64: 128, 512>}, {pipeline_mode = #tpu.pipeline_mode<synchronous>, transform_indices = @transform_5, window_bounds = array<i64: 1, 512>}, {pipeline_mode = #tpu.pipeline_mode<synchronous>, transform_indices = @transform_6, window_bounds = array<i64: 256, 128>}, {pipeline_mode = #tpu.pipeline_mode<synchronous>, transform_indices = @transform_7, window_bounds = array<i64: 256, 512>}, {pipeline_mode = #tpu.pipeline_mode<synchronous>, transform_indices = @transform_8, window_bounds = array<i64: 1, 512>}, {pipeline_mode = #tpu.pipeline_mode<synchronous>, transform_indices = @transform_9, window_bounds = array<i64: 128, 256>}, {pipeline_mode = #tpu.pipeline_mode<synchronous>, transform_indices = @transform_10, window_bounds = array<i64: 1, 256>}, {pipeline_mode = #tpu.pipeline_mode<synchronous>, transform_indices = @transform_11, window_bounds = array<i64: 56, 256>}]} {
    %c0 = arith.constant 0 : index
    %c0_0 = arith.constant 0 : index
    %0 = vector.load %arg2[%c0, %c0_0] : memref<64x128xbf16, #tpu.memory_space<vmem>>, vector<64x128xbf16>
    %c0_1 = arith.constant 0 : index
    %c0_2 = arith.constant 0 : index
    %1 = vector.load %arg5[%c0_1, %c0_2] : memref<128x512xbf16, #tpu.memory_space<vmem>>, vector<128x512xbf16>
    %cst = arith.constant dense<0.000000e+00> : vector<64x512xf32>
    %2 = tpu.matmul %0, %1, %cst {dimension_numbers = #tpu.dot_dimension_numbers<[1], [0], [0], [1], [0, 0, 1, 1], [], []>} : vector<64x128xbf16>, vector<128x512xbf16>, vector<64x512xf32> -> vector<64x512xf32>
    %c0_3 = arith.constant 0 : index
    %c0_4 = arith.constant 0 : index
    %3 = vector.load %arg7[%c0_3, %c0_4] : memref<1x512xf32, #tpu.memory_space<vmem>>, vector<1x512xf32>
    %4 = vector.broadcast %3 : vector<1x512xf32> to vector<64x512xf32>
    %5 = arith.addf %2, %4 : vector<64x512xf32>
    %c0_5 = arith.constant 0 : index
    %c0_6 = arith.constant 0 : index
    %6 = vector.load %arg14[%c0_5, %c0_6] : memref<64x512xf32, #tpu.memory_space<vmem>>, vector<64x512xf32>
    tpu.vector_store %arg14[%c0_5, %c0_6], %5 {strides = array<i32>} : memref<64x512xf32, #tpu.memory_space<vmem>>, vector<64x512xf32>,
    %cst_7 = arith.constant 0.000000e+00 : f32
    %7 = vector.broadcast %cst_7 : f32 to vector<8x128xf32>
    %c0_i32 = arith.constant 0 : i32
    %c8_i32 = arith.constant 8 : i32
    %8 = arith.muli %c0_i32, %c8_i32 : i32
    %9 = tpu.assume_multiple %8, 8 : i32
    %10 = arith.index_cast %9 : i32 to index
    %c0_8 = arith.constant 0 : index
    %11 = vector.load %arg14[%10, %c0_8] : memref<64x512xf32, #tpu.memory_space<vmem>>, vector<8x512xf32>
    %12 = arith.truncf %7 : vector<8x128xf32> to vector<8x128xbf16>
    %c0_9 = arith.constant 0 : index
    %c0_10 = arith.constant 0 : index
    %13 = vector.load %arg6[%c0_9, %c0_10] : memref<128x512xbf16, #tpu.memory_space<vmem>>, vector<128x512xbf16>
    %cst_11 = arith.constant dense<0.000000e+00> : vector<8x512xf32>
    %14 = tpu.matmul %12, %13, %cst_11 {dimension_numbers = #tpu.dot_dimension_numbers<[1], [0], [0], [1], [0, 0, 1, 1], [], []>} : vector<8x128xbf16>, vector<128x512xbf16>, vector<8x512xf32> -> vector<8x512xf32>
    %15 = arith.addf %11, %14 : vector<8x512xf32>
    %16 = vector.extract_strided_slice %15 {offsets = [0, 0], sizes = [8, 128], strides = [1, 1]} : vector<8x512xf32> to vector<8x128xf32>
    %cst_12 = arith.constant 5.000000e-01 : f32
    %17 = vector.broadcast %cst_12 : f32 to vector<8x128xf32>
    %18 = arith.mulf %17, %16 : vector<8x128xf32>
    %19 = math.tanh %18 : vector<8x128xf32>
    %cst_13 = arith.constant 5.000000e-01 : f32
    %20 = vector.broadcast %cst_13 : f32 to vector<8x128xf32>
    %21 = arith.mulf %20, %19 : vector<8x128xf32>
    %cst_14 = arith.constant 5.000000e-01 : f32
    %22 = vector.broadcast %cst_14 : f32 to vector<8x128xf32>
    %23 = arith.addf %21, %22 : vector<8x128xf32>
    %24 = vector.extract_strided_slice %15 {offsets = [0, 128], sizes = [8, 128], strides = [1, 1]} : vector<8x512xf32> to vector<8x128xf32>
    %cst_15 = arith.constant 5.000000e-01 : f32
    %25 = vector.broadcast %cst_15 : f32 to vector<8x128xf32>
    %26 = arith.mulf %25, %24 : vector<8x128xf32>
    %27 = math.tanh %26 : vector<8x128xf32>
    %cst_16 = arith.constant 5.000000e-01 : f32
    %28 = vector.broadcast %cst_16 : f32 to vector<8x128xf32>
    %29 = arith.mulf %28, %27 : vector<8x128xf32>
    %cst_17 = arith.constant 5.000000e-01 : f32
    %30 = vector.broadcast %cst_17 : f32 to vector<8x128xf32>
    %31 = arith.addf %29, %30 : vector<8x128xf32>
    %32 = vector.extract_strided_slice %15 {offsets = [0, 256], sizes = [8, 128], strides = [1, 1]} : vector<8x512xf32> to vector<8x128xf32>
    %33 = math.tanh %32 : vector<8x128xf32>
    %34 = vector.extract_strided_slice %15 {offsets = [0, 384], sizes = [8, 128], strides = [1, 1]} : vector<8x512xf32> to vector<8x128xf32>
    %cst_18 = arith.constant 5.000000e-01 : f32
    %35 = vector.broadcast %cst_18 : f32 to vector<8x128xf32>
    %36 = arith.mulf %35, %34 : vector<8x128xf32>
    %37 = math.tanh %36 : vector<8x128xf32>
    %cst_19 = arith.constant 5.000000e-01 : f32
    %38 = vector.broadcast %cst_19 : f32 to vector<8x128xf32>
    %39 = arith.mulf %38, %37 : vector<8x128xf32>
    %cst_20 = arith.constant 5.000000e-01 : f32
    %40 = vector.broadcast %cst_20 : f32 to vector<8x128xf32>
    %41 = arith.addf %39, %40 : vector<8x128xf32>
    %42 = arith.mulf %31, %7 : vector<8x128xf32>
    %43 = arith.mulf %23, %33 : vector<8x128xf32>
    %44 = arith.addf %42, %43 : vector<8x128xf32>
    %45 = math.tanh %44 : vector<8x128xf32>
    %46 = arith.mulf %41, %45 : vector<8x128xf32>
    %c1_i32 = arith.constant 1 : i32
    %c8_i32_21 = arith.constant 8 : i32
    %47 = arith.muli %c1_i32, %c8_i32_21 : i32
    %48 = tpu.assume_multiple %47, 8 : i32
    %49 = arith.index_cast %48 : i32 to index
    %c0_22 = arith.constant 0 : index
    %50 = vector.load %arg14[%49, %c0_22] : memref<64x512xf32, #tpu.memory_space<vmem>>, vector<8x512xf32>
    %51 = arith.truncf %46 : vector<8x128xf32> to vector<8x128xbf16>
    %c0_23 = arith.constant 0 : index
    %c0_24 = arith.constant 0 : index
    %52 = vector.load %arg6[%c0_23, %c0_24] : memref<128x512xbf16, #tpu.memory_space<vmem>>, vector<128x512xbf16>
    %cst_25 = arith.constant dense<0.000000e+00> : vector<8x512xf32>
    %53 = tpu.matmul %51, %52, %cst_25 {dimension_numbers = #tpu.dot_dimension_numbers<[1], [0], [0], [1], [0, 0, 1, 1], [], []>} : vector<8x128xbf16>, vector<128x512xbf16>, vector<8x512xf32> -> vector<8x512xf32>
    %54 = arith.addf %50, %53 : vector<8x512xf32>
    %55 = vector.extract_strided_slice %54 {offsets = [0, 0], sizes = [8, 128], strides = [1, 1]} : vector<8x512xf32> to vector<8x128xf32>
    %cst_26 = arith.constant 5.000000e-01 : f32
    %56 = vector.broadcast %cst_26 : f32 to vector<8x128xf32>
    %57 = arith.mulf %56, %55 : vector<8x128xf32>
    %58 = math.tanh %57 : vector<8x128xf32>
    %cst_27 = arith.constant 5.000000e-01 : f32
    %59 = vector.broadcast %cst_27 : f32 to vector<8x128xf32>
    %60 = arith.mulf %59, %58 : vector<8x128xf32>
    %cst_28 = arith.constant 5.000000e-01 : f32
    %61 = vector.broadcast %cst_28 : f32 to vector<8x128xf32>
    %62 = arith.addf %60, %61 : vector<8x128xf32>
    %63 = vector.extract_strided_slice %54 {offsets = [0, 128], sizes = [8, 128], strides = [1, 1]} : vector<8x512xf32> to vector<8x128xf32>
    %cst_29 = arith.constant 5.000000e-01 : f32
    %64 = vector.broadcast %cst_29 : f32 to vector<8x128xf32>
    %65 = arith.mulf %64, %63 : vector<8x128xf32>
    %66 = math.tanh %65 : vector<8x128xf32>
    %cst_30 = arith.constant 5.000000e-01 : f32
    %67 = vector.broadcast %cst_30 : f32 to vector<8x128xf32>
    %68 = arith.mulf %67, %66 : vector<8x128xf32>
    %cst_31 = arith.constant 5.000000e-01 : f32
    %69 = vector.broadcast %cst_31 : f32 to vector<8x128xf32>
    %70 = arith.addf %68, %69 : vector<8x128xf32>
    %71 = vector.extract_strided_slice %54 {offsets = [0, 256], sizes = [8, 128], strides = [1, 1]} : vector<8x512xf32> to vector<8x128xf32>
    %72 = math.tanh %71 : vector<8x128xf32>
    %73 = vector.extract_strided_slice %54 {offsets = [0, 384], sizes = [8, 128], strides = [1, 1]} : vector<8x512xf32> to vector<8x128xf32>
    %cst_32 = arith.constant 5.000000e-01 : f32
    %74 = vector.broadcast %cst_32 : f32 to vector<8x128xf32>
    %75 = arith.mulf %74, %73 : vector<8x128xf32>
    %76 = math.tanh %75 : vector<8x128xf32>
    %cst_33 = arith.constant 5.000000e-01 : f32
    %77 = vector.broadcast %cst_33 : f32 to vector<8x128xf32>
    %78 = arith.mulf %77, %76 : vector<8x128xf32>
    %cst_34 = arith.constant 5.000000e-01 : f32
    %79 = vector.broadcast %cst_34 : f32 to vector<8x128xf32>
    %80 = arith.addf %78, %79 : vector<8x128xf32>
    %81 = arith.mulf %70, %44 : vector<8x128xf32>
    %82 = arith.mulf %62, %72 : vector<8x128xf32>
    %83 = arith.addf %81, %82 : vector<8x128xf32>
    %84 = math.tanh %83 : vector<8x128xf32>
    %85 = arith.mulf %80, %84 : vector<8x128xf32>
    %c2_i32 = arith.constant 2 : i32
    %c8_i32_35 = arith.constant 8 : i32
    %86 = arith.muli %c2_i32, %c8_i32_35 : i32
    %87 = tpu.assume_multiple %86, 8 : i32
    %88 = arith.index_cast %87 : i32 to index
    %c0_36 = arith.constant 0 : index
    %89 = vector.load %arg14[%88, %c0_36] : memref<64x512xf32, #tpu.memory_space<vmem>>, vector<8x512xf32>
    %90 = arith.truncf %85 : vector<8x128xf32> to vector<8x128xbf16>
    %c0_37 = arith.constant 0 : index
    %c0_38 = arith.constant 0 : index
    %91 = vector.load %arg6[%c0_37, %c0_38] : memref<128x512xbf16, #tpu.memory_space<vmem>>, vector<128x512xbf16>
    %cst_39 = arith.constant dense<0.000000e+00> : vector<8x512xf32>
    %92 = tpu.matmul %90, %91, %cst_39 {dimension_numbers = #tpu.dot_dimension_numbers<[1], [0], [0], [1], [0, 0, 1, 1], [], []>} : vector<8x128xbf16>, vector<128x512xbf16>, vector<8x512xf32> -> vector<8x512xf32>
    %93 = arith.addf %89, %92 : vector<8x512xf32>
    %94 = vector.extract_strided_slice %93 {offsets = [0, 0], sizes = [8, 128], strides = [1, 1]} : vector<8x512xf32> to vector<8x128xf32>
    %cst_40 = arith.constant 5.000000e-01 : f32
    %95 = vector.broadcast %cst_40 : f32 to vector<8x128xf32>
    %96 = arith.mulf %95, %94 : vector<8x128xf32>
    %97 = math.tanh %96 : vector<8x128xf32>
    %cst_41 = arith.constant 5.000000e-01 : f32
    %98 = vector.broadcast %cst_41 : f32 to vector<8x128xf32>
    %99 = arith.mulf %98, %97 : vector<8x128xf32>
    %cst_42 = arith.constant 5.000000e-01 : f32
    %100 = vector.broadcast %cst_42 : f32 to vector<8x128xf32>
    %101 = arith.addf %99, %100 : vector<8x128xf32>
    %102 = vector.extract_strided_slice %93 {offsets = [0, 128], sizes = [8, 128], strides = [1, 1]} : vector<8x512xf32> to vector<8x128xf32>
    %cst_43 = arith.constant 5.000000e-01 : f32
    %103 = vector.broadcast %cst_43 : f32 to vector<8x128xf32>
    %104 = arith.mulf %103, %102 : vector<8x128xf32>
    %105 = math.tanh %104 : vector<8x128xf32>
    %cst_44 = arith.constant 5.000000e-01 : f32
    %106 = vector.broadcast %cst_44 : f32 to vector<8x128xf32>
    %107 = arith.mulf %106, %105 : vector<8x128xf32>
    %cst_45 = arith.constant 5.000000e-01 : f32
    %108 = vector.broadcast %cst_45 : f32 to vector<8x128xf32>
    %109 = arith.addf %107, %108 : vector<8x128xf32>
    %110 = vector.extract_strided_slice %93 {offsets = [0, 256], sizes = [8, 128], strides = [1, 1]} : vector<8x512xf32> to vector<8x128xf32>
    %111 = math.tanh %110 : vector<8x128xf32>
    %112 = vector.extract_strided_slice %93 {offsets = [0, 384], sizes = [8, 128], strides = [1, 1]} : vector<8x512xf32> to vector<8x128xf32>
    %cst_46 = arith.constant 5.000000e-01 : f32
    %113 = vector.broadcast %cst_46 : f32 to vector<8x128xf32>
    %114 = arith.mulf %113, %112 : vector<8x128xf32>
    %115 = math.tanh %114 : vector<8x128xf32>
    %cst_47 = arith.constant 5.000000e-01 : f32
    %116 = vector.broadcast %cst_47 : f32 to vector<8x128xf32>
    %117 = arith.mulf %116, %115 : vector<8x128xf32>
    %cst_48 = arith.constant 5.000000e-01 : f32
    %118 = vector.broadcast %cst_48 : f32 to vector<8x128xf32>
    %119 = arith.addf %117, %118 : vector<8x128xf32>
    %120 = arith.mulf %109, %83 : vector<8x128xf32>
    %121 = arith.mulf %101, %111 : vector<8x128xf32>
    %122 = arith.addf %120, %121 : vector<8x128xf32>
    %123 = math.tanh %122 : vector<8x128xf32>
    %124 = arith.mulf %119, %123 : vector<8x128xf32>
    %c3_i32 = arith.constant 3 : i32
    %c8_i32_49 = arith.constant 8 : i32
    %125 = arith.muli %c3_i32, %c8_i32_49 : i32
    %126 = tpu.assume_multiple %125, 8 : i32
    %127 = arith.index_cast %126 : i32 to index
    %c0_50 = arith.constant 0 : index
    %128 = vector.load %arg14[%127, %c0_50] : memref<64x512xf32, #tpu.memory_space<vmem>>, vector<8x512xf32>
    %129 = arith.truncf %124 : vector<8x128xf32> to vector<8x128xbf16>
    %c0_51 = arith.constant 0 : index
    %c0_52 = arith.constant 0 : index
    %130 = vector.load %arg6[%c0_51, %c0_52] : memref<128x512xbf16, #tpu.memory_space<vmem>>, vector<128x512xbf16>
    %cst_53 = arith.constant dense<0.000000e+00> : vector<8x512xf32>
    %131 = tpu.matmul %129, %130, %cst_53 {dimension_numbers = #tpu.dot_dimension_numbers<[1], [0], [0], [1], [0, 0, 1, 1], [], []>} : vector<8x128xbf16>, vector<128x512xbf16>, vector<8x512xf32> -> vector<8x512xf32>
    %132 = arith.addf %128, %131 : vector<8x512xf32>
    %133 = vector.extract_strided_slice %132 {offsets = [0, 0], sizes = [8, 128], strides = [1, 1]} : vector<8x512xf32> to vector<8x128xf32>
    %cst_54 = arith.constant 5.000000e-01 : f32
    %134 = vector.broadcast %cst_54 : f32 to vector<8x128xf32>
    %135 = arith.mulf %134, %133 : vector<8x128xf32>
    %136 = math.tanh %135 : vector<8x128xf32>
    %cst_55 = arith.constant 5.000000e-01 : f32
    %137 = vector.broadcast %cst_55 : f32 to vector<8x128xf32>
    %138 = arith.mulf %137, %136 : vector<8x128xf32>
    %cst_56 = arith.constant 5.000000e-01 : f32
    %139 = vector.broadcast %cst_56 : f32 to vector<8x128xf32>
    %140 = arith.addf %138, %139 : vector<8x128xf32>
    %141 = vector.extract_strided_slice %132 {offsets = [0, 128], sizes = [8, 128], strides = [1, 1]} : vector<8x512xf32> to vector<8x128xf32>
    %cst_57 = arith.constant 5.000000e-01 : f32
    %142 = vector.broadcast %cst_57 : f32 to vector<8x128xf32>
    %143 = arith.mulf %142, %141 : vector<8x128xf32>
    %144 = math.tanh %143 : vector<8x128xf32>
    %cst_58 = arith.constant 5.000000e-01 : f32
    %145 = vector.broadcast %cst_58 : f32 to vector<8x128xf32>
    %146 = arith.mulf %145, %144 : vector<8x128xf32>
    %cst_59 = arith.constant 5.000000e-01 : f32
    %147 = vector.broadcast %cst_59 : f32 to vector<8x128xf32>
    %148 = arith.addf %146, %147 : vector<8x128xf32>
    %149 = vector.extract_strided_slice %132 {offsets = [0, 256], sizes = [8, 128], strides = [1, 1]} : vector<8x512xf32> to vector<8x128xf32>
    %150 = math.tanh %149 : vector<8x128xf32>
    %151 = vector.extract_strided_slice %132 {offsets = [0, 384], sizes = [8, 128], strides = [1, 1]} : vector<8x512xf32> to vector<8x128xf32>
    %cst_60 = arith.constant 5.000000e-01 : f32
    %152 = vector.broadcast %cst_60 : f32 to vector<8x128xf32>
    %153 = arith.mulf %152, %151 : vector<8x128xf32>
    %154 = math.tanh %153 : vector<8x128xf32>
    %cst_61 = arith.constant 5.000000e-01 : f32
    %155 = vector.broadcast %cst_61 : f32 to vector<8x128xf32>
    %156 = arith.mulf %155, %154 : vector<8x128xf32>
    %cst_62 = arith.constant 5.000000e-01 : f32
    %157 = vector.broadcast %cst_62 : f32 to vector<8x128xf32>
    %158 = arith.addf %156, %157 : vector<8x128xf32>
    %159 = arith.mulf %148, %122 : vector<8x128xf32>
    %160 = arith.mulf %140, %150 : vector<8x128xf32>
    %161 = arith.addf %159, %160 : vector<8x128xf32>
    %162 = math.tanh %161 : vector<8x128xf32>
    %163 = arith.mulf %158, %162 : vector<8x128xf32>
    %c4_i32 = arith.constant 4 : i32
    %c8_i32_63 = arith.constant 8 : i32
    %164 = arith.muli %c4_i32, %c8_i32_63 : i32
    %165 = tpu.assume_multiple %164, 8 : i32
    %166 = arith.index_cast %165 : i32 to index
    %c0_64 = arith.constant 0 : index
    %167 = vector.load %arg14[%166, %c0_64] : memref<64x512xf32, #tpu.memory_space<vmem>>, vector<8x512xf32>
    %168 = arith.truncf %163 : vector<8x128xf32> to vector<8x128xbf16>
    %c0_65 = arith.constant 0 : index
    %c0_66 = arith.constant 0 : index
    %169 = vector.load %arg6[%c0_65, %c0_66] : memref<128x512xbf16, #tpu.memory_space<vmem>>, vector<128x512xbf16>
    %cst_67 = arith.constant dense<0.000000e+00> : vector<8x512xf32>
    %170 = tpu.matmul %168, %169, %cst_67 {dimension_numbers = #tpu.dot_dimension_numbers<[1], [0], [0], [1], [0, 0, 1, 1], [], []>} : vector<8x128xbf16>, vector<128x512xbf16>, vector<8x512xf32> -> vector<8x512xf32>
    %171 = arith.addf %167, %170 : vector<8x512xf32>
    %172 = vector.extract_strided_slice %171 {offsets = [0, 0], sizes = [8, 128], strides = [1, 1]} : vector<8x512xf32> to vector<8x128xf32>
    %cst_68 = arith.constant 5.000000e-01 : f32
    %173 = vector.broadcast %cst_68 : f32 to vector<8x128xf32>
    %174 = arith.mulf %173, %172 : vector<8x128xf32>
    %175 = math.tanh %174 : vector<8x128xf32>
    %cst_69 = arith.constant 5.000000e-01 : f32
    %176 = vector.broadcast %cst_69 : f32 to vector<8x128xf32>
    %177 = arith.mulf %176, %175 : vector<8x128xf32>
    %cst_70 = arith.constant 5.000000e-01 : f32
    %178 = vector.broadcast %cst_70 : f32 to vector<8x128xf32>
    %179 = arith.addf %177, %178 : vector<8x128xf32>
    %180 = vector.extract_strided_slice %171 {offsets = [0, 128], sizes = [8, 128], strides = [1, 1]} : vector<8x512xf32> to vector<8x128xf32>
    %cst_71 = arith.constant 5.000000e-01 : f32
    %181 = vector.broadcast %cst_71 : f32 to vector<8x128xf32>
    %182 = arith.mulf %181, %180 : vector<8x128xf32>
    %183 = math.tanh %182 : vector<8x128xf32>
    %cst_72 = arith.constant 5.000000e-01 : f32
    %184 = vector.broadcast %cst_72 : f32 to vector<8x128xf32>
    %185 = arith.mulf %184, %183 : vector<8x128xf32>
    %cst_73 = arith.constant 5.000000e-01 : f32
    %186 = vector.broadcast %cst_73 : f32 to vector<8x128xf32>
    %187 = arith.addf %185, %186 : vector<8x128xf32>
    %188 = vector.extract_strided_slice %171 {offsets = [0, 256], sizes = [8, 128], strides = [1, 1]} : vector<8x512xf32> to vector<8x128xf32>
    %189 = math.tanh %188 : vector<8x128xf32>
    %190 = vector.extract_strided_slice %171 {offsets = [0, 384], sizes = [8, 128], strides = [1, 1]} : vector<8x512xf32> to vector<8x128xf32>
    %cst_74 = arith.constant 5.000000e-01 : f32
    %191 = vector.broadcast %cst_74 : f32 to vector<8x128xf32>
    %192 = arith.mulf %191, %190 : vector<8x128xf32>
    %193 = math.tanh %192 : vector<8x128xf32>
    %cst_75 = arith.constant 5.000000e-01 : f32
    %194 = vector.broadcast %cst_75 : f32 to vector<8x128xf32>
    %195 = arith.mulf %194, %193 : vector<8x128xf32>
    %cst_76 = arith.constant 5.000000e-01 : f32
    %196 = vector.broadcast %cst_76 : f32 to vector<8x128xf32>
    %197 = arith.addf %195, %196 : vector<8x128xf32>
    %198 = arith.mulf %187, %161 : vector<8x128xf32>
    %199 = arith.mulf %179, %189 : vector<8x128xf32>
    %200 = arith.addf %198, %199 : vector<8x128xf32>
    %201 = math.tanh %200 : vector<8x128xf32>
    %202 = arith.mulf %197, %201 : vector<8x128xf32>
    %c5_i32 = arith.constant 5 : i32
    %c8_i32_77 = arith.constant 8 : i32
    %203 = arith.muli %c5_i32, %c8_i32_77 : i32
    %204 = tpu.assume_multiple %203, 8 : i32
    %205 = arith.index_cast %204 : i32 to index
    %c0_78 = arith.constant 0 : index
    %206 = vector.load %arg14[%205, %c0_78] : memref<64x512xf32, #tpu.memory_space<vmem>>, vector<8x512xf32>
    %207 = arith.truncf %202 : vector<8x128xf32> to vector<8x128xbf16>
    %c0_79 = arith.constant 0 : index
    %c0_80 = arith.constant 0 : index
    %208 = vector.load %arg6[%c0_79, %c0_80] : memref<128x512xbf16, #tpu.memory_space<vmem>>, vector<128x512xbf16>
    %cst_81 = arith.constant dense<0.000000e+00> : vector<8x512xf32>
    %209 = tpu.matmul %207, %208, %cst_81 {dimension_numbers = #tpu.dot_dimension_numbers<[1], [0], [0], [1], [0, 0, 1, 1], [], []>} : vector<8x128xbf16>, vector<128x512xbf16>, vector<8x512xf32> -> vector<8x512xf32>
    %210 = arith.addf %206, %209 : vector<8x512xf32>
    %211 = vector.extract_strided_slice %210 {offsets = [0, 0], sizes = [8, 128], strides = [1, 1]} : vector<8x512xf32> to vector<8x128xf32>
    %cst_82 = arith.constant 5.000000e-01 : f32
    %212 = vector.broadcast %cst_82 : f32 to vector<8x128xf32>
    %213 = arith.mulf %212, %211 : vector<8x128xf32>
    %214 = math.tanh %213 : vector<8x128xf32>
    %cst_83 = arith.constant 5.000000e-01 : f32
    %215 = vector.broadcast %cst_83 : f32 to vector<8x128xf32>
    %216 = arith.mulf %215, %214 : vector<8x128xf32>
    %cst_84 = arith.constant 5.000000e-01 : f32
    %217 = vector.broadcast %cst_84 : f32 to vector<8x128xf32>
    %218 = arith.addf %216, %217 : vector<8x128xf32>
    %219 = vector.extract_strided_slice %210 {offsets = [0, 128], sizes = [8, 128], strides = [1, 1]} : vector<8x512xf32> to vector<8x128xf32>
    %cst_85 = arith.constant 5.000000e-01 : f32
    %220 = vector.broadcast %cst_85 : f32 to vector<8x128xf32>
    %221 = arith.mulf %220, %219 : vector<8x128xf32>
    %222 = math.tanh %221 : vector<8x128xf32>
    %cst_86 = arith.constant 5.000000e-01 : f32
    %223 = vector.broadcast %cst_86 : f32 to vector<8x128xf32>
    %224 = arith.mulf %223, %222 : vector<8x128xf32>
    %cst_87 = arith.constant 5.000000e-01 : f32
    %225 = vector.broadcast %cst_87 : f32 to vector<8x128xf32>
    %226 = arith.addf %224, %225 : vector<8x128xf32>
    %227 = vector.extract_strided_slice %210 {offsets = [0, 256], sizes = [8, 128], strides = [1, 1]} : vector<8x512xf32> to vector<8x128xf32>
    %228 = math.tanh %227 : vector<8x128xf32>
    %229 = vector.extract_strided_slice %210 {offsets = [0, 384], sizes = [8, 128], strides = [1, 1]} : vector<8x512xf32> to vector<8x128xf32>
    %cst_88 = arith.constant 5.000000e-01 : f32
    %230 = vector.broadcast %cst_88 : f32 to vector<8x128xf32>
    %231 = arith.mulf %230, %229 : vector<8x128xf32>
    %232 = math.tanh %231 : vector<8x128xf32>
    %cst_89 = arith.constant 5.000000e-01 : f32
    %233 = vector.broadcast %cst_89 : f32 to vector<8x128xf32>
    %234 = arith.mulf %233, %232 : vector<8x128xf32>
    %cst_90 = arith.constant 5.000000e-01 : f32
    %235 = vector.broadcast %cst_90 : f32 to vector<8x128xf32>
    %236 = arith.addf %234, %235 : vector<8x128xf32>
    %237 = arith.mulf %226, %200 : vector<8x128xf32>
    %238 = arith.mulf %218, %228 : vector<8x128xf32>
    %239 = arith.addf %237, %238 : vector<8x128xf32>
    %240 = math.tanh %239 : vector<8x128xf32>
    %241 = arith.mulf %236, %240 : vector<8x128xf32>
    %c6_i32 = arith.constant 6 : i32
    %c8_i32_91 = arith.constant 8 : i32
    %242 = arith.muli %c6_i32, %c8_i32_91 : i32
    %243 = tpu.assume_multiple %242, 8 : i32
    %244 = arith.index_cast %243 : i32 to index
    %c0_92 = arith.constant 0 : index
    %245 = vector.load %arg14[%244, %c0_92] : memref<64x512xf32, #tpu.memory_space<vmem>>, vector<8x512xf32>
    %246 = arith.truncf %241 : vector<8x128xf32> to vector<8x128xbf16>
    %c0_93 = arith.constant 0 : index
    %c0_94 = arith.constant 0 : index
    %247 = vector.load %arg6[%c0_93, %c0_94] : memref<128x512xbf16, #tpu.memory_space<vmem>>, vector<128x512xbf16>
    %cst_95 = arith.constant dense<0.000000e+00> : vector<8x512xf32>
    %248 = tpu.matmul %246, %247, %cst_95 {dimension_numbers = #tpu.dot_dimension_numbers<[1], [0], [0], [1], [0, 0, 1, 1], [], []>} : vector<8x128xbf16>, vector<128x512xbf16>, vector<8x512xf32> -> vector<8x512xf32>
    %249 = arith.addf %245, %248 : vector<8x512xf32>
    %250 = vector.extract_strided_slice %249 {offsets = [0, 0], sizes = [8, 128], strides = [1, 1]} : vector<8x512xf32> to vector<8x128xf32>
    %cst_96 = arith.constant 5.000000e-01 : f32
    %251 = vector.broadcast %cst_96 : f32 to vector<8x128xf32>
    %252 = arith.mulf %251, %250 : vector<8x128xf32>
    %253 = math.tanh %252 : vector<8x128xf32>
    %cst_97 = arith.constant 5.000000e-01 : f32
    %254 = vector.broadcast %cst_97 : f32 to vector<8x128xf32>
    %255 = arith.mulf %254, %253 : vector<8x128xf32>
    %cst_98 = arith.constant 5.000000e-01 : f32
    %256 = vector.broadcast %cst_98 : f32 to vector<8x128xf32>
    %257 = arith.addf %255, %256 : vector<8x128xf32>
    %258 = vector.extract_strided_slice %249 {offsets = [0, 128], sizes = [8, 128], strides = [1, 1]} : vector<8x512xf32> to vector<8x128xf32>
    %cst_99 = arith.constant 5.000000e-01 : f32
    %259 = vector.broadcast %cst_99 : f32 to vector<8x128xf32>
    %260 = arith.mulf %259, %258 : vector<8x128xf32>
    %261 = math.tanh %260 : vector<8x128xf32>
    %cst_100 = arith.constant 5.000000e-01 : f32
    %262 = vector.broadcast %cst_100 : f32 to vector<8x128xf32>
    %263 = arith.mulf %262, %261 : vector<8x128xf32>
    %cst_101 = arith.constant 5.000000e-01 : f32
    %264 = vector.broadcast %cst_101 : f32 to vector<8x128xf32>
    %265 = arith.addf %263, %264 : vector<8x128xf32>
    %266 = vector.extract_strided_slice %249 {offsets = [0, 256], sizes = [8, 128], strides = [1, 1]} : vector<8x512xf32> to vector<8x128xf32>
    %267 = math.tanh %266 : vector<8x128xf32>
    %268 = vector.extract_strided_slice %249 {offsets = [0, 384], sizes = [8, 128], strides = [1, 1]} : vector<8x512xf32> to vector<8x128xf32>
    %cst_102 = arith.constant 5.000000e-01 : f32
    %269 = vector.broadcast %cst_102 : f32 to vector<8x128xf32>
    %270 = arith.mulf %269, %268 : vector<8x128xf32>
    %271 = math.tanh %270 : vector<8x128xf32>
    %cst_103 = arith.constant 5.000000e-01 : f32
    %272 = vector.broadcast %cst_103 : f32 to vector<8x128xf32>
    %273 = arith.mulf %272, %271 : vector<8x128xf32>
    %cst_104 = arith.constant 5.000000e-01 : f32
    %274 = vector.broadcast %cst_104 : f32 to vector<8x128xf32>
    %275 = arith.addf %273, %274 : vector<8x128xf32>
    %276 = arith.mulf %265, %239 : vector<8x128xf32>
    %277 = arith.mulf %257, %267 : vector<8x128xf32>
    %278 = arith.addf %276, %277 : vector<8x128xf32>
    %279 = math.tanh %278 : vector<8x128xf32>
    %280 = arith.mulf %275, %279 : vector<8x128xf32>
    %c7_i32 = arith.constant 7 : i32
    %c8_i32_105 = arith.constant 8 : i32
    %281 = arith.muli %c7_i32, %c8_i32_105 : i32
    %282 = tpu.assume_multiple %281, 8 : i32
    %283 = arith.index_cast %282 : i32 to index
    %c0_106 = arith.constant 0 : index
    %284 = vector.load %arg14[%283, %c0_106] : memref<64x512xf32, #tpu.memory_space<vmem>>, vector<8x512xf32>
    %285 = arith.truncf %280 : vector<8x128xf32> to vector<8x128xbf16>
    %c0_107 = arith.constant 0 : index
    %c0_108 = arith.constant 0 : index
    %286 = vector.load %arg6[%c0_107, %c0_108] : memref<128x512xbf16, #tpu.memory_space<vmem>>, vector<128x512xbf16>
    %cst_109 = arith.constant dense<0.000000e+00> : vector<8x512xf32>
    %287 = tpu.matmul %285, %286, %cst_109 {dimension_numbers = #tpu.dot_dimension_numbers<[1], [0], [0], [1], [0, 0, 1, 1], [], []>} : vector<8x128xbf16>, vector<128x512xbf16>, vector<8x512xf32> -> vector<8x512xf32>
    %288 = arith.addf %284, %287 : vector<8x512xf32>
    %289 = vector.extract_strided_slice %288 {offsets = [0, 0], sizes = [8, 128], strides = [1, 1]} : vector<8x512xf32> to vector<8x128xf32>
    %cst_110 = arith.constant 5.000000e-01 : f32
    %290 = vector.broadcast %cst_110 : f32 to vector<8x128xf32>
    %291 = arith.mulf %290, %289 : vector<8x128xf32>
    %292 = math.tanh %291 : vector<8x128xf32>
    %cst_111 = arith.constant 5.000000e-01 : f32
    %293 = vector.broadcast %cst_111 : f32 to vector<8x128xf32>
    %294 = arith.mulf %293, %292 : vector<8x128xf32>
    %cst_112 = arith.constant 5.000000e-01 : f32
    %295 = vector.broadcast %cst_112 : f32 to vector<8x128xf32>
    %296 = arith.addf %294, %295 : vector<8x128xf32>
    %297 = vector.extract_strided_slice %288 {offsets = [0, 128], sizes = [8, 128], strides = [1, 1]} : vector<8x512xf32> to vector<8x128xf32>
    %cst_113 = arith.constant 5.000000e-01 : f32
    %298 = vector.broadcast %cst_113 : f32 to vector<8x128xf32>
    %299 = arith.mulf %298, %297 : vector<8x128xf32>
    %300 = math.tanh %299 : vector<8x128xf32>
    %cst_114 = arith.constant 5.000000e-01 : f32
    %301 = vector.broadcast %cst_114 : f32 to vector<8x128xf32>
    %302 = arith.mulf %301, %300 : vector<8x128xf32>
    %cst_115 = arith.constant 5.000000e-01 : f32
    %303 = vector.broadcast %cst_115 : f32 to vector<8x128xf32>
    %304 = arith.addf %302, %303 : vector<8x128xf32>
    %305 = vector.extract_strided_slice %288 {offsets = [0, 256], sizes = [8, 128], strides = [1, 1]} : vector<8x512xf32> to vector<8x128xf32>
    %306 = math.tanh %305 : vector<8x128xf32>
    %307 = vector.extract_strided_slice %288 {offsets = [0, 384], sizes = [8, 128], strides = [1, 1]} : vector<8x512xf32> to vector<8x128xf32>
    %cst_116 = arith.constant 5.000000e-01 : f32
    %308 = vector.broadcast %cst_116 : f32 to vector<8x128xf32>
    %309 = arith.mulf %308, %307 : vector<8x128xf32>
    %310 = math.tanh %309 : vector<8x128xf32>
    %cst_117 = arith.constant 5.000000e-01 : f32
    %311 = vector.broadcast %cst_117 : f32 to vector<8x128xf32>
    %312 = arith.mulf %311, %310 : vector<8x128xf32>
    %cst_118 = arith.constant 5.000000e-01 : f32
    %313 = vector.broadcast %cst_118 : f32 to vector<8x128xf32>
    %314 = arith.addf %312, %313 : vector<8x128xf32>
    %315 = arith.mulf %304, %278 : vector<8x128xf32>
    %316 = arith.mulf %296, %306 : vector<8x128xf32>
    %317 = arith.addf %315, %316 : vector<8x128xf32>
    %318 = math.tanh %317 : vector<8x128xf32>
    %319 = arith.mulf %314, %318 : vector<8x128xf32>
    %c8_i32_119 = arith.constant 8 : i32
    %c0_120 = arith.constant 0 : index
    %c0_121 = arith.constant 0 : index
    %320 = vector.load %arg3[%c0_120, %c0_121] : memref<8x128xbf16, #tpu.memory_space<vmem>>, vector<8x128xbf16>
    %c0_122 = arith.constant 0 : index
    %c0_123 = arith.constant 0 : index
    %321 = vector.load %arg15[%c0_122, %c0_123] : memref<8x256xbf16, #tpu.memory_space<vmem>>, vector<8x128xbf16>
    tpu.vector_store %arg15[%c0_122, %c0_123], %320 {strides = array<i32>} : memref<8x256xbf16, #tpu.memory_space<vmem>>, vector<8x128xbf16>,
    %322 = tpu.iota {dimensions = array<i32: 1>} : vector<8x256xi32>
    %c0_i32_124 = arith.constant 0 : i32
    %323 = arith.truncf %319 : vector<8x128xf32> to vector<8x128xbf16>
    %c0_125 = arith.constant 0 : index
    %c128 = arith.constant 128 : index
    %324 = vector.load %arg15[%c0_125, %c128] : memref<8x256xbf16, #tpu.memory_space<vmem>>, vector<8x128xbf16>
    tpu.vector_store %arg15[%c0_125, %c128], %323 {strides = array<i32>} : memref<8x256xbf16, #tpu.memory_space<vmem>>, vector<8x128xbf16>,
    %c0_126 = arith.constant 0 : index
    %c0_127 = arith.constant 0 : index
    %325 = vector.load %arg15[%c0_126, %c0_127] : memref<8x256xbf16, #tpu.memory_space<vmem>>, vector<8x256xbf16>
    %c0_128 = arith.constant 0 : index
    %c0_129 = arith.constant 0 : index
    %326 = vector.load %arg9[%c0_128, %c0_129] : memref<256x512xbf16, #tpu.memory_space<vmem>>, vector<256x512xbf16>
    %cst_130 = arith.constant dense<0.000000e+00> : vector<8x512xf32>
    %327 = tpu.matmul %325, %326, %cst_130 {dimension_numbers = #tpu.dot_dimension_numbers<[1], [0], [0], [1], [0, 0, 1, 1], [], []>} : vector<8x256xbf16>, vector<256x512xbf16>, vector<8x512xf32> -> vector<8x512xf32>
    %c0_131 = arith.constant 0 : index
    %c0_132 = arith.constant 0 : index
    %328 = vector.load %arg10[%c0_131, %c0_132] : memref<1x512xf32, #tpu.memory_space<vmem>>, vector<1x512xf32>
    %329 = vector.broadcast %328 : vector<1x512xf32> to vector<8x512xf32>
    %330 = arith.addf %327, %329 : vector<8x512xf32>
    %331 = vector.extract_strided_slice %330 {offsets = [0, 0], sizes = [8, 128], strides = [1, 1]} : vector<8x512xf32> to vector<8x128xf32>
    %cst_133 = arith.constant 5.000000e-01 : f32
    %332 = vector.broadcast %cst_133 : f32 to vector<8x128xf32>
    %333 = arith.mulf %332, %331 : vector<8x128xf32>
    %334 = math.tanh %333 : vector<8x128xf32>
    %cst_134 = arith.constant 5.000000e-01 : f32
    %335 = vector.broadcast %cst_134 : f32 to vector<8x128xf32>
    %336 = arith.mulf %335, %334 : vector<8x128xf32>
    %cst_135 = arith.constant 5.000000e-01 : f32
    %337 = vector.broadcast %cst_135 : f32 to vector<8x128xf32>
    %338 = arith.addf %336, %337 : vector<8x128xf32>
    %339 = vector.extract_strided_slice %330 {offsets = [0, 128], sizes = [8, 128], strides = [1, 1]} : vector<8x512xf32> to vector<8x128xf32>
    %cst_136 = arith.constant 5.000000e-01 : f32
    %340 = vector.broadcast %cst_136 : f32 to vector<8x128xf32>
    %341 = arith.mulf %340, %339 : vector<8x128xf32>
    %342 = math.tanh %341 : vector<8x128xf32>
    %cst_137 = arith.constant 5.000000e-01 : f32
    %343 = vector.broadcast %cst_137 : f32 to vector<8x128xf32>
    %344 = arith.mulf %343, %342 : vector<8x128xf32>
    %cst_138 = arith.constant 5.000000e-01 : f32
    %345 = vector.broadcast %cst_138 : f32 to vector<8x128xf32>
    %346 = arith.addf %344, %345 : vector<8x128xf32>
    %347 = vector.extract_strided_slice %330 {offsets = [0, 256], sizes = [8, 128], strides = [1, 1]} : vector<8x512xf32> to vector<8x128xf32>
    %348 = math.tanh %347 : vector<8x128xf32>
    %349 = vector.extract_strided_slice %330 {offsets = [0, 384], sizes = [8, 128], strides = [1, 1]} : vector<8x512xf32> to vector<8x128xf32>
    %cst_139 = arith.constant 5.000000e-01 : f32
    %350 = vector.broadcast %cst_139 : f32 to vector<8x128xf32>
    %351 = arith.mulf %350, %349 : vector<8x128xf32>
    %352 = math.tanh %351 : vector<8x128xf32>
    %cst_140 = arith.constant 5.000000e-01 : f32
    %353 = vector.broadcast %cst_140 : f32 to vector<8x128xf32>
    %354 = arith.mulf %353, %352 : vector<8x128xf32>
    %cst_141 = arith.constant 5.000000e-01 : f32
    %355 = vector.broadcast %cst_141 : f32 to vector<8x128xf32>
    %356 = arith.addf %354, %355 : vector<8x128xf32>
    %357 = arith.mulf %346, %317 : vector<8x128xf32>
    %358 = arith.mulf %338, %348 : vector<8x128xf32>
    %359 = arith.addf %357, %358 : vector<8x128xf32>
    %360 = math.tanh %359 : vector<8x128xf32>
    %361 = arith.mulf %356, %360 : vector<8x128xf32>
    %362 = arith.truncf %361 : vector<8x128xf32> to vector<8x128xbf16>
    %c0_142 = arith.constant 0 : index
    %c0_143 = arith.constant 0 : index
    %363 = vector.load %arg11[%c0_142, %c0_143] : memref<128x256xbf16, #tpu.memory_space<vmem>>, vector<128x256xbf16>
    %cst_144 = arith.constant dense<0.000000e+00> : vector<8x256xf32>
    %364 = tpu.matmul %362, %363, %cst_144 {dimension_numbers = #tpu.dot_dimension_numbers<[1], [0], [0], [1], [0, 0, 1, 1], [], []>} : vector<8x128xbf16>, vector<128x256xbf16>, vector<8x256xf32> -> vector<8x256xf32>
    %c0_145 = arith.constant 0 : index
    %c0_146 = arith.constant 0 : index
    %365 = vector.load %arg12[%c0_145, %c0_146] : memref<1x256xf32, #tpu.memory_space<vmem>>, vector<1x256xf32>
    %366 = vector.broadcast %365 : vector<1x256xf32> to vector<8x256xf32>
    %367 = arith.addf %364, %366 : vector<8x256xf32>
    %c8_i32_147 = arith.constant 8 : i32
    %368 = arith.muli %c0_i32_124, %c8_i32_147 : i32
    %369 = tpu.assume_multiple %368, 8 : i32
    %370 = arith.index_cast %369 : i32 to index
    %c0_148 = arith.constant 0 : index
    %371 = vector.load %arg13[%370, %c0_148] : memref<56x256xf32, #tpu.memory_space<vmem>>, vector<8x256xf32>
    tpu.vector_store %arg13[%370, %c0_148], %367 {strides = array<i32>} : memref<56x256xf32, #tpu.memory_space<vmem>>, vector<8x256xf32>,
    %cst_149 = arith.constant dense<0xFF800000> : vector<8xf32>
    %372 = vector.multi_reduction <maximumf>, %367, %cst_149 [1] : vector<8x256xf32> to vector<8xf32>
    %373 = vector.shape_cast %372 : vector<8xf32> to vector<8x1xf32>
    %374 = vector.broadcast %373 : vector<8x1xf32> to vector<8x256xf32>
    %375 = arith.cmpf oeq, %367, %374 : vector<8x256xf32>
    %c256_i32 = arith.constant 256 : i32
    %376 = vector.broadcast %c256_i32 : i32 to vector<8x256xi32>
    %377 = arith.select %375, %322, %376 : vector<8x256xi1>, vector<8x256xi32>
    %cst_150 = arith.constant dense<2147483647> : vector<8xi32>
    %378 = vector.multi_reduction <minsi>, %377, %cst_150 [1] : vector<8x256xi32> to vector<8xi32>
    %379 = vector.shape_cast %378 : vector<8xi32> to vector<8x1xi32>
    %380 = vector.broadcast %379 : vector<8x1xi32> to vector<8x256xi32>
    %381 = arith.cmpi eq, %322, %380 : vector<8x256xi32>
    %382 = arith.extui %381 : vector<8x256xi1> to vector<8x256xi32>
    %383 = arith.sitofp %382 : vector<8x256xi32> to vector<8x256xf32>
    %384 = arith.truncf %383 : vector<8x256xf32> to vector<8x256xbf16>
    %c0_151 = arith.constant 0 : index
    %c0_152 = arith.constant 0 : index
    %385 = vector.load %arg8[%c0_151, %c0_152] : memref<256x128xbf16, #tpu.memory_space<vmem>>, vector<256x128xbf16>
    %cst_153 = arith.constant dense<0.000000e+00> : vector<8x128xf32>
    %386 = tpu.matmul %384, %385, %cst_153 {dimension_numbers = #tpu.dot_dimension_numbers<[1], [0], [0], [1], [0, 0, 1, 1], [], []>} : vector<8x256xbf16>, vector<256x128xbf16>, vector<8x128xf32> -> vector<8x128xf32>
    %387 = arith.index_cast %369 : i32 to index
    %c0_154 = arith.constant 0 : index
    %388 = vector.load %arg4[%387, %c0_154] : memref<56x128xbf16, #tpu.memory_space<vmem>>, vector<8x128xbf16>
    %389 = arith.index_cast %c0_i32_124 : i32 to index
    %390 = memref.load %arg1[%389] : memref<7xi32, #tpu.memory_space<smem>>
    %c1_i32_155 = arith.constant 1 : i32
    %391 = arith.cmpi eq, %390, %c1_i32_155 : i32
    %392 = arith.truncf %386 : vector<8x128xf32> to vector<8x128xbf16>
    %393 = arith.select %391, %388, %392 : vector<8x128xbf16>
    %c0_156 = arith.constant 0 : index
    %c0_157 = arith.constant 0 : index
    %394 = vector.load %arg15[%c0_156, %c0_157] : memref<8x256xbf16, #tpu.memory_space<vmem>>, vector<8x128xbf16>
    tpu.vector_store %arg15[%c0_156, %c0_157], %393 {strides = array<i32>} : memref<8x256xbf16, #tpu.memory_space<vmem>>, vector<8x128xbf16>,
    %c1_i32_158 = arith.constant 1 : i32
    %395 = arith.truncf %361 : vector<8x128xf32> to vector<8x128xbf16>
    %c0_159 = arith.constant 0 : index
    %c128_160 = arith.constant 128 : index
    %396 = vector.load %arg15[%c0_159, %c128_160] : memref<8x256xbf16, #tpu.memory_space<vmem>>, vector<8x128xbf16>
    tpu.vector_store %arg15[%c0_159, %c128_160], %395 {strides = array<i32>} : memref<8x256xbf16, #tpu.memory_space<vmem>>, vector<8x128xbf16>,
    %c0_161 = arith.constant 0 : index
    %c0_162 = arith.constant 0 : index
    %397 = vector.load %arg15[%c0_161, %c0_162] : memref<8x256xbf16, #tpu.memory_space<vmem>>, vector<8x256xbf16>
    %c0_163 = arith.constant 0 : index
    %c0_164 = arith.constant 0 : index
    %398 = vector.load %arg9[%c0_163, %c0_164] : memref<256x512xbf16, #tpu.memory_space<vmem>>, vector<256x512xbf16>
    %cst_165 = arith.constant dense<0.000000e+00> : vector<8x512xf32>
    %399 = tpu.matmul %397, %398, %cst_165 {dimension_numbers = #tpu.dot_dimension_numbers<[1], [0], [0], [1], [0, 0, 1, 1], [], []>} : vector<8x256xbf16>, vector<256x512xbf16>, vector<8x512xf32> -> vector<8x512xf32>
    %c0_166 = arith.constant 0 : index
    %c0_167 = arith.constant 0 : index
    %400 = vector.load %arg10[%c0_166, %c0_167] : memref<1x512xf32, #tpu.memory_space<vmem>>, vector<1x512xf32>
    %401 = vector.broadcast %400 : vector<1x512xf32> to vector<8x512xf32>
    %402 = arith.addf %399, %401 : vector<8x512xf32>
    %403 = vector.extract_strided_slice %402 {offsets = [0, 0], sizes = [8, 128], strides = [1, 1]} : vector<8x512xf32> to vector<8x128xf32>
    %cst_168 = arith.constant 5.000000e-01 : f32
    %404 = vector.broadcast %cst_168 : f32 to vector<8x128xf32>
    %405 = arith.mulf %404, %403 : vector<8x128xf32>
    %406 = math.tanh %405 : vector<8x128xf32>
    %cst_169 = arith.constant 5.000000e-01 : f32
    %407 = vector.broadcast %cst_169 : f32 to vector<8x128xf32>
    %408 = arith.mulf %407, %406 : vector<8x128xf32>
    %cst_170 = arith.constant 5.000000e-01 : f32
    %409 = vector.broadcast %cst_170 : f32 to vector<8x128xf32>
    %410 = arith.addf %408, %409 : vector<8x128xf32>
    %411 = vector.extract_strided_slice %402 {offsets = [0, 128], sizes = [8, 128], strides = [1, 1]} : vector<8x512xf32> to vector<8x128xf32>
    %cst_171 = arith.constant 5.000000e-01 : f32
    %412 = vector.broadcast %cst_171 : f32 to vector<8x128xf32>
    %413 = arith.mulf %412, %411 : vector<8x128xf32>
    %414 = math.tanh %413 : vector<8x128xf32>
    %cst_172 = arith.constant 5.000000e-01 : f32
    %415 = vector.broadcast %cst_172 : f32 to vector<8x128xf32>
    %416 = arith.mulf %415, %414 : vector<8x128xf32>
    %cst_173 = arith.constant 5.000000e-01 : f32
    %417 = vector.broadcast %cst_173 : f32 to vector<8x128xf32>
    %418 = arith.addf %416, %417 : vector<8x128xf32>
    %419 = vector.extract_strided_slice %402 {offsets = [0, 256], sizes = [8, 128], strides = [1, 1]} : vector<8x512xf32> to vector<8x128xf32>
    %420 = math.tanh %419 : vector<8x128xf32>
    %421 = vector.extract_strided_slice %402 {offsets = [0, 384], sizes = [8, 128], strides = [1, 1]} : vector<8x512xf32> to vector<8x128xf32>
    %cst_174 = arith.constant 5.000000e-01 : f32
    %422 = vector.broadcast %cst_174 : f32 to vector<8x128xf32>
    %423 = arith.mulf %422, %421 : vector<8x128xf32>
    %424 = math.tanh %423 : vector<8x128xf32>
    %cst_175 = arith.constant 5.000000e-01 : f32
    %425 = vector.broadcast %cst_175 : f32 to vector<8x128xf32>
    %426 = arith.mulf %425, %424 : vector<8x128xf32>
    %cst_176 = arith.constant 5.000000e-01 : f32
    %427 = vector.broadcast %cst_176 : f32 to vector<8x128xf32>
    %428 = arith.addf %426, %427 : vector<8x128xf32>
    %429 = arith.mulf %418, %359 : vector<8x128xf32>
    %430 = arith.mulf %410, %420 : vector<8x128xf32>
    %431 = arith.addf %429, %430 : vector<8x128xf32>
    %432 = math.tanh %431 : vector<8x128xf32>
    %433 = arith.mulf %428, %432 : vector<8x128xf32>
    %434 = arith.truncf %433 : vector<8x128xf32> to vector<8x128xbf16>
    %c0_177 = arith.constant 0 : index
    %c0_178 = arith.constant 0 : index
    %435 = vector.load %arg11[%c0_177, %c0_178] : memref<128x256xbf16, #tpu.memory_space<vmem>>, vector<128x256xbf16>
    %cst_179 = arith.constant dense<0.000000e+00> : vector<8x256xf32>
    %436 = tpu.matmul %434, %435, %cst_179 {dimension_numbers = #tpu.dot_dimension_numbers<[1], [0], [0], [1], [0, 0, 1, 1], [], []>} : vector<8x128xbf16>, vector<128x256xbf16>, vector<8x256xf32> -> vector<8x256xf32>
    %c0_180 = arith.constant 0 : index
    %c0_181 = arith.constant 0 : index
    %437 = vector.load %arg12[%c0_180, %c0_181] : memref<1x256xf32, #tpu.memory_space<vmem>>, vector<1x256xf32>
    %438 = vector.broadcast %437 : vector<1x256xf32> to vector<8x256xf32>
    %439 = arith.addf %436, %438 : vector<8x256xf32>
    %c8_i32_182 = arith.constant 8 : i32
    %440 = arith.muli %c1_i32_158, %c8_i32_182 : i32
    %441 = tpu.assume_multiple %440, 8 : i32
    %442 = arith.index_cast %441 : i32 to index
    %c0_183 = arith.constant 0 : index
    %443 = vector.load %arg13[%442, %c0_183] : memref<56x256xf32, #tpu.memory_space<vmem>>, vector<8x256xf32>
    tpu.vector_store %arg13[%442, %c0_183], %439 {strides = array<i32>} : memref<56x256xf32, #tpu.memory_space<vmem>>, vector<8x256xf32>,
    %cst_184 = arith.constant dense<0xFF800000> : vector<8xf32>
    %444 = vector.multi_reduction <maximumf>, %439, %cst_184 [1] : vector<8x256xf32> to vector<8xf32>
    %445 = vector.shape_cast %444 : vector<8xf32> to vector<8x1xf32>
    %446 = vector.broadcast %445 : vector<8x1xf32> to vector<8x256xf32>
    %447 = arith.cmpf oeq, %439, %446 : vector<8x256xf32>
    %c256_i32_185 = arith.constant 256 : i32
    %448 = vector.broadcast %c256_i32_185 : i32 to vector<8x256xi32>
    %449 = arith.select %447, %322, %448 : vector<8x256xi1>, vector<8x256xi32>
    %cst_186 = arith.constant dense<2147483647> : vector<8xi32>
    %450 = vector.multi_reduction <minsi>, %449, %cst_186 [1] : vector<8x256xi32> to vector<8xi32>
    %451 = vector.shape_cast %450 : vector<8xi32> to vector<8x1xi32>
    %452 = vector.broadcast %451 : vector<8x1xi32> to vector<8x256xi32>
    %453 = arith.cmpi eq, %322, %452 : vector<8x256xi32>
    %454 = arith.extui %453 : vector<8x256xi1> to vector<8x256xi32>
    %455 = arith.sitofp %454 : vector<8x256xi32> to vector<8x256xf32>
    %456 = arith.truncf %455 : vector<8x256xf32> to vector<8x256xbf16>
    %c0_187 = arith.constant 0 : index
    %c0_188 = arith.constant 0 : index
    %457 = vector.load %arg8[%c0_187, %c0_188] : memref<256x128xbf16, #tpu.memory_space<vmem>>, vector<256x128xbf16>
    %cst_189 = arith.constant dense<0.000000e+00> : vector<8x128xf32>
    %458 = tpu.matmul %456, %457, %cst_189 {dimension_numbers = #tpu.dot_dimension_numbers<[1], [0], [0], [1], [0, 0, 1, 1], [], []>} : vector<8x256xbf16>, vector<256x128xbf16>, vector<8x128xf32> -> vector<8x128xf32>
    %459 = arith.index_cast %441 : i32 to index
    %c0_190 = arith.constant 0 : index
    %460 = vector.load %arg4[%459, %c0_190] : memref<56x128xbf16, #tpu.memory_space<vmem>>, vector<8x128xbf16>
    %461 = arith.index_cast %c1_i32_158 : i32 to index
    %462 = memref.load %arg1[%461] : memref<7xi32, #tpu.memory_space<smem>>
    %c1_i32_191 = arith.constant 1 : i32
    %463 = arith.cmpi eq, %462, %c1_i32_191 : i32
    %464 = arith.truncf %458 : vector<8x128xf32> to vector<8x128xbf16>
    %465 = arith.select %463, %460, %464 : vector<8x128xbf16>
    %c0_192 = arith.constant 0 : index
    %c0_193 = arith.constant 0 : index
    %466 = vector.load %arg15[%c0_192, %c0_193] : memref<8x256xbf16, #tpu.memory_space<vmem>>, vector<8x128xbf16>
    tpu.vector_store %arg15[%c0_192, %c0_193], %465 {strides = array<i32>} : memref<8x256xbf16, #tpu.memory_space<vmem>>, vector<8x128xbf16>,
    %c2_i32_194 = arith.constant 2 : i32
    %467 = arith.truncf %433 : vector<8x128xf32> to vector<8x128xbf16>
    %c0_195 = arith.constant 0 : index
    %c128_196 = arith.constant 128 : index
    %468 = vector.load %arg15[%c0_195, %c128_196] : memref<8x256xbf16, #tpu.memory_space<vmem>>, vector<8x128xbf16>
    tpu.vector_store %arg15[%c0_195, %c128_196], %467 {strides = array<i32>} : memref<8x256xbf16, #tpu.memory_space<vmem>>, vector<8x128xbf16>,
    %c0_197 = arith.constant 0 : index
    %c0_198 = arith.constant 0 : index
    %469 = vector.load %arg15[%c0_197, %c0_198] : memref<8x256xbf16, #tpu.memory_space<vmem>>, vector<8x256xbf16>
    %c0_199 = arith.constant 0 : index
    %c0_200 = arith.constant 0 : index
    %470 = vector.load %arg9[%c0_199, %c0_200] : memref<256x512xbf16, #tpu.memory_space<vmem>>, vector<256x512xbf16>
    %cst_201 = arith.constant dense<0.000000e+00> : vector<8x512xf32>
    %471 = tpu.matmul %469, %470, %cst_201 {dimension_numbers = #tpu.dot_dimension_numbers<[1], [0], [0], [1], [0, 0, 1, 1], [], []>} : vector<8x256xbf16>, vector<256x512xbf16>, vector<8x512xf32> -> vector<8x512xf32>
    %c0_202 = arith.constant 0 : index
    %c0_203 = arith.constant 0 : index
    %472 = vector.load %arg10[%c0_202, %c0_203] : memref<1x512xf32, #tpu.memory_space<vmem>>, vector<1x512xf32>
    %473 = vector.broadcast %472 : vector<1x512xf32> to vector<8x512xf32>
    %474 = arith.addf %471, %473 : vector<8x512xf32>
    %475 = vector.extract_strided_slice %474 {offsets = [0, 0], sizes = [8, 128], strides = [1, 1]} : vector<8x512xf32> to vector<8x128xf32>
    %cst_204 = arith.constant 5.000000e-01 : f32
    %476 = vector.broadcast %cst_204 : f32 to vector<8x128xf32>
    %477 = arith.mulf %476, %475 : vector<8x128xf32>
    %478 = math.tanh %477 : vector<8x128xf32>
    %cst_205 = arith.constant 5.000000e-01 : f32
    %479 = vector.broadcast %cst_205 : f32 to vector<8x128xf32>
    %480 = arith.mulf %479, %478 : vector<8x128xf32>
    %cst_206 = arith.constant 5.000000e-01 : f32
    %481 = vector.broadcast %cst_206 : f32 to vector<8x128xf32>
    %482 = arith.addf %480, %481 : vector<8x128xf32>
    %483 = vector.extract_strided_slice %474 {offsets = [0, 128], sizes = [8, 128], strides = [1, 1]} : vector<8x512xf32> to vector<8x128xf32>
    %cst_207 = arith.constant 5.000000e-01 : f32
    %484 = vector.broadcast %cst_207 : f32 to vector<8x128xf32>
    %485 = arith.mulf %484, %483 : vector<8x128xf32>
    %486 = math.tanh %485 : vector<8x128xf32>
    %cst_208 = arith.constant 5.000000e-01 : f32
    %487 = vector.broadcast %cst_208 : f32 to vector<8x128xf32>
    %488 = arith.mulf %487, %486 : vector<8x128xf32>
    %cst_209 = arith.constant 5.000000e-01 : f32
    %489 = vector.broadcast %cst_209 : f32 to vector<8x128xf32>
    %490 = arith.addf %488, %489 : vector<8x128xf32>
    %491 = vector.extract_strided_slice %474 {offsets = [0, 256], sizes = [8, 128], strides = [1, 1]} : vector<8x512xf32> to vector<8x128xf32>
    %492 = math.tanh %491 : vector<8x128xf32>
    %493 = vector.extract_strided_slice %474 {offsets = [0, 384], sizes = [8, 128], strides = [1, 1]} : vector<8x512xf32> to vector<8x128xf32>
    %cst_210 = arith.constant 5.000000e-01 : f32
    %494 = vector.broadcast %cst_210 : f32 to vector<8x128xf32>
    %495 = arith.mulf %494, %493 : vector<8x128xf32>
    %496 = math.tanh %495 : vector<8x128xf32>
    %cst_211 = arith.constant 5.000000e-01 : f32
    %497 = vector.broadcast %cst_211 : f32 to vector<8x128xf32>
    %498 = arith.mulf %497, %496 : vector<8x128xf32>
    %cst_212 = arith.constant 5.000000e-01 : f32
    %499 = vector.broadcast %cst_212 : f32 to vector<8x128xf32>
    %500 = arith.addf %498, %499 : vector<8x128xf32>
    %501 = arith.mulf %490, %431 : vector<8x128xf32>
    %502 = arith.mulf %482, %492 : vector<8x128xf32>
    %503 = arith.addf %501, %502 : vector<8x128xf32>
    %504 = math.tanh %503 : vector<8x128xf32>
    %505 = arith.mulf %500, %504 : vector<8x128xf32>
    %506 = arith.truncf %505 : vector<8x128xf32> to vector<8x128xbf16>
    %c0_213 = arith.constant 0 : index
    %c0_214 = arith.constant 0 : index
    %507 = vector.load %arg11[%c0_213, %c0_214] : memref<128x256xbf16, #tpu.memory_space<vmem>>, vector<128x256xbf16>
    %cst_215 = arith.constant dense<0.000000e+00> : vector<8x256xf32>
    %508 = tpu.matmul %506, %507, %cst_215 {dimension_numbers = #tpu.dot_dimension_numbers<[1], [0], [0], [1], [0, 0, 1, 1], [], []>} : vector<8x128xbf16>, vector<128x256xbf16>, vector<8x256xf32> -> vector<8x256xf32>
    %c0_216 = arith.constant 0 : index
    %c0_217 = arith.constant 0 : index
    %509 = vector.load %arg12[%c0_216, %c0_217] : memref<1x256xf32, #tpu.memory_space<vmem>>, vector<1x256xf32>
    %510 = vector.broadcast %509 : vector<1x256xf32> to vector<8x256xf32>
    %511 = arith.addf %508, %510 : vector<8x256xf32>
    %c8_i32_218 = arith.constant 8 : i32
    %512 = arith.muli %c2_i32_194, %c8_i32_218 : i32
    %513 = tpu.assume_multiple %512, 8 : i32
    %514 = arith.index_cast %513 : i32 to index
    %c0_219 = arith.constant 0 : index
    %515 = vector.load %arg13[%514, %c0_219] : memref<56x256xf32, #tpu.memory_space<vmem>>, vector<8x256xf32>
    tpu.vector_store %arg13[%514, %c0_219], %511 {strides = array<i32>} : memref<56x256xf32, #tpu.memory_space<vmem>>, vector<8x256xf32>,
    %cst_220 = arith.constant dense<0xFF800000> : vector<8xf32>
    %516 = vector.multi_reduction <maximumf>, %511, %cst_220 [1] : vector<8x256xf32> to vector<8xf32>
    %517 = vector.shape_cast %516 : vector<8xf32> to vector<8x1xf32>
    %518 = vector.broadcast %517 : vector<8x1xf32> to vector<8x256xf32>
    %519 = arith.cmpf oeq, %511, %518 : vector<8x256xf32>
    %c256_i32_221 = arith.constant 256 : i32
    %520 = vector.broadcast %c256_i32_221 : i32 to vector<8x256xi32>
    %521 = arith.select %519, %322, %520 : vector<8x256xi1>, vector<8x256xi32>
    %cst_222 = arith.constant dense<2147483647> : vector<8xi32>
    %522 = vector.multi_reduction <minsi>, %521, %cst_222 [1] : vector<8x256xi32> to vector<8xi32>
    %523 = vector.shape_cast %522 : vector<8xi32> to vector<8x1xi32>
    %524 = vector.broadcast %523 : vector<8x1xi32> to vector<8x256xi32>
    %525 = arith.cmpi eq, %322, %524 : vector<8x256xi32>
    %526 = arith.extui %525 : vector<8x256xi1> to vector<8x256xi32>
    %527 = arith.sitofp %526 : vector<8x256xi32> to vector<8x256xf32>
    %528 = arith.truncf %527 : vector<8x256xf32> to vector<8x256xbf16>
    %c0_223 = arith.constant 0 : index
    %c0_224 = arith.constant 0 : index
    %529 = vector.load %arg8[%c0_223, %c0_224] : memref<256x128xbf16, #tpu.memory_space<vmem>>, vector<256x128xbf16>
    %cst_225 = arith.constant dense<0.000000e+00> : vector<8x128xf32>
    %530 = tpu.matmul %528, %529, %cst_225 {dimension_numbers = #tpu.dot_dimension_numbers<[1], [0], [0], [1], [0, 0, 1, 1], [], []>} : vector<8x256xbf16>, vector<256x128xbf16>, vector<8x128xf32> -> vector<8x128xf32>
    %531 = arith.index_cast %513 : i32 to index
    %c0_226 = arith.constant 0 : index
    %532 = vector.load %arg4[%531, %c0_226] : memref<56x128xbf16, #tpu.memory_space<vmem>>, vector<8x128xbf16>
    %533 = arith.index_cast %c2_i32_194 : i32 to index
    %534 = memref.load %arg1[%533] : memref<7xi32, #tpu.memory_space<smem>>
    %c1_i32_227 = arith.constant 1 : i32
    %535 = arith.cmpi eq, %534, %c1_i32_227 : i32
    %536 = arith.truncf %530 : vector<8x128xf32> to vector<8x128xbf16>
    %537 = arith.select %535, %532, %536 : vector<8x128xbf16>
    %c0_228 = arith.constant 0 : index
    %c0_229 = arith.constant 0 : index
    %538 = vector.load %arg15[%c0_228, %c0_229] : memref<8x256xbf16, #tpu.memory_space<vmem>>, vector<8x128xbf16>
    tpu.vector_store %arg15[%c0_228, %c0_229], %537 {strides = array<i32>} : memref<8x256xbf16, #tpu.memory_space<vmem>>, vector<8x128xbf16>,
    %c3_i32_230 = arith.constant 3 : i32
    %539 = arith.truncf %505 : vector<8x128xf32> to vector<8x128xbf16>
    %c0_231 = arith.constant 0 : index
    %c128_232 = arith.constant 128 : index
    %540 = vector.load %arg15[%c0_231, %c128_232] : memref<8x256xbf16, #tpu.memory_space<vmem>>, vector<8x128xbf16>
    tpu.vector_store %arg15[%c0_231, %c128_232], %539 {strides = array<i32>} : memref<8x256xbf16, #tpu.memory_space<vmem>>, vector<8x128xbf16>,
    %c0_233 = arith.constant 0 : index
    %c0_234 = arith.constant 0 : index
    %541 = vector.load %arg15[%c0_233, %c0_234] : memref<8x256xbf16, #tpu.memory_space<vmem>>, vector<8x256xbf16>
    %c0_235 = arith.constant 0 : index
    %c0_236 = arith.constant 0 : index
    %542 = vector.load %arg9[%c0_235, %c0_236] : memref<256x512xbf16, #tpu.memory_space<vmem>>, vector<256x512xbf16>
    %cst_237 = arith.constant dense<0.000000e+00> : vector<8x512xf32>
    %543 = tpu.matmul %541, %542, %cst_237 {dimension_numbers = #tpu.dot_dimension_numbers<[1], [0], [0], [1], [0, 0, 1, 1], [], []>} : vector<8x256xbf16>, vector<256x512xbf16>, vector<8x512xf32> -> vector<8x512xf32>
    %c0_238 = arith.constant 0 : index
    %c0_239 = arith.constant 0 : index
    %544 = vector.load %arg10[%c0_238, %c0_239] : memref<1x512xf32, #tpu.memory_space<vmem>>, vector<1x512xf32>
    %545 = vector.broadcast %544 : vector<1x512xf32> to vector<8x512xf32>
    %546 = arith.addf %543, %545 : vector<8x512xf32>
    %547 = vector.extract_strided_slice %546 {offsets = [0, 0], sizes = [8, 128], strides = [1, 1]} : vector<8x512xf32> to vector<8x128xf32>
    %cst_240 = arith.constant 5.000000e-01 : f32
    %548 = vector.broadcast %cst_240 : f32 to vector<8x128xf32>
    %549 = arith.mulf %548, %547 : vector<8x128xf32>
    %550 = math.tanh %549 : vector<8x128xf32>
    %cst_241 = arith.constant 5.000000e-01 : f32
    %551 = vector.broadcast %cst_241 : f32 to vector<8x128xf32>
    %552 = arith.mulf %551, %550 : vector<8x128xf32>
    %cst_242 = arith.constant 5.000000e-01 : f32
    %553 = vector.broadcast %cst_242 : f32 to vector<8x128xf32>
    %554 = arith.addf %552, %553 : vector<8x128xf32>
    %555 = vector.extract_strided_slice %546 {offsets = [0, 128], sizes = [8, 128], strides = [1, 1]} : vector<8x512xf32> to vector<8x128xf32>
    %cst_243 = arith.constant 5.000000e-01 : f32
    %556 = vector.broadcast %cst_243 : f32 to vector<8x128xf32>
    %557 = arith.mulf %556, %555 : vector<8x128xf32>
    %558 = math.tanh %557 : vector<8x128xf32>
    %cst_244 = arith.constant 5.000000e-01 : f32
    %559 = vector.broadcast %cst_244 : f32 to vector<8x128xf32>
    %560 = arith.mulf %559, %558 : vector<8x128xf32>
    %cst_245 = arith.constant 5.000000e-01 : f32
    %561 = vector.broadcast %cst_245 : f32 to vector<8x128xf32>
    %562 = arith.addf %560, %561 : vector<8x128xf32>
    %563 = vector.extract_strided_slice %546 {offsets = [0, 256], sizes = [8, 128], strides = [1, 1]} : vector<8x512xf32> to vector<8x128xf32>
    %564 = math.tanh %563 : vector<8x128xf32>
    %565 = vector.extract_strided_slice %546 {offsets = [0, 384], sizes = [8, 128], strides = [1, 1]} : vector<8x512xf32> to vector<8x128xf32>
    %cst_246 = arith.constant 5.000000e-01 : f32
    %566 = vector.broadcast %cst_246 : f32 to vector<8x128xf32>
    %567 = arith.mulf %566, %565 : vector<8x128xf32>
    %568 = math.tanh %567 : vector<8x128xf32>
    %cst_247 = arith.constant 5.000000e-01 : f32
    %569 = vector.broadcast %cst_247 : f32 to vector<8x128xf32>
    %570 = arith.mulf %569, %568 : vector<8x128xf32>
    %cst_248 = arith.constant 5.000000e-01 : f32
    %571 = vector.broadcast %cst_248 : f32 to vector<8x128xf32>
    %572 = arith.addf %570, %571 : vector<8x128xf32>
    %573 = arith.mulf %562, %503 : vector<8x128xf32>
    %574 = arith.mulf %554, %564 : vector<8x128xf32>
    %575 = arith.addf %573, %574 : vector<8x128xf32>
    %576 = math.tanh %575 : vector<8x128xf32>
    %577 = arith.mulf %572, %576 : vector<8x128xf32>
    %578 = arith.truncf %577 : vector<8x128xf32> to vector<8x128xbf16>
    %c0_249 = arith.constant 0 : index
    %c0_250 = arith.constant 0 : index
    %579 = vector.load %arg11[%c0_249, %c0_250] : memref<128x256xbf16, #tpu.memory_space<vmem>>, vector<128x256xbf16>
    %cst_251 = arith.constant dense<0.000000e+00> : vector<8x256xf32>
    %580 = tpu.matmul %578, %579, %cst_251 {dimension_numbers = #tpu.dot_dimension_numbers<[1], [0], [0], [1], [0, 0, 1, 1], [], []>} : vector<8x128xbf16>, vector<128x256xbf16>, vector<8x256xf32> -> vector<8x256xf32>
    %c0_252 = arith.constant 0 : index
    %c0_253 = arith.constant 0 : index
    %581 = vector.load %arg12[%c0_252, %c0_253] : memref<1x256xf32, #tpu.memory_space<vmem>>, vector<1x256xf32>
    %582 = vector.broadcast %581 : vector<1x256xf32> to vector<8x256xf32>
    %583 = arith.addf %580, %582 : vector<8x256xf32>
    %c8_i32_254 = arith.constant 8 : i32
    %584 = arith.muli %c3_i32_230, %c8_i32_254 : i32
    %585 = tpu.assume_multiple %584, 8 : i32
    %586 = arith.index_cast %585 : i32 to index
    %c0_255 = arith.constant 0 : index
    %587 = vector.load %arg13[%586, %c0_255] : memref<56x256xf32, #tpu.memory_space<vmem>>, vector<8x256xf32>
    tpu.vector_store %arg13[%586, %c0_255], %583 {strides = array<i32>} : memref<56x256xf32, #tpu.memory_space<vmem>>, vector<8x256xf32>,
    %cst_256 = arith.constant dense<0xFF800000> : vector<8xf32>
    %588 = vector.multi_reduction <maximumf>, %583, %cst_256 [1] : vector<8x256xf32> to vector<8xf32>
    %589 = vector.shape_cast %588 : vector<8xf32> to vector<8x1xf32>
    %590 = vector.broadcast %589 : vector<8x1xf32> to vector<8x256xf32>
    %591 = arith.cmpf oeq, %583, %590 : vector<8x256xf32>
    %c256_i32_257 = arith.constant 256 : i32
    %592 = vector.broadcast %c256_i32_257 : i32 to vector<8x256xi32>
    %593 = arith.select %591, %322, %592 : vector<8x256xi1>, vector<8x256xi32>
    %cst_258 = arith.constant dense<2147483647> : vector<8xi32>
    %594 = vector.multi_reduction <minsi>, %593, %cst_258 [1] : vector<8x256xi32> to vector<8xi32>
    %595 = vector.shape_cast %594 : vector<8xi32> to vector<8x1xi32>
    %596 = vector.broadcast %595 : vector<8x1xi32> to vector<8x256xi32>
    %597 = arith.cmpi eq, %322, %596 : vector<8x256xi32>
    %598 = arith.extui %597 : vector<8x256xi1> to vector<8x256xi32>
    %599 = arith.sitofp %598 : vector<8x256xi32> to vector<8x256xf32>
    %600 = arith.truncf %599 : vector<8x256xf32> to vector<8x256xbf16>
    %c0_259 = arith.constant 0 : index
    %c0_260 = arith.constant 0 : index
    %601 = vector.load %arg8[%c0_259, %c0_260] : memref<256x128xbf16, #tpu.memory_space<vmem>>, vector<256x128xbf16>
    %cst_261 = arith.constant dense<0.000000e+00> : vector<8x128xf32>
    %602 = tpu.matmul %600, %601, %cst_261 {dimension_numbers = #tpu.dot_dimension_numbers<[1], [0], [0], [1], [0, 0, 1, 1], [], []>} : vector<8x256xbf16>, vector<256x128xbf16>, vector<8x128xf32> -> vector<8x128xf32>
    %603 = arith.index_cast %585 : i32 to index
    %c0_262 = arith.constant 0 : index
    %604 = vector.load %arg4[%603, %c0_262] : memref<56x128xbf16, #tpu.memory_space<vmem>>, vector<8x128xbf16>
    %605 = arith.index_cast %c3_i32_230 : i32 to index
    %606 = memref.load %arg1[%605] : memref<7xi32, #tpu.memory_space<smem>>
    %c1_i32_263 = arith.constant 1 : i32
    %607 = arith.cmpi eq, %606, %c1_i32_263 : i32
    %608 = arith.truncf %602 : vector<8x128xf32> to vector<8x128xbf16>
    %609 = arith.select %607, %604, %608 : vector<8x128xbf16>
    %c0_264 = arith.constant 0 : index
    %c0_265 = arith.constant 0 : index
    %610 = vector.load %arg15[%c0_264, %c0_265] : memref<8x256xbf16, #tpu.memory_space<vmem>>, vector<8x128xbf16>
    tpu.vector_store %arg15[%c0_264, %c0_265], %609 {strides = array<i32>} : memref<8x256xbf16, #tpu.memory_space<vmem>>, vector<8x128xbf16>,
    %c4_i32_266 = arith.constant 4 : i32
    %611 = arith.truncf %577 : vector<8x128xf32> to vector<8x128xbf16>
    %c0_267 = arith.constant 0 : index
    %c128_268 = arith.constant 128 : index
    %612 = vector.load %arg15[%c0_267, %c128_268] : memref<8x256xbf16, #tpu.memory_space<vmem>>, vector<8x128xbf16>
    tpu.vector_store %arg15[%c0_267, %c128_268], %611 {strides = array<i32>} : memref<8x256xbf16, #tpu.memory_space<vmem>>, vector<8x128xbf16>,
    %c0_269 = arith.constant 0 : index
    %c0_270 = arith.constant 0 : index
    %613 = vector.load %arg15[%c0_269, %c0_270] : memref<8x256xbf16, #tpu.memory_space<vmem>>, vector<8x256xbf16>
    %c0_271 = arith.constant 0 : index
    %c0_272 = arith.constant 0 : index
    %614 = vector.load %arg9[%c0_271, %c0_272] : memref<256x512xbf16, #tpu.memory_space<vmem>>, vector<256x512xbf16>
    %cst_273 = arith.constant dense<0.000000e+00> : vector<8x512xf32>
    %615 = tpu.matmul %613, %614, %cst_273 {dimension_numbers = #tpu.dot_dimension_numbers<[1], [0], [0], [1], [0, 0, 1, 1], [], []>} : vector<8x256xbf16>, vector<256x512xbf16>, vector<8x512xf32> -> vector<8x512xf32>
    %c0_274 = arith.constant 0 : index
    %c0_275 = arith.constant 0 : index
    %616 = vector.load %arg10[%c0_274, %c0_275] : memref<1x512xf32, #tpu.memory_space<vmem>>, vector<1x512xf32>
    %617 = vector.broadcast %616 : vector<1x512xf32> to vector<8x512xf32>
    %618 = arith.addf %615, %617 : vector<8x512xf32>
    %619 = vector.extract_strided_slice %618 {offsets = [0, 0], sizes = [8, 128], strides = [1, 1]} : vector<8x512xf32> to vector<8x128xf32>
    %cst_276 = arith.constant 5.000000e-01 : f32
    %620 = vector.broadcast %cst_276 : f32 to vector<8x128xf32>
    %621 = arith.mulf %620, %619 : vector<8x128xf32>
    %622 = math.tanh %621 : vector<8x128xf32>
    %cst_277 = arith.constant 5.000000e-01 : f32
    %623 = vector.broadcast %cst_277 : f32 to vector<8x128xf32>
    %624 = arith.mulf %623, %622 : vector<8x128xf32>
    %cst_278 = arith.constant 5.000000e-01 : f32
    %625 = vector.broadcast %cst_278 : f32 to vector<8x128xf32>
    %626 = arith.addf %624, %625 : vector<8x128xf32>
    %627 = vector.extract_strided_slice %618 {offsets = [0, 128], sizes = [8, 128], strides = [1, 1]} : vector<8x512xf32> to vector<8x128xf32>
    %cst_279 = arith.constant 5.000000e-01 : f32
    %628 = vector.broadcast %cst_279 : f32 to vector<8x128xf32>
    %629 = arith.mulf %628, %627 : vector<8x128xf32>
    %630 = math.tanh %629 : vector<8x128xf32>
    %cst_280 = arith.constant 5.000000e-01 : f32
    %631 = vector.broadcast %cst_280 : f32 to vector<8x128xf32>
    %632 = arith.mulf %631, %630 : vector<8x128xf32>
    %cst_281 = arith.constant 5.000000e-01 : f32
    %633 = vector.broadcast %cst_281 : f32 to vector<8x128xf32>
    %634 = arith.addf %632, %633 : vector<8x128xf32>
    %635 = vector.extract_strided_slice %618 {offsets = [0, 256], sizes = [8, 128], strides = [1, 1]} : vector<8x512xf32> to vector<8x128xf32>
    %636 = math.tanh %635 : vector<8x128xf32>
    %637 = vector.extract_strided_slice %618 {offsets = [0, 384], sizes = [8, 128], strides = [1, 1]} : vector<8x512xf32> to vector<8x128xf32>
    %cst_282 = arith.constant 5.000000e-01 : f32
    %638 = vector.broadcast %cst_282 : f32 to vector<8x128xf32>
    %639 = arith.mulf %638, %637 : vector<8x128xf32>
    %640 = math.tanh %639 : vector<8x128xf32>
    %cst_283 = arith.constant 5.000000e-01 : f32
    %641 = vector.broadcast %cst_283 : f32 to vector<8x128xf32>
    %642 = arith.mulf %641, %640 : vector<8x128xf32>
    %cst_284 = arith.constant 5.000000e-01 : f32
    %643 = vector.broadcast %cst_284 : f32 to vector<8x128xf32>
    %644 = arith.addf %642, %643 : vector<8x128xf32>
    %645 = arith.mulf %634, %575 : vector<8x128xf32>
    %646 = arith.mulf %626, %636 : vector<8x128xf32>
    %647 = arith.addf %645, %646 : vector<8x128xf32>
    %648 = math.tanh %647 : vector<8x128xf32>
    %649 = arith.mulf %644, %648 : vector<8x128xf32>
    %650 = arith.truncf %649 : vector<8x128xf32> to vector<8x128xbf16>
    %c0_285 = arith.constant 0 : index
    %c0_286 = arith.constant 0 : index
    %651 = vector.load %arg11[%c0_285, %c0_286] : memref<128x256xbf16, #tpu.memory_space<vmem>>, vector<128x256xbf16>
    %cst_287 = arith.constant dense<0.000000e+00> : vector<8x256xf32>
    %652 = tpu.matmul %650, %651, %cst_287 {dimension_numbers = #tpu.dot_dimension_numbers<[1], [0], [0], [1], [0, 0, 1, 1], [], []>} : vector<8x128xbf16>, vector<128x256xbf16>, vector<8x256xf32> -> vector<8x256xf32>
    %c0_288 = arith.constant 0 : index
    %c0_289 = arith.constant 0 : index
    %653 = vector.load %arg12[%c0_288, %c0_289] : memref<1x256xf32, #tpu.memory_space<vmem>>, vector<1x256xf32>
    %654 = vector.broadcast %653 : vector<1x256xf32> to vector<8x256xf32>
    %655 = arith.addf %652, %654 : vector<8x256xf32>
    %c8_i32_290 = arith.constant 8 : i32
    %656 = arith.muli %c4_i32_266, %c8_i32_290 : i32
    %657 = tpu.assume_multiple %656, 8 : i32
    %658 = arith.index_cast %657 : i32 to index
    %c0_291 = arith.constant 0 : index
    %659 = vector.load %arg13[%658, %c0_291] : memref<56x256xf32, #tpu.memory_space<vmem>>, vector<8x256xf32>
    tpu.vector_store %arg13[%658, %c0_291], %655 {strides = array<i32>} : memref<56x256xf32, #tpu.memory_space<vmem>>, vector<8x256xf32>,
    %cst_292 = arith.constant dense<0xFF800000> : vector<8xf32>
    %660 = vector.multi_reduction <maximumf>, %655, %cst_292 [1] : vector<8x256xf32> to vector<8xf32>
    %661 = vector.shape_cast %660 : vector<8xf32> to vector<8x1xf32>
    %662 = vector.broadcast %661 : vector<8x1xf32> to vector<8x256xf32>
    %663 = arith.cmpf oeq, %655, %662 : vector<8x256xf32>
    %c256_i32_293 = arith.constant 256 : i32
    %664 = vector.broadcast %c256_i32_293 : i32 to vector<8x256xi32>
    %665 = arith.select %663, %322, %664 : vector<8x256xi1>, vector<8x256xi32>
    %cst_294 = arith.constant dense<2147483647> : vector<8xi32>
    %666 = vector.multi_reduction <minsi>, %665, %cst_294 [1] : vector<8x256xi32> to vector<8xi32>
    %667 = vector.shape_cast %666 : vector<8xi32> to vector<8x1xi32>
    %668 = vector.broadcast %667 : vector<8x1xi32> to vector<8x256xi32>
    %669 = arith.cmpi eq, %322, %668 : vector<8x256xi32>
    %670 = arith.extui %669 : vector<8x256xi1> to vector<8x256xi32>
    %671 = arith.sitofp %670 : vector<8x256xi32> to vector<8x256xf32>
    %672 = arith.truncf %671 : vector<8x256xf32> to vector<8x256xbf16>
    %c0_295 = arith.constant 0 : index
    %c0_296 = arith.constant 0 : index
    %673 = vector.load %arg8[%c0_295, %c0_296] : memref<256x128xbf16, #tpu.memory_space<vmem>>, vector<256x128xbf16>
    %cst_297 = arith.constant dense<0.000000e+00> : vector<8x128xf32>
    %674 = tpu.matmul %672, %673, %cst_297 {dimension_numbers = #tpu.dot_dimension_numbers<[1], [0], [0], [1], [0, 0, 1, 1], [], []>} : vector<8x256xbf16>, vector<256x128xbf16>, vector<8x128xf32> -> vector<8x128xf32>
    %675 = arith.index_cast %657 : i32 to index
    %c0_298 = arith.constant 0 : index
    %676 = vector.load %arg4[%675, %c0_298] : memref<56x128xbf16, #tpu.memory_space<vmem>>, vector<8x128xbf16>
    %677 = arith.index_cast %c4_i32_266 : i32 to index
    %678 = memref.load %arg1[%677] : memref<7xi32, #tpu.memory_space<smem>>
    %c1_i32_299 = arith.constant 1 : i32
    %679 = arith.cmpi eq, %678, %c1_i32_299 : i32
    %680 = arith.truncf %674 : vector<8x128xf32> to vector<8x128xbf16>
    %681 = arith.select %679, %676, %680 : vector<8x128xbf16>
    %c0_300 = arith.constant 0 : index
    %c0_301 = arith.constant 0 : index
    %682 = vector.load %arg15[%c0_300, %c0_301] : memref<8x256xbf16, #tpu.memory_space<vmem>>, vector<8x128xbf16>
    tpu.vector_store %arg15[%c0_300, %c0_301], %681 {strides = array<i32>} : memref<8x256xbf16, #tpu.memory_space<vmem>>, vector<8x128xbf16>,
    %c5_i32_302 = arith.constant 5 : i32
    %683 = arith.truncf %649 : vector<8x128xf32> to vector<8x128xbf16>
    %c0_303 = arith.constant 0 : index
    %c128_304 = arith.constant 128 : index
    %684 = vector.load %arg15[%c0_303, %c128_304] : memref<8x256xbf16, #tpu.memory_space<vmem>>, vector<8x128xbf16>
    tpu.vector_store %arg15[%c0_303, %c128_304], %683 {strides = array<i32>} : memref<8x256xbf16, #tpu.memory_space<vmem>>, vector<8x128xbf16>,
    %c0_305 = arith.constant 0 : index
    %c0_306 = arith.constant 0 : index
    %685 = vector.load %arg15[%c0_305, %c0_306] : memref<8x256xbf16, #tpu.memory_space<vmem>>, vector<8x256xbf16>
    %c0_307 = arith.constant 0 : index
    %c0_308 = arith.constant 0 : index
    %686 = vector.load %arg9[%c0_307, %c0_308] : memref<256x512xbf16, #tpu.memory_space<vmem>>, vector<256x512xbf16>
    %cst_309 = arith.constant dense<0.000000e+00> : vector<8x512xf32>
    %687 = tpu.matmul %685, %686, %cst_309 {dimension_numbers = #tpu.dot_dimension_numbers<[1], [0], [0], [1], [0, 0, 1, 1], [], []>} : vector<8x256xbf16>, vector<256x512xbf16>, vector<8x512xf32> -> vector<8x512xf32>
    %c0_310 = arith.constant 0 : index
    %c0_311 = arith.constant 0 : index
    %688 = vector.load %arg10[%c0_310, %c0_311] : memref<1x512xf32, #tpu.memory_space<vmem>>, vector<1x512xf32>
    %689 = vector.broadcast %688 : vector<1x512xf32> to vector<8x512xf32>
    %690 = arith.addf %687, %689 : vector<8x512xf32>
    %691 = vector.extract_strided_slice %690 {offsets = [0, 0], sizes = [8, 128], strides = [1, 1]} : vector<8x512xf32> to vector<8x128xf32>
    %cst_312 = arith.constant 5.000000e-01 : f32
    %692 = vector.broadcast %cst_312 : f32 to vector<8x128xf32>
    %693 = arith.mulf %692, %691 : vector<8x128xf32>
    %694 = math.tanh %693 : vector<8x128xf32>
    %cst_313 = arith.constant 5.000000e-01 : f32
    %695 = vector.broadcast %cst_313 : f32 to vector<8x128xf32>
    %696 = arith.mulf %695, %694 : vector<8x128xf32>
    %cst_314 = arith.constant 5.000000e-01 : f32
    %697 = vector.broadcast %cst_314 : f32 to vector<8x128xf32>
    %698 = arith.addf %696, %697 : vector<8x128xf32>
    %699 = vector.extract_strided_slice %690 {offsets = [0, 128], sizes = [8, 128], strides = [1, 1]} : vector<8x512xf32> to vector<8x128xf32>
    %cst_315 = arith.constant 5.000000e-01 : f32
    %700 = vector.broadcast %cst_315 : f32 to vector<8x128xf32>
    %701 = arith.mulf %700, %699 : vector<8x128xf32>
    %702 = math.tanh %701 : vector<8x128xf32>
    %cst_316 = arith.constant 5.000000e-01 : f32
    %703 = vector.broadcast %cst_316 : f32 to vector<8x128xf32>
    %704 = arith.mulf %703, %702 : vector<8x128xf32>
    %cst_317 = arith.constant 5.000000e-01 : f32
    %705 = vector.broadcast %cst_317 : f32 to vector<8x128xf32>
    %706 = arith.addf %704, %705 : vector<8x128xf32>
    %707 = vector.extract_strided_slice %690 {offsets = [0, 256], sizes = [8, 128], strides = [1, 1]} : vector<8x512xf32> to vector<8x128xf32>
    %708 = math.tanh %707 : vector<8x128xf32>
    %709 = vector.extract_strided_slice %690 {offsets = [0, 384], sizes = [8, 128], strides = [1, 1]} : vector<8x512xf32> to vector<8x128xf32>
    %cst_318 = arith.constant 5.000000e-01 : f32
    %710 = vector.broadcast %cst_318 : f32 to vector<8x128xf32>
    %711 = arith.mulf %710, %709 : vector<8x128xf32>
    %712 = math.tanh %711 : vector<8x128xf32>
    %cst_319 = arith.constant 5.000000e-01 : f32
    %713 = vector.broadcast %cst_319 : f32 to vector<8x128xf32>
    %714 = arith.mulf %713, %712 : vector<8x128xf32>
    %cst_320 = arith.constant 5.000000e-01 : f32
    %715 = vector.broadcast %cst_320 : f32 to vector<8x128xf32>
    %716 = arith.addf %714, %715 : vector<8x128xf32>
    %717 = arith.mulf %706, %647 : vector<8x128xf32>
    %718 = arith.mulf %698, %708 : vector<8x128xf32>
    %719 = arith.addf %717, %718 : vector<8x128xf32>
    %720 = math.tanh %719 : vector<8x128xf32>
    %721 = arith.mulf %716, %720 : vector<8x128xf32>
    %722 = arith.truncf %721 : vector<8x128xf32> to vector<8x128xbf16>
    %c0_321 = arith.constant 0 : index
    %c0_322 = arith.constant 0 : index
    %723 = vector.load %arg11[%c0_321, %c0_322] : memref<128x256xbf16, #tpu.memory_space<vmem>>, vector<128x256xbf16>
    %cst_323 = arith.constant dense<0.000000e+00> : vector<8x256xf32>
    %724 = tpu.matmul %722, %723, %cst_323 {dimension_numbers = #tpu.dot_dimension_numbers<[1], [0], [0], [1], [0, 0, 1, 1], [], []>} : vector<8x128xbf16>, vector<128x256xbf16>, vector<8x256xf32> -> vector<8x256xf32>
    %c0_324 = arith.constant 0 : index
    %c0_325 = arith.constant 0 : index
    %725 = vector.load %arg12[%c0_324, %c0_325] : memref<1x256xf32, #tpu.memory_space<vmem>>, vector<1x256xf32>
    %726 = vector.broadcast %725 : vector<1x256xf32> to vector<8x256xf32>
    %727 = arith.addf %724, %726 : vector<8x256xf32>
    %c8_i32_326 = arith.constant 8 : i32
    %728 = arith.muli %c5_i32_302, %c8_i32_326 : i32
    %729 = tpu.assume_multiple %728, 8 : i32
    %730 = arith.index_cast %729 : i32 to index
    %c0_327 = arith.constant 0 : index
    %731 = vector.load %arg13[%730, %c0_327] : memref<56x256xf32, #tpu.memory_space<vmem>>, vector<8x256xf32>
    tpu.vector_store %arg13[%730, %c0_327], %727 {strides = array<i32>} : memref<56x256xf32, #tpu.memory_space<vmem>>, vector<8x256xf32>,
    %cst_328 = arith.constant dense<0xFF800000> : vector<8xf32>
    %732 = vector.multi_reduction <maximumf>, %727, %cst_328 [1] : vector<8x256xf32> to vector<8xf32>
    %733 = vector.shape_cast %732 : vector<8xf32> to vector<8x1xf32>
    %734 = vector.broadcast %733 : vector<8x1xf32> to vector<8x256xf32>
    %735 = arith.cmpf oeq, %727, %734 : vector<8x256xf32>
    %c256_i32_329 = arith.constant 256 : i32
    %736 = vector.broadcast %c256_i32_329 : i32 to vector<8x256xi32>
    %737 = arith.select %735, %322, %736 : vector<8x256xi1>, vector<8x256xi32>
    %cst_330 = arith.constant dense<2147483647> : vector<8xi32>
    %738 = vector.multi_reduction <minsi>, %737, %cst_330 [1] : vector<8x256xi32> to vector<8xi32>
    %739 = vector.shape_cast %738 : vector<8xi32> to vector<8x1xi32>
    %740 = vector.broadcast %739 : vector<8x1xi32> to vector<8x256xi32>
    %741 = arith.cmpi eq, %322, %740 : vector<8x256xi32>
    %742 = arith.extui %741 : vector<8x256xi1> to vector<8x256xi32>
    %743 = arith.sitofp %742 : vector<8x256xi32> to vector<8x256xf32>
    %744 = arith.truncf %743 : vector<8x256xf32> to vector<8x256xbf16>
    %c0_331 = arith.constant 0 : index
    %c0_332 = arith.constant 0 : index
    %745 = vector.load %arg8[%c0_331, %c0_332] : memref<256x128xbf16, #tpu.memory_space<vmem>>, vector<256x128xbf16>
    %cst_333 = arith.constant dense<0.000000e+00> : vector<8x128xf32>
    %746 = tpu.matmul %744, %745, %cst_333 {dimension_numbers = #tpu.dot_dimension_numbers<[1], [0], [0], [1], [0, 0, 1, 1], [], []>} : vector<8x256xbf16>, vector<256x128xbf16>, vector<8x128xf32> -> vector<8x128xf32>
    %747 = arith.index_cast %729 : i32 to index
    %c0_334 = arith.constant 0 : index
    %748 = vector.load %arg4[%747, %c0_334] : memref<56x128xbf16, #tpu.memory_space<vmem>>, vector<8x128xbf16>
    %749 = arith.index_cast %c5_i32_302 : i32 to index
    %750 = memref.load %arg1[%749] : memref<7xi32, #tpu.memory_space<smem>>
    %c1_i32_335 = arith.constant 1 : i32
    %751 = arith.cmpi eq, %750, %c1_i32_335 : i32
    %752 = arith.truncf %746 : vector<8x128xf32> to vector<8x128xbf16>
    %753 = arith.select %751, %748, %752 : vector<8x128xbf16>
    %c0_336 = arith.constant 0 : index
    %c0_337 = arith.constant 0 : index
    %754 = vector.load %arg15[%c0_336, %c0_337] : memref<8x256xbf16, #tpu.memory_space<vmem>>, vector<8x128xbf16>
    tpu.vector_store %arg15[%c0_336, %c0_337], %753 {strides = array<i32>} : memref<8x256xbf16, #tpu.memory_space<vmem>>, vector<8x128xbf16>,
    %c6_i32_338 = arith.constant 6 : i32
    %755 = arith.truncf %721 : vector<8x128xf32> to vector<8x128xbf16>
    %c0_339 = arith.constant 0 : index
    %c128_340 = arith.constant 128 : index
    %756 = vector.load %arg15[%c0_339, %c128_340] : memref<8x256xbf16, #tpu.memory_space<vmem>>, vector<8x128xbf16>
    tpu.vector_store %arg15[%c0_339, %c128_340], %755 {strides = array<i32>} : memref<8x256xbf16, #tpu.memory_space<vmem>>, vector<8x128xbf16>,
    %c0_341 = arith.constant 0 : index
    %c0_342 = arith.constant 0 : index
    %757 = vector.load %arg15[%c0_341, %c0_342] : memref<8x256xbf16, #tpu.memory_space<vmem>>, vector<8x256xbf16>
    %c0_343 = arith.constant 0 : index
    %c0_344 = arith.constant 0 : index
    %758 = vector.load %arg9[%c0_343, %c0_344] : memref<256x512xbf16, #tpu.memory_space<vmem>>, vector<256x512xbf16>
    %cst_345 = arith.constant dense<0.000000e+00> : vector<8x512xf32>
    %759 = tpu.matmul %757, %758, %cst_345 {dimension_numbers = #tpu.dot_dimension_numbers<[1], [0], [0], [1], [0, 0, 1, 1], [], []>} : vector<8x256xbf16>, vector<256x512xbf16>, vector<8x512xf32> -> vector<8x512xf32>
    %c0_346 = arith.constant 0 : index
    %c0_347 = arith.constant 0 : index
    %760 = vector.load %arg10[%c0_346, %c0_347] : memref<1x512xf32, #tpu.memory_space<vmem>>, vector<1x512xf32>
    %761 = vector.broadcast %760 : vector<1x512xf32> to vector<8x512xf32>
    %762 = arith.addf %759, %761 : vector<8x512xf32>
    %763 = vector.extract_strided_slice %762 {offsets = [0, 0], sizes = [8, 128], strides = [1, 1]} : vector<8x512xf32> to vector<8x128xf32>
    %cst_348 = arith.constant 5.000000e-01 : f32
    %764 = vector.broadcast %cst_348 : f32 to vector<8x128xf32>
    %765 = arith.mulf %764, %763 : vector<8x128xf32>
    %766 = math.tanh %765 : vector<8x128xf32>
    %cst_349 = arith.constant 5.000000e-01 : f32
    %767 = vector.broadcast %cst_349 : f32 to vector<8x128xf32>
    %768 = arith.mulf %767, %766 : vector<8x128xf32>
    %cst_350 = arith.constant 5.000000e-01 : f32
    %769 = vector.broadcast %cst_350 : f32 to vector<8x128xf32>
    %770 = arith.addf %768, %769 : vector<8x128xf32>
    %771 = vector.extract_strided_slice %762 {offsets = [0, 128], sizes = [8, 128], strides = [1, 1]} : vector<8x512xf32> to vector<8x128xf32>
    %cst_351 = arith.constant 5.000000e-01 : f32
    %772 = vector.broadcast %cst_351 : f32 to vector<8x128xf32>
    %773 = arith.mulf %772, %771 : vector<8x128xf32>
    %774 = math.tanh %773 : vector<8x128xf32>
    %cst_352 = arith.constant 5.000000e-01 : f32
    %775 = vector.broadcast %cst_352 : f32 to vector<8x128xf32>
    %776 = arith.mulf %775, %774 : vector<8x128xf32>
    %cst_353 = arith.constant 5.000000e-01 : f32
    %777 = vector.broadcast %cst_353 : f32 to vector<8x128xf32>
    %778 = arith.addf %776, %777 : vector<8x128xf32>
    %779 = vector.extract_strided_slice %762 {offsets = [0, 256], sizes = [8, 128], strides = [1, 1]} : vector<8x512xf32> to vector<8x128xf32>
    %780 = math.tanh %779 : vector<8x128xf32>
    %781 = vector.extract_strided_slice %762 {offsets = [0, 384], sizes = [8, 128], strides = [1, 1]} : vector<8x512xf32> to vector<8x128xf32>
    %cst_354 = arith.constant 5.000000e-01 : f32
    %782 = vector.broadcast %cst_354 : f32 to vector<8x128xf32>
    %783 = arith.mulf %782, %781 : vector<8x128xf32>
    %784 = math.tanh %783 : vector<8x128xf32>
    %cst_355 = arith.constant 5.000000e-01 : f32
    %785 = vector.broadcast %cst_355 : f32 to vector<8x128xf32>
    %786 = arith.mulf %785, %784 : vector<8x128xf32>
    %cst_356 = arith.constant 5.000000e-01 : f32
    %787 = vector.broadcast %cst_356 : f32 to vector<8x128xf32>
    %788 = arith.addf %786, %787 : vector<8x128xf32>
    %789 = arith.mulf %778, %719 : vector<8x128xf32>
    %790 = arith.mulf %770, %780 : vector<8x128xf32>
    %791 = arith.addf %789, %790 : vector<8x128xf32>
    %792 = math.tanh %791 : vector<8x128xf32>
    %793 = arith.mulf %788, %792 : vector<8x128xf32>
    %794 = arith.truncf %793 : vector<8x128xf32> to vector<8x128xbf16>
    %c0_357 = arith.constant 0 : index
    %c0_358 = arith.constant 0 : index
    %795 = vector.load %arg11[%c0_357, %c0_358] : memref<128x256xbf16, #tpu.memory_space<vmem>>, vector<128x256xbf16>
    %cst_359 = arith.constant dense<0.000000e+00> : vector<8x256xf32>
    %796 = tpu.matmul %794, %795, %cst_359 {dimension_numbers = #tpu.dot_dimension_numbers<[1], [0], [0], [1], [0, 0, 1, 1], [], []>} : vector<8x128xbf16>, vector<128x256xbf16>, vector<8x256xf32> -> vector<8x256xf32>
    %c0_360 = arith.constant 0 : index
    %c0_361 = arith.constant 0 : index
    %797 = vector.load %arg12[%c0_360, %c0_361] : memref<1x256xf32, #tpu.memory_space<vmem>>, vector<1x256xf32>
    %798 = vector.broadcast %797 : vector<1x256xf32> to vector<8x256xf32>
    %799 = arith.addf %796, %798 : vector<8x256xf32>
    %c8_i32_362 = arith.constant 8 : i32
    %800 = arith.muli %c6_i32_338, %c8_i32_362 : i32
    %801 = tpu.assume_multiple %800, 8 : i32
    %802 = arith.index_cast %801 : i32 to index
    %c0_363 = arith.constant 0 : index
    %803 = vector.load %arg13[%802, %c0_363] : memref<56x256xf32, #tpu.memory_space<vmem>>, vector<8x256xf32>
    tpu.vector_store %arg13[%802, %c0_363], %799 {strides = array<i32>} : memref<56x256xf32, #tpu.memory_space<vmem>>, vector<8x256xf32>,
    %cst_364 = arith.constant dense<0xFF800000> : vector<8xf32>
    %804 = vector.multi_reduction <maximumf>, %799, %cst_364 [1] : vector<8x256xf32> to vector<8xf32>
    %805 = vector.shape_cast %804 : vector<8xf32> to vector<8x1xf32>
    %806 = vector.broadcast %805 : vector<8x1xf32> to vector<8x256xf32>
    %807 = arith.cmpf oeq, %799, %806 : vector<8x256xf32>
    %c256_i32_365 = arith.constant 256 : i32
    %808 = vector.broadcast %c256_i32_365 : i32 to vector<8x256xi32>
    %809 = arith.select %807, %322, %808 : vector<8x256xi1>, vector<8x256xi32>
    %cst_366 = arith.constant dense<2147483647> : vector<8xi32>
    %810 = vector.multi_reduction <minsi>, %809, %cst_366 [1] : vector<8x256xi32> to vector<8xi32>
    %811 = vector.shape_cast %810 : vector<8xi32> to vector<8x1xi32>
    %812 = vector.broadcast %811 : vector<8x1xi32> to vector<8x256xi32>
    %813 = arith.cmpi eq, %322, %812 : vector<8x256xi32>
    %814 = arith.extui %813 : vector<8x256xi1> to vector<8x256xi32>
    %815 = arith.sitofp %814 : vector<8x256xi32> to vector<8x256xf32>
    %816 = arith.truncf %815 : vector<8x256xf32> to vector<8x256xbf16>
    %c0_367 = arith.constant 0 : index
    %c0_368 = arith.constant 0 : index
    %817 = vector.load %arg8[%c0_367, %c0_368] : memref<256x128xbf16, #tpu.memory_space<vmem>>, vector<256x128xbf16>
    %cst_369 = arith.constant dense<0.000000e+00> : vector<8x128xf32>
    %818 = tpu.matmul %816, %817, %cst_369 {dimension_numbers = #tpu.dot_dimension_numbers<[1], [0], [0], [1], [0, 0, 1, 1], [], []>} : vector<8x256xbf16>, vector<256x128xbf16>, vector<8x128xf32> -> vector<8x128xf32>
    %819 = arith.index_cast %801 : i32 to index
    %c0_370 = arith.constant 0 : index
    %820 = vector.load %arg4[%819, %c0_370] : memref<56x128xbf16, #tpu.memory_space<vmem>>, vector<8x128xbf16>
    %821 = arith.index_cast %c6_i32_338 : i32 to index
    %822 = memref.load %arg1[%821] : memref<7xi32, #tpu.memory_space<smem>>
    %c1_i32_371 = arith.constant 1 : i32
    %823 = arith.cmpi eq, %822, %c1_i32_371 : i32
    %824 = arith.truncf %818 : vector<8x128xf32> to vector<8x128xbf16>
    %825 = arith.select %823, %820, %824 : vector<8x128xbf16>
    %c0_372 = arith.constant 0 : index
    %c0_373 = arith.constant 0 : index
    %826 = vector.load %arg15[%c0_372, %c0_373] : memref<8x256xbf16, #tpu.memory_space<vmem>>, vector<8x128xbf16>
    tpu.vector_store %arg15[%c0_372, %c0_373], %825 {strides = array<i32>} : memref<8x256xbf16, #tpu.memory_space<vmem>>, vector<8x128xbf16>,
    %c7_i32_374 = arith.constant 7 : i32
    return
  }
  func.func @transform_0(%arg0: i32, %arg1: memref<7xi32, #tpu.memory_space<smem>>) -> (i32, i32) {
    %c0_i32 = arith.constant 0 : i32
    %c0_i32_0 = arith.constant 0 : i32
    %c0_i32_1 = arith.constant 0 : i32
    return %c0_i32, %c0_i32_0 : i32, i32
  }
  func.func @transform_1(%arg0: i32, %arg1: memref<7xi32, #tpu.memory_space<smem>>) -> (i32, i32) {
    %c0_i32 = arith.constant 0 : i32
    %c0_i32_0 = arith.constant 0 : i32
    %c0_i32_1 = arith.constant 0 : i32
    return %c0_i32, %c0_i32_0 : i32, i32
  }
  func.func @transform_2(%arg0: i32, %arg1: memref<7xi32, #tpu.memory_space<smem>>) -> (i32, i32) {
    %c0_i32 = arith.constant 0 : i32
    %c0_i32_0 = arith.constant 0 : i32
    %c0_i32_1 = arith.constant 0 : i32
    return %c0_i32, %c0_i32_0 : i32, i32
  }
  func.func @transform_3(%arg0: i32, %arg1: memref<7xi32, #tpu.memory_space<smem>>) -> (i32, i32) {
    %c0_i32 = arith.constant 0 : i32
    %c0_i32_0 = arith.constant 0 : i32
    %c0_i32_1 = arith.constant 0 : i32
    return %c0_i32, %c0_i32_0 : i32, i32
  }
  func.func @transform_4(%arg0: i32, %arg1: memref<7xi32, #tpu.memory_space<smem>>) -> (i32, i32) {
    %c0_i32 = arith.constant 0 : i32
    %c0_i32_0 = arith.constant 0 : i32
    %c0_i32_1 = arith.constant 0 : i32
    return %c0_i32, %c0_i32_0 : i32, i32
  }
  func.func @transform_5(%arg0: i32, %arg1: memref<7xi32, #tpu.memory_space<smem>>) -> (i32, i32) {
    %c0_i32 = arith.constant 0 : i32
    %c0_i32_0 = arith.constant 0 : i32
    %c0_i32_1 = arith.constant 0 : i32
    return %c0_i32, %c0_i32_0 : i32, i32
  }
  func.func @transform_6(%arg0: i32, %arg1: memref<7xi32, #tpu.memory_space<smem>>) -> (i32, i32) {
    %c0_i32 = arith.constant 0 : i32
    %c0_i32_0 = arith.constant 0 : i32
    %c0_i32_1 = arith.constant 0 : i32
    return %c0_i32, %c0_i32_0 : i32, i32
  }
  func.func @transform_7(%arg0: i32, %arg1: memref<7xi32, #tpu.memory_space<smem>>) -> (i32, i32) {
    %c0_i32 = arith.constant 0 : i32
    %c0_i32_0 = arith.constant 0 : i32
    %c0_i32_1 = arith.constant 0 : i32
    return %c0_i32, %c0_i32_0 : i32, i32
  }
  func.func @transform_8(%arg0: i32, %arg1: memref<7xi32, #tpu.memory_space<smem>>) -> (i32, i32) {
    %c0_i32 = arith.constant 0 : i32
    %c0_i32_0 = arith.constant 0 : i32
    %c0_i32_1 = arith.constant 0 : i32
    return %c0_i32, %c0_i32_0 : i32, i32
  }
  func.func @transform_9(%arg0: i32, %arg1: memref<7xi32, #tpu.memory_space<smem>>) -> (i32, i32) {
    %c0_i32 = arith.constant 0 : i32
    %c0_i32_0 = arith.constant 0 : i32
    %c0_i32_1 = arith.constant 0 : i32
    return %c0_i32, %c0_i32_0 : i32, i32
  }
  func.func @transform_10(%arg0: i32, %arg1: memref<7xi32, #tpu.memory_space<smem>>) -> (i32, i32) {
    %c0_i32 = arith.constant 0 : i32
    %c0_i32_0 = arith.constant 0 : i32
    %c0_i32_1 = arith.constant 0 : i32
    return %c0_i32, %c0_i32_0 : i32, i32
  }
  func.func @transform_11(%arg0: i32, %arg1: memref<7xi32, #tpu.memory_space<smem>>) -> (i32, i32) {
    %c0_i32 = arith.constant 0 : i32
    %c0_i32_0 = arith.constant 0 : i32
    %c0_i32_1 = arith.constant 0 : i32
    return %c0_i32, %c0_i32_0 : i32, i32
  }
}

</mosaic_0001>

<bundles_post_ra>
// kernel: _forward_core.1
= control target key start
LH: loop header
LB: loop body
LE: loop exit
PB: predicated region body
PF: predicated region fallthrough
CT: control target
= control target key end

     0   :  { %s12797_s0 = inlined_call_operand.vmem [shape: s32[7], index: 0, kind: input, shape index: {}]   ;;  %s12798_s1 = inlined_call_operand.vmem [shape: bf16[64,128], index: 1, kind: input, shape index: {}]   ;;  %s12799_s2 = inlined_call_operand.vmem [shape: bf16[8,128], index: 2, kind: input, shape index: {}]   ;;  %s12800_s3 = inlined_call_operand.vmem [shape: bf16[56,128], index: 3, kind: input, shape index: {}]   ;;  %s12801_s4 = inlined_call_operand.hbm [shape: bf16[128,512], index: 4, kind: input, shape index: {}]   ;;  %s12802_s5 = inlined_call_operand.hbm [shape: bf16[128,512], index: 5, kind: input, shape index: {}]   ;;  %s12803_s6 = inlined_call_operand.vmem [shape: f32[1,512], index: 6, kind: input, shape index: {}]   ;;  %s12804_s7 = inlined_call_operand.vmem [shape: bf16[256,128], index: 7, kind: input, shape index: {}]   ;;  %s12805_s8 = inlined_call_operand.vmem [shape: bf16[256,512], index: 8, kind: input, shape index: {}]   ;;  %s12806_s9 = inlined_call_operand.vmem [shape: f32[1,512], index: 9, kind: input, shape index: {}]   ;;  %s12807_s10 = inlined_call_operand.vmem [shape: bf16[128,256], index: 10, kind: input, shape index: {}]   ;;  %s12808_s11 = inlined_call_operand.vmem [shape: f32[1,256], index: 11, kind: input, shape index: {}]   ;;  %s12809_s12 = inlined_call_operand.vmem [shape: f32[56,256], index: 12, kind: output, shape index: {}]  }
   0x1   :  { %s17_s23 = sshll.u32 %s12797_s0, 4  ;;  %s18_s23 = int_to_ptr.vmem [resolvable:$true] %s17_s23 }
   0x2   :  { %s9631_s24 = scalar_lea.vmem %s18_s23, 16  ;;  %p9636_p1 = scmp.lt.s32.totalorder %s18_s23, %s18_s23 }
   0x3   :  { %p9632_p0 = scmp.ne.s32.totalorder %s18_s23, %s9631_s24  ;;  %p9637_p2 = scmp.lt.s32.totalorder %s9631_s24, %s9631_s24 }
   0x5   :  { %p9638_p3 = por %p9637_p2, %p9636_p1 }
   0x7   :  { %p9639_p4 = pnand %p9638_p3, %p9632_p0 }
   0x9   :  { %9642 = shalt.err (!%p9639_p4)  }
   0xa   :  { %s9689_s25 = smov [#allocation5]  }
   0xb   :  { %20 = dma.vmem_to_smem %s18_s23, 16, %s9689_s25, [#allocation4] }
   0xc   :  { %9683 = dma.done.wait [#allocation4], 16 }
   0xd   :  { %9684 = vsyncadd [#allocation4], 4294967280 }
   0xe   :  { %22 = sfence }
   0xf   :  { %23 = vsyncpa [#allocation7], 0 }
  0x10   :  { %24 = vsyncpa [#allocation9], 0  ;;  %s9690_s26 = smov [#allocation6]  }
  0x11   :  { %s36_s27 = sshll.u32 %s9690_s26, 4  ;;  %s37_s27 = int_to_ptr.vmem [resolvable:$true] %s36_s27 }
  0x12   :  { %s9651_s28 = scalar_lea.vmem %s37_s27, 4096  ;;  %p9656_p6 = scmp.lt.s32.totalorder %s37_s27, %s37_s27 }
  0x13   :  { %p9652_p5 = scmp.ne.s32.totalorder %s37_s27, %s9651_s28  ;;  %p9657_p7 = scmp.lt.s32.totalorder %s9651_s28, %s9651_s28 }
  0x15   :  { %p9658_p8 = por %p9657_p7, %p9656_p6 }
  0x17   :  { %p9659_p9 = pnand %p9658_p8, %p9652_p5 }
  0x19   :  { %9662 = shalt.err (!%p9659_p9)
}
  0x1a   :  { %s9691_s0 = smov 256   ;;  %s9692_s29 = smov 16  }
  0x1b   :  { %42 = dma.hbm_to_vmem [thread:$0]  %s12801_s4, 4096, %s37_s27, [#allocation7], %s9691_s0, %s9691_s0, %s9692_s29  }
  0x1c   :  { %s9693_s14 = smov [#allocation8]  }
  0x1d   :  { %s48_s15 = sshll.u32 %s9693_s14, 4  ;;  %s49_s15 = int_to_ptr.vmem [resolvable:$true] %s48_s15 }
  0x1e   :  { %s9671_s16 = scalar_lea.vmem %s49_s15, 4096  ;;  %p9676_p11 = scmp.lt.s32.totalorder %s49_s15, %s49_s15 }
  0x1f   :  { %p9672_p10 = scmp.ne.s32.totalorder %s49_s15, %s9671_s16  ;;  %p9677_p12 = scmp.lt.s32.totalorder %s9671_s16, %s9671_s16 }
  0x21   :  { %p9678_p13 = por %p9677_p12, %p9676_p11 }
  0x23   :  { %p9679_p0 = pnand %p9678_p13, %p9672_p10 }
  0x25   :  { %9682 = shalt.err (!%p9679_p0)
}
  0x26   :  { %54 = dma.hbm_to_vmem [thread:$0]  %s12802_s5, 4096, %s49_s15, [#allocation9], %s9691_s0, %s9691_s0, %s9692_s29  }
  0x27   :  { %9685 = dma.done.wait [#allocation7], 4096  }
  0x28   :  { %9686 = vsyncadd [#allocation7], 4294963200 }
  0x29   :  { %9687 = dma.done.wait [#allocation9], 4096  }
  0x2a   :  { %9688 = vsyncadd [#allocation9], 4294963200  ;;  %v12811_v0 = vmov 0   ;;  %v8743_v1 = vld [vmem:[#allocation6 + $0xe4] ss:$16 sps:$4 sm:$0xff]   ;;  %v8791_v35 = vld [vmem:[%s12798_s1] sm:$0xff]  }
  0x2b   :  { %352 = vmatprep.mubr.bf16.mxu0 %v12811_v0  ;;  %425 = vmatprep.mubr.bf16.mxu1 %v12811_v0  ;;  %v8745_v2 = vld [vmem:[#allocation6 + $0xec] ss:$16 sps:$4 sm:$0xff]   ;;  %v8747_v3 = vld [vmem:[#allocation6 + $0xe0] ss:$16 sps:$4 sm:$0xff]   ;;  %v8748_v4 = vld [vmem:[#allocation6 + $0xe8] ss:$16 sps:$4 sm:$0xff]  }
  0x2c   :  { %320 = vmatprep.subr.bf16.mxu0 %v8743_v1  ;;  %393 = vmatprep.subr.bf16.mxu1 %v8745_v2  ;;  %v8749_v5 = vld [vmem:[#allocation6 + $0xc4] ss:$16 sps:$4 sm:$0xff]   ;;  %v8751_v6 = vld [vmem:[#allocation6 + $0xcc] ss:$16 sps:$4 sm:$0xff]   ;;  %v8753_v7 = vld [vmem:[#allocation6 + $0xc0] ss:$16 sps:$4 sm:$0xff]  }
  0x2d   :  { %321 = vmatpush1.bf16.msra.mxu0 %v8747_v3  ;;  %394 = vmatpush1.bf16.msra.mxu1 %v8748_v4  ;;  %v8754_v8 = vld [vmem:[#allocation6 + $0xc8] ss:$16 sps:$4 sm:$0xff]   ;;  %v8755_v9 = vld [vmem:[#allocation6 + $0xa4] ss:$16 sps:$4 sm:$0xff]   ;;  %v8757_v10 = vld [vmem:[#allocation6 + $0xac] ss:$16 sps:$4 sm:$0xff]  }
  0x2e   :  { %322 = vmatprep.subr.bf16.mxu0 %v8749_v5  ;;  %395 = vmatprep.subr.bf16.mxu1 %v8751_v6  ;;  %v8759_v11 = vld [vmem:[#allocation6 + $0xa0] ss:$16 sps:$4 sm:$0xff]   ;;  %v8760_v12 = vld [vmem:[#allocation6 + $0xa8] ss:$16 sps:$4 sm:$0xff]   ;;  %v8761_v13 = vld [vmem:[#allocation6 + $0x84] ss:$16 sps:$4 sm:$0xff]   ;;  %v12810_v6 = vlaneseq }
  0x2f   :  { %v8763_v14 = vld [vmem:[#allocation6 + $0x8c] ss:$16 sps:$4 sm:$0xff]   ;;  %v8765_v15 = vld [vmem:[#allocation6 + $0x80] ss:$16 sps:$4 sm:$0xff]   ;;  %v8766_v16 = vld [vmem:[#allocation6 + $0x88] ss:$16 sps:$4 sm:$0xff]  }
  0x30   :  { %v8767_v17 = vld [vmem:[#allocation6 + $0x64] ss:$16 sps:$4 sm:$0xff]   ;;  %v8769_v18 = vld [vmem:[#allocation6 + $0x6c] ss:$16 sps:$4 sm:$0xff]   ;;  %v8771_v19 = vld [vmem:[#allocation6 + $0x60] ss:$16 sps:$4 sm:$0xff]  }
  0x31   :  { %323 = vmatpush1.bf16.msra.mxu0 %v8753_v7  ;;  %396 = vmatpush1.bf16.msra.mxu1 %v8754_v8  ;;  %v8772_v20 = vld [vmem:[#allocation6 + $0x68] ss:$16 sps:$4 sm:$0xff]   ;;  %v8773_v21 = vld [vmem:[#allocation6 + $0x44] ss:$16 sps:$4 sm:$0xff]   ;;  %v8775_v22 = vld [vmem:[#allocation6 + $0x4c] ss:$16 sps:$4 sm:$0xff]  }
  0x32   :  { %324 = vmatprep.subr.bf16.mxu0 %v8755_v9  ;;  %397 = vmatprep.subr.bf16.mxu1 %v8757_v10  ;;  %v8777_v23 = vld [vmem:[#allocation6 + $0x40] ss:$16 sps:$4 sm:$0xff]   ;;  %v8778_v24 = vld [vmem:[#allocation6 + $0x48] ss:$16 sps:$4 sm:$0xff]   ;;  %v8779_v25 = vld [vmem:[#allocation6 + $0x24] ss:$16 sps:$4 sm:$0xff]  }
  0x33   :  { %v8781_v26 = vld [vmem:[#allocation6 + $0x2c] ss:$16 sps:$4 sm:$0xff]   ;;  %v8783_v27 = vld [vmem:[#allocation6 + $0x20] ss:$16 sps:$4 sm:$0xff]   ;;  %v8784_v28 = vld [vmem:[#allocation6 + $0x28] ss:$16 sps:$4 sm:$0xff]  }
  0x34   :  { %v8785_v29 = vld [vmem:[#allocation6 + $0x4] ss:$16 sps:$4 sm:$0xff]   ;;  %v8787_v30 = vld [vmem:[#allocation6 + $0xc] ss:$16 sps:$4 sm:$0xff]   ;;  %v8789_v31 = vld [vmem:[#allocation6] ss:$16 sps:$4 sm:$0xff]  }
  0x35   :  { %325 = vmatpush1.bf16.msra.mxu0 %v8759_v11  ;;  %398 = vmatpush1.bf16.msra.mxu1 %v8760_v12  ;;  %v8790_v32 = vld [vmem:[#allocation6 + $0x8] ss:$16 sps:$4 sm:$0xff]   ;;  %v9772_v33 = vld [vmem:[#allocation8 + $0xe4] ss:$16 sps:$4 sm:$0xff]   ;;  %v9774_v34 = vld [vmem:[#allocation8 + $0xec] ss:$16 sps:$4 sm:$0xff]  }
  0x36   :  { %326 = vmatprep.subr.bf16.mxu0 %v8761_v13  ;;  %399 = vmatprep.subr.bf16.mxu1 %v8763_v14  ;;  %v9779_v36 = vld [vmem:[#allocation8 + $0xe0] ss:$16 sps:$4 sm:$0xff]   ;;  %v9781_v37 = vld [vmem:[#allocation8 + $0xe8] ss:$16 sps:$4 sm:$0xff]   ;;  %v9785_v38 = vld [vmem:[#allocation8 + $0xc4] ss:$16 sps:$4 sm:$0xff]  }
  0x37   :  { %v9787_v39 = vld [vmem:[#allocation8 + $0xcc] ss:$16 sps:$4 sm:$0xff]   ;;  %v9789_v40 = vld [vmem:[#allocation8 + $0xc0] ss:$16 sps:$4 sm:$0xff]   ;;  %v9793_v41 = vld [vmem:[#allocation8 + $0xc8] ss:$16 sps:$4 sm:$0xff]  }
  0x38   :  { %v9797_v42 = vld [vmem:[#allocation8 + $0xa4] ss:$16 sps:$4 sm:$0xff]   ;;  %v9799_v43 = vld [vmem:[#allocation8 + $0xac] ss:$16 sps:$4 sm:$0xff]   ;;  %v9806_v45 = vld [vmem:[#allocation8 + $0xa0] ss:$16 sps:$4 sm:$0xff]  }
  0x39   :  { %327 = vmatpush1.bf16.msra.mxu0 %v8765_v15  ;;  %400 = vmatpush1.bf16.msra.mxu1 %v8766_v16  ;;  %v8804_v44 = vld [vmem:[%s12798_s1 + $0x8] sm:$0xff]   ;;  %v9808_v46 = vld [vmem:[#allocation8 + $0xa8] ss:$16 sps:$4 sm:$0xff]   ;;  %v9816_v48 = vld [vmem:[#allocation8 + $0x8c] ss:$16 sps:$4 sm:$0xff]   ;;  %v117_v7 = vshrl.u32 %v12810_v6, 7 }
  0x3a   :  { %328 = vmatprep.subr.bf16.mxu0 %v8767_v17  ;;  %401 = vmatprep.subr.bf16.mxu1 %v8769_v18  ;;  %v9812_v47 = vld [vmem:[#allocation8 + $0x84] ss:$16 sps:$4 sm:$0xff]   ;;  %v9818_v49 = vld [vmem:[#allocation8 + $0x80] ss:$16 sps:$4 sm:$0xff]   ;;  %v9820_v50 = vld [vmem:[#allocation8 + $0x88] ss:$16 sps:$4 sm:$0xff]  }
  0x3b   :  { %v9824_v51 = vld [vmem:[#allocation8 + $0x64] ss:$16 sps:$4 sm:$0xff]   ;;  %v9828_v52 = vld [vmem:[#allocation8 + $0x6c] ss:$16 sps:$4 sm:$0xff]   ;;  %v8822_v54 = vld [vmem:[#allocation8 + $0x60] ss:$16 sps:$4 sm:$0xff]  }
  0x3c   :  { %v8817_v53 = vld [vmem:[%s12798_s1 + $0x10] sm:$0xff]   ;;  %v8824_v56 = vld [vmem:[#allocation8 + $0x44] ss:$16 sps:$4 sm:$0xff]   ;;  %v8828_v58 = vld [vmem:[#allocation8 + $0x40] ss:$16 sps:$4 sm:$0xff]   ;;  %v9871_v8 = vsub.s32 0, %v117_v7 }
  0x3d   :  { %329 = vmatpush1.bf16.msra.mxu0 %v8771_v19  ;;  %402 = vmatpush1.bf16.msra.mxu1 %v8772_v20  ;;  %v8823_v55 = vld [vmem:[#allocation8 + $0x68] ss:$16 sps:$4 sm:$0xff]   ;;  %v8826_v57 = vld [vmem:[#allocation8 + $0x4c] ss:$16 sps:$4 sm:$0xff]   ;;  %v8831_v60 = vld [vmem:[#allocation8 + $0x24] ss:$16 sps:$4 sm:$0xff]  }
  0x3e   :  { %330 = vmatprep.subr.bf16.mxu0 %v8773_v21  ;;  %403 = vmatprep.subr.bf16.mxu1 %v8775_v22  ;;  %v8829_v59 = vld [vmem:[#allocation8 + $0x48] ss:$16 sps:$4 sm:$0xff]   ;;  %v8833_v61 = vld [vmem:[#allocation8 + $0x2c] ss:$16 sps:$4 sm:$0xff]   ;;  %v8830_v62 = vld [vmem:[%s12798_s1 + $0x18] sm:$0xff]   ;;  %12957 = vst [vmem:[#allocation13_spill] sm:$0xff] %v9871_v8 }
  0x3f   :  { %v8835_v63 = vld [vmem:[#allocation8 + $0x20] ss:$16 sps:$4 sm:$0xff]   ;;  %v8836_v1 = vld [vmem:[#allocation8 + $0x28] ss:$16 sps:$4 sm:$0xff]   ;;  %v8837_v2 = vld [vmem:[#allocation8 + $0x4] ss:$16 sps:$4 sm:$0xff]  }
  0x40   :  { %v8839_v3 = vld [vmem:[#allocation8 + $0xc] ss:$16 sps:$4 sm:$0xff]   ;;  %v8841_v4 = vld [vmem:[#allocation8] ss:$16 sps:$4 sm:$0xff]   ;;  %v8842_v5 = vld [vmem:[#allocation8 + $0x8] ss:$16 sps:$4 sm:$0xff]  }
  0x41   :  { %331 = vmatpush1.bf16.msra.mxu0 %v8777_v23  ;;  %404 = vmatpush1.bf16.msra.mxu1 %v8778_v24  ;;  %v9873_v9 = vsub.s32 2, %v117_v7  ;;  %v9875_v10 = vsub.s32 3, %v117_v7  ;;  %v114_v11 = vld [vmem:[%s12803_s6] sm:$0xf]  ;;  %v9884_v14 = vsub.s32 1, %v117_v7  ;;  %s2461_s5 = sld [smem:[#allocation5]] }
  0x42   :  { %332 = vmatprep.subr.bf16.mxu0 %v8779_v25  ;;  %405 = vmatprep.subr.bf16.mxu1 %v8781_v26  ;;  %v119_v18 = vrot.slane %v114_v11, %v9871_v8  ;;  %v10066_v6 = vld [vmem:[#allocation8 + $0x8] ss:$16 sps:$4 sm:$0xff]   ;;  %s8149_s1 = sld [smem:[#allocation5 + $0x2]] }
  0x43   :  { %12958 = vst [vmem:[#allocation14_spill] sm:$0xff] %v9873_v9  ;;  %12959 = vst [vmem:[#allocation15_spill] sm:$0xff] %v9875_v10  ;;  %v9887_v15 = vrot.slane %v114_v11, %v9873_v9  ;;  %v9895_v19 = vrot.slane %v114_v11, %v9875_v10  ;;  %v123_v22 = vrot.slane %v114_v11, %v9884_v14  ;;  %v10072_v10 = vld [vmem:[#allocation8 + $0xec] ss:$16 sps:$4 sm:$0xff]   ;;  %s8257_s27 = sld [smem:[#allocation5 + $0x3]] }
  0x44   :  { %12960 = vst [vmem:[#allocation16_spill] sm:$0xff] %v9884_v14  ;;  %s8365_s30 = sld [smem:[#allocation5 + $0x4]] }
  0x45   :  { %333 = vmatpush1.bf16.msra.mxu0 %v8783_v27  ;;  %406 = vmatpush1.bf16.msra.mxu1 %v8784_v28  ;;  %s8473_s16 = sld [smem:[#allocation5 + $0x5]] }
  0x46   :  { %334 = vmatprep.subr.bf16.mxu0 %v8785_v29  ;;  %407 = vmatprep.subr.bf16.mxu1 %v8787_v30 }
  0x47   :  { %p2462_p1 = scmp.eq.s32.totalorder %s2461_s5, 1 }
  0x48   :  { %p4220_p3 = scmp.eq.s32.totalorder %s8149_s1, 1 }
  0x49   :  { %335 = vmatpush1.bf16.msra.mxu0 %v8789_v31  ;;  %408 = vmatpush1.bf16.msra.mxu1 %v8790_v32  ;;  %s2464_s19 = scalar_select %p2462_p1, 1, 0 }
  0x4a   :  { %697 = vmatprep.subr.bf16.mxu0 %v9772_v33  ;;  %738 = vmatprep.subr.bf16.mxu1 %v9774_v34  ;;  %s4222_s25 = scalar_select %p4220_p3, 1, 0 }
  0x4b   :  { %p5099_p4 = scmp.eq.s32.totalorder %s8257_s27, 1  ;;  %p5978_p5 = scmp.eq.s32.totalorder %s8365_s30, 1 }
  0x4c   :  { %353 = vmatmul.mubr.bf16.vlgmr.msra.gmra.mxu0 %v8791_v35  ;;  %426 = vmatmul.mubr.bf16.vlgmr.msra.gmra.mxu1 %v8791_v35  ;;  %p6857_p6 = scmp.eq.s32.totalorder %s8473_s16, 1 }
  0x4d   :  { %698 = vmatpush1.bf16.msra.mxu0 %v9779_v36  ;;  %739 = vmatpush1.bf16.msra.mxu1 %v9781_v37  ;;  %s5101_s28 = scalar_select %p5099_p4, 1, 0 }
  0x4e   :  { %699 = vmatprep.subr.bf16.mxu0 %v9785_v38  ;;  %740 = vmatprep.subr.bf16.mxu1 %v9787_v39  ;;  %s5980_s13 = scalar_select %p5978_p5, 1, 0 }
  0x4f   :  { %362 = vmatprep.mubr.bf16.mxu0 %v12811_v0  ;;  %435 = vmatprep.mubr.bf16.mxu1 %v12811_v0  ;;  %s6859_s17 = scalar_select %p6857_p6, 1, 0 }
  0x51   :  { %700 = vmatpush1.bf16.msra.mxu0 %v9789_v40  ;;  %741 = vmatpush1.bf16.msra.mxu1 %v9793_v41 }
  0x52   :  { %701 = vmatprep.subr.bf16.mxu0 %v9797_v42  ;;  %742 = vmatprep.subr.bf16.mxu1 %v9799_v43 }
  0x54   :  { %363 = vmatmul.mubr.bf16.gmra.mxu0 %v8804_v44  ;;  %436 = vmatmul.mubr.bf16.gmra.mxu1 %v8804_v44 }
  0x55   :  { %702 = vmatpush1.bf16.msra.mxu0 %v9806_v45  ;;  %743 = vmatpush1.bf16.msra.mxu1 %v9808_v46 }
  0x56   :  { %703 = vmatprep.subr.bf16.mxu0 %v9812_v47  ;;  %744 = vmatprep.subr.bf16.mxu1 %v9816_v48 }
  0x57   :  { %372 = vmatprep.mubr.bf16.mxu0 %v12811_v0  ;;  %445 = vmatprep.mubr.bf16.mxu1 %v12811_v0 }
  0x59   :  { %704 = vmatpush1.bf16.msra.mxu0 %v9818_v49  ;;  %745 = vmatpush1.bf16.msra.mxu1 %v9820_v50 }
  0x5a   :  { %705 = vmatprep.subr.bf16.mxu0 %v9824_v51  ;;  %746 = vmatprep.subr.bf16.mxu1 %v9828_v52 }
  0x5c   :  { %373 = vmatmul.mubr.bf16.gmra.mxu0 %v8817_v53  ;;  %446 = vmatmul.mubr.bf16.gmra.mxu1 %v8817_v53 }
  0x5d   :  { %706 = vmatpush1.bf16.msra.mxu0 %v8822_v54  ;;  %747 = vmatpush1.bf16.msra.mxu1 %v8823_v55 }
  0x5e   :  { %707 = vmatprep.subr.bf16.mxu0 %v8824_v56  ;;  %748 = vmatprep.subr.bf16.mxu1 %v8826_v57 }
  0x5f   :  { %382 = vmatprep.mubr.bf16.mxu0 %v12811_v0  ;;  %455 = vmatprep.mubr.bf16.mxu1 %v12811_v0 }
  0x61   :  { %708 = vmatpush1.bf16.msra.mxu0 %v8828_v58  ;;  %749 = vmatpush1.bf16.msra.mxu1 %v8829_v59 }
  0x62   :  { %709 = vmatprep.subr.bf16.mxu0 %v8831_v60  ;;  %750 = vmatprep.subr.bf16.mxu1 %v8833_v61 }
  0x64   :  { %383 = vmatmul.mubr.bf16.gmra.mxu0 %v8830_v62  ;;  %456 = vmatmul.mubr.bf16.gmra.mxu1 %v8830_v62 }
  0x65   :  { %710 = vmatpush1.bf16.msra.mxu0 %v8835_v63  ;;  %751 = vmatpush1.bf16.msra.mxu1 %v8836_v1 }
  0x66   :  { %711 = vmatprep.subr.bf16.mxu0 %v8837_v2  ;;  %752 = vmatprep.subr.bf16.mxu1 %v8839_v3 }
  0x67   :  { %729 = vmatprep.mubr.bf16.mxu0 %v12811_v0  ;;  %770 = vmatprep.mubr.bf16.mxu1 %v12811_v0 }
  0x69   :  { %712 = vmatpush1.bf16.msra.mxu0 %v8841_v4  ;;  %753 = vmatpush1.bf16.msra.mxu1 %v8842_v5 }
  0x6a   :  { %809 = vmatprep.subr.bf16.mxu0 %v9772_v33  ;;  %850 = vmatprep.subr.bf16.mxu1 %v9774_v34 }
  0x6c   :  { %730 = vmatmul.mubr.bf16.vlgmr.msra.gmra.mxu0 %v12811_v0  ;;  %771 = vmatmul.mubr.bf16.vlgmr.msra.gmra.mxu1 %v12811_v0 }
  0x6d   :  { %810 = vmatpush1.bf16.msra.mxu0 %v9779_v36  ;;  %851 = vmatpush1.bf16.msra.mxu1 %v9781_v37 }
  0x6e   :  { %811 = vmatprep.subr.bf16.mxu0 %v9785_v38  ;;  %852 = vmatprep.subr.bf16.mxu1 %v9787_v39 }
  0x6f   :  { %841 = vmatprep.mubr.bf16.mxu0 %v12811_v0  ;;  %882 = vmatprep.mubr.bf16.mxu1 %v12811_v0 }
  0x71   :  { %812 = vmatpush1.bf16.msra.mxu0 %v9789_v40  ;;  %853 = vmatpush1.bf16.msra.mxu1 %v9793_v41 }
  0x72   :  { %813 = vmatprep.subr.bf16.mxu0 %v9797_v42  ;;  %854 = vmatprep.subr.bf16.mxu1 %v9799_v43 }
  0x75   :  { %814 = vmatpush1.bf16.msra.mxu0 %v9806_v45  ;;  %855 = vmatpush1.bf16.msra.mxu1 %v9808_v46 }
  0x76   :  { %815 = vmatprep.subr.bf16.mxu0 %v9812_v47  ;;  %856 = vmatprep.subr.bf16.mxu1 %v9816_v48 }
  0x79   :  { %816 = vmatpush1.bf16.msra.mxu0 %v9818_v49  ;;  %857 = vmatpush1.bf16.msra.mxu1 %v9820_v50 }
  0x7a   :  { %817 = vmatprep.subr.bf16.mxu0 %v9824_v51  ;;  %858 = vmatprep.subr.bf16.mxu1 %v9828_v52 }
  0x7d   :  { %818 = vmatpush1.bf16.msra.mxu0 %v8822_v54  ;;  %859 = vmatpush1.bf16.msra.mxu1 %v8823_v55 }
  0x7e   :  { %819 = vmatprep.subr.bf16.mxu0 %v8824_v56  ;;  %860 = vmatprep.subr.bf16.mxu1 %v8826_v57 }
  0x81   :  { %820 = vmatpush1.bf16.msra.mxu0 %v8828_v58  ;;  %861 = vmatpush1.bf16.msra.mxu1 %v8829_v59 }
  0x82   :  { %821 = vmatprep.subr.bf16.mxu0 %v8831_v60  ;;  %862 = vmatprep.subr.bf16.mxu1 %v8833_v61 }
  0x85   :  { %822 = vmatpush1.bf16.msra.mxu0 %v8835_v63  ;;  %863 = vmatpush1.bf16.msra.mxu1 %v8836_v1 }
  0x86   :  { %823 = vmatprep.subr.bf16.mxu0 %v8837_v2  ;;  %864 = vmatprep.subr.bf16.mxu1 %v8839_v3 }
  0x89   :  { %824 = vmatpush1.bf16.msra.mxu0 %v8841_v4  ;;  %865 = vmatpush1.bf16.msra.mxu1 %v8842_v5 }
  0x8a   :  { %921 = vmatprep.subr.bf16.mxu0 %v9772_v33  ;;  %962 = vmatprep.subr.bf16.mxu1 %v9774_v34 }
 0x10c   :  { %v9880_v12 = vpop.f32.mrf.mxu0  ;;  %v9882_v13 = vpop.f32.mrf.mxu1 }
 0x10e   :  { %v9889_v16 = vpop.f32.mrf.mxu0  ;;  %v9891_v17 = vpop.f32.mrf.mxu1 }
 0x110   :  { %v358_v20 = vpop.f32.mrf.mxu0  ;;  %v431_v21 = vpop.f32.mrf.mxu1 }
 0x111   :  { %v9898_v23 = vadd.f32 %v358_v20, %v119_v18  ;;  %v9901_v24 = vadd.f32 %v431_v21, %v9887_v15 }
 0x112   :  { %v360_v25 = vpop.f32.mrf.mxu0  ;;  %v433_v26 = vpop.f32.mrf.mxu1 }
 0x113   :  { %v9903_v27 = vadd.f32 %v360_v25, %v123_v22  ;;  %v9906_v28 = vadd.f32 %v433_v26, %v9895_v19 }
 0x114   :  { %v364_v29 = vpop.f32.mrf.mxu0  ;;  %v437_v30 = vpop.f32.mrf.mxu1 }
 0x115   :  { %v9908_v31 = vadd.f32 %v364_v29, %v119_v18  ;;  %v9911_v32 = vadd.f32 %v437_v30, %v9887_v15  ;;  %v355_v29 = vadd.f32 %v9880_v12, %v119_v18 }
 0x116   :  { %v366_v33 = vpop.f32.mrf.mxu0  ;;  %v439_v34 = vpop.f32.mrf.mxu1 }
 0x117   :  { %v9913_v35 = vadd.f32 %v366_v33, %v123_v22  ;;  %v9916_v36 = vadd.f32 %v439_v34, %v9895_v19 }
 0x118   :  { %v368_v37 = vpop.f32.mrf.mxu0  ;;  %v441_v38 = vpop.f32.mrf.mxu1 }
 0x119   :  { %v9918_v39 = vadd.f32 %v368_v37, %v119_v18  ;;  %v9921_v40 = vadd.f32 %v441_v38, %v9887_v15  ;;  %v357_v38 = vadd.f32 %v9889_v16, %v123_v22 }
 0x11a   :  { %v370_v41 = vpop.f32.mrf.mxu0  ;;  %v443_v42 = vpop.f32.mrf.mxu1 }
 0x11b   :  { %v9923_v43 = vadd.f32 %v370_v41, %v123_v22  ;;  %v9926_v44 = vadd.f32 %v443_v42, %v9895_v19 }
 0x11c   :  { %v374_v45 = vpop.f32.mrf.mxu0  ;;  %v447_v46 = vpop.f32.mrf.mxu1 }
 0x11d   :  { %v9928_v47 = vadd.f32 %v374_v45, %v119_v18  ;;  %v9931_v48 = vadd.f32 %v447_v46, %v9887_v15 }
 0x11e   :  { %v376_v49 = vpop.f32.mrf.mxu0  ;;  %v449_v50 = vpop.f32.mrf.mxu1 }
 0x11f   :  { %12961 = vst [vmem:[#allocation17_spill] sm:$0xff] %v9931_v48  ;;  %v9933_v51 = vadd.f32 %v376_v49, %v123_v22  ;;  %v9936_v52 = vadd.f32 %v449_v50, %v9895_v19 }
 0x120   :  { %v378_v53 = vpop.f32.mrf.mxu0  ;;  %v451_v54 = vpop.f32.mrf.mxu1 }
 0x121   :  { %12962 = vst [vmem:[#allocation18_spill] sm:$0xff] %v9936_v52  ;;  %v9938_v55 = vadd.f32 %v378_v53, %v119_v18  ;;  %v9941_v56 = vadd.f32 %v451_v54, %v9887_v15  ;;  %v428_v54 = vadd.f32 %v9882_v13, %v9887_v15 }
 0x122   :  { %v380_v57 = vpop.f32.mrf.mxu0  ;;  %v453_v58 = vpop.f32.mrf.mxu1 }
 0x123   :  { %12963 = vst [vmem:[#allocation19_spill] sm:$0xff] %v9938_v55  ;;  %12964 = vst [vmem:[#allocation20_spill] sm:$0xff] %v9941_v56  ;;  %v9943_v59 = vadd.f32 %v380_v57, %v123_v22  ;;  %v9946_v60 = vadd.f32 %v453_v58, %v9895_v19 }
 0x124   :  { %v384_v61 = vpop.f32.mrf.mxu0  ;;  %v457_v62 = vpop.f32.mrf.mxu1 }
 0x125   :  { %12965 = vst [vmem:[#allocation21_spill] sm:$0xff] %v9943_v59  ;;  %12966 = vst [vmem:[#allocation22_spill] sm:$0xff] %v9946_v60  ;;  %v9948_v63 = vadd.f32 %v384_v61, %v119_v18  ;;  %v9951_v1 = vadd.f32 %v457_v62, %v9887_v15  ;;  %v430_v61 = vadd.f32 %v9891_v17, %v9895_v19 }
 0x126   :  { %v386_v2 = vpop.f32.mrf.mxu0  ;;  %v459_v3 = vpop.f32.mrf.mxu1 }
 0x127   :  { %12967 = vst [vmem:[#allocation23_spill] sm:$0xff] %v9948_v63  ;;  %12968 = vst [vmem:[#allocation24_spill] sm:$0xff] %v9951_v1  ;;  %v9953_v4 = vadd.f32 %v386_v2, %v123_v22  ;;  %v9956_v5 = vadd.f32 %v459_v3, %v9895_v19 }
 0x128   :  { %v388_v7 = vpop.f32.mrf.mxu0  ;;  %v461_v11 = vpop.f32.mrf.mxu1 }
 0x129   :  { %12969 = vst [vmem:[#allocation25_spill] sm:$0xff] %v9953_v4  ;;  %12970 = vst [vmem:[#allocation26_spill] sm:$0xff] %v9956_v5  ;;  %v9958_v20 = vadd.f32 %v388_v7, %v119_v18  ;;  %v9961_v21 = vadd.f32 %v461_v11, %v9887_v15 }
 0x12a   :  { %v390_v25 = vpop.f32.mrf.mxu0  ;;  %v463_v26 = vpop.f32.mrf.mxu1 }
 0x12b   :  { %12971 = vst [vmem:[#allocation27_spill] sm:$0xff] %v9958_v20  ;;  %12972 = vst [vmem:[#allocation28_spill] sm:$0xff] %v9961_v21  ;;  %v9964_v30 = vadd.f32 %v390_v25, %v123_v22  ;;  %v9967_v33 = vadd.f32 %v463_v26, %v9895_v19 }
 0x12c   :  { %v731_v34 = vpop.f32.mrf.mxu0  ;;  %v772_v37 = vpop.f32.mrf.mxu1 }
 0x12d   :  { %12973 = vst [vmem:[#allocation29_spill] sm:$0xff] %v9964_v30  ;;  %12974 = vst [vmem:[#allocation30_spill] sm:$0xff] %v9967_v33  ;;  %v779_v41 = vadd.f32 %v731_v34, %v355_v29  ;;  %v781_v58 = vadd.f32 %v772_v37, %v428_v54  ;;  %v9997_v54 = vld [vmem:[#allocation8 + $0xa4] ss:$16 sps:$4 sm:$0xff]  }
 0x12e   :  { %v733_v42 = vpop.f32.mrf.mxu0  ;;  %v774_v45 = vpop.f32.mrf.mxu1 }
 0x12f   :  { %v783_v46 = vmul.f32 0.5, %v779_v41  ;;  %v780_v49 = vadd.f32 %v733_v42, %v357_v38  ;;  %v782_v16 = vadd.f32 %v774_v45, %v430_v61  ;;  %v9977_v42 = vld [vmem:[#allocation8 + $0xe0] ss:$16 sps:$4 sm:$0xff]   ;;  %v9980_v45 = vld [vmem:[#allocation8 + $0xe8] ss:$16 sps:$4 sm:$0xff]  }
 0x130   :  { %v735_v50 = vpop.f32.mrf.mxu0  ;;  %v776_v53 = vpop.f32.mrf.mxu1  ;;  %v10012_v61 = vld [vmem:[#allocation8 + $0x8c] ss:$16 sps:$4 sm:$0xff]  }
 0x131   :  { %9449 = vtanh.f32 %v783_v46  ;;  %v787_v12 = vmul.f32 0.5, %v780_v49  ;;  %v792_v22 = vmul.f32 0.5, %v782_v16  ;;  %v9983_v46 = vld [vmem:[#allocation8 + $0xc4] ss:$16 sps:$4 sm:$0xff]   ;;  %v9986_v49 = vld [vmem:[#allocation8 + $0xcc] ss:$16 sps:$4 sm:$0xff]  }
 0x132   :  { %v736_v18 = vpop.f32.mrf.mxu0  ;;  %v777_v57 = vpop.f32.mrf.mxu1  ;;  %v9991_v50 = vld [vmem:[#allocation8 + $0xc0] ss:$16 sps:$4 sm:$0xff]   ;;  %v9994_v53 = vld [vmem:[#allocation8 + $0xc8] ss:$16 sps:$4 sm:$0xff]  }
 0x133   :  { %9451 = vtanh.f32 %v787_v12  ;;  %v10000_v12 = vld [vmem:[#allocation8 + $0xac] ss:$16 sps:$4 sm:$0xff]   ;;  %v10003_v18 = vld [vmem:[#allocation8 + $0xa0] ss:$16 sps:$4 sm:$0xff]   ;;  %v10006_v57 = vld [vmem:[#allocation8 + $0xa8] ss:$16 sps:$4 sm:$0xff]  }
 0x134   :  { %9453 = vtanh.f32 %v781_v58  ;;  %v10009_v58 = vld [vmem:[#allocation8 + $0x84] ss:$16 sps:$4 sm:$0xff]   ;;  %v10015_v16 = vld [vmem:[#allocation8 + $0x80] ss:$16 sps:$4 sm:$0xff]  }
 0x135   :  { %9455 = vtanh.f32 %v792_v22  ;;  %v10018_v22 = vld [vmem:[#allocation8 + $0x88] ss:$16 sps:$4 sm:$0xff]  }
 0x13e   :  { %v9450_v62 = vpop.eup %9449 }
 0x13f   :  { %v785_v2 = vmul.f32 0.5, %v9450_v62  ;;  %v10021_v62 = vld [vmem:[#allocation8 + $0x64] ss:$16 sps:$4 sm:$0xff]  }
 0x140   :  { %v9452_v3 = vpop.eup %9451 }
 0x141   :  { %v786_v7 = vadd.f32 0.5, %v785_v2  ;;  %v789_v11 = vmul.f32 0.5, %v9452_v3  ;;  %v9454_v13 = vpop.eup %9453  ;;  %v10024_v2 = vld [vmem:[#allocation8 + $0x6c] ss:$16 sps:$4 sm:$0xff]   ;;  %v10027_v3 = vld [vmem:[#allocation8 + $0x60] ss:$16 sps:$4 sm:$0xff]  }
 0x142   :  { %v9456_v34 = vpop.eup %9455 }
 0x143   :  { %v790_v25 = vadd.f32 0.5, %v789_v11  ;;  %v797_v26 = vmul.f32 %v9454_v13, %v786_v7  ;;  %v794_v37 = vmul.f32 0.5, %v9456_v34  ;;  %v10030_v7 = vld [vmem:[#allocation8 + $0x68] ss:$16 sps:$4 sm:$0xff]   ;;  %v10033_v11 = vld [vmem:[#allocation8 + $0x44] ss:$16 sps:$4 sm:$0xff]  }
 0x144   :  { %v10039_v13 = vld [vmem:[#allocation8 + $0x40] ss:$16 sps:$4 sm:$0xff]   ;;  %v10048_v34 = vld [vmem:[#allocation8 + $0x2c] ss:$16 sps:$4 sm:$0xff]  }
 0x145   :  { %v796_v15 = vmul.f32 0.0, %v790_v25  ;;  %v795_v17 = vadd.f32 0.5, %v794_v37  ;;  %v10036_v25 = vld [vmem:[#allocation8 + $0x4c] ss:$16 sps:$4 sm:$0xff]   ;;  %v10051_v37 = vld [vmem:[#allocation8 + $0x20] ss:$16 sps:$4 sm:$0xff]  }
 0x147   :  { %v9974_v29 = vadd.f32 %v797_v26, %v796_v15  ;;  %v10042_v15 = vld [vmem:[#allocation8 + $0x48] ss:$16 sps:$4 sm:$0xff]   ;;  %v10045_v26 = vld [vmem:[#allocation8 + $0x24] ss:$16 sps:$4 sm:$0xff]  }
 0x149   :  { %9457 = vtanh.f32 %v9974_v29 }
 0x156   :  { %v9458_v19 = vpop.eup %9457 }
 0x157   :  { %v800_v38 = vmul.f32 %v9458_v19, %v795_v17  ;;  %v10054_v17 = vld [vmem:[#allocation8 + $0x28] ss:$16 sps:$4 sm:$0xff]   ;;  %v10057_v19 = vld [vmem:[#allocation8 + $0x4] ss:$16 sps:$4 sm:$0xff]  }
 0x159   :  { %v808_v41 = vpack.c.bf16 %v800_v38, %v800_v38  ;;  %v10060_v38 = vld [vmem:[#allocation8 + $0xc] ss:$16 sps:$4 sm:$0xff]  }
 0x15b   :  { %842 = vmatmul.mubr.bf16.vlgmr.msra.gmra.mxu0 %v808_v41  ;;  %883 = vmatmul.mubr.bf16.vlgmr.msra.gmra.mxu1 %v808_v41  ;;  %v10063_v41 = vld [vmem:[#allocation8] ss:$16 sps:$4 sm:$0xff]  }
 0x15c   :  { %922 = vmatpush1.bf16.msra.mxu0 %v9977_v42  ;;  %963 = vmatpush1.bf16.msra.mxu1 %v9980_v45 }
 0x15d   :  { %923 = vmatprep.subr.bf16.mxu0 %v9983_v46  ;;  %964 = vmatprep.subr.bf16.mxu1 %v9986_v49 }
 0x15e   :  { %953 = vmatprep.mubr.bf16.mxu0 %v12811_v0  ;;  %994 = vmatprep.mubr.bf16.mxu1 %v12811_v0  ;;  %v10069_v0 = vld [vmem:[#allocation8 + $0xe4] ss:$16 sps:$4 sm:$0xff]  }
 0x160   :  { %924 = vmatpush1.bf16.msra.mxu0 %v9991_v50  ;;  %965 = vmatpush1.bf16.msra.mxu1 %v9994_v53 }
 0x161   :  { %925 = vmatprep.subr.bf16.mxu0 %v9997_v54  ;;  %966 = vmatprep.subr.bf16.mxu1 %v10000_v12 }
 0x164   :  { %926 = vmatpush1.bf16.msra.mxu0 %v10003_v18  ;;  %967 = vmatpush1.bf16.msra.mxu1 %v10006_v57 }
 0x165   :  { %927 = vmatprep.subr.bf16.mxu0 %v10009_v58  ;;  %968 = vmatprep.subr.bf16.mxu1 %v10012_v61 }
 0x168   :  { %928 = vmatpush1.bf16.msra.mxu0 %v10015_v16  ;;  %969 = vmatpush1.bf16.msra.mxu1 %v10018_v22 }
 0x169   :  { %929 = vmatprep.subr.bf16.mxu0 %v10021_v62  ;;  %970 = vmatprep.subr.bf16.mxu1 %v10024_v2 }
 0x16c   :  { %930 = vmatpush1.bf16.msra.mxu0 %v10027_v3  ;;  %971 = vmatpush1.bf16.msra.mxu1 %v10030_v7 }
 0x16d   :  { %931 = vmatprep.subr.bf16.mxu0 %v10033_v11  ;;  %972 = vmatprep.subr.bf16.mxu1 %v10036_v25 }
 0x170   :  { %932 = vmatpush1.bf16.msra.mxu0 %v10039_v13  ;;  %973 = vmatpush1.bf16.msra.mxu1 %v10042_v15 }
 0x171   :  { %933 = vmatprep.subr.bf16.mxu0 %v10045_v26  ;;  %974 = vmatprep.subr.bf16.mxu1 %v10048_v34 }
 0x174   :  { %934 = vmatpush1.bf16.msra.mxu0 %v10051_v37  ;;  %975 = vmatpush1.bf16.msra.mxu1 %v10054_v17 }
 0x175   :  { %935 = vmatprep.subr.bf16.mxu0 %v10057_v19  ;;  %976 = vmatprep.subr.bf16.mxu1 %v10060_v38 }
 0x178   :  { %936 = vmatpush1.bf16.msra.mxu0 %v10063_v41  ;;  %977 = vmatpush1.bf16.msra.mxu1 %v10066_v6 }
 0x179   :  { %1033 = vmatprep.subr.bf16.mxu0 %v10069_v0  ;;  %1074 = vmatprep.subr.bf16.mxu1 %v10072_v10 }
 0x21b   :  { %v843_v9 = vpop.f32.mrf.mxu0  ;;  %v884_v14 = vpop.f32.mrf.mxu1 }
 0x21c   :  { %v891_v8 = vadd.f32 %v843_v9, %v9898_v23  ;;  %v893_v4 = vadd.f32 %v884_v14, %v9901_v24 }
 0x21d   :  { %v845_v33 = vpop.f32.mrf.mxu0  ;;  %v886_v21 = vpop.f32.mrf.mxu1 }
 0x21e   :  { %v895_v30 = vmul.f32 0.5, %v891_v8  ;;  %v892_v20 = vadd.f32 %v845_v33, %v9903_v27  ;;  %v894_v59 = vadd.f32 %v886_v21, %v9906_v28 }
 0x21f   :  { %v847_v5 = vpop.f32.mrf.mxu0  ;;  %v888_v1 = vpop.f32.mrf.mxu1 }
 0x220   :  { %9459 = vtanh.f32 %v895_v30  ;;  %v899_v63 = vmul.f32 0.5, %v892_v20  ;;  %v904_v55 = vmul.f32 0.5, %v894_v59 }
 0x221   :  { %v848_v60 = vpop.f32.mrf.mxu0  ;;  %v889_v56 = vpop.f32.mrf.mxu1 }
 0x222   :  { %9461 = vtanh.f32 %v899_v63 }
 0x223   :  { %9463 = vtanh.f32 %v893_v4 }
 0x224   :  { %9465 = vtanh.f32 %v904_v55 }
 0x22d   :  { %v9460_v52 = vpop.eup %9459 }
 0x22e   :  { %v897_v9 = vmul.f32 0.5, %v9460_v52 }
 0x22f   :  { %v9462_v23 = vpop.eup %9461 }
 0x230   :  { %v898_v48 = vadd.f32 0.5, %v897_v9  ;;  %v901_v8 = vmul.f32 0.5, %v9462_v23  ;;  %v9464_v27 = vpop.eup %9463 }
 0x231   :  { %v9466_v24 = vpop.eup %9465 }
 0x232   :  { %v902_v5 = vadd.f32 0.5, %v901_v8  ;;  %v909_v1 = vmul.f32 %v9464_v27, %v898_v48  ;;  %v906_v56 = vmul.f32 0.5, %v9466_v24  ;;  %v12975_v48 = vmov 0  }
 0x234   :  { %v908_v30 = vmul.f32 %v902_v5, %v9974_v29  ;;  %v907_v60 = vadd.f32 0.5, %v906_v56 }
 0x236   :  { %v10080_v14 = vadd.f32 %v909_v1, %v908_v30 }
 0x238   :  { %9467 = vtanh.f32 %v10080_v14 }
 0x245   :  { %v9468_v28 = vpop.eup %9467 }
 0x246   :  { %v912_v59 = vmul.f32 %v9468_v28, %v907_v60 }
 0x248   :  { %v920_v63 = vpack.c.bf16 %v912_v59, %v912_v59 }
 0x24a   :  { %954 = vmatmul.mubr.bf16.vlgmr.msra.gmra.mxu0 %v920_v63  ;;  %995 = vmatmul.mubr.bf16.vlgmr.msra.gmra.mxu1 %v920_v63 }
 0x24b   :  { %1034 = vmatpush1.bf16.msra.mxu0 %v9977_v42  ;;  %1075 = vmatpush1.bf16.msra.mxu1 %v9980_v45 }
 0x24c   :  { %1035 = vmatprep.subr.bf16.mxu0 %v9983_v46  ;;  %1076 = vmatprep.subr.bf16.mxu1 %v9986_v49 }
 0x24d   :  { %1065 = vmatprep.mubr.bf16.mxu0 %v12975_v48  ;;  %1106 = vmatprep.mubr.bf16.mxu1 %v12975_v48 }
 0x24f   :  { %1036 = vmatpush1.bf16.msra.mxu0 %v9991_v50  ;;  %1077 = vmatpush1.bf16.msra.mxu1 %v9994_v53 }
 0x250   :  { %1037 = vmatprep.subr.bf16.mxu0 %v9997_v54  ;;  %1078 = vmatprep.subr.bf16.mxu1 %v10000_v12 }
 0x253   :  { %1038 = vmatpush1.bf16.msra.mxu0 %v10003_v18  ;;  %1079 = vmatpush1.bf16.msra.mxu1 %v10006_v57 }
 0x254   :  { %1039 = vmatprep.subr.bf16.mxu0 %v10009_v58  ;;  %1080 = vmatprep.subr.bf16.mxu1 %v10012_v61 }
 0x257   :  { %1040 = vmatpush1.bf16.msra.mxu0 %v10015_v16  ;;  %1081 = vmatpush1.bf16.msra.mxu1 %v10018_v22 }
 0x258   :  { %1041 = vmatprep.subr.bf16.mxu0 %v10021_v62  ;;  %1082 = vmatprep.subr.bf16.mxu1 %v10024_v2 }
 0x25b   :  { %1042 = vmatpush1.bf16.msra.mxu0 %v10027_v3  ;;  %1083 = vmatpush1.bf16.msra.mxu1 %v10030_v7 }
 0x25c   :  { %1043 = vmatprep.subr.bf16.mxu0 %v10033_v11  ;;  %1084 = vmatprep.subr.bf16.mxu1 %v10036_v25 }
 0x25f   :  { %1044 = vmatpush1.bf16.msra.mxu0 %v10039_v13  ;;  %1085 = vmatpush1.bf16.msra.mxu1 %v10042_v15 }
 0x260   :  { %1045 = vmatprep.subr.bf16.mxu0 %v10045_v26  ;;  %1086 = vmatprep.subr.bf16.mxu1 %v10048_v34 }
 0x263   :  { %1046 = vmatpush1.bf16.msra.mxu0 %v10051_v37  ;;  %1087 = vmatpush1.bf16.msra.mxu1 %v10054_v17 }
 0x264   :  { %1047 = vmatprep.subr.bf16.mxu0 %v10057_v19  ;;  %1088 = vmatprep.subr.bf16.mxu1 %v10060_v38 }
 0x267   :  { %1048 = vmatpush1.bf16.msra.mxu0 %v10063_v41  ;;  %1089 = vmatpush1.bf16.msra.mxu1 %v10066_v6 }
 0x268   :  { %1145 = vmatprep.subr.bf16.mxu0 %v10069_v0  ;;  %1186 = vmatprep.subr.bf16.mxu1 %v10072_v10 }
 0x30a   :  { %v955_v52 = vpop.f32.mrf.mxu0  ;;  %v996_v55 = vpop.f32.mrf.mxu1 }
 0x30b   :  { %v1003_v4 = vadd.f32 %v955_v52, %v9908_v31  ;;  %v1005_v8 = vadd.f32 %v996_v55, %v9911_v32 }
 0x30c   :  { %v957_v20 = vpop.f32.mrf.mxu0  ;;  %v998_v21 = vpop.f32.mrf.mxu1 }
 0x30d   :  { %v1007_v33 = vmul.f32 0.5, %v1003_v4  ;;  %v1004_v29 = vadd.f32 %v957_v20, %v9913_v35  ;;  %v1006_v30 = vadd.f32 %v998_v21, %v9916_v36 }
 0x30e   :  { %v959_v9 = vpop.f32.mrf.mxu0  ;;  %v1000_v23 = vpop.f32.mrf.mxu1 }
 0x30f   :  { %9469 = vtanh.f32 %v1007_v33  ;;  %v1011_v27 = vmul.f32 0.5, %v1004_v29  ;;  %v1016_v24 = vmul.f32 0.5, %v1006_v30 }
 0x310   :  { %v960_v5 = vpop.f32.mrf.mxu0  ;;  %v1001_v1 = vpop.f32.mrf.mxu1 }
 0x311   :  { %9471 = vtanh.f32 %v1011_v27 }
 0x312   :  { %9473 = vtanh.f32 %v1005_v8 }
 0x313   :  { %9475 = vtanh.f32 %v1016_v24 }
 0x31c   :  { %v9470_v56 = vpop.eup %9469 }
 0x31d   :  { %v1009_v31 = vmul.f32 0.5, %v9470_v56 }
 0x31e   :  { %v9472_v60 = vpop.eup %9471 }
 0x31f   :  { %v1010_v28 = vadd.f32 0.5, %v1009_v31  ;;  %v1013_v59 = vmul.f32 0.5, %v9472_v60  ;;  %v9474_v35 = vpop.eup %9473 }
 0x320   :  { %v9476_v55 = vpop.eup %9475 }
 0x321   :  { %v1014_v63 = vadd.f32 0.5, %v1013_v59  ;;  %v1021_v52 = vmul.f32 %v9474_v35, %v1010_v28  ;;  %v1018_v20 = vmul.f32 0.5, %v9476_v55 }
 0x323   :  { %v1020_v4 = vmul.f32 %v1014_v63, %v10080_v14  ;;  %v1019_v33 = vadd.f32 0.5, %v1018_v20 }
 0x325   :  { %v10122_v32 = vadd.f32 %v1021_v52, %v1020_v4 }
 0x327   :  { %9477 = vtanh.f32 %v10122_v32 }
 0x334   :  { %v9478_v36 = vpop.eup %9477 }
 0x335   :  { %v1024_v21 = vmul.f32 %v9478_v36, %v1019_v33 }
 0x337   :  { %v1032_v29 = vpack.c.bf16 %v1024_v21, %v1024_v21 }
 0x339   :  { %1066 = vmatmul.mubr.bf16.vlgmr.msra.gmra.mxu0 %v1032_v29  ;;  %1107 = vmatmul.mubr.bf16.vlgmr.msra.gmra.mxu1 %v1032_v29 }
 0x33a   :  { %1146 = vmatpush1.bf16.msra.mxu0 %v9977_v42  ;;  %1187 = vmatpush1.bf16.msra.mxu1 %v9980_v45 }
 0x33b   :  { %1147 = vmatprep.subr.bf16.mxu0 %v9983_v46  ;;  %1188 = vmatprep.subr.bf16.mxu1 %v9986_v49 }
 0x33c   :  { %1177 = vmatprep.mubr.bf16.mxu0 %v12975_v48  ;;  %1218 = vmatprep.mubr.bf16.mxu1 %v12975_v48 }
 0x33e   :  { %1148 = vmatpush1.bf16.msra.mxu0 %v9991_v50  ;;  %1189 = vmatpush1.bf16.msra.mxu1 %v9994_v53 }
 0x33f   :  { %1149 = vmatprep.subr.bf16.mxu0 %v9997_v54  ;;  %1190 = vmatprep.subr.bf16.mxu1 %v10000_v12 }
 0x342   :  { %1150 = vmatpush1.bf16.msra.mxu0 %v10003_v18  ;;  %1191 = vmatpush1.bf16.msra.mxu1 %v10006_v57 }
 0x343   :  { %1151 = vmatprep.subr.bf16.mxu0 %v10009_v58  ;;  %1192 = vmatprep.subr.bf16.mxu1 %v10012_v61 }
 0x346   :  { %1152 = vmatpush1.bf16.msra.mxu0 %v10015_v16  ;;  %1193 = vmatpush1.bf16.msra.mxu1 %v10018_v22 }
 0x347   :  { %1153 = vmatprep.subr.bf16.mxu0 %v10021_v62  ;;  %1194 = vmatprep.subr.bf16.mxu1 %v10024_v2 }
 0x34a   :  { %1154 = vmatpush1.bf16.msra.mxu0 %v10027_v3  ;;  %1195 = vmatpush1.bf16.msra.mxu1 %v10030_v7 }
 0x34b   :  { %1155 = vmatprep.subr.bf16.mxu0 %v10033_v11  ;;  %1196 = vmatprep.subr.bf16.mxu1 %v10036_v25 }
 0x34e   :  { %1156 = vmatpush1.bf16.msra.mxu0 %v10039_v13  ;;  %1197 = vmatpush1.bf16.msra.mxu1 %v10042_v15 }
 0x34f   :  { %1157 = vmatprep.subr.bf16.mxu0 %v10045_v26  ;;  %1198 = vmatprep.subr.bf16.mxu1 %v10048_v34 }
 0x352   :  { %1158 = vmatpush1.bf16.msra.mxu0 %v10051_v37  ;;  %1199 = vmatpush1.bf16.msra.mxu1 %v10054_v17 }
 0x353   :  { %1159 = vmatprep.subr.bf16.mxu0 %v10057_v19  ;;  %1200 = vmatprep.subr.bf16.mxu1 %v10060_v38 }
 0x356   :  { %1160 = vmatpush1.bf16.msra.mxu0 %v10063_v41  ;;  %1201 = vmatpush1.bf16.msra.mxu1 %v10066_v6 }
 0x357   :  { %1257 = vmatprep.subr.bf16.mxu0 %v10069_v0  ;;  %1298 = vmatprep.subr.bf16.mxu1 %v10072_v10 }
 0x3f9   :  { %v1067_v14 = vpop.f32.mrf.mxu0  ;;  %v1108_v9 = vpop.f32.mrf.mxu1 }
 0x3fa   :  { %v1115_v23 = vadd.f32 %v1067_v14, %v9918_v39  ;;  %v1117_v56 = vadd.f32 %v1108_v9, %v9921_v40 }
 0x3fb   :  { %v1069_v8 = vpop.f32.mrf.mxu0  ;;  %v1110_v27 = vpop.f32.mrf.mxu1 }
 0x3fc   :  { %v1119_v5 = vmul.f32 0.5, %v1115_v23  ;;  %v1116_v1 = vadd.f32 %v1069_v8, %v9923_v43  ;;  %v1118_v59 = vadd.f32 %v1110_v27, %v9926_v44 }
 0x3fd   :  { %v1071_v30 = vpop.f32.mrf.mxu0  ;;  %v1112_v24 = vpop.f32.mrf.mxu1 }
 0x3fe   :  { %9479 = vtanh.f32 %v1119_v5  ;;  %v1123_v31 = vmul.f32 0.5, %v1116_v1  ;;  %v1128_v35 = vmul.f32 0.5, %v1118_v59 }
 0x3ff   :  { %v1072_v60 = vpop.f32.mrf.mxu0  ;;  %v1113_v28 = vpop.f32.mrf.mxu1 }
 0x400   :  { %9481 = vtanh.f32 %v1123_v31  ;;  %v12976_v60 = vld [vmem:[#allocation17_spill] sm:$0xff] }
 0x401   :  { %9483 = vtanh.f32 %v1117_v56 }
 0x402   :  { %9485 = vtanh.f32 %v1128_v35 }
 0x40b   :  { %v9480_v63 = vpop.eup %9479 }
 0x40c   :  { %v1121_v39 = vmul.f32 0.5, %v9480_v63 }
 0x40d   :  { %v9482_v52 = vpop.eup %9481 }
 0x40e   :  { %v1122_v4 = vadd.f32 0.5, %v1121_v39  ;;  %v1125_v55 = vmul.f32 0.5, %v9482_v52  ;;  %v9484_v43 = vpop.eup %9483  ;;  %v12977_v39 = vld [vmem:[#allocation18_spill] sm:$0xff] }
 0x40f   :  { %v9486_v21 = vpop.eup %9485 }
 0x410   :  { %v1126_v20 = vadd.f32 0.5, %v1125_v55  ;;  %v1133_v33 = vmul.f32 %v9484_v43, %v1122_v4  ;;  %v1130_v29 = vmul.f32 0.5, %v9486_v21 }
 0x412   :  { %v1132_v36 = vmul.f32 %v1126_v20, %v10122_v32  ;;  %v1131_v14 = vadd.f32 0.5, %v1130_v29 }
 0x414   :  { %v10164_v40 = vadd.f32 %v1133_v33, %v1132_v36 }
 0x416   :  { %9487 = vtanh.f32 %v10164_v40 }
 0x423   :  { %v9488_v44 = vpop.eup %9487 }
 0x424   :  { %v1136_v9 = vmul.f32 %v9488_v44, %v1131_v14 }
 0x426   :  { %v1144_v23 = vpack.c.bf16 %v1136_v9, %v1136_v9 }
 0x428   :  { %1178 = vmatmul.mubr.bf16.vlgmr.msra.gmra.mxu0 %v1144_v23  ;;  %1219 = vmatmul.mubr.bf16.vlgmr.msra.gmra.mxu1 %v1144_v23 }
 0x429   :  { %1258 = vmatpush1.bf16.msra.mxu0 %v9977_v42  ;;  %1299 = vmatpush1.bf16.msra.mxu1 %v9980_v45 }
 0x42a   :  { %1259 = vmatprep.subr.bf16.mxu0 %v9983_v46  ;;  %1300 = vmatprep.subr.bf16.mxu1 %v9986_v49 }
 0x42b   :  { %1289 = vmatprep.mubr.bf16.mxu0 %v12975_v48  ;;  %1330 = vmatprep.mubr.bf16.mxu1 %v12975_v48 }
 0x42d   :  { %1260 = vmatpush1.bf16.msra.mxu0 %v9991_v50  ;;  %1301 = vmatpush1.bf16.msra.mxu1 %v9994_v53 }
 0x42e   :  { %1261 = vmatprep.subr.bf16.mxu0 %v9997_v54  ;;  %1302 = vmatprep.subr.bf16.mxu1 %v10000_v12 }
 0x431   :  { %1262 = vmatpush1.bf16.msra.mxu0 %v10003_v18  ;;  %1303 = vmatpush1.bf16.msra.mxu1 %v10006_v57 }
 0x432   :  { %1263 = vmatprep.subr.bf16.mxu0 %v10009_v58  ;;  %1304 = vmatprep.subr.bf16.mxu1 %v10012_v61 }
 0x435   :  { %1264 = vmatpush1.bf16.msra.mxu0 %v10015_v16  ;;  %1305 = vmatpush1.bf16.msra.mxu1 %v10018_v22 }
 0x436   :  { %1265 = vmatprep.subr.bf16.mxu0 %v10021_v62  ;;  %1306 = vmatprep.subr.bf16.mxu1 %v10024_v2 }
 0x439   :  { %1266 = vmatpush1.bf16.msra.mxu0 %v10027_v3  ;;  %1307 = vmatpush1.bf16.msra.mxu1 %v10030_v7 }
 0x43a   :  { %1267 = vmatprep.subr.bf16.mxu0 %v10033_v11  ;;  %1308 = vmatprep.subr.bf16.mxu1 %v10036_v25 }
 0x43d   :  { %1268 = vmatpush1.bf16.msra.mxu0 %v10039_v13  ;;  %1309 = vmatpush1.bf16.msra.mxu1 %v10042_v15 }
 0x43e   :  { %1269 = vmatprep.subr.bf16.mxu0 %v10045_v26  ;;  %1310 = vmatprep.subr.bf16.mxu1 %v10048_v34 }
 0x441   :  { %1270 = vmatpush1.bf16.msra.mxu0 %v10051_v37  ;;  %1311 = vmatpush1.bf16.msra.mxu1 %v10054_v17 }
 0x442   :  { %1271 = vmatprep.subr.bf16.mxu0 %v10057_v19  ;;  %1312 = vmatprep.subr.bf16.mxu1 %v10060_v38 }
 0x445   :  { %1272 = vmatpush1.bf16.msra.mxu0 %v10063_v41  ;;  %1313 = vmatpush1.bf16.msra.mxu1 %v10066_v6 }
 0x446   :  { %1369 = vmatprep.subr.bf16.mxu0 %v10069_v0  ;;  %1410 = vmatprep.subr.bf16.mxu1 %v10072_v10 }
 0x4e8   :  { %v1179_v32 = vpop.f32.mrf.mxu0  ;;  %v1220_v8 = vpop.f32.mrf.mxu1 }
 0x4e9   :  { %v1227_v27 = vadd.f32 %v1179_v32, %v9928_v47  ;;  %v1229_v28 = vadd.f32 %v1220_v8, %v12976_v60  ;;  %v12979_v60 = vld [vmem:[#allocation21_spill] sm:$0xff] }
 0x4ea   :  { %v1181_v5 = vpop.f32.mrf.mxu0  ;;  %v1222_v1 = vpop.f32.mrf.mxu1 }
 0x4eb   :  { %v1231_v30 = vmul.f32 0.5, %v1227_v27  ;;  %v1228_v24 = vadd.f32 %v1181_v5, %v9933_v51  ;;  %v1230_v52 = vadd.f32 %v1222_v1, %v12977_v39  ;;  %v12978_v1 = vld [vmem:[#allocation19_spill] sm:$0xff] }
 0x4ec   :  { %v1183_v56 = vpop.f32.mrf.mxu0  ;;  %v1224_v31 = vpop.f32.mrf.mxu1 }
 0x4ed   :  { %9489 = vtanh.f32 %v1231_v30  ;;  %v1235_v59 = vmul.f32 0.5, %v1228_v24  ;;  %v1240_v4 = vmul.f32 0.5, %v1230_v52 }
 0x4ee   :  { %v1184_v35 = vpop.f32.mrf.mxu0  ;;  %v1225_v63 = vpop.f32.mrf.mxu1 }
 0x4ef   :  { %9491 = vtanh.f32 %v1235_v59  ;;  %v12980_v63 = vld [vmem:[#allocation20_spill] sm:$0xff] }
 0x4f0   :  { %9493 = vtanh.f32 %v1229_v28 }
 0x4f1   :  { %9495 = vtanh.f32 %v1240_v4 }
 0x4fa   :  { %v9490_v55 = vpop.eup %9489 }
 0x4fb   :  { %v1233_v47 = vmul.f32 0.5, %v9490_v55 }
 0x4fc   :  { %v9492_v43 = vpop.eup %9491 }
 0x4fd   :  { %v1234_v20 = vadd.f32 0.5, %v1233_v47  ;;  %v1237_v33 = vmul.f32 0.5, %v9492_v43  ;;  %v9494_v51 = vpop.eup %9493 }
 0x4fe   :  { %v9496_v44 = vpop.eup %9495 }
 0x4ff   :  { %v1238_v36 = vadd.f32 0.5, %v1237_v33  ;;  %v1245_v21 = vmul.f32 %v9494_v51, %v1234_v20  ;;  %v1242_v9 = vmul.f32 0.5, %v9496_v44 }
 0x501   :  { %v1244_v29 = vmul.f32 %v1238_v36, %v10164_v40  ;;  %v1243_v23 = vadd.f32 0.5, %v1242_v9 }
 0x503   :  { %v10206_v14 = vadd.f32 %v1245_v21, %v1244_v29 }
 0x505   :  { %9497 = vtanh.f32 %v10206_v14 }
 0x512   :  { %v9498_v32 = vpop.eup %9497 }
 0x513   :  { %v1248_v8 = vmul.f32 %v9498_v32, %v1243_v23 }
 0x515   :  { %v1256_v27 = vpack.c.bf16 %v1248_v8, %v1248_v8 }
 0x517   :  { %1290 = vmatmul.mubr.bf16.vlgmr.msra.gmra.mxu0 %v1256_v27  ;;  %1331 = vmatmul.mubr.bf16.vlgmr.msra.gmra.mxu1 %v1256_v27 }
 0x518   :  { %1370 = vmatpush1.bf16.msra.mxu0 %v9977_v42  ;;  %1411 = vmatpush1.bf16.msra.mxu1 %v9980_v45 }
 0x519   :  { %1371 = vmatprep.subr.bf16.mxu0 %v9983_v46  ;;  %1412 = vmatprep.subr.bf16.mxu1 %v9986_v49 }
 0x51a   :  { %1401 = vmatprep.mubr.bf16.mxu0 %v12975_v48  ;;  %1442 = vmatprep.mubr.bf16.mxu1 %v12975_v48 }
 0x51c   :  { %1372 = vmatpush1.bf16.msra.mxu0 %v9991_v50  ;;  %1413 = vmatpush1.bf16.msra.mxu1 %v9994_v53 }
 0x51d   :  { %1373 = vmatprep.subr.bf16.mxu0 %v9997_v54  ;;  %1414 = vmatprep.subr.bf16.mxu1 %v10000_v12 }
 0x520   :  { %1374 = vmatpush1.bf16.msra.mxu0 %v10003_v18  ;;  %1415 = vmatpush1.bf16.msra.mxu1 %v10006_v57 }
 0x521   :  { %1375 = vmatprep.subr.bf16.mxu0 %v10009_v58  ;;  %1416 = vmatprep.subr.bf16.mxu1 %v10012_v61 }
 0x524   :  { %1376 = vmatpush1.bf16.msra.mxu0 %v10015_v16  ;;  %1417 = vmatpush1.bf16.msra.mxu1 %v10018_v22 }
 0x525   :  { %1377 = vmatprep.subr.bf16.mxu0 %v10021_v62  ;;  %1418 = vmatprep.subr.bf16.mxu1 %v10024_v2 }
 0x528   :  { %1378 = vmatpush1.bf16.msra.mxu0 %v10027_v3  ;;  %1419 = vmatpush1.bf16.msra.mxu1 %v10030_v7 }
 0x529   :  { %1379 = vmatprep.subr.bf16.mxu0 %v10033_v11  ;;  %1420 = vmatprep.subr.bf16.mxu1 %v10036_v25 }
 0x52c   :  { %1380 = vmatpush1.bf16.msra.mxu0 %v10039_v13  ;;  %1421 = vmatpush1.bf16.msra.mxu1 %v10042_v15 }
 0x52d   :  { %1381 = vmatprep.subr.bf16.mxu0 %v10045_v26  ;;  %1422 = vmatprep.subr.bf16.mxu1 %v10048_v34 }
 0x530   :  { %1382 = vmatpush1.bf16.msra.mxu0 %v10051_v37  ;;  %1423 = vmatpush1.bf16.msra.mxu1 %v10054_v17 }
 0x531   :  { %1383 = vmatprep.subr.bf16.mxu0 %v10057_v19  ;;  %1424 = vmatprep.subr.bf16.mxu1 %v10060_v38 }
 0x534   :  { %1384 = vmatpush1.bf16.msra.mxu0 %v10063_v41  ;;  %1425 = vmatpush1.bf16.msra.mxu1 %v10066_v6 }
 0x535   :  { %1481 = vmatprep.subr.bf16.mxu0 %v10069_v0  ;;  %1522 = vmatprep.subr.bf16.mxu1 %v10072_v10  ;;  %v12981_v0 = vld [vmem:[#allocation22_spill] sm:$0xff] }
 0x5d7   :  { %v1291_v40 = vpop.f32.mrf.mxu0  ;;  %v1332_v5 = vpop.f32.mrf.mxu1 }
 0x5d8   :  { %v1339_v30 = vadd.f32 %v1291_v40, %v12978_v1  ;;  %v1341_v39 = vadd.f32 %v1332_v5, %v12980_v63  ;;  %v10316_v63 = vld [vmem:[%s12805_s8 + $0xc4] ss:$16 sps:$4 sm:$0xff]  }
 0x5d9   :  { %v1293_v24 = vpop.f32.mrf.mxu0  ;;  %v1334_v56 = vpop.f32.mrf.mxu1 }
 0x5da   :  { %v1343_v31 = vmul.f32 0.5, %v1339_v30  ;;  %v1340_v28 = vadd.f32 %v1293_v24, %v12979_v60  ;;  %v1342_v10 = vadd.f32 %v1334_v56, %v12981_v0  ;;  %v10347_v0 = vld [vmem:[%s12805_s8 + $0xac] ss:$16 sps:$4 sm:$0xff]  }
 0x5db   :  { %v1295_v59 = vpop.f32.mrf.mxu0  ;;  %v1336_v35 = vpop.f32.mrf.mxu1 }
 0x5dc   :  { %9499 = vtanh.f32 %v1343_v31  ;;  %v1347_v52 = vmul.f32 0.5, %v1340_v28  ;;  %v1352_v47 = vmul.f32 0.5, %v1342_v10  ;;  %v10306_v28 = vld [vmem:[%s12805_s8 + $0xe0] ss:$16 sps:$4 sm:$0xff]   ;;  %v10311_v59 = vld [vmem:[%s12805_s8 + $0xe8] ss:$16 sps:$4 sm:$0xff]  }
 0x5dd   :  { %v1296_v4 = vpop.f32.mrf.mxu0  ;;  %v1337_v55 = vpop.f32.mrf.mxu1  ;;  %v10352_v10 = vld [vmem:[%s12805_s8 + $0xa0] ss:$16 sps:$4 sm:$0xff]  }
 0x5de   :  { %9501 = vtanh.f32 %v1347_v52  ;;  %v10328_v52 = vld [vmem:[%s12805_s8 + $0xc0] ss:$16 sps:$4 sm:$0xff]   ;;  %v10333_v4 = vld [vmem:[%s12805_s8 + $0xc8] ss:$16 sps:$4 sm:$0xff]   ;;  %v10342_v55 = vld [vmem:[%s12805_s8 + $0xa4] ss:$16 sps:$4 sm:$0xff]  }
 0x5df   :  { %9503 = vtanh.f32 %v1341_v39  ;;  %v10321_v39 = vld [vmem:[%s12805_s8 + $0xcc] ss:$16 sps:$4 sm:$0xff]  }
 0x5e0   :  { %9505 = vtanh.f32 %v1352_v47  ;;  %v10357_v47 = vld [vmem:[%s12805_s8 + $0xa8] ss:$16 sps:$4 sm:$0xff]  }
 0x5e1   :  { %12986 = vst [vmem:[#allocation17_spill] sm:$0xff] %v10357_v47 }
 0x5e9   :  { %v9500_v43 = vpop.eup %9499 }
 0x5ea   :  { %v1345_v20 = vmul.f32 0.5, %v9500_v43  ;;  %v10366_v43 = vld [vmem:[%s12805_s8 + $0x84] ss:$16 sps:$4 sm:$0xff]  }
 0x5eb   :  { %v9502_v33 = vpop.eup %9501 }
 0x5ec   :  { %v1346_v51 = vadd.f32 0.5, %v1345_v20  ;;  %v1349_v36 = vmul.f32 0.5, %v9502_v33  ;;  %v9504_v21 = vpop.eup %9503  ;;  %v10371_v20 = vld [vmem:[%s12805_s8 + $0x8c] ss:$16 sps:$4 sm:$0xff]   ;;  %v10376_v33 = vld [vmem:[%s12805_s8 + $0x80] ss:$16 sps:$4 sm:$0xff]  }
 0x5ed   :  { %v9506_v32 = vpop.eup %9505  ;;  %12987 = vst [vmem:[#allocation18_spill] sm:$0xff] %v10371_v20 }
 0x5ee   :  { %v1350_v29 = vadd.f32 0.5, %v1349_v36  ;;  %v1357_v44 = vmul.f32 %v9504_v21, %v1346_v51  ;;  %v1354_v8 = vmul.f32 0.5, %v9506_v32  ;;  %v10381_v51 = vld [vmem:[%s12805_s8 + $0x88] ss:$16 sps:$4 sm:$0xff]   ;;  %v10390_v36 = vld [vmem:[%s12805_s8 + $0x64] ss:$16 sps:$4 sm:$0xff]  }
 0x5ef   :  { %12988 = vst [vmem:[#allocation19_spill] sm:$0xff] %v10381_v51  ;;  %v10395_v21 = vld [vmem:[%s12805_s8 + $0x6c] ss:$16 sps:$4 sm:$0xff]   ;;  %v10424_v32 = vld [vmem:[%s12805_s8 + $0x40] ss:$16 sps:$4 sm:$0xff]  }
 0x5f0   :  { %v1356_v9 = vmul.f32 %v1350_v29, %v10206_v14  ;;  %v1355_v27 = vadd.f32 0.5, %v1354_v8  ;;  %12989 = vst [vmem:[#allocation21_spill] sm:$0xff] %v10395_v21  ;;  %v10400_v29 = vld [vmem:[%s12805_s8 + $0x60] ss:$16 sps:$4 sm:$0xff]   ;;  %v10429_v8 = vld [vmem:[%s12805_s8 + $0x48] ss:$16 sps:$4 sm:$0xff]  }
 0x5f2   :  { %v10248_v23 = vadd.f32 %v1357_v44, %v1356_v9  ;;  %v10405_v44 = vld [vmem:[%s12805_s8 + $0x68] ss:$16 sps:$4 sm:$0xff]   ;;  %v10414_v9 = vld [vmem:[%s12805_s8 + $0x44] ss:$16 sps:$4 sm:$0xff]  }
 0x5f3   :  { %12990 = vst [vmem:[#allocation20_spill] sm:$0xff] %v10405_v44 }
 0x5f4   :  { %9507 = vtanh.f32 %v10248_v23 }
 0x601   :  { %v9508_v40 = vpop.eup %9507 }
 0x602   :  { %v1360_v5 = vmul.f32 %v9508_v40, %v1355_v27  ;;  %v10438_v27 = vld [vmem:[%s12805_s8 + $0x24] ss:$16 sps:$4 sm:$0xff]   ;;  %v10443_v40 = vld [vmem:[%s12805_s8 + $0x2c] ss:$16 sps:$4 sm:$0xff]  }
 0x604   :  { %v1368_v1 = vpack.c.bf16 %v1360_v5, %v1360_v5  ;;  %v10448_v5 = vld [vmem:[%s12805_s8 + $0x20] ss:$16 sps:$4 sm:$0xff]  }
 0x606   :  { %1402 = vmatmul.mubr.bf16.vlgmr.msra.gmra.mxu0 %v1368_v1  ;;  %1443 = vmatmul.mubr.bf16.vlgmr.msra.gmra.mxu1 %v1368_v1  ;;  %v10453_v1 = vld [vmem:[%s12805_s8 + $0x28] ss:$16 sps:$4 sm:$0xff]  }
 0x607   :  { %1482 = vmatpush1.bf16.msra.mxu0 %v9977_v42  ;;  %1523 = vmatpush1.bf16.msra.mxu1 %v9980_v45  ;;  %v10286_v42 = vld [vmem:[%s12805_s8 + $0xe4] ss:$16 sps:$4 sm:$0xff]   ;;  %v10291_v45 = vld [vmem:[%s12805_s8 + $0xec] ss:$16 sps:$4 sm:$0xff]  }
 0x608   :  { %1483 = vmatprep.subr.bf16.mxu0 %v9983_v46  ;;  %1524 = vmatprep.subr.bf16.mxu1 %v9986_v49 }
 0x609   :  { %1513 = vmatprep.mubr.bf16.mxu0 %v12975_v48  ;;  %1554 = vmatprep.mubr.bf16.mxu1 %v12975_v48 }
 0x60b   :  { %1484 = vmatpush1.bf16.msra.mxu0 %v9991_v50  ;;  %1525 = vmatpush1.bf16.msra.mxu1 %v9994_v53  ;;  %v12982_v50 = vld [vmem:[#allocation23_spill] sm:$0xff] }
 0x60c   :  { %1485 = vmatprep.subr.bf16.mxu0 %v9997_v54  ;;  %1526 = vmatprep.subr.bf16.mxu1 %v10000_v12  ;;  %12992 = vst [vmem:[#allocation23_spill] sm:$0xff] %v10429_v8 }
 0x60f   :  { %1486 = vmatpush1.bf16.msra.mxu0 %v10003_v18  ;;  %1527 = vmatpush1.bf16.msra.mxu1 %v10006_v57  ;;  %v12983_v18 = vld [vmem:[#allocation25_spill] sm:$0xff] }
 0x610   :  { %1487 = vmatprep.subr.bf16.mxu0 %v10009_v58  ;;  %1528 = vmatprep.subr.bf16.mxu1 %v10012_v61  ;;  %12993 = vst [vmem:[#allocation25_spill] sm:$0xff] %v10443_v40 }
 0x613   :  { %1488 = vmatpush1.bf16.msra.mxu0 %v10015_v16  ;;  %1529 = vmatpush1.bf16.msra.mxu1 %v10018_v22  ;;  %v12984_v16 = vld [vmem:[#allocation24_spill] sm:$0xff] }
 0x614   :  { %1489 = vmatprep.subr.bf16.mxu0 %v10021_v62  ;;  %1530 = vmatprep.subr.bf16.mxu1 %v10024_v2  ;;  %12994 = vst [vmem:[#allocation24_spill] sm:$0xff] %v10453_v1 }
 0x617   :  { %1490 = vmatpush1.bf16.msra.mxu0 %v10027_v3  ;;  %1531 = vmatpush1.bf16.msra.mxu1 %v10030_v7  ;;  %v12985_v7 = vld [vmem:[#allocation26_spill] sm:$0xff] }
 0x618   :  { %1491 = vmatprep.subr.bf16.mxu0 %v10033_v11  ;;  %1532 = vmatprep.subr.bf16.mxu1 %v10036_v25 }
 0x61b   :  { %1492 = vmatpush1.bf16.msra.mxu0 %v10039_v13  ;;  %1533 = vmatpush1.bf16.msra.mxu1 %v10042_v15 }
 0x61c   :  { %1493 = vmatprep.subr.bf16.mxu0 %v10045_v26  ;;  %1534 = vmatprep.subr.bf16.mxu1 %v10048_v34 }
 0x61f   :  { %1494 = vmatpush1.bf16.msra.mxu0 %v10051_v37  ;;  %1535 = vmatpush1.bf16.msra.mxu1 %v10054_v17 }
 0x620   :  { %1495 = vmatprep.subr.bf16.mxu0 %v10057_v19  ;;  %1536 = vmatprep.subr.bf16.mxu1 %v10060_v38 }
 0x623   :  { %1496 = vmatpush1.bf16.msra.mxu0 %v10063_v41  ;;  %1537 = vmatpush1.bf16.msra.mxu1 %v10066_v6 }
 0x624   :  { %2006 = vmatprep.subr.bf16.mxu0 %v10286_v42  ;;  %2047 = vmatprep.subr.bf16.mxu1 %v10291_v45 }
 0x6c6   :  { %v1403_v46 = vpop.f32.mrf.mxu0  ;;  %v1444_v49 = vpop.f32.mrf.mxu1 }
 0x6c7   :  { %v1451_v53 = vadd.f32 %v1403_v46, %v12982_v50  ;;  %v1453_v22 = vadd.f32 %v1444_v49, %v12984_v16  ;;  %v10462_v46 = vld [vmem:[%s12805_s8 + $0x4] ss:$16 sps:$4 sm:$0xff]   ;;  %v10467_v49 = vld [vmem:[%s12805_s8 + $0xc] ss:$16 sps:$4 sm:$0xff]   ;;  %v10472_v50 = vld [vmem:[%s12805_s8] ss:$16 sps:$4 sm:$0xff]  }
 0x6c8   :  { %v1405_v54 = vpop.f32.mrf.mxu0  ;;  %v1446_v6 = vpop.f32.mrf.mxu1  ;;  %12995 = vst [vmem:[#allocation26_spill] sm:$0xff] %v10467_v49  ;;  %v10525_v16 = vld [vmem:[%s12805_s8 + $0x1c8] ss:$16 sps:$4 sm:$0xff]  }
 0x6c9   :  { %v1455_v12 = vmul.f32 0.5, %v1451_v53  ;;  %v1452_v57 = vadd.f32 %v1405_v54, %v12983_v18  ;;  %v1454_v11 = vadd.f32 %v1446_v6, %v12985_v7  ;;  %v10477_v53 = vld [vmem:[%s12805_s8 + $0x8] ss:$16 sps:$4 sm:$0xff]   ;;  %v10486_v54 = vld [vmem:[%s12805_s8 + $0x1e4] ss:$16 sps:$4 sm:$0xff]   ;;  %13000 = vst [vmem:[#allocation35_spill] sm:$0xff] %v10525_v16 }
 0x6ca   :  { %v1407_v58 = vpop.f32.mrf.mxu0  ;;  %v1448_v61 = vpop.f32.mrf.mxu1  ;;  %12996 = vst [vmem:[#allocation31_spill] sm:$0xff] %v10477_v53  ;;  %v10491_v6 = vld [vmem:[%s12805_s8 + $0x1ec] ss:$16 sps:$4 sm:$0xff]   ;;  %v10501_v18 = vld [vmem:[%s12805_s8 + $0x1e8] ss:$16 sps:$4 sm:$0xff]  }
 0x6cb   :  { %9509 = vtanh.f32 %v1455_v12  ;;  %v1459_v62 = vmul.f32 0.5, %v1452_v57  ;;  %v1464_v25 = vmul.f32 0.5, %v1454_v11  ;;  %12997 = vst [vmem:[#allocation32_spill] sm:$0xff] %v10491_v6  ;;  %v10496_v12 = vld [vmem:[%s12805_s8 + $0x1e0] ss:$16 sps:$4 sm:$0xff]   ;;  %12998 = vst [vmem:[#allocation33_spill] sm:$0xff] %v10501_v18 }
 0x6cc   :  { %v1408_v2 = vpop.f32.mrf.mxu0  ;;  %v1449_v3 = vpop.f32.mrf.mxu1  ;;  %v10510_v57 = vld [vmem:[%s12805_s8 + $0x1c4] ss:$16 sps:$4 sm:$0xff]   ;;  %v10515_v58 = vld [vmem:[%s12805_s8 + $0x1cc] ss:$16 sps:$4 sm:$0xff]   ;;  %v10520_v61 = vld [vmem:[%s12805_s8 + $0x1c0] ss:$16 sps:$4 sm:$0xff]  }
 0x6cd   :  { %9511 = vtanh.f32 %v1459_v62  ;;  %12999 = vst [vmem:[#allocation34_spill] sm:$0xff] %v10515_v58  ;;  %v10539_v62 = vld [vmem:[%s12805_s8 + $0x1ac] ss:$16 sps:$4 sm:$0xff]   ;;  %v10544_v2 = vld [vmem:[%s12805_s8 + $0x1a0] ss:$16 sps:$4 sm:$0xff]  }
 0x6ce   :  { %9513 = vtanh.f32 %v1453_v22  ;;  %v10534_v22 = vld [vmem:[%s12805_s8 + $0x1a4] ss:$16 sps:$4 sm:$0xff]   ;;  %13001 = vst [vmem:[#allocation36_spill] sm:$0xff] %v10539_v62  ;;  %v10549_v3 = vld [vmem:[%s12805_s8 + $0x1a8] ss:$16 sps:$4 sm:$0xff]  }
 0x6cf   :  { %9515 = vtanh.f32 %v1464_v25  ;;  %13002 = vst [vmem:[#allocation37_spill] sm:$0xff] %v10549_v3  ;;  %v10558_v7 = vld [vmem:[%s12805_s8 + $0x184] ss:$16 sps:$4 sm:$0xff]   ;;  %v10563_v11 = vld [vmem:[%s12805_s8 + $0x18c] ss:$16 sps:$4 sm:$0xff]  }
 0x6d0   :  { %13003 = vst [vmem:[#allocation38_spill] sm:$0xff] %v10563_v11  ;;  %v10568_v25 = vld [vmem:[%s12805_s8 + $0x180] ss:$16 sps:$4 sm:$0xff]  }
 0x6d8   :  { %v9510_v13 = vpop.eup %9509 }
 0x6d9   :  { %v1457_v15 = vmul.f32 0.5, %v9510_v13  ;;  %v10573_v13 = vld [vmem:[%s12805_s8 + $0x188] ss:$16 sps:$4 sm:$0xff]  }
 0x6da   :  { %v9512_v26 = vpop.eup %9511  ;;  %13004 = vst [vmem:[#allocation39_spill] sm:$0xff] %v10573_v13 }
 0x6db   :  { %v1458_v34 = vadd.f32 0.5, %v1457_v15  ;;  %v1461_v37 = vmul.f32 0.5, %v9512_v26  ;;  %v9514_v17 = vpop.eup %9513  ;;  %v10582_v15 = vld [vmem:[%s12805_s8 + $0x164] ss:$16 sps:$4 sm:$0xff]   ;;  %v10587_v26 = vld [vmem:[%s12805_s8 + $0x16c] ss:$16 sps:$4 sm:$0xff]  }
 0x6dc   :  { %v9516_v30 = vpop.eup %9515  ;;  %13005 = vst [vmem:[#allocation40_spill] sm:$0xff] %v10587_v26 }
 0x6dd   :  { %v1462_v19 = vadd.f32 0.5, %v1461_v37  ;;  %v1469_v38 = vmul.f32 %v9514_v17, %v1458_v34  ;;  %v1466_v24 = vmul.f32 0.5, %v9516_v30  ;;  %v10592_v34 = vld [vmem:[%s12805_s8 + $0x160] ss:$16 sps:$4 sm:$0xff]   ;;  %v10597_v37 = vld [vmem:[%s12805_s8 + $0x168] ss:$16 sps:$4 sm:$0xff]  }
 0x6de   :  { %13006 = vst [vmem:[#allocation41_spill] sm:$0xff] %v10597_v37  ;;  %v1585_v17 = vld [vmem:[%s12799_s2] sm:$0xf]  ;;  %v10624_v30 = vld [vmem:[%s12805_s8 + $0x148] ss:$16 sps:$4 sm:$0xff]   ;;  %s8041_s2 = sld [smem:[#allocation5 + $0x1]] }
 0x6df   :  { %v1468_v41 = vmul.f32 %v1462_v19, %v10248_v23  ;;  %v1467_v56 = vadd.f32 0.5, %v1466_v24  ;;  %v10419_v23 = vld [vmem:[%s12805_s8 + $0x4c] ss:$16 sps:$4 sm:$0xff]   ;;  %1586 = vst [vmem:[#allocation3] sm:$0xf] %v1585_v17  ;;  %13008 = vst [vmem:[#allocation43_spill] sm:$0xff] %v10624_v30 }
 0x6e0   :  { %12991 = vst [vmem:[#allocation22_spill] sm:$0xff] %v10419_v23  ;;  %v10609_v19 = vld [vmem:[%s12805_s8 + $0x144] ss:$16 sps:$4 sm:$0xff]   ;;  %v10662_v17 = vld [vmem:[%s12805_s8 + $0x10c] ss:$16 sps:$4 sm:$0xff]  }
 0x6e1   :  { %v10300_v14 = vadd.f32 %v1469_v38, %v1468_v41  ;;  %v10614_v38 = vld [vmem:[%s12805_s8 + $0x14c] ss:$16 sps:$4 sm:$0xff]   ;;  %v10619_v41 = vld [vmem:[%s12805_s8 + $0x140] ss:$16 sps:$4 sm:$0xff]   ;;  %v10633_v24 = vld [vmem:[%s12805_s8 + $0x124] ss:$16 sps:$4 sm:$0xff]  }
 0x6e2   :  { %13007 = vst [vmem:[#allocation42_spill] sm:$0xff] %v10614_v38  ;;  %13011 = vst [vmem:[#allocation46_spill] sm:$0xff] %v10662_v17 }
 0x6e3   :  { %9517 = vtanh.f32 %v10300_v14 }
 0x6e4   :  { %p3341_p2 = scmp.eq.s32.totalorder %s8041_s2, 1 }
 0x6e6   :  { %s3343_s22 = scalar_select %p3341_p2, 1, 0 }
 0x6f0   :  { %v9518_v31 = vpop.eup %9517 }
 0x6f1   :  { %v1472_v60 = vmul.f32 %v9518_v31, %v1467_v56  ;;  %v10638_v56 = vld [vmem:[%s12805_s8 + $0x12c] ss:$16 sps:$4 sm:$0xff]   ;;  %v10643_v31 = vld [vmem:[%s12805_s8 + $0x120] ss:$16 sps:$4 sm:$0xff]  }
 0x6f2   :  { %13009 = vst [vmem:[#allocation44_spill] sm:$0xff] %v10638_v56 }
 0x6f3   :  { %v1480_v35 = vpack.c.bf16 %v1472_v60, %v1472_v60  ;;  %v10648_v60 = vld [vmem:[%s12805_s8 + $0x128] ss:$16 sps:$4 sm:$0xff]  }
 0x6f4   :  { %13010 = vst [vmem:[#allocation45_spill] sm:$0xff] %v10648_v60 }
 0x6f5   :  { %1514 = vmatmul.mubr.bf16.vlgmr.msra.gmra.mxu0 %v1480_v35  ;;  %1555 = vmatmul.mubr.bf16.vlgmr.msra.gmra.mxu1 %v1480_v35  ;;  %v10657_v35 = vld [vmem:[%s12805_s8 + $0x104] ss:$16 sps:$4 sm:$0xff]  }
 0x6f6   :  { %2007 = vmatpush1.bf16.msra.mxu0 %v10306_v28  ;;  %2048 = vmatpush1.bf16.msra.mxu1 %v10311_v59 }
 0x6f7   :  { %2008 = vmatprep.subr.bf16.mxu0 %v10316_v63  ;;  %2049 = vmatprep.subr.bf16.mxu1 %v10321_v39 }
 0x6fa   :  { %2009 = vmatpush1.bf16.msra.mxu0 %v10328_v52  ;;  %2050 = vmatpush1.bf16.msra.mxu1 %v10333_v4 }
 0x6fb   :  { %2010 = vmatprep.subr.bf16.mxu0 %v10342_v55  ;;  %2051 = vmatprep.subr.bf16.mxu1 %v10347_v0 }
 0x6fe   :  { %2011 = vmatpush1.bf16.msra.mxu0 %v10352_v10  ;;  %2052 = vmatpush1.bf16.msra.mxu1 %v10357_v47 }
 0x6ff   :  { %2012 = vmatprep.subr.bf16.mxu0 %v10366_v43  ;;  %2053 = vmatprep.subr.bf16.mxu1 %v10371_v20 }
 0x702   :  { %2013 = vmatpush1.bf16.msra.mxu0 %v10376_v33  ;;  %2054 = vmatpush1.bf16.msra.mxu1 %v10381_v51 }
 0x703   :  { %2014 = vmatprep.subr.bf16.mxu0 %v10390_v36  ;;  %2055 = vmatprep.subr.bf16.mxu1 %v10395_v21 }
 0x706   :  { %2015 = vmatpush1.bf16.msra.mxu0 %v10400_v29  ;;  %2056 = vmatpush1.bf16.msra.mxu1 %v10405_v44 }
 0x707   :  { %2016 = vmatprep.subr.bf16.mxu0 %v10414_v9  ;;  %2057 = vmatprep.subr.bf16.mxu1 %v10419_v23 }
 0x70a   :  { %2017 = vmatpush1.bf16.msra.mxu0 %v10424_v32  ;;  %2058 = vmatpush1.bf16.msra.mxu1 %v10429_v8 }
 0x70b   :  { %2018 = vmatprep.subr.bf16.mxu0 %v10438_v27  ;;  %2059 = vmatprep.subr.bf16.mxu1 %v10443_v40 }
 0x70e   :  { %2019 = vmatpush1.bf16.msra.mxu0 %v10448_v5  ;;  %2060 = vmatpush1.bf16.msra.mxu1 %v10453_v1 }
 0x70f   :  { %2020 = vmatprep.subr.bf16.mxu0 %v10462_v46  ;;  %2061 = vmatprep.subr.bf16.mxu1 %v10467_v49 }
 0x712   :  { %2021 = vmatpush1.bf16.msra.mxu0 %v10472_v50  ;;  %2062 = vmatpush1.bf16.msra.mxu1 %v10477_v53 }
 0x713   :  { %2022 = vmatprep.subr.bf16.mxu0 %v10486_v54  ;;  %2063 = vmatprep.subr.bf16.mxu1 %v10491_v6  ;;  %v13015_v6 = vld [vmem:[#allocation28_spill] sm:$0xff] }
 0x716   :  { %2023 = vmatpush2.bf16.msra.mxu0 %v10496_v12  ;;  %2064 = vmatpush2.bf16.msra.mxu1 %v10501_v18 }
 0x717   :  { %2024 = vmatprep.subr.bf16.mxu0 %v10510_v57  ;;  %2065 = vmatprep.subr.bf16.mxu1 %v10515_v58 }
 0x71a   :  { %2025 = vmatpush2.bf16.msra.mxu0 %v10520_v61  ;;  %2066 = vmatpush2.bf16.msra.mxu1 %v10525_v16 }
 0x71b   :  { %2026 = vmatprep.subr.bf16.mxu0 %v10534_v22  ;;  %2067 = vmatprep.subr.bf16.mxu1 %v10539_v62  ;;  %v13014_v62 = vld [vmem:[#allocation29_spill] sm:$0xff] }
 0x71e   :  { %2027 = vmatpush2.bf16.msra.mxu0 %v10544_v2  ;;  %2068 = vmatpush2.bf16.msra.mxu1 %v10549_v3 }
 0x71f   :  { %2028 = vmatprep.subr.bf16.mxu0 %v10558_v7  ;;  %2069 = vmatprep.subr.bf16.mxu1 %v10563_v11 }
 0x722   :  { %2029 = vmatpush2.bf16.msra.mxu0 %v10568_v25  ;;  %2070 = vmatpush2.bf16.msra.mxu1 %v10573_v13 }
 0x723   :  { %2030 = vmatprep.subr.bf16.mxu0 %v10582_v15  ;;  %2071 = vmatprep.subr.bf16.mxu1 %v10587_v26 }
 0x726   :  { %2031 = vmatpush2.bf16.msra.mxu0 %v10592_v34  ;;  %2072 = vmatpush2.bf16.msra.mxu1 %v10597_v37  ;;  %v13013_v37 = vld [vmem:[#allocation27_spill] sm:$0xff] }
 0x727   :  { %2032 = vmatprep.subr.bf16.mxu0 %v10609_v19  ;;  %2073 = vmatprep.subr.bf16.mxu1 %v10614_v38 }
 0x72a   :  { %2033 = vmatpush2.bf16.msra.mxu0 %v10619_v41  ;;  %2074 = vmatpush2.bf16.msra.mxu1 %v10624_v30  ;;  %v10667_v30 = vld [vmem:[%s12805_s8 + $0x100] ss:$16 sps:$4 sm:$0xff]  }
 0x72b   :  { %2034 = vmatprep.subr.bf16.mxu0 %v10633_v24  ;;  %2075 = vmatprep.subr.bf16.mxu1 %v10638_v56  ;;  %v10672_v56 = vld [vmem:[%s12805_s8 + $0x108] ss:$16 sps:$4 sm:$0xff]  }
 0x72c   :  { %13012 = vst [vmem:[#allocation47_spill] sm:$0xff] %v10672_v56 }
 0x72e   :  { %2035 = vmatpush2.bf16.msra.mxu0 %v10643_v31  ;;  %2076 = vmatpush2.bf16.msra.mxu1 %v10648_v60 }
 0x72f   :  { %2036 = vmatprep.subr.bf16.mxu0 %v10657_v35  ;;  %2077 = vmatprep.subr.bf16.mxu1 %v10662_v17 }
 0x732   :  { %2037 = vmatpush2.bf16.msra.mxu0 %v10667_v30  ;;  %2078 = vmatpush2.bf16.msra.mxu1 %v10672_v56  ;;  %v13016_v56 = vld [vmem:[#allocation30_spill] sm:$0xff] }
 0x7b5   :  { %v1515_v60 = vpop.f32.mrf.mxu0  ;;  %v1556_v38 = vpop.f32.mrf.mxu1 }
 0x7b6   :  { %v1563_v26 = vadd.f32 %v1515_v60, %v13013_v37  ;;  %v1565_v53 = vadd.f32 %v1556_v38, %v13015_v6 }
 0x7b7   :  { %v1517_v13 = vpop.f32.mrf.mxu0  ;;  %v1558_v11 = vpop.f32.mrf.mxu1 }
 0x7b8   :  { %v1567_v3 = vmul.f32 0.5, %v1563_v26  ;;  %v1564_v16 = vadd.f32 %v1517_v13, %v13014_v62  ;;  %v1566_v40 = vadd.f32 %v1558_v11, %v13016_v56  ;;  %v10707_v56 = vld [vmem:[%s12807_s10 + $0x60] ss:$8 sps:$4 sm:$0xff]  }
 0x7b9   :  { %v1519_v58 = vpop.f32.mrf.mxu0  ;;  %v1560_v18 = vpop.f32.mrf.mxu1  ;;  %13019 = vst [vmem:[#allocation28_spill] sm:$0xff] %v10707_v56 }
 0x7ba   :  { %9519 = vtanh.f32 %v1567_v3  ;;  %v1571_v49 = vmul.f32 0.5, %v1564_v16  ;;  %v1576_v8 = vmul.f32 0.5, %v1566_v40 }
 0x7bb   :  { %v1520_v17 = vpop.f32.mrf.mxu0  ;;  %v1561_v1 = vpop.f32.mrf.mxu1 }
 0x7bc   :  { %9521 = vtanh.f32 %v1571_v49  ;;  %v10714_v17 = vld [vmem:[%s12807_s10 + $0x54] ss:$8 sps:$4 sm:$0xff]  }
 0x7bd   :  { %9523 = vtanh.f32 %v1565_v53  ;;  %13020 = vst [vmem:[#allocation30_spill] sm:$0xff] %v10714_v17 }
 0x7be   :  { %9525 = vtanh.f32 %v1576_v8  ;;  %v10702_v8 = vld [vmem:[%s12807_s10 + $0x64] ss:$8 sps:$4 sm:$0xff]  }
 0x7bf   :  { %13018 = vst [vmem:[#allocation29_spill] sm:$0xff] %v10702_v8 }
 0x7c7   :  { %v9520_v23 = vpop.eup %9519 }
 0x7c8   :  { %v1569_v37 = vmul.f32 0.5, %v9520_v23 }
 0x7c9   :  { %v9522_v60 = vpop.eup %9521 }
 0x7ca   :  { %v1570_v44 = vadd.f32 0.5, %v1569_v37  ;;  %v1573_v26 = vmul.f32 0.5, %v9522_v60  ;;  %v9524_v62 = vpop.eup %9523  ;;  %v10719_v37 = vld [vmem:[%s12807_s10 + $0x50] ss:$8 sps:$4 sm:$0xff]   ;;  %v10726_v60 = vld [vmem:[%s12807_s10 + $0x44] ss:$8 sps:$4 sm:$0xff]  }
 0x7cb   :  { %v9526_v1 = vpop.eup %9525  ;;  %13021 = vst [vmem:[#allocation48_spill] sm:$0xff] %v10719_v37  ;;  %13022 = vst [vmem:[#allocation49_spill] sm:$0xff] %v10726_v60 }
 0x7cc   :  { %v1574_v58 = vadd.f32 0.5, %v1573_v26  ;;  %v1581_v18 = vmul.f32 %v9524_v62, %v1570_v44  ;;  %v1578_v49 = vmul.f32 0.5, %v9526_v1  ;;  %v10695_v44 = vld [vmem:[%s12807_s10 + $0x70] ss:$8 sps:$4 sm:$0xff]   ;;  %v10731_v26 = vld [vmem:[%s12807_s10 + $0x40] ss:$8 sps:$4 sm:$0xff]  }
 0x7cd   :  { %13017 = vst [vmem:[#allocation27_spill] sm:$0xff] %v10695_v44  ;;  %13023 = vst [vmem:[#allocation50_spill] sm:$0xff] %v10731_v26  ;;  %v10738_v62 = vld [vmem:[%s12807_s10 + $0x34] ss:$8 sps:$4 sm:$0xff]  }
 0x7ce   :  { %v1580_v3 = vmul.f32 %v1574_v58, %v10300_v14  ;;  %v1579_v53 = vadd.f32 0.5, %v1578_v49  ;;  %v10690_v14 = vld [vmem:[%s12807_s10 + $0x74] ss:$8 sps:$4 sm:$0xff]   ;;  %13024 = vst [vmem:[#allocation51_spill] sm:$0xff] %v10738_v62  ;;  %v10743_v58 = vld [vmem:[%s12807_s10 + $0x30] ss:$8 sps:$4 sm:$0xff]  }
 0x7cf   :  { %2215 = vmatprep.subr.bf16.mxu0 %v10690_v14  ;;  %13025 = vst [vmem:[#allocation52_spill] sm:$0xff] %v10743_v58  ;;  %v10762_v1 = vld [vmem:[%s12807_s10 + $0x14] ss:$8 sps:$4 sm:$0xff]   ;;  %v10767_v49 = vld [vmem:[%s12807_s10 + $0x10] ss:$8 sps:$4 sm:$0xff]  }
 0x7d0   :  { %v10683_v6 = vadd.f32 %v1581_v18, %v1580_v3  ;;  %v10750_v18 = vld [vmem:[%s12807_s10 + $0x24] ss:$8 sps:$4 sm:$0xff]   ;;  %v10755_v3 = vld [vmem:[%s12807_s10 + $0x20] ss:$8 sps:$4 sm:$0xff]   ;;  %13028 = vst [vmem:[#allocation55_spill] sm:$0xff] %v10762_v1  ;;  %13029 = vst [vmem:[#allocation56_spill] sm:$0xff] %v10767_v49 }
 0x7d1   :  { %13026 = vst [vmem:[#allocation53_spill] sm:$0xff] %v10750_v18  ;;  %13027 = vst [vmem:[#allocation54_spill] sm:$0xff] %v10755_v3 }
 0x7d2   :  { %9527 = vtanh.f32 %v10683_v6 }
 0x7df   :  { %v9528_v16 = vpop.eup %9527 }
 0x7e0   :  { %v1584_v40 = vmul.f32 %v9528_v16, %v1579_v53  ;;  %v10774_v53 = vld [vmem:[%s12807_s10 + $0x4] ss:$8 sps:$4 sm:$0xff]   ;;  %v10779_v16 = vld [vmem:[%s12807_s10] ss:$8 sps:$4 sm:$0xff]  }
 0x7e1   :  { %13030 = vst [vmem:[#allocation57_spill] sm:$0xff] %v10774_v53  ;;  %13031 = vst [vmem:[#allocation58_spill] sm:$0xff] %v10779_v16 }
 0x7e2   :  { %v1590_v11 = vpack.c.bf16 %v1584_v40, %v1584_v40  ;;  %v1657_v40 = vld [vmem:[%s12806_s9] sm:$0xf] }
 0x7e4   :  { %1591 = vst [vmem:[#allocation3 + $0x4] sm:$0xf] %v1590_v11  ;;  %v13032_v11 = vld [vmem:[#allocation13_spill] sm:$0xff] }
 0x7eb   :  { %v1592_v23 = vld [vmem:[#allocation3] sm:$0xff] }
 0x7ec   :  { %v7831_v13 = vcombine.high %v1592_v23, %v1592_v23  ;;  %v7830_v38 = vcombine.low %v1592_v23, %v1592_v23  ;;  %v1662_v23 = vrot.slane %v1657_v40, %v13032_v11 }
 0x7ee   :  { %2038 = vmatprep.mubr.bf16.mxu0 %v7831_v13  ;;  %2079 = vmatprep.mubr.bf16.mxu1 %v7831_v13  ;;  %v13033_v13 = vld [vmem:[#allocation16_spill] sm:$0xff] }
 0x7ef   :  { %2039 = vmatmul.mubr.bf16.vlgmr.msra.gmra.mxu0 %v7830_v38  ;;  %2080 = vmatmul.mubr.bf16.vlgmr.msra.gmra.mxu1 %v7830_v38  ;;  %v1666_v38 = vrot.slane %v1657_v40, %v13033_v13 }
 0x7f0   :  { %2247 = vmatprep.mubr.bf16.mxu0 %v12975_v48  ;;  %2216 = vmatpush1.bf16.msra.mxu0 %v10695_v44  ;;  %v13035_v48 = vld [vmem:[#allocation15_spill] sm:$0xff] }
 0x7f1   :  { %2217 = vmatprep.subr.bf16.mxu0 %v10702_v8  ;;  %v1674_v44 = vrot.slane %v1657_v40, %v13035_v48 }
 0x7f4   :  { %2218 = vmatpush1.bf16.msra.mxu0 %v10707_v56 }
 0x7f5   :  { %2219 = vmatprep.subr.bf16.mxu0 %v10714_v17 }
 0x7f8   :  { %2220 = vmatpush1.bf16.msra.mxu0 %v10719_v37 }
 0x7f9   :  { %2221 = vmatprep.subr.bf16.mxu0 %v10726_v60 }
 0x7fc   :  { %2222 = vmatpush1.bf16.msra.mxu0 %v10731_v26  ;;  %v13034_v26 = vld [vmem:[#allocation14_spill] sm:$0xff] }
 0x7fd   :  { %2223 = vmatprep.subr.bf16.mxu0 %v10738_v62 }
 0x800   :  { %2224 = vmatpush1.bf16.msra.mxu0 %v10743_v58 }
 0x801   :  { %2225 = vmatprep.subr.bf16.mxu0 %v10750_v18 }
 0x804   :  { %2226 = vmatpush1.bf16.msra.mxu0 %v10755_v3 }
 0x805   :  { %2227 = vmatprep.subr.bf16.mxu0 %v10762_v1 }
 0x808   :  { %2228 = vmatpush1.bf16.msra.mxu0 %v10767_v49 }
 0x809   :  { %2229 = vmatprep.subr.bf16.mxu0 %v10774_v53  ;;  %v1670_v53 = vrot.slane %v1657_v40, %v13034_v26  ;;  %v8980_v40 = vld [vmem:[%s12804_s7] sm:$0xff]  }
 0x80c   :  { %2230 = vmatpush1.bf16.msra.mxu0 %v10779_v16 }
 0x80d   :  { %2884 = vmatprep.subr.bf16.mxu0 %v10286_v42 }
 0x8af   :  { %v2040_v49 = vpop.f32.mrf.mxu0  ;;  %v2081_v1 = vpop.f32.mrf.mxu1 }
 0x8b0   :  { %v2041_v3 = vadd.f32 %v2040_v49, %v1662_v23  ;;  %v2082_v8 = vadd.f32 %v2081_v1, %v1670_v53  ;;  %v8978_v1 = vld [vmem:[%s12804_s7 + $0x8] sm:$0xff]   ;;  %v8979_v53 = vld [vmem:[%s12804_s7 + $0x40] sm:$0xff]  }
 0x8b1   :  { %v2042_v18 = vpop.f32.mrf.mxu0  ;;  %v2083_v58 = vpop.f32.mrf.mxu1 }
 0x8b2   :  { %v2088_v62 = vmul.f32 0.5, %v2041_v3  ;;  %v2043_v60 = vadd.f32 %v2042_v18, %v1666_v38  ;;  %v2084_v21 = vadd.f32 %v2083_v58, %v1674_v44 }
 0x8b3   :  { %v2044_v16 = vpop.f32.mrf.mxu0  ;;  %v2085_v37 = vpop.f32.mrf.mxu1 }
 0x8b4   :  { %9529 = vtanh.f32 %v2088_v62  ;;  %v2092_v42 = vmul.f32 0.5, %v2043_v60  ;;  %v2097_v51 = vmul.f32 0.5, %v2084_v21 }
 0x8b5   :  { %v2045_v17 = vpop.f32.mrf.mxu0  ;;  %v2086_v56 = vpop.f32.mrf.mxu1 }
 0x8b6   :  { %9531 = vtanh.f32 %v2092_v42 }
 0x8b7   :  { %9533 = vtanh.f32 %v2082_v8 }
 0x8b8   :  { %9535 = vtanh.f32 %v2097_v51 }
 0x8c1   :  { %v9530_v49 = vpop.eup %9529 }
 0x8c2   :  { %v2090_v23 = vmul.f32 0.5, %v9530_v49 }
 0x8c3   :  { %v9532_v20 = vpop.eup %9531 }
 0x8c4   :  { %v2091_v3 = vadd.f32 0.5, %v2090_v23  ;;  %v2094_v47 = vmul.f32 0.5, %v9532_v20  ;;  %v9534_v16 = vpop.eup %9533 }
 0x8c5   :  { %v9536_v56 = vpop.eup %9535 }
 0x8c6   :  { %v2095_v18 = vadd.f32 0.5, %v2094_v47  ;;  %v2102_v60 = vmul.f32 %v9534_v16, %v2091_v3  ;;  %v2099_v62 = vmul.f32 0.5, %v9536_v56  ;;  %v13038_v16 = vld [vmem:[#allocation18_spill] sm:$0xff]  ;;  %v13041_v56 = vld [vmem:[#allocation20_spill] sm:$0xff] }
 0x8c8   :  { %v2101_v37 = vmul.f32 %v2095_v18, %v10683_v6  ;;  %v2100_v8 = vadd.f32 0.5, %v2099_v62  ;;  %v12864_v18 = vmov 1.0|1.0   ;;  %v13042_v62 = vld [vmem:[#allocation22_spill] sm:$0xff] }
 0x8ca   :  { %v10792_v17 = vadd.f32 %v2102_v60, %v2101_v37  ;;  %v13039_v37 = vld [vmem:[#allocation19_spill] sm:$0xff]  ;;  %v13040_v60 = vld [vmem:[#allocation21_spill] sm:$0xff] }
 0x8cc   :  { %9537 = vtanh.f32 %v10792_v17 }
 0x8d9   :  { %v9538_v44 = vpop.eup %9537 }
 0x8da   :  { %v2105_v21 = vmul.f32 %v9538_v44, %v2100_v8  ;;  %v13043_v8 = vld [vmem:[#allocation23_spill] sm:$0xff]  ;;  %v13048_v44 = vld [vmem:[#allocation32_spill] sm:$0xff] }
 0x8dc   :  { %v2106_v58 = vpack.c.bf16 %v2105_v21, %v2105_v21  ;;  %v13049_v21 = vld [vmem:[#allocation33_spill] sm:$0xff] }
 0x8de   :  { %2248 = vmatmul.mubr.bf16.vlgmr.msra.gmra.mxu0 %v2106_v58  ;;  %2469 = vst [vmem:[#allocation3 + $0x4] sm:$0xf] %v2106_v58  ;;  %v13050_v58 = vld [vmem:[#allocation34_spill] sm:$0xff] }
 0x8df   :  { %2885 = vmatpush1.bf16.msra.mxu0 %v10306_v28  ;;  %v2123_v28 = vld [vmem:[%s12808_s11] sm:$0x3] }
 0x8e0   :  { %2886 = vmatprep.subr.bf16.mxu0 %v10316_v63  ;;  %v2128_v63 = vrot.slane %v2123_v28, %v13032_v11 }
 0x8e3   :  { %2887 = vmatpush1.bf16.msra.mxu0 %v10328_v52  ;;  %v2132_v52 = vrot.slane %v2123_v28, %v13033_v13  ;;  %v13051_v28 = vld [vmem:[#allocation35_spill] sm:$0xff] }
 0x8e4   :  { %2888 = vmatprep.subr.bf16.mxu0 %v10342_v55 }
 0x8e7   :  { %2889 = vmatpush1.bf16.msra.mxu0 %v10352_v10 }
 0x8e8   :  { %2890 = vmatprep.subr.bf16.mxu0 %v10366_v43 }
 0x8eb   :  { %2891 = vmatpush1.bf16.msra.mxu0 %v10376_v33 }
 0x8ec   :  { %2892 = vmatprep.subr.bf16.mxu0 %v10390_v36  ;;  %v13036_v36 = vlaneseq }
 0x8ef   :  { %2893 = vmatpush1.bf16.msra.mxu0 %v10400_v29  ;;  %v10839_v29 = vand.u32 127, %v13036_v36  ;;  %v13061_v36 = vld [vmem:[#allocation45_spill] sm:$0xff] }
 0x8f0   :  { %2894 = vmatprep.subr.bf16.mxu0 %v10414_v9 }
 0x8f1   :  { %v10842_v9 = vadd.s32 128, %v10839_v29 }
 0x8f3   :  { %2895 = vmatpush1.bf16.msra.mxu0 %v10424_v32 }
 0x8f4   :  { %2896 = vmatprep.subr.bf16.mxu0 %v10438_v27 }
 0x8f7   :  { %2897 = vmatpush1.bf16.msra.mxu0 %v10448_v5 }
 0x8f8   :  { %2898 = vmatprep.subr.bf16.mxu0 %v10462_v46 }
 0x8fb   :  { %2899 = vmatpush1.bf16.msra.mxu0 %v10472_v50 }
 0x8fc   :  { %2900 = vmatprep.subr.bf16.mxu0 %v10486_v54 }
 0x8ff   :  { %2901 = vmatpush2.bf16.msra.mxu0 %v10496_v12  ;;  %v8965_v12 = vld [vmem:[%s12804_s7 + $0x78] sm:$0xff]  }
 0x900   :  { %2902 = vmatprep.subr.bf16.mxu0 %v10510_v57  ;;  %v8966_v57 = vld [vmem:[%s12804_s7 + $0x38] sm:$0xff]   ;;  %8582 = vmatprep.subr.bf16.mxu1 %v8965_v12  ;;  %v2460_v12 = vld [vmem:[%s12800_s3] sm:$0xf] }
 0x901   :  { %8583 = vmatpush3.bf16.msra.mxu1 %v8966_v57 }
 0x903   :  { %2903 = vmatpush2.bf16.msra.mxu0 %v10520_v61  ;;  %v8967_v61 = vld [vmem:[%s12804_s7 + $0x70] sm:$0xff]  }
 0x904   :  { %2904 = vmatprep.subr.bf16.mxu0 %v10534_v22  ;;  %v8968_v22 = vld [vmem:[%s12804_s7 + $0x30] sm:$0xff]   ;;  %8584 = vmatprep.subr.bf16.mxu1 %v8967_v61 }
 0x905   :  { %8585 = vmatpush3.bf16.msra.mxu1 %v8968_v22 }
 0x907   :  { %2905 = vmatpush2.bf16.msra.mxu0 %v10544_v2  ;;  %v8969_v2 = vld [vmem:[%s12804_s7 + $0x68] sm:$0xff]  }
 0x908   :  { %2906 = vmatprep.subr.bf16.mxu0 %v10558_v7  ;;  %v8970_v7 = vld [vmem:[%s12804_s7 + $0x28] sm:$0xff]   ;;  %8586 = vmatprep.subr.bf16.mxu1 %v8969_v2 }
 0x909   :  { %8587 = vmatpush3.bf16.msra.mxu1 %v8970_v7 }
 0x90b   :  { %2907 = vmatpush2.bf16.msra.mxu0 %v10568_v25  ;;  %v8971_v25 = vld [vmem:[%s12804_s7 + $0x60] sm:$0xff]  }
 0x90c   :  { %2908 = vmatprep.subr.bf16.mxu0 %v10582_v15  ;;  %v8972_v15 = vld [vmem:[%s12804_s7 + $0x20] sm:$0xff]   ;;  %8588 = vmatprep.subr.bf16.mxu1 %v8971_v25 }
 0x90d   :  { %8589 = vmatpush3.bf16.msra.mxu1 %v8972_v15 }
 0x90f   :  { %2909 = vmatpush2.bf16.msra.mxu0 %v10592_v34  ;;  %v8973_v34 = vld [vmem:[%s12804_s7 + $0x58] sm:$0xff]  }
 0x910   :  { %2910 = vmatprep.subr.bf16.mxu0 %v10609_v19  ;;  %v8974_v19 = vld [vmem:[%s12804_s7 + $0x18] sm:$0xff]   ;;  %8590 = vmatprep.subr.bf16.mxu1 %v8973_v34 }
 0x911   :  { %8591 = vmatpush3.bf16.msra.mxu1 %v8974_v19  ;;  %v13064_v34 = vld [vmem:[#allocation27_spill] sm:$0xff]  ;;  %v13065_v19 = vmov 0  }
 0x913   :  { %2911 = vmatpush2.bf16.msra.mxu0 %v10619_v41  ;;  %v8975_v41 = vld [vmem:[%s12804_s7 + $0x50] sm:$0xff]  }
 0x914   :  { %2912 = vmatprep.subr.bf16.mxu0 %v10633_v24  ;;  %8592 = vmatprep.subr.bf16.mxu1 %v8975_v41  ;;  %v8977_v24 = vld [vmem:[%s12804_s7 + $0x48] sm:$0xff]  }
 0x915   :  { %v13066_v41 = vld [vmem:[#allocation29_spill] sm:$0xff] }
 0x917   :  { %2913 = vmatpush2.bf16.msra.mxu0 %v10643_v31 }
 0x918   :  { %2914 = vmatprep.subr.bf16.mxu0 %v10657_v35 }
 0x91b   :  { %2915 = vmatpush2.bf16.msra.mxu0 %v10667_v30  ;;  %v8976_v30 = vld [vmem:[%s12804_s7 + $0x10] sm:$0xff]  }
 0x91c   :  { %3093 = vmatprep.subr.bf16.mxu0 %v10690_v14  ;;  %8593 = vmatpush3.bf16.msra.mxu1 %v8976_v30  ;;  %v13067_v30 = vld [vmem:[#allocation28_spill] sm:$0xff] }
 0x91d   :  { %8594 = vmatprep.subr.bf16.mxu1 %v8977_v24  ;;  %v13068_v24 = vld [vmem:[#allocation30_spill] sm:$0xff] }
 0x920   :  { %8595 = vmatpush3.bf16.msra.mxu1 %v8978_v1  ;;  %v13073_v1 = vld [vmem:[#allocation52_spill] sm:$0xff] }
 0x921   :  { %8596 = vmatprep.subr.bf16.mxu1 %v8979_v53  ;;  %v13074_v53 = vld [vmem:[#allocation53_spill] sm:$0xff] }
 0x924   :  { %8597 = vmatpush3.bf16.msra.mxu1 %v8980_v40  ;;  %v13075_v40 = vld [vmem:[#allocation54_spill] sm:$0xff] }
 0x925   :  { %2925 = vmatprep.subr.bf16.mxu1 %v10291_v45  ;;  %v13037_v45 = vld [vmem:[#allocation17_spill] sm:$0xff] }
 0x99e   :  { %v2249_v55 = vpop.f32.mrf.mxu0 }
 0x99f   :  { %v2250_v10 = vadd.f32 %v2249_v55, %v2128_v63  ;;  %v13052_v63 = vld [vmem:[#allocation36_spill] sm:$0xff]  ;;  %v13054_v55 = vld [vmem:[#allocation38_spill] sm:$0xff] }
 0x9a0   :  { %v2251_v47 = vpop.f32.mrf.mxu0 }
 0x9a1   :  { %2259 = vst [vmem:[%s12809_s12] sm:$0xff] %v2250_v10  ;;  %v2252_v43 = vadd.f32 %v2251_v47, %v2132_v52  ;;  %v13053_v52 = vld [vmem:[#allocation37_spill] sm:$0xff]  ;;  %v13056_v47 = vld [vmem:[#allocation40_spill] sm:$0xff] }
 0x9a2   :  { %v2253_v20 = vpop.f32.mrf.mxu0 }
 0x9a3   :  { %2260 = vst [vmem:[%s12809_s12 + $0x8] sm:$0xff] %v2252_v43  ;;  %v2261_v33 = vmax.f32 %v2250_v10, %v2252_v43  ;;  %v13058_v20 = vld [vmem:[#allocation42_spill] sm:$0xff] }
 0x9a4   :  { %v2254_v51 = vpop.f32.mrf.mxu0 }
 0x9a5   :  { %2262 = vmax.xlane.f32.xlu0 %v2261_v33  ;;  %v13059_v33 = vld [vmem:[#allocation43_spill] sm:$0xff]  ;;  %v13060_v51 = vld [vmem:[#allocation44_spill] sm:$0xff] }
 0xa2e   :  { %v2263_v32 = vpop.xlane.xlu0 %2262 }
 0xa2f   :  { %vm2264_vm0 = vcmp.eq.f32.partialorder %v2250_v10, %v2263_v32  ;;  %vm2265_vm1 = vcmp.eq.f32.partialorder %v2252_v43, %v2263_v32  ;;  %v13055_v10 = vld [vmem:[#allocation39_spill] sm:$0xff]  ;;  %v13057_v43 = vld [vmem:[#allocation41_spill] sm:$0xff]  ;;  %v13062_v32 = vld [vmem:[#allocation46_spill] sm:$0xff] }
 0xa30   :  { %v2266_v27 = vsel %vm2264_vm0, %v10839_v29, 256  ;;  %v2267_v5 = vsel %vm2265_vm1, %v10842_v9, 256 }
 0xa31   :  { %vm2268_vm2 = vcmp.lt.s32.totalorder %v2266_v27, %v2267_v5 }
 0xa32   :  { %v2269_v46 = vsel %vm2268_vm2, %v2266_v27, %v2267_v5  ;;  %v13063_v27 = vld [vmem:[#allocation47_spill] sm:$0xff] }
 0xa33   :  { %v2271_v50 = vshra.s32 %v2269_v46, 16  ;;  %v2270_v31 = vand.u32 65535, %v2269_v46  ;;  %v2465_v46 = vstv %s2464_s19 }
 0xa34   :  { %vm2466_vm8 = vcmp.eq.s32.totalorder %v2465_v46, 1 }
 0xa35   :  { %v2273_v54 = vcvt.s32.f32 %v2271_v50  ;;  %v2272_v6 = vcvt.s32.f32 %v2270_v31  ;;  %v13069_v31 = vld [vmem:[#allocation48_spill] sm:$0xff] }
 0xa37   :  { %2274 = vmin.xlane.f32.xlu0 %v2273_v54 }
 0xac0   :  { %v2275_v35 = vpop.xlane.xlu0 %2274 }
 0xac1   :  { %vm2276_vm3 = vcmp.eq.f32.partialorder %v2273_v54, %v2275_v35  ;;  %v2281_v38 = vcvt.f32.s32 %v2275_v35  ;;  %v13070_v35 = vld [vmem:[#allocation49_spill] sm:$0xff] }
 0xac2   :  { %v2277_v14 = vsel %vm2276_vm3, %v2272_v6, inf  ;;  %v13071_v6 = vld [vmem:[#allocation50_spill] sm:$0xff] }
 0xac3   :  { %2278 = vmin.xlane.f32.xlu1 %v2277_v14  ;;  %v2282_v49 = vshll.u32 %v2281_v38, 16  ;;  %v13072_v14 = vld [vmem:[#allocation51_spill] sm:$0xff] }
 0xac4   :  { %v13076_v38 = vld [vmem:[#allocation55_spill] sm:$0xff] }
 0xb4c   :  { %v2279_v42 = vpop.xlane.xlu1 %2278 }
 0xb4d   :  { %v2280_v23 = vcvt.f32.s32 %v2279_v42  ;;  %v13077_v42 = vld [vmem:[#allocation56_spill] sm:$0xff] }
 0xb4f   :  { %v2283_v3 = vadd.s32 %v2282_v49, %v2280_v23  ;;  %v13078_v49 = vld [vmem:[#allocation57_spill] sm:$0xff]  ;;  %v13079_v23 = vld [vmem:[#allocation58_spill] sm:$0xff] }
 0xb51   :  { %vm2284_vm4 = vcmp.eq.s32.totalorder %v10839_v29, %v2283_v3  ;;  %vm2285_vm5 = vcmp.eq.s32.totalorder %v10842_v9, %v2283_v3  ;;  %v2535_v3 = vld [vmem:[%s12806_s9] sm:$0xf] }
 0xb52   :  { %vm7932_vm6 = vmpackc.low %vm2284_vm4, %vm2284_vm4 }
 0xb53   :  { %vm7930_vm7 = vmpackc.low %vm2285_vm5, %vm2285_vm5 }
 0xb54   :  { %7931 = vmatprep.mubr.msk.bf16.mxu1 %vm7930_vm7, %v12864_v18 }
 0xb55   :  { %7933 = vmatmul.mubr.msk.bf16.vlgmr.msra.gmra.mxu1 %vm7932_vm6, %v12864_v18 }
 0xb56   :  { %2926 = vmatpush1.bf16.msra.mxu1 %v10311_v59  ;;  %v13044_v59 = vld [vmem:[#allocation25_spill] sm:$0xff] }
 0xb57   :  { %2927 = vmatprep.subr.bf16.mxu1 %v10321_v39  ;;  %v13045_v39 = vld [vmem:[#allocation24_spill] sm:$0xff] }
 0xb5a   :  { %2928 = vmatpush1.bf16.msra.mxu1 %v10333_v4  ;;  %v13046_v4 = vld [vmem:[#allocation26_spill] sm:$0xff] }
 0xb5b   :  { %2929 = vmatprep.subr.bf16.mxu1 %v10347_v0  ;;  %v13047_v0 = vld [vmem:[#allocation31_spill] sm:$0xff] }
 0xb5e   :  { %2930 = vmatpush1.bf16.msra.mxu1 %v13037_v45  ;;  %v2540_v45 = vrot.slane %v2535_v3, %v13032_v11 }
 0xb5f   :  { %2931 = vmatprep.subr.bf16.mxu1 %v13038_v16  ;;  %v2544_v16 = vrot.slane %v2535_v3, %v13033_v13 }
 0xb62   :  { %2932 = vmatpush1.bf16.msra.mxu1 %v13039_v37 }
 0xb63   :  { %2933 = vmatprep.subr.bf16.mxu1 %v13040_v60 }
 0xb66   :  { %2934 = vmatpush1.bf16.msra.mxu1 %v13041_v56 }
 0xb67   :  { %2935 = vmatprep.subr.bf16.mxu1 %v13042_v62 }
 0xb6a   :  { %2936 = vmatpush1.bf16.msra.mxu1 %v13043_v8 }
 0xb6b   :  { %2937 = vmatprep.subr.bf16.mxu1 %v13044_v59 }
 0xb6e   :  { %2938 = vmatpush1.bf16.msra.mxu1 %v13045_v39  ;;  %v2548_v39 = vrot.slane %v2535_v3, %v13034_v26 }
 0xb6f   :  { %2939 = vmatprep.subr.bf16.mxu1 %v13046_v4 }
 0xb72   :  { %2940 = vmatpush1.bf16.msra.mxu1 %v13047_v0 }
 0xb73   :  { %2941 = vmatprep.subr.bf16.mxu1 %v13048_v44 }
 0xb76   :  { %2942 = vmatpush2.bf16.msra.mxu1 %v13049_v21 }
 0xb77   :  { %2943 = vmatprep.subr.bf16.mxu1 %v13050_v58 }
 0xb7a   :  { %2944 = vmatpush2.bf16.msra.mxu1 %v13051_v28 }
 0xb7b   :  { %2945 = vmatprep.subr.bf16.mxu1 %v13052_v63 }
 0xb7e   :  { %2946 = vmatpush2.bf16.msra.mxu1 %v13053_v52  ;;  %v2552_v52 = vrot.slane %v2535_v3, %v13035_v48  ;;  %v8987_v3 = vld [vmem:[%s12804_s7 + $0x68] sm:$0xff]  }
 0xb7f   :  { %2947 = vmatprep.subr.bf16.mxu1 %v13054_v55 }
 0xb82   :  { %2948 = vmatpush2.bf16.msra.mxu1 %v13055_v10 }
 0xb83   :  { %2949 = vmatprep.subr.bf16.mxu1 %v13056_v47 }
 0xb86   :  { %2950 = vmatpush2.bf16.msra.mxu1 %v13057_v43 }
 0xb87   :  { %2951 = vmatprep.subr.bf16.mxu1 %v13058_v20 }
 0xb8a   :  { %2952 = vmatpush2.bf16.msra.mxu1 %v13059_v33 }
 0xb8b   :  { %2953 = vmatprep.subr.bf16.mxu1 %v13060_v51 }
 0xb8e   :  { %2954 = vmatpush2.bf16.msra.mxu1 %v13061_v36 }
 0xb8f   :  { %2955 = vmatprep.subr.bf16.mxu1 %v13062_v32 }
 0xb92   :  { %2956 = vmatpush2.bf16.msra.mxu1 %v13063_v27 }
 0xc15   :  { %v8598_v5 = vpop.f32.mrf.mxu1 }
 0xc17   :  { %v8599_v50 = vpop.f32.mrf.mxu1 }
 0xc18   :  { %v8600_v54 = vadd.f32 %v8599_v50, %v8598_v5 }
 0xc19   :  { %v8601_v57 = vpop.f32.mrf.mxu1 }
 0xc1a   :  { %v2463_v61 = vpack.c.bf16 %v8600_v54, %v8600_v54 }
 0xc1b   :  { %v8602_v22 = vpop.f32.mrf.mxu1 }
 0xc1c   :  { %v2467_v2 = vsel %vm2466_vm8, %v2460_v12, %v2463_v61 }
 0xc1d   :  { %2468 = vst [vmem:[#allocation3] sm:$0xf] %v2467_v2  ;;  %v3001_v2 = vld [vmem:[%s12808_s11] sm:$0x3] }
 0xc24   :  { %v2470_v7 = vld [vmem:[#allocation3] sm:$0xff] }
 0xc25   :  { %v7935_v25 = vcombine.high %v2470_v7, %v2470_v7  ;;  %v7934_v15 = vcombine.low %v2470_v7, %v2470_v7  ;;  %v3006_v7 = vrot.slane %v3001_v2, %v13032_v11 }
 0xc27   :  { %2916 = vmatprep.mubr.bf16.mxu0 %v7935_v25  ;;  %2957 = vmatprep.mubr.bf16.mxu1 %v7935_v25 }
 0xc28   :  { %2917 = vmatmul.mubr.bf16.vlgmr.msra.gmra.mxu0 %v7934_v15  ;;  %2958 = vmatmul.mubr.bf16.vlgmr.msra.gmra.mxu1 %v7934_v15 }
 0xc29   :  { %3094 = vmatpush1.bf16.msra.mxu0 %v13064_v34  ;;  %3125 = vmatprep.mubr.bf16.mxu0 %v13065_v19 }
 0xc2a   :  { %3095 = vmatprep.subr.bf16.mxu0 %v13066_v41 }
 0xc2d   :  { %3096 = vmatpush1.bf16.msra.mxu0 %v13067_v30 }
 0xc2e   :  { %3097 = vmatprep.subr.bf16.mxu0 %v13068_v24 }
 0xc31   :  { %3098 = vmatpush1.bf16.msra.mxu0 %v13069_v31 }
 0xc32   :  { %3099 = vmatprep.subr.bf16.mxu0 %v13070_v35 }
 0xc35   :  { %3100 = vmatpush1.bf16.msra.mxu0 %v13071_v6 }
 0xc36   :  { %3101 = vmatprep.subr.bf16.mxu0 %v13072_v14 }
 0xc39   :  { %3102 = vmatpush1.bf16.msra.mxu0 %v13073_v1 }
 0xc3a   :  { %3103 = vmatprep.subr.bf16.mxu0 %v13074_v53 }
 0xc3d   :  { %3104 = vmatpush1.bf16.msra.mxu0 %v13075_v40 }
 0xc3e   :  { %3105 = vmatprep.subr.bf16.mxu0 %v13076_v38  ;;  %v8983_v38 = vld [vmem:[%s12804_s7 + $0x78] sm:$0xff]  }
 0xc3f   :  { %8604 = vmatprep.subr.bf16.mxu1 %v8983_v38  ;;  %v11211_v38 = vld [vmem:[%s12805_s8 + $0x8c] ss:$16 sps:$4 sm:$0xff]  }
 0xc40   :  { %13083 = vst [vmem:[#allocation15_spill] sm:$0xff] %v11211_v38 }
 0xc41   :  { %3106 = vmatpush1.bf16.msra.mxu0 %v13077_v42  ;;  %v8984_v42 = vld [vmem:[%s12804_s7 + $0x38] sm:$0xff]  }
 0xc42   :  { %3107 = vmatprep.subr.bf16.mxu0 %v13078_v49  ;;  %v8985_v49 = vld [vmem:[%s12804_s7 + $0x70] sm:$0xff]   ;;  %8605 = vmatpush3.bf16.msra.mxu1 %v8984_v42  ;;  %v11217_v42 = vld [vmem:[%s12805_s8 + $0x88] ss:$16 sps:$4 sm:$0xff]  }
 0xc43   :  { %8606 = vmatprep.subr.bf16.mxu1 %v8985_v49  ;;  %13084 = vst [vmem:[#allocation17_spill] sm:$0xff] %v11217_v42  ;;  %v11223_v49 = vld [vmem:[%s12805_s8 + $0x6c] ss:$16 sps:$4 sm:$0xff]  }
 0xc44   :  { %13085 = vst [vmem:[#allocation18_spill] sm:$0xff] %v11223_v49 }
 0xc45   :  { %3108 = vmatpush1.bf16.msra.mxu0 %v13079_v23  ;;  %v8986_v23 = vld [vmem:[%s12804_s7 + $0x30] sm:$0xff]  }
 0xc46   :  { %8607 = vmatpush3.bf16.msra.mxu1 %v8986_v23  ;;  %v11229_v23 = vld [vmem:[%s12805_s8 + $0x68] ss:$16 sps:$4 sm:$0xff]  }
 0xc47   :  { %8608 = vmatprep.subr.bf16.mxu1 %v8987_v3  ;;  %13086 = vst [vmem:[#allocation19_spill] sm:$0xff] %v11229_v23  ;;  %v11235_v3 = vld [vmem:[%s12805_s8 + $0x4c] ss:$16 sps:$4 sm:$0xff]  }
 0xc48   :  { %13087 = vst [vmem:[#allocation21_spill] sm:$0xff] %v11235_v3 }
 0xce8   :  { %v2918_v37 = vpop.f32.mrf.mxu0  ;;  %v2959_v60 = vpop.f32.mrf.mxu1 }
 0xce9   :  { %v2919_v56 = vadd.f32 %v2918_v37, %v2540_v45  ;;  %v2960_v63 = vadd.f32 %v2959_v60, %v2548_v39  ;;  %v8988_v45 = vld [vmem:[%s12804_s7 + $0x28] sm:$0xff]   ;;  %v8990_v37 = vld [vmem:[%s12804_s7 + $0x20] sm:$0xff]   ;;  %v8991_v60 = vld [vmem:[%s12804_s7 + $0x58] sm:$0xff]  }
 0xcea   :  { %v2920_v62 = vpop.f32.mrf.mxu0  ;;  %v2961_v8 = vpop.f32.mrf.mxu1  ;;  %8609 = vmatpush3.bf16.msra.mxu1 %v8988_v45  ;;  %v11241_v45 = vld [vmem:[%s12805_s8 + $0x48] ss:$16 sps:$4 sm:$0xff]  }
 0xceb   :  { %v2966_v59 = vmul.f32 0.5, %v2919_v56  ;;  %v2921_v4 = vadd.f32 %v2920_v62, %v2544_v16  ;;  %v2962_v55 = vadd.f32 %v2961_v8, %v2552_v52  ;;  %v8989_v16 = vld [vmem:[%s12804_s7 + $0x60] sm:$0xff]   ;;  %v8992_v56 = vld [vmem:[%s12804_s7 + $0x18] sm:$0xff]   ;;  %v8993_v62 = vld [vmem:[%s12804_s7 + $0x50] sm:$0xff]   ;;  %13088 = vst [vmem:[#allocation20_spill] sm:$0xff] %v11241_v45 }
 0xcec   :  { %v2922_v0 = vpop.f32.mrf.mxu0  ;;  %v2963_v44 = vpop.f32.mrf.mxu1  ;;  %8610 = vmatprep.subr.bf16.mxu1 %v8989_v16  ;;  %v8994_v8 = vld [vmem:[%s12804_s7 + $0x10] sm:$0xff]   ;;  %v11247_v16 = vld [vmem:[%s12805_s8 + $0x2c] ss:$16 sps:$4 sm:$0xff]  }
 0xced   :  { %9539 = vtanh.f32 %v2966_v59  ;;  %v2970_v21 = vmul.f32 0.5, %v2921_v4  ;;  %v2975_v10 = vmul.f32 0.5, %v2962_v55  ;;  %v8995_v59 = vld [vmem:[%s12804_s7 + $0x48] sm:$0xff]   ;;  %v11032_v52 = vld [vmem:[%s12805_s8 + $0xe4] ss:$16 sps:$4 sm:$0xff]   ;;  %13089 = vst [vmem:[#allocation22_spill] sm:$0xff] %v11247_v16 }
 0xcee   :  { %v2923_v58 = vpop.f32.mrf.mxu0  ;;  %v2964_v28 = vpop.f32.mrf.mxu1  ;;  %8611 = vmatpush3.bf16.msra.mxu1 %v8990_v37  ;;  %v11037_v55 = vld [vmem:[%s12805_s8 + $0xec] ss:$16 sps:$4 sm:$0xff]   ;;  %3763 = vmatprep.subr.bf16.mxu0 %v11032_v52  ;;  %v11253_v37 = vld [vmem:[%s12805_s8 + $0x28] ss:$16 sps:$4 sm:$0xff]  }
 0xcef   :  { %9541 = vtanh.f32 %v2970_v21  ;;  %8612 = vmatprep.subr.bf16.mxu1 %v8991_v60  ;;  %v8996_v21 = vld [vmem:[%s12804_s7 + $0x8] sm:$0xff]   ;;  %v8997_v58 = vld [vmem:[%s12804_s7 + $0x40] sm:$0xff]   ;;  %13090 = vst [vmem:[#allocation23_spill] sm:$0xff] %v11253_v37 }
 0xcf0   :  { %9543 = vtanh.f32 %v2960_v63  ;;  %v8998_v28 = vld [vmem:[%s12804_s7] sm:$0xff]   ;;  %v11259_v60 = vld [vmem:[%s12805_s8 + $0xc] ss:$16 sps:$4 sm:$0xff]  }
 0xcf1   :  { %9545 = vtanh.f32 %v2975_v10  ;;  %v11027_v63 = vld [vmem:[%s12805_s8 + $0xe0] ss:$16 sps:$4 sm:$0xff]   ;;  %v11042_v10 = vld [vmem:[%s12805_s8 + $0xc4] ss:$16 sps:$4 sm:$0xff]   ;;  %13091 = vst [vmem:[#allocation25_spill] sm:$0xff] %v11259_v60 }
 0xcf2   :  { %8613 = vmatpush3.bf16.msra.mxu1 %v8992_v56  ;;  %v11265_v56 = vld [vmem:[%s12805_s8 + $0x8] ss:$16 sps:$4 sm:$0xff]  }
 0xcf3   :  { %8614 = vmatprep.subr.bf16.mxu1 %v8993_v62  ;;  %13092 = vst [vmem:[#allocation24_spill] sm:$0xff] %v11265_v56  ;;  %v11271_v62 = vld [vmem:[%s12805_s8 + $0x1ec] ss:$16 sps:$4 sm:$0xff]  }
 0xcf4   :  { %13093 = vst [vmem:[#allocation26_spill] sm:$0xff] %v11271_v62 }
 0xcf6   :  { %8615 = vmatpush3.bf16.msra.mxu1 %v8994_v8  ;;  %v11277_v8 = vld [vmem:[%s12805_s8 + $0x1e8] ss:$16 sps:$4 sm:$0xff]  }
 0xcf7   :  { %8616 = vmatprep.subr.bf16.mxu1 %v8995_v59  ;;  %13094 = vst [vmem:[#allocation31_spill] sm:$0xff] %v11277_v8  ;;  %v11283_v59 = vld [vmem:[%s12805_s8 + $0x1cc] ss:$16 sps:$4 sm:$0xff]  }
 0xcf8   :  { %13095 = vst [vmem:[#allocation32_spill] sm:$0xff] %v11283_v59 }
 0xcfa   :  { %v9540_v47 = vpop.eup %9539  ;;  %8617 = vmatpush3.bf16.msra.mxu1 %v8996_v21  ;;  %v11313_v21 = vld [vmem:[%s12805_s8 + $0x188] ss:$16 sps:$4 sm:$0xff]  }
 0xcfb   :  { %v2968_v43 = vmul.f32 0.5, %v9540_v47  ;;  %8618 = vmatprep.subr.bf16.mxu1 %v8997_v58  ;;  %v11050_v47 = vld [vmem:[%s12805_s8 + $0xc0] ss:$16 sps:$4 sm:$0xff]   ;;  %13100 = vst [vmem:[#allocation37_spill] sm:$0xff] %v11313_v21  ;;  %v11320_v58 = vld [vmem:[%s12805_s8 + $0x164] ss:$16 sps:$4 sm:$0xff]  }
 0xcfc   :  { %v9542_v20 = vpop.eup %9541 }
 0xcfd   :  { %v2969_v33 = vadd.f32 0.5, %v2968_v43  ;;  %v2972_v51 = vmul.f32 0.5, %v9542_v20  ;;  %v9544_v32 = vpop.eup %9543  ;;  %v11056_v43 = vld [vmem:[%s12805_s8 + $0xa4] ss:$16 sps:$4 sm:$0xff]   ;;  %v11062_v20 = vld [vmem:[%s12805_s8 + $0xa0] ss:$16 sps:$4 sm:$0xff]  }
 0xcfe   :  { %v9546_v50 = vpop.eup %9545  ;;  %8619 = vmatpush3.bf16.msra.mxu1 %v8998_v28  ;;  %v11325_v28 = vld [vmem:[%s12805_s8 + $0x16c] ss:$16 sps:$4 sm:$0xff]  }
 0xcff   :  { %v2973_v36 = vadd.f32 0.5, %v2972_v51  ;;  %v2980_v5 = vmul.f32 %v9544_v32, %v2969_v33  ;;  %v2977_v54 = vmul.f32 0.5, %v9546_v50  ;;  %3804 = vmatprep.subr.bf16.mxu1 %v11037_v55  ;;  %v11068_v33 = vld [vmem:[%s12805_s8 + $0x84] ss:$16 sps:$4 sm:$0xff]   ;;  %v11074_v51 = vld [vmem:[%s12805_s8 + $0x80] ss:$16 sps:$4 sm:$0xff]  }
 0xd00   :  { %v11086_v32 = vld [vmem:[%s12805_s8 + $0x60] ss:$16 sps:$4 sm:$0xff]   ;;  %v11104_v50 = vld [vmem:[%s12805_s8 + $0x24] ss:$16 sps:$4 sm:$0xff]   ;;  %13101 = vst [vmem:[#allocation38_spill] sm:$0xff] %v11325_v28 }
 0xd01   :  { %v2979_v27 = vmul.f32 %v2973_v36, %v10792_v17  ;;  %v2978_v12 = vadd.f32 0.5, %v2977_v54  ;;  %v3010_v17 = vrot.slane %v3001_v2, %v13033_v13  ;;  %v11080_v36 = vld [vmem:[%s12805_s8 + $0x64] ss:$16 sps:$4 sm:$0xff]   ;;  %v11110_v54 = vld [vmem:[%s12805_s8 + $0x20] ss:$16 sps:$4 sm:$0xff]  }
 0xd02   :  { %v11140_v2 = vld [vmem:[%s12805_s8 + $0x1c4] ss:$16 sps:$4 sm:$0xff]  }
 0xd03   :  { %v10957_v46 = vadd.f32 %v2980_v5, %v2979_v27  ;;  %v11092_v27 = vld [vmem:[%s12805_s8 + $0x44] ss:$16 sps:$4 sm:$0xff]   ;;  %v11098_v5 = vld [vmem:[%s12805_s8 + $0x40] ss:$16 sps:$4 sm:$0xff]  }
 0xd05   :  { %9547 = vtanh.f32 %v10957_v46 }
 0xd12   :  { %v9548_v57 = vpop.eup %9547 }
 0xd13   :  { %v2983_v61 = vmul.f32 %v9548_v57, %v2978_v12  ;;  %v11116_v12 = vld [vmem:[%s12805_s8 + $0x4] ss:$16 sps:$4 sm:$0xff]   ;;  %v11122_v57 = vld [vmem:[%s12805_s8] ss:$16 sps:$4 sm:$0xff]  }
 0xd15   :  { %v2984_v22 = vpack.c.bf16 %v2983_v61, %v2983_v61  ;;  %v11128_v61 = vld [vmem:[%s12805_s8 + $0x1e4] ss:$16 sps:$4 sm:$0xff]  }
 0xd17   :  { %3126 = vmatmul.mubr.bf16.vlgmr.msra.gmra.mxu0 %v2984_v22  ;;  %3348 = vst [vmem:[#allocation3 + $0x4] sm:$0xf] %v2984_v22  ;;  %v11134_v22 = vld [vmem:[%s12805_s8 + $0x1e0] ss:$16 sps:$4 sm:$0xff]  }
 0xd18   :  { %3764 = vmatpush1.bf16.msra.mxu0 %v11027_v63 }
 0xd19   :  { %3765 = vmatprep.subr.bf16.mxu0 %v11042_v10 }
 0xd1c   :  { %3766 = vmatpush1.bf16.msra.mxu0 %v11050_v47 }
 0xd1d   :  { %3767 = vmatprep.subr.bf16.mxu0 %v11056_v43 }
 0xd20   :  { %3768 = vmatpush1.bf16.msra.mxu0 %v11062_v20 }
 0xd21   :  { %3769 = vmatprep.subr.bf16.mxu0 %v11068_v33 }
 0xd24   :  { %3770 = vmatpush1.bf16.msra.mxu0 %v11074_v51 }
 0xd25   :  { %3771 = vmatprep.subr.bf16.mxu0 %v11080_v36 }
 0xd28   :  { %3772 = vmatpush1.bf16.msra.mxu0 %v11086_v32 }
 0xd29   :  { %3773 = vmatprep.subr.bf16.mxu0 %v11092_v27 }
 0xd2c   :  { %3774 = vmatpush1.bf16.msra.mxu0 %v11098_v5 }
 0xd2d   :  { %3775 = vmatprep.subr.bf16.mxu0 %v11104_v50 }
 0xd30   :  { %3776 = vmatpush1.bf16.msra.mxu0 %v11110_v54 }
 0xd31   :  { %3777 = vmatprep.subr.bf16.mxu0 %v11116_v12 }
 0xd34   :  { %3778 = vmatpush1.bf16.msra.mxu0 %v11122_v57 }
 0xd35   :  { %3779 = vmatprep.subr.bf16.mxu0 %v11128_v61 }
 0xd38   :  { %3780 = vmatpush2.bf16.msra.mxu0 %v11134_v22 }
 0xd39   :  { %3781 = vmatprep.subr.bf16.mxu0 %v11140_v2 }
 0xdd7   :  { %v3127_v25 = vpop.f32.mrf.mxu0 }
 0xdd8   :  { %v3128_v15 = vadd.f32 %v3127_v25, %v3006_v7  ;;  %v11146_v7 = vld [vmem:[%s12805_s8 + $0x1c0] ss:$16 sps:$4 sm:$0xff]  }
 0xdd9   :  { %v3129_v34 = vpop.f32.mrf.mxu0  ;;  %3782 = vmatpush2.bf16.msra.mxu0 %v11146_v7  ;;  %v11158_v25 = vld [vmem:[%s12805_s8 + $0x1a0] ss:$16 sps:$4 sm:$0xff]  }
 0xdda   :  { %8016 = vst [vmem:[%s12809_s12 + $0x10] sm:$0xff] %v3128_v15  ;;  %v3130_v41 = vadd.f32 %v3129_v34, %v3010_v17  ;;  %v11152_v17 = vld [vmem:[%s12805_s8 + $0x1a4] ss:$16 sps:$4 sm:$0xff]   ;;  %v11170_v34 = vld [vmem:[%s12805_s8 + $0x180] ss:$16 sps:$4 sm:$0xff]  }
 0xddb   :  { %v3131_v30 = vpop.f32.mrf.mxu0  ;;  %3783 = vmatprep.subr.bf16.mxu0 %v11152_v17 }
 0xddc   :  { %8017 = vst [vmem:[%s12809_s12 + $0x18] sm:$0xff] %v3130_v41  ;;  %v3139_v24 = vmax.f32 %v3128_v15, %v3130_v41 }
 0xddd   :  { %v3132_v31 = vpop.f32.mrf.mxu0  ;;  %3784 = vmatpush2.bf16.msra.mxu0 %v11158_v25 }
 0xdde   :  { %3140 = vmax.xlane.f32.xlu1 %v3139_v24 }
 0xe67   :  { %v3141_v35 = vpop.xlane.xlu1 %3140 }
 0xe68   :  { %vm3142_vm9 = vcmp.eq.f32.partialorder %v3128_v15, %v3141_v35  ;;  %vm3143_vm10 = vcmp.eq.f32.partialorder %v3130_v41, %v3141_v35  ;;  %v11164_v15 = vld [vmem:[%s12805_s8 + $0x184] ss:$16 sps:$4 sm:$0xff]  }
 0xe69   :  { %v3144_v6 = vsel %vm3142_vm9, %v10839_v29, 256  ;;  %v3145_v14 = vsel %vm3143_vm10, %v10842_v9, 256  ;;  %3785 = vmatprep.subr.bf16.mxu0 %v11164_v15 }
 0xe6a   :  { %vm3146_vm11 = vcmp.lt.s32.totalorder %v3144_v6, %v3145_v14  ;;  %3786 = vmatpush2.bf16.msra.mxu0 %v11170_v34 }
 0xe6b   :  { %v3147_v1 = vsel %vm3146_vm11, %v3144_v6, %v3145_v14  ;;  %v11180_v6 = vld [vmem:[%s12805_s8 + $0xe8] ss:$16 sps:$4 sm:$0xff]   ;;  %v11185_v14 = vld [vmem:[%s12805_s8 + $0xcc] ss:$16 sps:$4 sm:$0xff]   ;;  %3787 = vmatprep.subr.bf16.mxu0 %v11320_v58 }
 0xe6c   :  { %v3149_v53 = vshra.s32 %v3147_v1, 16  ;;  %v3148_v39 = vand.u32 65535, %v3147_v1  ;;  %v11193_v1 = vld [vmem:[%s12805_s8 + $0xc8] ss:$16 sps:$4 sm:$0xff]  }
 0xe6d   :  { %13080 = vst [vmem:[#allocation13_spill] sm:$0xff] %v11193_v1 }
 0xe6e   :  { %v3151_v40 = vcvt.s32.f32 %v3149_v53  ;;  %v3150_v0 = vcvt.s32.f32 %v3148_v39  ;;  %v11199_v53 = vld [vmem:[%s12805_s8 + $0xac] ss:$16 sps:$4 sm:$0xff]   ;;  %v11289_v39 = vld [vmem:[%s12805_s8 + $0x1c8] ss:$16 sps:$4 sm:$0xff]  }
 0xe6f   :  { %13081 = vst [vmem:[#allocation16_spill] sm:$0xff] %v11199_v53  ;;  %13096 = vst [vmem:[#allocation33_spill] sm:$0xff] %v11289_v39 }
 0xe70   :  { %3152 = vmin.xlane.f32.xlu0 %v3151_v40 }
 0xef9   :  { %v11012_v4 = vpop.xlane.xlu0 %3152 }
 0xefa   :  { %vm3154_vm12 = vcmp.eq.f32.partialorder %v3151_v40, %v11012_v4  ;;  %v3159_v41 = vcvt.f32.s32 %v11012_v4  ;;  %v11205_v40 = vld [vmem:[%s12805_s8 + $0xa8] ss:$16 sps:$4 sm:$0xff]   ;;  %v11295_v4 = vld [vmem:[%s12805_s8 + $0x1ac] ss:$16 sps:$4 sm:$0xff]  }
 0xefb   :  { %v3155_v44 = vsel %vm3154_vm12, %v3150_v0, inf  ;;  %13082 = vst [vmem:[#allocation14_spill] sm:$0xff] %v11205_v40  ;;  %13097 = vst [vmem:[#allocation34_spill] sm:$0xff] %v11295_v4  ;;  %v11301_v0 = vld [vmem:[%s12805_s8 + $0x1a8] ss:$16 sps:$4 sm:$0xff]  }
 0xefc   :  { %3156 = vmin.xlane.f32.xlu1 %v3155_v44  ;;  %v3160_v24 = vshll.u32 %v3159_v41, 16  ;;  %13098 = vst [vmem:[#allocation35_spill] sm:$0xff] %v11301_v0  ;;  %v11307_v44 = vld [vmem:[%s12805_s8 + $0x18c] ss:$16 sps:$4 sm:$0xff]   ;;  %v11330_v41 = vld [vmem:[%s12805_s8 + $0x160] ss:$16 sps:$4 sm:$0xff]  }
 0xefd   :  { %13099 = vst [vmem:[#allocation36_spill] sm:$0xff] %v11307_v44  ;;  %3788 = vmatpush2.bf16.msra.mxu0 %v11330_v41 }
 0xf85   :  { %v3157_v30 = vpop.xlane.xlu1 %3156 }
 0xf86   :  { %v3158_v31 = vcvt.f32.s32 %v3157_v30  ;;  %v11335_v30 = vld [vmem:[%s12805_s8 + $0x168] ss:$16 sps:$4 sm:$0xff]  }
 0xf87   :  { %13102 = vst [vmem:[#allocation39_spill] sm:$0xff] %v11335_v30 }
 0xf88   :  { %v3161_v35 = vadd.s32 %v3160_v24, %v3158_v31  ;;  %v11344_v24 = vld [vmem:[%s12805_s8 + $0x144] ss:$16 sps:$4 sm:$0xff]   ;;  %v11349_v31 = vld [vmem:[%s12805_s8 + $0x14c] ss:$16 sps:$4 sm:$0xff]  }
 0xf89   :  { %13103 = vst [vmem:[#allocation40_spill] sm:$0xff] %v11349_v31  ;;  %3789 = vmatprep.subr.bf16.mxu0 %v11344_v24 }
 0xf8a   :  { %vm3162_vm13 = vcmp.eq.s32.totalorder %v10839_v29, %v3161_v35  ;;  %vm3163_vm14 = vcmp.eq.s32.totalorder %v10842_v9, %v3161_v35  ;;  %v11354_v35 = vld [vmem:[%s12805_s8 + $0x140] ss:$16 sps:$4 sm:$0xff]  }
 0xf8b   :  { %vm8038_vm15 = vmpackc.low %vm3162_vm13, %vm3162_vm13  ;;  %3790 = vmatpush2.bf16.msra.mxu0 %v11354_v35 }
 0xf8c   :  { %vm8036_vm0 = vmpackc.low %vm3163_vm14, %vm3163_vm14 }
 0xf8d   :  { %8037 = vmatprep.mubr.msk.bf16.mxu1 %vm8036_vm0, %v12864_v18 }
 0xf8e   :  { %8039 = vmatmul.mubr.msk.bf16.vlgmr.msra.gmra.mxu1 %vm8038_vm15, %v12864_v18  ;;  %v11359_v18 = vld [vmem:[%s12805_s8 + $0x148] ss:$16 sps:$4 sm:$0xff]  }
 0xf8f   :  { %3805 = vmatpush1.bf16.msra.mxu1 %v11180_v6  ;;  %13104 = vst [vmem:[#allocation41_spill] sm:$0xff] %v11359_v18 }
 0xf90   :  { %3806 = vmatprep.subr.bf16.mxu1 %v11185_v14 }
 0xf93   :  { %3807 = vmatpush1.bf16.msra.mxu1 %v11193_v1 }
 0xf94   :  { %3808 = vmatprep.subr.bf16.mxu1 %v11199_v53 }
 0xf97   :  { %3809 = vmatpush1.bf16.msra.mxu1 %v11205_v40 }
 0xf98   :  { %3810 = vmatprep.subr.bf16.mxu1 %v11211_v38 }
 0xf9b   :  { %3811 = vmatpush1.bf16.msra.mxu1 %v11217_v42 }
 0xf9c   :  { %3812 = vmatprep.subr.bf16.mxu1 %v11223_v49 }
 0xf9f   :  { %3813 = vmatpush1.bf16.msra.mxu1 %v11229_v23 }
 0xfa0   :  { %3814 = vmatprep.subr.bf16.mxu1 %v11235_v3 }
 0xfa3   :  { %3815 = vmatpush1.bf16.msra.mxu1 %v11241_v45 }
 0xfa4   :  { %3816 = vmatprep.subr.bf16.mxu1 %v11247_v16 }
 0xfa7   :  { %3817 = vmatpush1.bf16.msra.mxu1 %v11253_v37 }
 0xfa8   :  { %3818 = vmatprep.subr.bf16.mxu1 %v11259_v60 }
 0xfab   :  { %3819 = vmatpush1.bf16.msra.mxu1 %v11265_v56 }
 0xfac   :  { %3820 = vmatprep.subr.bf16.mxu1 %v11271_v62 }
 0xfaf   :  { %3821 = vmatpush2.bf16.msra.mxu1 %v11277_v8  ;;  %v8040_v8 = vld [vmem:[%s12800_s3 + $0x4] sm:$0xf] }
 0xfb0   :  { %3822 = vmatprep.subr.bf16.mxu1 %v11283_v59 }
 0xfb3   :  { %3823 = vmatpush2.bf16.msra.mxu1 %v11289_v39 }
 0xfb4   :  { %3824 = vmatprep.subr.bf16.mxu1 %v11295_v4  ;;  %v11407_v4 = vld [vmem:[%s12805_s8 + $0x108] ss:$16 sps:$4 sm:$0xff]  }
 0xfb5   :  { %13108 = vst [vmem:[#allocation45_spill] sm:$0xff] %v11407_v4 }
 0xfb7   :  { %3825 = vmatpush2.bf16.msra.mxu1 %v11301_v0  ;;  %v11402_v0 = vld [vmem:[%s12805_s8 + $0x100] ss:$16 sps:$4 sm:$0xff]  }
 0xfb8   :  { %3826 = vmatprep.subr.bf16.mxu1 %v11307_v44  ;;  %v11394_v44 = vld [vmem:[%s12805_s8 + $0x10c] ss:$16 sps:$4 sm:$0xff]  }
 0xfb9   :  { %13107 = vst [vmem:[#allocation44_spill] sm:$0xff] %v11394_v44 }
 0xfbb   :  { %3827 = vmatpush2.bf16.msra.mxu1 %v11313_v21  ;;  %v11378_v21 = vld [vmem:[%s12805_s8 + $0x128] ss:$16 sps:$4 sm:$0xff]  }
 0xfbc   :  { %3828 = vmatprep.subr.bf16.mxu1 %v11325_v28  ;;  %v11373_v28 = vld [vmem:[%s12805_s8 + $0x124] ss:$16 sps:$4 sm:$0xff]   ;;  %13105 = vst [vmem:[#allocation42_spill] sm:$0xff] %v11378_v21 }
 0xfbd   :  { %3791 = vmatprep.subr.bf16.mxu0 %v11373_v28 }
 0xfbf   :  { %3829 = vmatpush2.bf16.msra.mxu1 %v11335_v30  ;;  %v11368_v30 = vld [vmem:[%s12805_s8 + $0x120] ss:$16 sps:$4 sm:$0xff]  }
 0xfc0   :  { %3830 = vmatprep.subr.bf16.mxu1 %v11349_v31  ;;  %v11383_v31 = vld [vmem:[%s12805_s8 + $0x12c] ss:$16 sps:$4 sm:$0xff]   ;;  %3792 = vmatpush2.bf16.msra.mxu0 %v11368_v30 }
 0xfc1   :  { %13106 = vst [vmem:[#allocation43_spill] sm:$0xff] %v11383_v31 }
 0xfc3   :  { %3831 = vmatpush2.bf16.msra.mxu1 %v11359_v18  ;;  %v11388_v18 = vld [vmem:[%s12805_s8 + $0x104] ss:$16 sps:$4 sm:$0xff]  }
 0xfc4   :  { %3832 = vmatprep.subr.bf16.mxu1 %v11383_v31  ;;  %3793 = vmatprep.subr.bf16.mxu0 %v11388_v18  ;;  %v3344_v31 = vstv %s3343_s22 }
 0xfc5   :  { %3794 = vmatpush2.bf16.msra.mxu0 %v11402_v0  ;;  %vm3345_vm1 = vcmp.eq.s32.totalorder %v3344_v31, 1  ;;  %v11485_v31 = vld [vmem:[%s12807_s10 + $0x20] ss:$8 sps:$4 sm:$0xff]  }
 0xfc6   :  { %13119 = vst [vmem:[#allocation52_spill] sm:$0xff] %v11485_v31 }
 0xfc7   :  { %3833 = vmatpush2.bf16.msra.mxu1 %v11378_v21 }
 0xfc8   :  { %3834 = vmatprep.subr.bf16.mxu1 %v11394_v44 }
 0xfcb   :  { %3835 = vmatpush2.bf16.msra.mxu1 %v11407_v4 }
0x104e   :  { %v8620_v21 = vpop.f32.mrf.mxu1 }
0x1050   :  { %v8621_v39 = vpop.f32.mrf.mxu1 }
0x1051   :  { %v8622_v59 = vadd.f32 %v8621_v39, %v8620_v21  ;;  %v11420_v39 = vld [vmem:[%s12807_s10 + $0x74] ss:$8 sps:$4 sm:$0xff]   ;;  %v11480_v21 = vld [vmem:[%s12807_s10 + $0x24] ss:$8 sps:$4 sm:$0xff]  }
0x1052   :  { %v8623_v62 = vpop.f32.mrf.mxu1  ;;  %3972 = vmatprep.subr.bf16.mxu0 %v11420_v39  ;;  %13118 = vst [vmem:[#allocation51_spill] sm:$0xff] %v11480_v21 }
0x1053   :  { %v3342_v56 = vpack.c.bf16 %v8622_v59, %v8622_v59  ;;  %v11449_v62 = vld [vmem:[%s12807_s10 + $0x50] ss:$8 sps:$4 sm:$0xff]   ;;  %v11461_v59 = vld [vmem:[%s12807_s10 + $0x40] ss:$8 sps:$4 sm:$0xff]  }
0x1054   :  { %v8624_v60 = vpop.f32.mrf.mxu1  ;;  %13113 = vst [vmem:[#allocation28_spill] sm:$0xff] %v11449_v62  ;;  %13115 = vst [vmem:[#allocation48_spill] sm:$0xff] %v11461_v59 }
0x1055   :  { %v3346_v44 = vsel %vm3345_vm1, %v8040_v8, %v3342_v56  ;;  %v11425_v60 = vld [vmem:[%s12807_s10 + $0x70] ss:$8 sps:$4 sm:$0xff]   ;;  %v11444_v56 = vld [vmem:[%s12807_s10 + $0x54] ss:$8 sps:$4 sm:$0xff]   ;;  %v11456_v8 = vld [vmem:[%s12807_s10 + $0x44] ss:$8 sps:$4 sm:$0xff]  }
0x1056   :  { %3347 = vst [vmem:[#allocation3] sm:$0xf] %v3346_v44  ;;  %13109 = vst [vmem:[#allocation46_spill] sm:$0xff] %v11425_v60  ;;  %v11473_v44 = vld [vmem:[%s12807_s10 + $0x30] ss:$8 sps:$4 sm:$0xff]  }
0x1057   :  { %13112 = vst [vmem:[#allocation29_spill] sm:$0xff] %v11444_v56  ;;  %13114 = vst [vmem:[#allocation30_spill] sm:$0xff] %v11456_v8 }
0x1058   :  { %13117 = vst [vmem:[#allocation50_spill] sm:$0xff] %v11473_v44 }
0x105d   :  { %v3349_v37 = vld [vmem:[#allocation3] sm:$0xff] }
0x105e   :  { %v8043_v16 = vcombine.high %v3349_v37, %v3349_v37  ;;  %v8042_v4 = vcombine.low %v3349_v37, %v3349_v37  ;;  %v11437_v37 = vld [vmem:[%s12807_s10 + $0x60] ss:$8 sps:$4 sm:$0xff]  }
0x105f   :  { %13111 = vst [vmem:[#allocation27_spill] sm:$0xff] %v11437_v37 }
0x1060   :  { %3795 = vmatprep.mubr.bf16.mxu0 %v8043_v16  ;;  %3836 = vmatprep.mubr.bf16.mxu1 %v8043_v16  ;;  %v11432_v16 = vld [vmem:[%s12807_s10 + $0x64] ss:$8 sps:$4 sm:$0xff]  }
0x1061   :  { %3796 = vmatmul.mubr.bf16.vlgmr.msra.gmra.mxu0 %v8042_v4  ;;  %3837 = vmatmul.mubr.bf16.vlgmr.msra.gmra.mxu1 %v8042_v4  ;;  %13110 = vst [vmem:[#allocation47_spill] sm:$0xff] %v11432_v16  ;;  %v11468_v4 = vld [vmem:[%s12807_s10 + $0x34] ss:$8 sps:$4 sm:$0xff]  }
0x1062   :  { %4004 = vmatprep.mubr.bf16.mxu0 %v13065_v19  ;;  %3973 = vmatpush1.bf16.msra.mxu0 %v11425_v60  ;;  %13116 = vst [vmem:[#allocation49_spill] sm:$0xff] %v11468_v4 }
0x1063   :  { %3974 = vmatprep.subr.bf16.mxu0 %v11432_v16 }
0x1066   :  { %3975 = vmatpush1.bf16.msra.mxu0 %v11437_v37 }
0x1067   :  { %3976 = vmatprep.subr.bf16.mxu0 %v11444_v56 }
0x106a   :  { %3977 = vmatpush1.bf16.msra.mxu0 %v11449_v62 }
0x106b   :  { %3978 = vmatprep.subr.bf16.mxu0 %v11456_v8 }
0x106e   :  { %3979 = vmatpush1.bf16.msra.mxu0 %v11461_v59 }
0x106f   :  { %3980 = vmatprep.subr.bf16.mxu0 %v11468_v4  ;;  %v11492_v4 = vld [vmem:[%s12807_s10 + $0x14] ss:$8 sps:$4 sm:$0xff]  }
0x1070   :  { %13120 = vst [vmem:[#allocation53_spill] sm:$0xff] %v11492_v4 }
0x1072   :  { %3981 = vmatpush1.bf16.msra.mxu0 %v11473_v44  ;;  %v11497_v44 = vld [vmem:[%s12807_s10 + $0x10] ss:$8 sps:$4 sm:$0xff]  }
0x1073   :  { %3982 = vmatprep.subr.bf16.mxu0 %v11480_v21  ;;  %13121 = vst [vmem:[#allocation54_spill] sm:$0xff] %v11497_v44  ;;  %v11504_v21 = vld [vmem:[%s12807_s10 + $0x4] ss:$8 sps:$4 sm:$0xff]  }
0x1074   :  { %13122 = vst [vmem:[#allocation55_spill] sm:$0xff] %v11504_v21 }
0x1076   :  { %3983 = vmatpush1.bf16.msra.mxu0 %v11485_v31  ;;  %v11509_v31 = vld [vmem:[%s12807_s10] ss:$8 sps:$4 sm:$0xff]  }
0x1077   :  { %3984 = vmatprep.subr.bf16.mxu0 %v11492_v4  ;;  %13123 = vst [vmem:[#allocation56_spill] sm:$0xff] %v11509_v31 }
0x107a   :  { %3985 = vmatpush1.bf16.msra.mxu0 %v11497_v44  ;;  %v3414_v44 = vld [vmem:[%s12806_s9] sm:$0xf] }
0x107b   :  { %3986 = vmatprep.subr.bf16.mxu0 %v11504_v21  ;;  %v3419_v4 = vrot.slane %v3414_v44, %v13032_v11  ;;  %v3423_v59 = vrot.slane %v3414_v44, %v13033_v13  ;;  %v3427_v21 = vrot.slane %v3414_v44, %v13034_v26  ;;  %v3431_v42 = vrot.slane %v3414_v44, %v13035_v48 }
0x107e   :  { %3987 = vmatpush1.bf16.msra.mxu0 %v11509_v31 }
0x107f   :  { %4642 = vmatprep.subr.bf16.mxu0 %v11032_v52 }
0x1121   :  { %v3797_v8 = vpop.f32.mrf.mxu0  ;;  %v3838_v62 = vpop.f32.mrf.mxu1 }
0x1122   :  { %v3798_v56 = vadd.f32 %v3797_v8, %v3419_v4  ;;  %v3839_v49 = vadd.f32 %v3838_v62, %v3427_v21 }
0x1123   :  { %v3799_v37 = vpop.f32.mrf.mxu0  ;;  %v3840_v16 = vpop.f32.mrf.mxu1 }
0x1124   :  { %v3845_v19 = vmul.f32 0.5, %v3798_v56  ;;  %v3800_v60 = vadd.f32 %v3799_v37, %v3423_v59  ;;  %v3841_v38 = vadd.f32 %v3840_v16, %v3431_v42 }
0x1125   :  { %v3801_v31 = vpop.f32.mrf.mxu0  ;;  %v3842_v45 = vpop.f32.mrf.mxu1 }
0x1126   :  { %9549 = vtanh.f32 %v3845_v19  ;;  %v3849_v52 = vmul.f32 0.5, %v3800_v60  ;;  %v3854_v40 = vmul.f32 0.5, %v3841_v38 }
0x1127   :  { %v3802_v3 = vpop.f32.mrf.mxu0  ;;  %v3843_v23 = vpop.f32.mrf.mxu1 }
0x1128   :  { %9551 = vtanh.f32 %v3849_v52 }
0x1129   :  { %9553 = vtanh.f32 %v3839_v49 }
0x112a   :  { %9555 = vtanh.f32 %v3854_v40  ;;  %v9132_v40 = vld [vmem:[%s12804_s7 + $0x10] sm:$0xff]  }
0x1133   :  { %v9550_v8 = vpop.eup %9549 }
0x1134   :  { %v3847_v4 = vmul.f32 0.5, %v9550_v8  ;;  %v13124_v8 = vmov 1.0|1.0  }
0x1135   :  { %v9552_v53 = vpop.eup %9551 }
0x1136   :  { %v3848_v56 = vadd.f32 0.5, %v3847_v4  ;;  %v3851_v1 = vmul.f32 0.5, %v9552_v53  ;;  %v9554_v59 = vpop.eup %9553  ;;  %v9131_v53 = vld [vmem:[%s12804_s7 + $0x50] sm:$0xff]   ;;  %v13126_v4 = vld [vmem:[#allocation16_spill] sm:$0xff] }
0x1137   :  { %v9556_v23 = vpop.eup %9555 }
0x1138   :  { %v3852_v37 = vadd.f32 0.5, %v3851_v1  ;;  %v3859_v45 = vmul.f32 %v9554_v59, %v3848_v56  ;;  %v3856_v60 = vmul.f32 0.5, %v9556_v23  ;;  %v9130_v1 = vld [vmem:[%s12804_s7 + $0x18] sm:$0xff]   ;;  %v13127_v56 = vld [vmem:[#allocation14_spill] sm:$0xff]  ;;  %v13129_v59 = vld [vmem:[#allocation17_spill] sm:$0xff] }
0x1139   :  { %v13132_v23 = vld [vmem:[#allocation21_spill] sm:$0xff] }
0x113a   :  { %v3858_v19 = vmul.f32 %v3852_v37, %v10957_v46  ;;  %v3857_v49 = vadd.f32 0.5, %v3856_v60  ;;  %v3880_v46 = vld [vmem:[%s12808_s11] sm:$0x3]  ;;  %v13128_v37 = vld [vmem:[#allocation15_spill] sm:$0xff] }
0x113b   :  { %v13133_v60 = vld [vmem:[#allocation20_spill] sm:$0xff] }
0x113c   :  { %v11522_v3 = vadd.f32 %v3859_v45, %v3858_v19  ;;  %v13130_v19 = vld [vmem:[#allocation18_spill] sm:$0xff]  ;;  %v13131_v45 = vld [vmem:[#allocation19_spill] sm:$0xff] }
0x113e   :  { %9557 = vtanh.f32 %v11522_v3 }
0x114b   :  { %v9558_v42 = vpop.eup %9557 }
0x114c   :  { %v3862_v38 = vmul.f32 %v9558_v42, %v3857_v49  ;;  %v13136_v49 = vld [vmem:[#allocation25_spill] sm:$0xff]  ;;  %v13137_v42 = vld [vmem:[#allocation24_spill] sm:$0xff] }
0x114e   :  { %v3863_v16 = vpack.c.bf16 %v3862_v38, %v3862_v38  ;;  %v13138_v38 = vld [vmem:[#allocation26_spill] sm:$0xff] }
0x1150   :  { %4005 = vmatmul.mubr.bf16.vlgmr.msra.gmra.mxu0 %v3863_v16  ;;  %4227 = vst [vmem:[#allocation3 + $0x4] sm:$0xf] %v3863_v16  ;;  %v13139_v16 = vld [vmem:[#allocation31_spill] sm:$0xff] }
0x1151   :  { %4643 = vmatpush1.bf16.msra.mxu0 %v11027_v63  ;;  %v3885_v63 = vrot.slane %v3880_v46, %v13032_v11 }
0x1152   :  { %4644 = vmatprep.subr.bf16.mxu0 %v11042_v10  ;;  %v3889_v10 = vrot.slane %v3880_v46, %v13033_v13  ;;  %v13140_v46 = vld [vmem:[#allocation32_spill] sm:$0xff] }
0x1155   :  { %4645 = vmatpush1.bf16.msra.mxu0 %v11050_v47 }
0x1156   :  { %4646 = vmatprep.subr.bf16.mxu0 %v11056_v43 }
0x1159   :  { %4647 = vmatpush1.bf16.msra.mxu0 %v11062_v20 }
0x115a   :  { %4648 = vmatprep.subr.bf16.mxu0 %v11068_v33 }
0x115d   :  { %4649 = vmatpush1.bf16.msra.mxu0 %v11074_v51 }
0x115e   :  { %4650 = vmatprep.subr.bf16.mxu0 %v11080_v36 }
0x1161   :  { %4651 = vmatpush1.bf16.msra.mxu0 %v11086_v32 }
0x1162   :  { %4652 = vmatprep.subr.bf16.mxu0 %v11092_v27 }
0x1165   :  { %4653 = vmatpush1.bf16.msra.mxu0 %v11098_v5 }
0x1166   :  { %4654 = vmatprep.subr.bf16.mxu0 %v11104_v50 }
0x1169   :  { %4655 = vmatpush1.bf16.msra.mxu0 %v11110_v54 }
0x116a   :  { %4656 = vmatprep.subr.bf16.mxu0 %v11116_v12 }
0x116d   :  { %4657 = vmatpush1.bf16.msra.mxu0 %v11122_v57  ;;  %v9121_v57 = vld [vmem:[%s12804_s7 + $0x78] sm:$0xff]  }
0x116e   :  { %4658 = vmatprep.subr.bf16.mxu0 %v11128_v61  ;;  %v9122_v61 = vld [vmem:[%s12804_s7 + $0x38] sm:$0xff]   ;;  %8626 = vmatprep.subr.bf16.mxu1 %v9121_v57 }
0x116f   :  { %8627 = vmatpush3.bf16.msra.mxu1 %v9122_v61 }
0x1171   :  { %4659 = vmatpush2.bf16.msra.mxu0 %v11134_v22  ;;  %v9123_v22 = vld [vmem:[%s12804_s7 + $0x70] sm:$0xff]  }
0x1172   :  { %4660 = vmatprep.subr.bf16.mxu0 %v11140_v2  ;;  %v9124_v2 = vld [vmem:[%s12804_s7 + $0x30] sm:$0xff]   ;;  %8628 = vmatprep.subr.bf16.mxu1 %v9123_v22  ;;  %v8148_v22 = vld [vmem:[%s12800_s3 + $0x8] sm:$0xf] }
0x1173   :  { %8629 = vmatpush3.bf16.msra.mxu1 %v9124_v2 }
0x1175   :  { %4661 = vmatpush2.bf16.msra.mxu0 %v11146_v7  ;;  %v9125_v7 = vld [vmem:[%s12804_s7 + $0x68] sm:$0xff]  }
0x1176   :  { %4662 = vmatprep.subr.bf16.mxu0 %v11152_v17  ;;  %v9126_v17 = vld [vmem:[%s12804_s7 + $0x28] sm:$0xff]   ;;  %8630 = vmatprep.subr.bf16.mxu1 %v9125_v7 }
0x1177   :  { %8631 = vmatpush3.bf16.msra.mxu1 %v9126_v17 }
0x1179   :  { %4663 = vmatpush2.bf16.msra.mxu0 %v11158_v25  ;;  %v9127_v25 = vld [vmem:[%s12804_s7 + $0x60] sm:$0xff]  }
0x117a   :  { %4664 = vmatprep.subr.bf16.mxu0 %v11164_v15  ;;  %v9128_v15 = vld [vmem:[%s12804_s7 + $0x20] sm:$0xff]   ;;  %8632 = vmatprep.subr.bf16.mxu1 %v9127_v25 }
0x117b   :  { %8633 = vmatpush3.bf16.msra.mxu1 %v9128_v15 }
0x117d   :  { %4665 = vmatpush2.bf16.msra.mxu0 %v11170_v34  ;;  %v9129_v34 = vld [vmem:[%s12804_s7 + $0x58] sm:$0xff]  }
0x117e   :  { %4666 = vmatprep.subr.bf16.mxu0 %v11320_v58  ;;  %8634 = vmatprep.subr.bf16.mxu1 %v9129_v34 }
0x117f   :  { %8635 = vmatpush3.bf16.msra.mxu1 %v9130_v1 }
0x1180   :  { %8636 = vmatprep.subr.bf16.mxu1 %v9131_v53  ;;  %v13154_v53 = vld [vmem:[#allocation46_spill] sm:$0xff] }
0x1181   :  { %4667 = vmatpush2.bf16.msra.mxu0 %v11330_v41 }
0x1182   :  { %4668 = vmatprep.subr.bf16.mxu0 %v11344_v24  ;;  %v9134_v24 = vld [vmem:[%s12804_s7 + $0x8] sm:$0xff]  }
0x1183   :  { %8637 = vmatpush3.bf16.msra.mxu1 %v9132_v40  ;;  %v13155_v40 = vmov 0  }
0x1185   :  { %4669 = vmatpush2.bf16.msra.mxu0 %v11354_v35  ;;  %v9135_v35 = vld [vmem:[%s12804_s7 + $0x40] sm:$0xff]  }
0x1186   :  { %4670 = vmatprep.subr.bf16.mxu0 %v11373_v28 }
0x1189   :  { %4671 = vmatpush2.bf16.msra.mxu0 %v11368_v30 }
0x118a   :  { %4672 = vmatprep.subr.bf16.mxu0 %v11388_v18 }
0x118d   :  { %4673 = vmatpush2.bf16.msra.mxu0 %v11402_v0  ;;  %v9133_v0 = vld [vmem:[%s12804_s7 + $0x48] sm:$0xff]  }
0x118e   :  { %4851 = vmatprep.subr.bf16.mxu0 %v11420_v39  ;;  %8638 = vmatprep.subr.bf16.mxu1 %v9133_v0  ;;  %v9136_v39 = vld [vmem:[%s12804_s7] sm:$0xff]   ;;  %v13156_v0 = vld [vmem:[#allocation47_spill] sm:$0xff] }
0x118f   :  { %8639 = vmatpush3.bf16.msra.mxu1 %v9134_v24  ;;  %v13161_v24 = vld [vmem:[#allocation48_spill] sm:$0xff] }
0x1190   :  { %8640 = vmatprep.subr.bf16.mxu1 %v9135_v35  ;;  %v13162_v35 = vld [vmem:[#allocation49_spill] sm:$0xff] }
0x1193   :  { %8641 = vmatpush3.bf16.msra.mxu1 %v9136_v39  ;;  %v13163_v39 = vld [vmem:[#allocation50_spill] sm:$0xff] }
0x1194   :  { %4683 = vmatprep.subr.bf16.mxu1 %v11037_v55  ;;  %v13125_v55 = vld [vmem:[#allocation13_spill] sm:$0xff] }
0x1210   :  { %v4006_v47 = vpop.f32.mrf.mxu0 }
0x1211   :  { %v4007_v43 = vadd.f32 %v4006_v47, %v3885_v63  ;;  %v13141_v63 = vld [vmem:[#allocation33_spill] sm:$0xff]  ;;  %v13143_v47 = vld [vmem:[#allocation35_spill] sm:$0xff] }
0x1212   :  { %v4008_v20 = vpop.f32.mrf.mxu0 }
0x1213   :  { %8124 = vst [vmem:[%s12809_s12 + $0x20] sm:$0xff] %v4007_v43  ;;  %v4009_v18 = vadd.f32 %v4008_v20, %v3889_v10  ;;  %v13142_v10 = vld [vmem:[#allocation34_spill] sm:$0xff]  ;;  %v13145_v20 = vld [vmem:[#allocation37_spill] sm:$0xff] }
0x1214   :  { %v4010_v33 = vpop.f32.mrf.mxu0 }
0x1215   :  { %8125 = vst [vmem:[%s12809_s12 + $0x28] sm:$0xff] %v4009_v18  ;;  %v4018_v51 = vmax.f32 %v4007_v43, %v4009_v18  ;;  %v13147_v33 = vld [vmem:[#allocation39_spill] sm:$0xff] }
0x1216   :  { %v4011_v36 = vpop.f32.mrf.mxu0 }
0x1217   :  { %4019 = vmax.xlane.f32.xlu0 %v4018_v51  ;;  %v13148_v51 = vld [vmem:[#allocation40_spill] sm:$0xff]  ;;  %v13149_v36 = vld [vmem:[#allocation41_spill] sm:$0xff] }
0x12a0   :  { %v4020_v32 = vpop.xlane.xlu0 %4019 }
0x12a1   :  { %vm4021_vm2 = vcmp.eq.f32.partialorder %v4007_v43, %v4020_v32  ;;  %vm4022_vm3 = vcmp.eq.f32.partialorder %v4009_v18, %v4020_v32  ;;  %v13144_v43 = vld [vmem:[#allocation36_spill] sm:$0xff]  ;;  %v13146_v18 = vld [vmem:[#allocation38_spill] sm:$0xff]  ;;  %v13150_v32 = vld [vmem:[#allocation43_spill] sm:$0xff] }
0x12a2   :  { %v4023_v27 = vsel %vm4021_vm2, %v10839_v29, 256  ;;  %v4024_v5 = vsel %vm4022_vm3, %v10842_v9, 256 }
0x12a3   :  { %vm4025_vm4 = vcmp.lt.s32.totalorder %v4023_v27, %v4024_v5 }
0x12a4   :  { %v4026_v50 = vsel %vm4025_vm4, %v4023_v27, %v4024_v5  ;;  %v13151_v27 = vld [vmem:[#allocation42_spill] sm:$0xff]  ;;  %v13152_v5 = vld [vmem:[#allocation44_spill] sm:$0xff] }
0x12a5   :  { %v4028_v54 = vshra.s32 %v4026_v50, 16  ;;  %v4027_v58 = vand.u32 65535, %v4026_v50  ;;  %v13153_v50 = vld [vmem:[#allocation45_spill] sm:$0xff] }
0x12a7   :  { %v4030_v12 = vcvt.s32.f32 %v4028_v54  ;;  %v4029_v41 = vcvt.s32.f32 %v4027_v58  ;;  %v13157_v58 = vld [vmem:[#allocation27_spill] sm:$0xff] }
0x12a9   :  { %4031 = vmin.xlane.f32.xlu1 %v4030_v12 }
0x1332   :  { %v4032_v28 = vpop.xlane.xlu1 %4031 }
0x1333   :  { %vm4033_vm5 = vcmp.eq.f32.partialorder %v4030_v12, %v4032_v28  ;;  %v4038_v62 = vcvt.f32.s32 %v4032_v28  ;;  %v4223_v12 = vstv %s4222_s25  ;;  %v13158_v28 = vld [vmem:[#allocation29_spill] sm:$0xff] }
0x1334   :  { %v4034_v30 = vsel %vm4033_vm5, %v4029_v41, inf  ;;  %vm4224_vm10 = vcmp.eq.s32.totalorder %v4223_v12, 1  ;;  %v13159_v41 = vld [vmem:[#allocation28_spill] sm:$0xff] }
0x1335   :  { %4035 = vmin.xlane.f32.xlu0 %v4034_v30  ;;  %v4039_v21 = vshll.u32 %v4038_v62, 16  ;;  %v13160_v30 = vld [vmem:[#allocation30_spill] sm:$0xff]  ;;  %v13164_v62 = vld [vmem:[#allocation51_spill] sm:$0xff] }
0x13be   :  { %v4036_v44 = vpop.xlane.xlu0 %4035 }
0x13bf   :  { %v4037_v31 = vcvt.f32.s32 %v4036_v44  ;;  %v13165_v44 = vld [vmem:[#allocation52_spill] sm:$0xff] }
0x13c1   :  { %v4040_v52 = vadd.s32 %v4039_v21, %v4037_v31  ;;  %v13166_v21 = vld [vmem:[#allocation53_spill] sm:$0xff]  ;;  %v13167_v31 = vld [vmem:[#allocation54_spill] sm:$0xff] }
0x13c3   :  { %vm4041_vm6 = vcmp.eq.s32.totalorder %v10839_v29, %v4040_v52  ;;  %vm4042_vm7 = vcmp.eq.s32.totalorder %v10842_v9, %v4040_v52  ;;  %v13168_v52 = vld [vmem:[#allocation55_spill] sm:$0xff] }
0x13c4   :  { %vm8146_vm8 = vmpackc.low %vm4041_vm6, %vm4041_vm6 }
0x13c5   :  { %vm8144_vm9 = vmpackc.low %vm4042_vm7, %vm4042_vm7 }
0x13c6   :  { %8145 = vmatprep.mubr.msk.bf16.mxu1 %vm8144_vm9, %v13124_v8 }
0x13c7   :  { %8147 = vmatmul.mubr.msk.bf16.vlgmr.msra.gmra.mxu1 %vm8146_vm8, %v13124_v8 }
0x13c8   :  { %4684 = vmatpush1.bf16.msra.mxu1 %v11180_v6  ;;  %v13134_v6 = vld [vmem:[#allocation22_spill] sm:$0xff] }
0x13c9   :  { %4685 = vmatprep.subr.bf16.mxu1 %v11185_v14  ;;  %v13135_v14 = vld [vmem:[#allocation23_spill] sm:$0xff] }
0x13cc   :  { %4686 = vmatpush1.bf16.msra.mxu1 %v13125_v55  ;;  %v13169_v55 = vld [vmem:[#allocation56_spill] sm:$0xff] }
0x13cd   :  { %4687 = vmatprep.subr.bf16.mxu1 %v13126_v4  ;;  %v4293_v4 = vld [vmem:[%s12806_s9] sm:$0xf] }
0x13d0   :  { %4688 = vmatpush1.bf16.msra.mxu1 %v13127_v56  ;;  %v4298_v56 = vrot.slane %v4293_v4, %v13032_v11 }
0x13d1   :  { %4689 = vmatprep.subr.bf16.mxu1 %v13128_v37  ;;  %v4302_v37 = vrot.slane %v4293_v4, %v13033_v13 }
0x13d4   :  { %4690 = vmatpush1.bf16.msra.mxu1 %v13129_v59 }
0x13d5   :  { %4691 = vmatprep.subr.bf16.mxu1 %v13130_v19 }
0x13d8   :  { %4692 = vmatpush1.bf16.msra.mxu1 %v13131_v45 }
0x13d9   :  { %4693 = vmatprep.subr.bf16.mxu1 %v13132_v23 }
0x13dc   :  { %4694 = vmatpush1.bf16.msra.mxu1 %v13133_v60 }
0x13dd   :  { %4695 = vmatprep.subr.bf16.mxu1 %v13134_v6 }
0x13e0   :  { %4696 = vmatpush1.bf16.msra.mxu1 %v13135_v14  ;;  %v4306_v14 = vrot.slane %v4293_v4, %v13034_v26 }
0x13e1   :  { %4697 = vmatprep.subr.bf16.mxu1 %v13136_v49 }
0x13e4   :  { %4698 = vmatpush1.bf16.msra.mxu1 %v13137_v42 }
0x13e5   :  { %4699 = vmatprep.subr.bf16.mxu1 %v13138_v38 }
0x13e8   :  { %4700 = vmatpush2.bf16.msra.mxu1 %v13139_v16 }
0x13e9   :  { %4701 = vmatprep.subr.bf16.mxu1 %v13140_v46 }
0x13ec   :  { %4702 = vmatpush2.bf16.msra.mxu1 %v13141_v63 }
0x13ed   :  { %4703 = vmatprep.subr.bf16.mxu1 %v13142_v10 }
0x13f0   :  { %4704 = vmatpush2.bf16.msra.mxu1 %v13143_v47  ;;  %v4310_v47 = vrot.slane %v4293_v4, %v13035_v48  ;;  %v9143_v4 = vld [vmem:[%s12804_s7 + $0x68] sm:$0xff]  }
0x13f1   :  { %4705 = vmatprep.subr.bf16.mxu1 %v13144_v43 }
0x13f4   :  { %4706 = vmatpush2.bf16.msra.mxu1 %v13145_v20 }
0x13f5   :  { %4707 = vmatprep.subr.bf16.mxu1 %v13146_v18 }
0x13f8   :  { %4708 = vmatpush2.bf16.msra.mxu1 %v13147_v33 }
0x13f9   :  { %4709 = vmatprep.subr.bf16.mxu1 %v13148_v51 }
0x13fc   :  { %4710 = vmatpush2.bf16.msra.mxu1 %v13149_v36 }
0x13fd   :  { %4711 = vmatprep.subr.bf16.mxu1 %v13150_v32 }
0x1400   :  { %4712 = vmatpush2.bf16.msra.mxu1 %v13151_v27 }
0x1401   :  { %4713 = vmatprep.subr.bf16.mxu1 %v13152_v5 }
0x1404   :  { %4714 = vmatpush2.bf16.msra.mxu1 %v13153_v50 }
0x1487   :  { %v8642_v54 = vpop.f32.mrf.mxu1 }
0x1489   :  { %v8643_v57 = vpop.f32.mrf.mxu1 }
0x148a   :  { %v8644_v61 = vadd.f32 %v8643_v57, %v8642_v54 }
0x148b   :  { %v8645_v2 = vpop.f32.mrf.mxu1 }
0x148c   :  { %v4221_v7 = vpack.c.bf16 %v8644_v61, %v8644_v61 }
0x148d   :  { %v8646_v17 = vpop.f32.mrf.mxu1 }
0x148e   :  { %v4225_v25 = vsel %vm4224_vm10, %v8148_v22, %v4221_v7 }
0x148f   :  { %4226 = vst [vmem:[#allocation3] sm:$0xf] %v4225_v25  ;;  %v4759_v25 = vld [vmem:[%s12808_s11] sm:$0x3] }
0x1496   :  { %v4228_v15 = vld [vmem:[#allocation3] sm:$0xff] }
0x1497   :  { %v8151_v34 = vcombine.high %v4228_v15, %v4228_v15  ;;  %v8150_v1 = vcombine.low %v4228_v15, %v4228_v15  ;;  %v4764_v15 = vrot.slane %v4759_v25, %v13032_v11 }
0x1499   :  { %4674 = vmatprep.mubr.bf16.mxu0 %v8151_v34  ;;  %4715 = vmatprep.mubr.bf16.mxu1 %v8151_v34 }
0x149a   :  { %4675 = vmatmul.mubr.bf16.vlgmr.msra.gmra.mxu0 %v8150_v1  ;;  %4716 = vmatmul.mubr.bf16.vlgmr.msra.gmra.mxu1 %v8150_v1 }
0x149b   :  { %4852 = vmatpush1.bf16.msra.mxu0 %v13154_v53  ;;  %4883 = vmatprep.mubr.bf16.mxu0 %v13155_v40 }
0x149c   :  { %4853 = vmatprep.subr.bf16.mxu0 %v13156_v0 }
0x149f   :  { %4854 = vmatpush1.bf16.msra.mxu0 %v13157_v58 }
0x14a0   :  { %4855 = vmatprep.subr.bf16.mxu0 %v13158_v28 }
0x14a3   :  { %4856 = vmatpush1.bf16.msra.mxu0 %v13159_v41 }
0x14a4   :  { %4857 = vmatprep.subr.bf16.mxu0 %v13160_v30 }
0x14a7   :  { %4858 = vmatpush1.bf16.msra.mxu0 %v13161_v24 }
0x14a8   :  { %4859 = vmatprep.subr.bf16.mxu0 %v13162_v35 }
0x14ab   :  { %4860 = vmatpush1.bf16.msra.mxu0 %v13163_v39 }
0x14ac   :  { %4861 = vmatprep.subr.bf16.mxu0 %v13164_v62 }
0x14af   :  { %4862 = vmatpush1.bf16.msra.mxu0 %v13165_v44 }
0x14b0   :  { %4863 = vmatprep.subr.bf16.mxu0 %v13166_v21  ;;  %v9139_v21 = vld [vmem:[%s12804_s7 + $0x78] sm:$0xff]  }
0x14b1   :  { %8648 = vmatprep.subr.bf16.mxu1 %v9139_v21  ;;  %v11935_v21 = vld [vmem:[%s12805_s8 + $0x8c] ss:$16 sps:$4 sm:$0xff]  }
0x14b2   :  { %13174 = vst [vmem:[#allocation14_spill] sm:$0xff] %v11935_v21 }
0x14b3   :  { %4864 = vmatpush1.bf16.msra.mxu0 %v13167_v31  ;;  %v9140_v31 = vld [vmem:[%s12804_s7 + $0x38] sm:$0xff]  }
0x14b4   :  { %4865 = vmatprep.subr.bf16.mxu0 %v13168_v52  ;;  %v9141_v52 = vld [vmem:[%s12804_s7 + $0x70] sm:$0xff]   ;;  %8649 = vmatpush3.bf16.msra.mxu1 %v9140_v31  ;;  %v11941_v31 = vld [vmem:[%s12805_s8 + $0x88] ss:$16 sps:$4 sm:$0xff]  }
0x14b5   :  { %8650 = vmatprep.subr.bf16.mxu1 %v9141_v52  ;;  %13175 = vst [vmem:[#allocation15_spill] sm:$0xff] %v11941_v31  ;;  %v11947_v52 = vld [vmem:[%s12805_s8 + $0x6c] ss:$16 sps:$4 sm:$0xff]  }
0x14b6   :  { %13176 = vst [vmem:[#allocation17_spill] sm:$0xff] %v11947_v52 }
0x14b7   :  { %4866 = vmatpush1.bf16.msra.mxu0 %v13169_v55  ;;  %v9142_v55 = vld [vmem:[%s12804_s7 + $0x30] sm:$0xff]  }
0x14b8   :  { %8651 = vmatpush3.bf16.msra.mxu1 %v9142_v55  ;;  %v11953_v55 = vld [vmem:[%s12805_s8 + $0x68] ss:$16 sps:$4 sm:$0xff]  }
0x14b9   :  { %8652 = vmatprep.subr.bf16.mxu1 %v9143_v4  ;;  %13177 = vst [vmem:[#allocation18_spill] sm:$0xff] %v11953_v55  ;;  %v11959_v4 = vld [vmem:[%s12805_s8 + $0x4c] ss:$16 sps:$4 sm:$0xff]  }
0x14ba   :  { %13178 = vst [vmem:[#allocation19_spill] sm:$0xff] %v11959_v4 }
0x155a   :  { %v4676_v59 = vpop.f32.mrf.mxu0  ;;  %v4717_v19 = vpop.f32.mrf.mxu1 }
0x155b   :  { %v4677_v45 = vadd.f32 %v4676_v59, %v4298_v56  ;;  %v4718_v10 = vadd.f32 %v4717_v19, %v4306_v14  ;;  %v9144_v56 = vld [vmem:[%s12804_s7 + $0x28] sm:$0xff]   ;;  %v9146_v59 = vld [vmem:[%s12804_s7 + $0x20] sm:$0xff]   ;;  %v9147_v19 = vld [vmem:[%s12804_s7 + $0x58] sm:$0xff]  }
0x155c   :  { %v4678_v23 = vpop.f32.mrf.mxu0  ;;  %v4719_v60 = vpop.f32.mrf.mxu1  ;;  %8653 = vmatpush3.bf16.msra.mxu1 %v9144_v56  ;;  %v11965_v56 = vld [vmem:[%s12805_s8 + $0x48] ss:$16 sps:$4 sm:$0xff]  }
0x155d   :  { %v4724_v6 = vmul.f32 0.5, %v4677_v45  ;;  %v4679_v49 = vadd.f32 %v4678_v23, %v4302_v37  ;;  %v4720_v43 = vadd.f32 %v4719_v60, %v4310_v47  ;;  %v9145_v37 = vld [vmem:[%s12804_s7 + $0x60] sm:$0xff]   ;;  %v9148_v45 = vld [vmem:[%s12804_s7 + $0x18] sm:$0xff]   ;;  %v9149_v23 = vld [vmem:[%s12804_s7 + $0x50] sm:$0xff]   ;;  %13179 = vst [vmem:[#allocation21_spill] sm:$0xff] %v11965_v56 }
0x155e   :  { %v4680_v42 = vpop.f32.mrf.mxu0  ;;  %v4721_v38 = vpop.f32.mrf.mxu1  ;;  %8654 = vmatprep.subr.bf16.mxu1 %v9145_v37  ;;  %v9150_v60 = vld [vmem:[%s12804_s7 + $0x10] sm:$0xff]   ;;  %v11971_v37 = vld [vmem:[%s12805_s8 + $0x2c] ss:$16 sps:$4 sm:$0xff]  }
0x155f   :  { %9559 = vtanh.f32 %v4724_v6  ;;  %v4728_v16 = vmul.f32 0.5, %v4679_v49  ;;  %v4733_v20 = vmul.f32 0.5, %v4720_v43  ;;  %v9151_v6 = vld [vmem:[%s12804_s7 + $0x48] sm:$0xff]   ;;  %v11756_v47 = vld [vmem:[%s12805_s8 + $0xe4] ss:$16 sps:$4 sm:$0xff]   ;;  %13180 = vst [vmem:[#allocation20_spill] sm:$0xff] %v11971_v37 }
0x1560   :  { %v4681_v46 = vpop.f32.mrf.mxu0  ;;  %v4722_v63 = vpop.f32.mrf.mxu1  ;;  %8655 = vmatpush3.bf16.msra.mxu1 %v9146_v59  ;;  %v11761_v43 = vld [vmem:[%s12805_s8 + $0xec] ss:$16 sps:$4 sm:$0xff]   ;;  %5521 = vmatprep.subr.bf16.mxu0 %v11756_v47  ;;  %v11977_v59 = vld [vmem:[%s12805_s8 + $0x28] ss:$16 sps:$4 sm:$0xff]  }
0x1561   :  { %9561 = vtanh.f32 %v4728_v16  ;;  %8656 = vmatprep.subr.bf16.mxu1 %v9147_v19  ;;  %v9152_v16 = vld [vmem:[%s12804_s7 + $0x8] sm:$0xff]   ;;  %v9153_v46 = vld [vmem:[%s12804_s7 + $0x40] sm:$0xff]   ;;  %13181 = vst [vmem:[#allocation22_spill] sm:$0xff] %v11977_v59 }
0x1562   :  { %9563 = vtanh.f32 %v4718_v10  ;;  %v9154_v63 = vld [vmem:[%s12804_s7] sm:$0xff]   ;;  %v11983_v19 = vld [vmem:[%s12805_s8 + $0xc] ss:$16 sps:$4 sm:$0xff]  }
0x1563   :  { %9565 = vtanh.f32 %v4733_v20  ;;  %v11751_v10 = vld [vmem:[%s12805_s8 + $0xe0] ss:$16 sps:$4 sm:$0xff]   ;;  %v11766_v20 = vld [vmem:[%s12805_s8 + $0xc4] ss:$16 sps:$4 sm:$0xff]   ;;  %13182 = vst [vmem:[#allocation23_spill] sm:$0xff] %v11983_v19 }
0x1564   :  { %8657 = vmatpush3.bf16.msra.mxu1 %v9148_v45  ;;  %v11989_v45 = vld [vmem:[%s12805_s8 + $0x8] ss:$16 sps:$4 sm:$0xff]  }
0x1565   :  { %8658 = vmatprep.subr.bf16.mxu1 %v9149_v23  ;;  %13183 = vst [vmem:[#allocation25_spill] sm:$0xff] %v11989_v45  ;;  %v11995_v23 = vld [vmem:[%s12805_s8 + $0x1ec] ss:$16 sps:$4 sm:$0xff]  }
0x1566   :  { %13184 = vst [vmem:[#allocation24_spill] sm:$0xff] %v11995_v23 }
0x1568   :  { %8659 = vmatpush3.bf16.msra.mxu1 %v9150_v60  ;;  %v12001_v60 = vld [vmem:[%s12805_s8 + $0x1e8] ss:$16 sps:$4 sm:$0xff]  }
0x1569   :  { %8660 = vmatprep.subr.bf16.mxu1 %v9151_v6  ;;  %13185 = vst [vmem:[#allocation26_spill] sm:$0xff] %v12001_v60  ;;  %v12007_v6 = vld [vmem:[%s12805_s8 + $0x1cc] ss:$16 sps:$4 sm:$0xff]  }
0x156a   :  { %13186 = vst [vmem:[#allocation31_spill] sm:$0xff] %v12007_v6 }
0x156c   :  { %v9560_v18 = vpop.eup %9559  ;;  %8661 = vmatpush3.bf16.msra.mxu1 %v9152_v16  ;;  %v12037_v16 = vld [vmem:[%s12805_s8 + $0x188] ss:$16 sps:$4 sm:$0xff]  }
0x156d   :  { %v4726_v33 = vmul.f32 0.5, %v9560_v18  ;;  %8662 = vmatprep.subr.bf16.mxu1 %v9153_v46  ;;  %v11774_v18 = vld [vmem:[%s12805_s8 + $0xc0] ss:$16 sps:$4 sm:$0xff]   ;;  %13191 = vst [vmem:[#allocation36_spill] sm:$0xff] %v12037_v16  ;;  %v12044_v46 = vld [vmem:[%s12805_s8 + $0x164] ss:$16 sps:$4 sm:$0xff]  }
0x156e   :  { %v9562_v51 = vpop.eup %9561 }
0x156f   :  { %v4727_v36 = vadd.f32 0.5, %v4726_v33  ;;  %v4730_v32 = vmul.f32 0.5, %v9562_v51  ;;  %v9564_v5 = vpop.eup %9563  ;;  %v11780_v33 = vld [vmem:[%s12805_s8 + $0xa4] ss:$16 sps:$4 sm:$0xff]   ;;  %v11786_v51 = vld [vmem:[%s12805_s8 + $0xa0] ss:$16 sps:$4 sm:$0xff]  }
0x1570   :  { %v9566_v57 = vpop.eup %9565  ;;  %8663 = vmatpush3.bf16.msra.mxu1 %v9154_v63  ;;  %v12049_v63 = vld [vmem:[%s12805_s8 + $0x16c] ss:$16 sps:$4 sm:$0xff]  }
0x1571   :  { %v4731_v27 = vadd.f32 0.5, %v4730_v32  ;;  %v4738_v54 = vmul.f32 %v9564_v5, %v4727_v36  ;;  %v4735_v61 = vmul.f32 0.5, %v9566_v57  ;;  %5562 = vmatprep.subr.bf16.mxu1 %v11761_v43  ;;  %v11792_v36 = vld [vmem:[%s12805_s8 + $0x84] ss:$16 sps:$4 sm:$0xff]   ;;  %v11798_v32 = vld [vmem:[%s12805_s8 + $0x80] ss:$16 sps:$4 sm:$0xff]  }
0x1572   :  { %v11810_v5 = vld [vmem:[%s12805_s8 + $0x60] ss:$16 sps:$4 sm:$0xff]   ;;  %v11828_v57 = vld [vmem:[%s12805_s8 + $0x24] ss:$16 sps:$4 sm:$0xff]   ;;  %13192 = vst [vmem:[#allocation37_spill] sm:$0xff] %v12049_v63 }
0x1573   :  { %v4737_v50 = vmul.f32 %v4731_v27, %v11522_v3  ;;  %v4736_v22 = vadd.f32 0.5, %v4735_v61  ;;  %v4768_v3 = vrot.slane %v4759_v25, %v13033_v13  ;;  %v11804_v27 = vld [vmem:[%s12805_s8 + $0x64] ss:$16 sps:$4 sm:$0xff]   ;;  %v11834_v61 = vld [vmem:[%s12805_s8 + $0x20] ss:$16 sps:$4 sm:$0xff]  }
0x1574   :  { %v11864_v25 = vld [vmem:[%s12805_s8 + $0x1c4] ss:$16 sps:$4 sm:$0xff]  }
0x1575   :  { %v11681_v12 = vadd.f32 %v4738_v54, %v4737_v50  ;;  %v11816_v50 = vld [vmem:[%s12805_s8 + $0x44] ss:$16 sps:$4 sm:$0xff]   ;;  %v11822_v54 = vld [vmem:[%s12805_s8 + $0x40] ss:$16 sps:$4 sm:$0xff]  }
0x1577   :  { %9567 = vtanh.f32 %v11681_v12 }
0x1584   :  { %v9568_v2 = vpop.eup %9567 }
0x1585   :  { %v4741_v7 = vmul.f32 %v9568_v2, %v4736_v22  ;;  %v11840_v22 = vld [vmem:[%s12805_s8 + $0x4] ss:$16 sps:$4 sm:$0xff]   ;;  %v11846_v2 = vld [vmem:[%s12805_s8] ss:$16 sps:$4 sm:$0xff]  }
0x1587   :  { %v4742_v17 = vpack.c.bf16 %v4741_v7, %v4741_v7  ;;  %v11852_v7 = vld [vmem:[%s12805_s8 + $0x1e4] ss:$16 sps:$4 sm:$0xff]  }
0x1589   :  { %4884 = vmatmul.mubr.bf16.vlgmr.msra.gmra.mxu0 %v4742_v17  ;;  %5106 = vst [vmem:[#allocation3 + $0x4] sm:$0xf] %v4742_v17  ;;  %v11858_v17 = vld [vmem:[%s12805_s8 + $0x1e0] ss:$16 sps:$4 sm:$0xff]  }
0x158a   :  { %5522 = vmatpush1.bf16.msra.mxu0 %v11751_v10 }
0x158b   :  { %5523 = vmatprep.subr.bf16.mxu0 %v11766_v20 }
0x158e   :  { %5524 = vmatpush1.bf16.msra.mxu0 %v11774_v18 }
0x158f   :  { %5525 = vmatprep.subr.bf16.mxu0 %v11780_v33 }
0x1592   :  { %5526 = vmatpush1.bf16.msra.mxu0 %v11786_v51 }
0x1593   :  { %5527 = vmatprep.subr.bf16.mxu0 %v11792_v36 }
0x1596   :  { %5528 = vmatpush1.bf16.msra.mxu0 %v11798_v32 }
0x1597   :  { %5529 = vmatprep.subr.bf16.mxu0 %v11804_v27 }
0x159a   :  { %5530 = vmatpush1.bf16.msra.mxu0 %v11810_v5 }
0x159b   :  { %5531 = vmatprep.subr.bf16.mxu0 %v11816_v50 }
0x159e   :  { %5532 = vmatpush1.bf16.msra.mxu0 %v11822_v54 }
0x159f   :  { %5533 = vmatprep.subr.bf16.mxu0 %v11828_v57 }
0x15a2   :  { %5534 = vmatpush1.bf16.msra.mxu0 %v11834_v61 }
0x15a3   :  { %5535 = vmatprep.subr.bf16.mxu0 %v11840_v22 }
0x15a6   :  { %5536 = vmatpush1.bf16.msra.mxu0 %v11846_v2 }
0x15a7   :  { %5537 = vmatprep.subr.bf16.mxu0 %v11852_v7 }
0x15aa   :  { %5538 = vmatpush2.bf16.msra.mxu0 %v11858_v17 }
0x15ab   :  { %5539 = vmatprep.subr.bf16.mxu0 %v11864_v25 }
0x1649   :  { %v4885_v34 = vpop.f32.mrf.mxu0 }
0x164a   :  { %v4886_v1 = vadd.f32 %v4885_v34, %v4764_v15  ;;  %v11870_v15 = vld [vmem:[%s12805_s8 + $0x1c0] ss:$16 sps:$4 sm:$0xff]  }
0x164b   :  { %v4887_v53 = vpop.f32.mrf.mxu0  ;;  %5540 = vmatpush2.bf16.msra.mxu0 %v11870_v15  ;;  %v11882_v34 = vld [vmem:[%s12805_s8 + $0x1a0] ss:$16 sps:$4 sm:$0xff]  }
0x164c   :  { %8232 = vst [vmem:[%s12809_s12 + $0x30] sm:$0xff] %v4886_v1  ;;  %v4888_v0 = vadd.f32 %v4887_v53, %v4768_v3  ;;  %v11876_v3 = vld [vmem:[%s12805_s8 + $0x1a4] ss:$16 sps:$4 sm:$0xff]   ;;  %v11894_v53 = vld [vmem:[%s12805_s8 + $0x180] ss:$16 sps:$4 sm:$0xff]  }
0x164d   :  { %v4889_v58 = vpop.f32.mrf.mxu0  ;;  %5541 = vmatprep.subr.bf16.mxu0 %v11876_v3 }
0x164e   :  { %8233 = vst [vmem:[%s12809_s12 + $0x38] sm:$0xff] %v4888_v0  ;;  %v4897_v28 = vmax.f32 %v4886_v1, %v4888_v0 }
0x164f   :  { %v4890_v41 = vpop.f32.mrf.mxu0  ;;  %5542 = vmatpush2.bf16.msra.mxu0 %v11882_v34 }
0x1650   :  { %4898 = vmax.xlane.f32.xlu1 %v4897_v28 }
0x16d9   :  { %v4899_v30 = vpop.xlane.xlu1 %4898 }
0x16da   :  { %vm4900_vm11 = vcmp.eq.f32.partialorder %v4886_v1, %v4899_v30  ;;  %vm4901_vm12 = vcmp.eq.f32.partialorder %v4888_v0, %v4899_v30  ;;  %v11888_v1 = vld [vmem:[%s12805_s8 + $0x184] ss:$16 sps:$4 sm:$0xff]  }
0x16db   :  { %v4902_v24 = vsel %vm4900_vm11, %v10839_v29, 256  ;;  %v4903_v35 = vsel %vm4901_vm12, %v10842_v9, 256  ;;  %5543 = vmatprep.subr.bf16.mxu0 %v11888_v1 }
0x16dc   :  { %vm4904_vm13 = vcmp.lt.s32.totalorder %v4902_v24, %v4903_v35  ;;  %5544 = vmatpush2.bf16.msra.mxu0 %v11894_v53 }
0x16dd   :  { %v4905_v39 = vsel %vm4904_vm13, %v4902_v24, %v4903_v35  ;;  %v11904_v24 = vld [vmem:[%s12805_s8 + $0xe8] ss:$16 sps:$4 sm:$0xff]   ;;  %v11909_v35 = vld [vmem:[%s12805_s8 + $0xcc] ss:$16 sps:$4 sm:$0xff]   ;;  %5545 = vmatprep.subr.bf16.mxu0 %v12044_v46 }
0x16de   :  { %v4907_v62 = vshra.s32 %v4905_v39, 16  ;;  %v4906_v14 = vand.u32 65535, %v4905_v39  ;;  %13170 = vst [vmem:[#allocation57_spill] sm:$0xff] %v11909_v35  ;;  %v11917_v39 = vld [vmem:[%s12805_s8 + $0xc8] ss:$16 sps:$4 sm:$0xff]  }
0x16df   :  { %13171 = vst [vmem:[#allocation58_spill] sm:$0xff] %v11917_v39 }
0x16e0   :  { %v4909_v44 = vcvt.s32.f32 %v4907_v62  ;;  %v4908_v42 = vcvt.s32.f32 %v4906_v14  ;;  %v11923_v62 = vld [vmem:[%s12805_s8 + $0xac] ss:$16 sps:$4 sm:$0xff]   ;;  %v12013_v14 = vld [vmem:[%s12805_s8 + $0x1c8] ss:$16 sps:$4 sm:$0xff]  }
0x16e1   :  { %13172 = vst [vmem:[#allocation13_spill] sm:$0xff] %v11923_v62  ;;  %13187 = vst [vmem:[#allocation32_spill] sm:$0xff] %v12013_v14 }
0x16e2   :  { %4910 = vmin.xlane.f32.xlu0 %v4909_v44 }
0x176b   :  { %v11736_v49 = vpop.xlane.xlu0 %4910 }
0x176c   :  { %vm4912_vm14 = vcmp.eq.f32.partialorder %v4909_v44, %v11736_v49  ;;  %v4917_v0 = vcvt.f32.s32 %v11736_v49  ;;  %v11929_v44 = vld [vmem:[%s12805_s8 + $0xa8] ss:$16 sps:$4 sm:$0xff]   ;;  %v12019_v49 = vld [vmem:[%s12805_s8 + $0x1ac] ss:$16 sps:$4 sm:$0xff]  }
0x176d   :  { %v4913_v38 = vsel %vm4912_vm14, %v4908_v42, inf  ;;  %13173 = vst [vmem:[#allocation16_spill] sm:$0xff] %v11929_v44  ;;  %13188 = vst [vmem:[#allocation33_spill] sm:$0xff] %v12019_v49  ;;  %v12025_v42 = vld [vmem:[%s12805_s8 + $0x1a8] ss:$16 sps:$4 sm:$0xff]  }
0x176e   :  { %4914 = vmin.xlane.f32.xlu1 %v4913_v38  ;;  %v4918_v28 = vshll.u32 %v4917_v0, 16  ;;  %13189 = vst [vmem:[#allocation34_spill] sm:$0xff] %v12025_v42  ;;  %v12031_v38 = vld [vmem:[%s12805_s8 + $0x18c] ss:$16 sps:$4 sm:$0xff]   ;;  %v12054_v0 = vld [vmem:[%s12805_s8 + $0x160] ss:$16 sps:$4 sm:$0xff]  }
0x176f   :  { %13190 = vst [vmem:[#allocation35_spill] sm:$0xff] %v12031_v38  ;;  %5546 = vmatpush2.bf16.msra.mxu0 %v12054_v0 }
0x17f7   :  { %v4915_v58 = vpop.xlane.xlu1 %4914 }
0x17f8   :  { %v4916_v41 = vcvt.f32.s32 %v4915_v58  ;;  %v12059_v58 = vld [vmem:[%s12805_s8 + $0x168] ss:$16 sps:$4 sm:$0xff]  }
0x17f9   :  { %13193 = vst [vmem:[#allocation38_spill] sm:$0xff] %v12059_v58 }
0x17fa   :  { %v4919_v30 = vadd.s32 %v4918_v28, %v4916_v41  ;;  %v12068_v28 = vld [vmem:[%s12805_s8 + $0x144] ss:$16 sps:$4 sm:$0xff]   ;;  %v12073_v41 = vld [vmem:[%s12805_s8 + $0x14c] ss:$16 sps:$4 sm:$0xff]  }
0x17fb   :  { %13194 = vst [vmem:[#allocation39_spill] sm:$0xff] %v12073_v41  ;;  %5547 = vmatprep.subr.bf16.mxu0 %v12068_v28 }
0x17fc   :  { %vm4920_vm15 = vcmp.eq.s32.totalorder %v10839_v29, %v4919_v30  ;;  %vm4921_vm0 = vcmp.eq.s32.totalorder %v10842_v9, %v4919_v30  ;;  %v12078_v30 = vld [vmem:[%s12805_s8 + $0x140] ss:$16 sps:$4 sm:$0xff]  }
0x17fd   :  { %vm8254_vm1 = vmpackc.low %vm4920_vm15, %vm4920_vm15  ;;  %5548 = vmatpush2.bf16.msra.mxu0 %v12078_v30 }
0x17fe   :  { %vm8252_vm2 = vmpackc.low %vm4921_vm0, %vm4921_vm0 }
0x17ff   :  { %8253 = vmatprep.mubr.msk.bf16.mxu1 %vm8252_vm2, %v13124_v8 }
0x1800   :  { %8255 = vmatmul.mubr.msk.bf16.vlgmr.msra.gmra.mxu1 %vm8254_vm1, %v13124_v8 }
0x1801   :  { %5563 = vmatpush1.bf16.msra.mxu1 %v11904_v24 }
0x1802   :  { %5564 = vmatprep.subr.bf16.mxu1 %v11909_v35 }
0x1805   :  { %5565 = vmatpush1.bf16.msra.mxu1 %v11917_v39 }
0x1806   :  { %5566 = vmatprep.subr.bf16.mxu1 %v11923_v62 }
0x1809   :  { %5567 = vmatpush1.bf16.msra.mxu1 %v11929_v44 }
0x180a   :  { %5568 = vmatprep.subr.bf16.mxu1 %v11935_v21 }
0x180d   :  { %5569 = vmatpush1.bf16.msra.mxu1 %v11941_v31 }
0x180e   :  { %5570 = vmatprep.subr.bf16.mxu1 %v11947_v52 }
0x1811   :  { %5571 = vmatpush1.bf16.msra.mxu1 %v11953_v55 }
0x1812   :  { %5572 = vmatprep.subr.bf16.mxu1 %v11959_v4 }
0x1815   :  { %5573 = vmatpush1.bf16.msra.mxu1 %v11965_v56 }
0x1816   :  { %5574 = vmatprep.subr.bf16.mxu1 %v11971_v37 }
0x1819   :  { %5575 = vmatpush1.bf16.msra.mxu1 %v11977_v59 }
0x181a   :  { %5576 = vmatprep.subr.bf16.mxu1 %v11983_v19 }
0x181d   :  { %5577 = vmatpush1.bf16.msra.mxu1 %v11989_v45 }
0x181e   :  { %5578 = vmatprep.subr.bf16.mxu1 %v11995_v23  ;;  %v8256_v23 = vld [vmem:[%s12800_s3 + $0xc] sm:$0xf] }
0x1821   :  { %5579 = vmatpush2.bf16.msra.mxu1 %v12001_v60 }
0x1822   :  { %5580 = vmatprep.subr.bf16.mxu1 %v12007_v6 }
0x1825   :  { %5581 = vmatpush2.bf16.msra.mxu1 %v12013_v14  ;;  %v12131_v14 = vld [vmem:[%s12805_s8 + $0x108] ss:$16 sps:$4 sm:$0xff]  }
0x1826   :  { %5582 = vmatprep.subr.bf16.mxu1 %v12019_v49  ;;  %v12126_v49 = vld [vmem:[%s12805_s8 + $0x100] ss:$16 sps:$4 sm:$0xff]   ;;  %13199 = vst [vmem:[#allocation44_spill] sm:$0xff] %v12131_v14 }
0x1829   :  { %5583 = vmatpush2.bf16.msra.mxu1 %v12025_v42  ;;  %v12118_v42 = vld [vmem:[%s12805_s8 + $0x10c] ss:$16 sps:$4 sm:$0xff]  }
0x182a   :  { %5584 = vmatprep.subr.bf16.mxu1 %v12031_v38  ;;  %v12102_v38 = vld [vmem:[%s12805_s8 + $0x128] ss:$16 sps:$4 sm:$0xff]   ;;  %13198 = vst [vmem:[#allocation42_spill] sm:$0xff] %v12118_v42 }
0x182b   :  { %13196 = vst [vmem:[#allocation41_spill] sm:$0xff] %v12102_v38 }
0x182d   :  { %5585 = vmatpush2.bf16.msra.mxu1 %v12037_v16  ;;  %v12097_v16 = vld [vmem:[%s12805_s8 + $0x124] ss:$16 sps:$4 sm:$0xff]  }
0x182e   :  { %5586 = vmatprep.subr.bf16.mxu1 %v12049_v63  ;;  %v12083_v63 = vld [vmem:[%s12805_s8 + $0x148] ss:$16 sps:$4 sm:$0xff]   ;;  %5549 = vmatprep.subr.bf16.mxu0 %v12097_v16 }
0x182f   :  { %13195 = vst [vmem:[#allocation40_spill] sm:$0xff] %v12083_v63 }
0x1831   :  { %5587 = vmatpush2.bf16.msra.mxu1 %v12059_v58  ;;  %v12092_v58 = vld [vmem:[%s12805_s8 + $0x120] ss:$16 sps:$4 sm:$0xff]  }
0x1832   :  { %5588 = vmatprep.subr.bf16.mxu1 %v12073_v41  ;;  %v12107_v41 = vld [vmem:[%s12805_s8 + $0x12c] ss:$16 sps:$4 sm:$0xff]   ;;  %5550 = vmatpush2.bf16.msra.mxu0 %v12092_v58 }
0x1833   :  { %13197 = vst [vmem:[#allocation43_spill] sm:$0xff] %v12107_v41 }
0x1835   :  { %5589 = vmatpush2.bf16.msra.mxu1 %v12083_v63  ;;  %v12112_v63 = vld [vmem:[%s12805_s8 + $0x104] ss:$16 sps:$4 sm:$0xff]  }
0x1836   :  { %5590 = vmatprep.subr.bf16.mxu1 %v12107_v41  ;;  %5551 = vmatprep.subr.bf16.mxu0 %v12112_v63  ;;  %v5102_v41 = vstv %s5101_s28  ;;  %s8581_s28 = sld [smem:[#allocation5 + $0x6]] }
0x1837   :  { %5552 = vmatpush2.bf16.msra.mxu0 %v12126_v49  ;;  %vm5103_vm3 = vcmp.eq.s32.totalorder %v5102_v41, 1  ;;  %v12209_v41 = vld [vmem:[%s12807_s10 + $0x20] ss:$8 sps:$4 sm:$0xff]  }
0x1838   :  { %13210 = vst [vmem:[#allocation51_spill] sm:$0xff] %v12209_v41 }
0x1839   :  { %5591 = vmatpush2.bf16.msra.mxu1 %v12102_v38 }
0x183a   :  { %5592 = vmatprep.subr.bf16.mxu1 %v12118_v42 }
0x183c   :  { %p7736_p7 = scmp.eq.s32.totalorder %s8581_s28, 1 }
0x183d   :  { %5593 = vmatpush2.bf16.msra.mxu1 %v12131_v14 }
0x18c0   :  { %v8664_v38 = vpop.f32.mrf.mxu1 }
0x18c2   :  { %v8665_v6 = vpop.f32.mrf.mxu1 }
0x18c3   :  { %v8666_v60 = vadd.f32 %v8665_v6, %v8664_v38  ;;  %v12144_v6 = vld [vmem:[%s12807_s10 + $0x74] ss:$8 sps:$4 sm:$0xff]   ;;  %v12204_v38 = vld [vmem:[%s12807_s10 + $0x24] ss:$8 sps:$4 sm:$0xff]  }
0x18c4   :  { %v8667_v45 = vpop.f32.mrf.mxu1  ;;  %5730 = vmatprep.subr.bf16.mxu0 %v12144_v6  ;;  %13209 = vst [vmem:[#allocation50_spill] sm:$0xff] %v12204_v38 }
0x18c5   :  { %v5100_v19 = vpack.c.bf16 %v8666_v60, %v8666_v60  ;;  %v12173_v45 = vld [vmem:[%s12807_s10 + $0x50] ss:$8 sps:$4 sm:$0xff]   ;;  %v12185_v60 = vld [vmem:[%s12807_s10 + $0x40] ss:$8 sps:$4 sm:$0xff]  }
0x18c6   :  { %v8668_v59 = vpop.f32.mrf.mxu1  ;;  %13204 = vst [vmem:[#allocation29_spill] sm:$0xff] %v12173_v45  ;;  %13206 = vst [vmem:[#allocation30_spill] sm:$0xff] %v12185_v60 }
0x18c7   :  { %v5104_v42 = vsel %vm5103_vm3, %v8256_v23, %v5100_v19  ;;  %v12149_v59 = vld [vmem:[%s12807_s10 + $0x70] ss:$8 sps:$4 sm:$0xff]   ;;  %v12168_v19 = vld [vmem:[%s12807_s10 + $0x54] ss:$8 sps:$4 sm:$0xff]   ;;  %v12180_v23 = vld [vmem:[%s12807_s10 + $0x44] ss:$8 sps:$4 sm:$0xff]  }
0x18c8   :  { %5105 = vst [vmem:[#allocation3] sm:$0xf] %v5104_v42  ;;  %13200 = vst [vmem:[#allocation45_spill] sm:$0xff] %v12149_v59  ;;  %v12197_v42 = vld [vmem:[%s12807_s10 + $0x30] ss:$8 sps:$4 sm:$0xff]  }
0x18c9   :  { %13203 = vst [vmem:[#allocation27_spill] sm:$0xff] %v12168_v19  ;;  %13205 = vst [vmem:[#allocation28_spill] sm:$0xff] %v12180_v23 }
0x18ca   :  { %13208 = vst [vmem:[#allocation49_spill] sm:$0xff] %v12197_v42 }
0x18cf   :  { %v5107_v37 = vld [vmem:[#allocation3] sm:$0xff] }
0x18d0   :  { %v8259_v56 = vcombine.high %v5107_v37, %v5107_v37  ;;  %v8258_v14 = vcombine.low %v5107_v37, %v5107_v37  ;;  %v12161_v37 = vld [vmem:[%s12807_s10 + $0x60] ss:$8 sps:$4 sm:$0xff]  }
0x18d1   :  { %13202 = vst [vmem:[#allocation47_spill] sm:$0xff] %v12161_v37 }
0x18d2   :  { %5553 = vmatprep.mubr.bf16.mxu0 %v8259_v56  ;;  %5594 = vmatprep.mubr.bf16.mxu1 %v8259_v56  ;;  %v12156_v56 = vld [vmem:[%s12807_s10 + $0x64] ss:$8 sps:$4 sm:$0xff]  }
0x18d3   :  { %5554 = vmatmul.mubr.bf16.vlgmr.msra.gmra.mxu0 %v8258_v14  ;;  %5595 = vmatmul.mubr.bf16.vlgmr.msra.gmra.mxu1 %v8258_v14  ;;  %13201 = vst [vmem:[#allocation46_spill] sm:$0xff] %v12156_v56  ;;  %v12192_v14 = vld [vmem:[%s12807_s10 + $0x34] ss:$8 sps:$4 sm:$0xff]  }
0x18d4   :  { %5762 = vmatprep.mubr.bf16.mxu0 %v13155_v40  ;;  %5731 = vmatpush1.bf16.msra.mxu0 %v12149_v59  ;;  %13207 = vst [vmem:[#allocation48_spill] sm:$0xff] %v12192_v14 }
0x18d5   :  { %5732 = vmatprep.subr.bf16.mxu0 %v12156_v56 }
0x18d8   :  { %5733 = vmatpush1.bf16.msra.mxu0 %v12161_v37 }
0x18d9   :  { %5734 = vmatprep.subr.bf16.mxu0 %v12168_v19 }
0x18dc   :  { %5735 = vmatpush1.bf16.msra.mxu0 %v12173_v45 }
0x18dd   :  { %5736 = vmatprep.subr.bf16.mxu0 %v12180_v23 }
0x18e0   :  { %5737 = vmatpush1.bf16.msra.mxu0 %v12185_v60 }
0x18e1   :  { %5738 = vmatprep.subr.bf16.mxu0 %v12192_v14  ;;  %v12216_v14 = vld [vmem:[%s12807_s10 + $0x14] ss:$8 sps:$4 sm:$0xff]  }
0x18e2   :  { %13211 = vst [vmem:[#allocation52_spill] sm:$0xff] %v12216_v14 }
0x18e4   :  { %5739 = vmatpush1.bf16.msra.mxu0 %v12197_v42  ;;  %v12221_v42 = vld [vmem:[%s12807_s10 + $0x10] ss:$8 sps:$4 sm:$0xff]  }
0x18e5   :  { %5740 = vmatprep.subr.bf16.mxu0 %v12204_v38  ;;  %13212 = vst [vmem:[#allocation53_spill] sm:$0xff] %v12221_v42  ;;  %v12228_v38 = vld [vmem:[%s12807_s10 + $0x4] ss:$8 sps:$4 sm:$0xff]  }
0x18e6   :  { %13213 = vst [vmem:[#allocation54_spill] sm:$0xff] %v12228_v38 }
0x18e8   :  { %5741 = vmatpush1.bf16.msra.mxu0 %v12209_v41  ;;  %v12233_v41 = vld [vmem:[%s12807_s10] ss:$8 sps:$4 sm:$0xff]  }
0x18e9   :  { %5742 = vmatprep.subr.bf16.mxu0 %v12216_v14  ;;  %13214 = vst [vmem:[#allocation55_spill] sm:$0xff] %v12233_v41 }
0x18ec   :  { %5743 = vmatpush1.bf16.msra.mxu0 %v12221_v42  ;;  %v5172_v42 = vld [vmem:[%s12806_s9] sm:$0xf] }
0x18ed   :  { %5744 = vmatprep.subr.bf16.mxu0 %v12228_v38  ;;  %v5177_v14 = vrot.slane %v5172_v42, %v13032_v11  ;;  %v5181_v60 = vrot.slane %v5172_v42, %v13033_v13  ;;  %v5185_v38 = vrot.slane %v5172_v42, %v13034_v26  ;;  %v5189_v21 = vrot.slane %v5172_v42, %v13035_v48 }
0x18f0   :  { %5745 = vmatpush1.bf16.msra.mxu0 %v12233_v41 }
0x18f1   :  { %6400 = vmatprep.subr.bf16.mxu0 %v11756_v47 }
0x1993   :  { %v5555_v23 = vpop.f32.mrf.mxu0  ;;  %v5596_v45 = vpop.f32.mrf.mxu1 }
0x1994   :  { %v5556_v19 = vadd.f32 %v5555_v23, %v5177_v14  ;;  %v5597_v31 = vadd.f32 %v5596_v45, %v5185_v38 }
0x1995   :  { %v5557_v37 = vpop.f32.mrf.mxu0  ;;  %v5598_v56 = vpop.f32.mrf.mxu1 }
0x1996   :  { %v5603_v40 = vmul.f32 0.5, %v5556_v19  ;;  %v5558_v59 = vadd.f32 %v5557_v37, %v5181_v60  ;;  %v5599_v44 = vadd.f32 %v5598_v56, %v5189_v21 }
0x1997   :  { %v5559_v41 = vpop.f32.mrf.mxu0  ;;  %v5600_v4 = vpop.f32.mrf.mxu1 }
0x1998   :  { %9569 = vtanh.f32 %v5603_v40  ;;  %v5607_v47 = vmul.f32 0.5, %v5558_v59  ;;  %v5612_v62 = vmul.f32 0.5, %v5599_v44 }
0x1999   :  { %v5560_v55 = vpop.f32.mrf.mxu0  ;;  %v5601_v52 = vpop.f32.mrf.mxu1 }
0x199a   :  { %9571 = vtanh.f32 %v5607_v47 }
0x199b   :  { %9573 = vtanh.f32 %v5597_v31 }
0x199c   :  { %9575 = vtanh.f32 %v5612_v62  ;;  %v9287_v62 = vld [vmem:[%s12804_s7 + $0x50] sm:$0xff]  }
0x19a5   :  { %v9570_v23 = vpop.eup %9569 }
0x19a6   :  { %v5605_v14 = vmul.f32 0.5, %v9570_v23  ;;  %v13215_v23 = vld [vmem:[#allocation57_spill] sm:$0xff] }
0x19a7   :  { %v9572_v39 = vpop.eup %9571 }
0x19a8   :  { %v5606_v19 = vadd.f32 0.5, %v5605_v14  ;;  %v5609_v35 = vmul.f32 0.5, %v9572_v39  ;;  %v9574_v60 = vpop.eup %9573  ;;  %v9286_v39 = vld [vmem:[%s12804_s7 + $0x18] sm:$0xff]   ;;  %v13217_v14 = vld [vmem:[#allocation13_spill] sm:$0xff] }
0x19a9   :  { %v9576_v52 = vpop.eup %9575 }
0x19aa   :  { %v5610_v37 = vadd.f32 0.5, %v5609_v35  ;;  %v5617_v4 = vmul.f32 %v9574_v60, %v5606_v19  ;;  %v5614_v59 = vmul.f32 0.5, %v9576_v52  ;;  %v9285_v35 = vld [vmem:[%s12804_s7 + $0x58] sm:$0xff]   ;;  %v13218_v19 = vld [vmem:[#allocation16_spill] sm:$0xff] }
0x19ab   :  { %v13220_v60 = vld [vmem:[#allocation15_spill] sm:$0xff] }
0x19ac   :  { %v5616_v40 = vmul.f32 %v5610_v37, %v11681_v12  ;;  %v5615_v31 = vadd.f32 0.5, %v5614_v59  ;;  %v5638_v12 = vld [vmem:[%s12808_s11] sm:$0x3]  ;;  %v13219_v37 = vld [vmem:[#allocation14_spill] sm:$0xff]  ;;  %v13223_v52 = vld [vmem:[#allocation19_spill] sm:$0xff] }
0x19ad   :  { %v13224_v59 = vld [vmem:[#allocation21_spill] sm:$0xff] }
0x19ae   :  { %v12246_v55 = vadd.f32 %v5617_v4, %v5616_v40  ;;  %v13221_v40 = vld [vmem:[#allocation17_spill] sm:$0xff]  ;;  %v13222_v4 = vld [vmem:[#allocation18_spill] sm:$0xff] }
0x19b0   :  { %9577 = vtanh.f32 %v12246_v55 }
0x19bd   :  { %v9578_v21 = vpop.eup %9577 }
0x19be   :  { %v5620_v44 = vmul.f32 %v9578_v21, %v5615_v31  ;;  %v13226_v31 = vld [vmem:[#allocation22_spill] sm:$0xff]  ;;  %v13227_v21 = vld [vmem:[#allocation23_spill] sm:$0xff] }
0x19c0   :  { %v5621_v56 = vpack.c.bf16 %v5620_v44, %v5620_v44  ;;  %v13228_v44 = vld [vmem:[#allocation25_spill] sm:$0xff] }
0x19c2   :  { %5763 = vmatmul.mubr.bf16.vlgmr.msra.gmra.mxu0 %v5621_v56  ;;  %5985 = vst [vmem:[#allocation3 + $0x4] sm:$0xf] %v5621_v56  ;;  %v13229_v56 = vld [vmem:[#allocation24_spill] sm:$0xff] }
0x19c3   :  { %6401 = vmatpush1.bf16.msra.mxu0 %v11751_v10  ;;  %v5643_v10 = vrot.slane %v5638_v12, %v13032_v11 }
0x19c4   :  { %6402 = vmatprep.subr.bf16.mxu0 %v11766_v20  ;;  %v5647_v20 = vrot.slane %v5638_v12, %v13033_v13  ;;  %v13230_v12 = vld [vmem:[#allocation26_spill] sm:$0xff] }
0x19c7   :  { %6403 = vmatpush1.bf16.msra.mxu0 %v11774_v18 }
0x19c8   :  { %6404 = vmatprep.subr.bf16.mxu0 %v11780_v33 }
0x19cb   :  { %6405 = vmatpush1.bf16.msra.mxu0 %v11786_v51 }
0x19cc   :  { %6406 = vmatprep.subr.bf16.mxu0 %v11792_v36 }
0x19cf   :  { %6407 = vmatpush1.bf16.msra.mxu0 %v11798_v32 }
0x19d0   :  { %6408 = vmatprep.subr.bf16.mxu0 %v11804_v27 }
0x19d3   :  { %6409 = vmatpush1.bf16.msra.mxu0 %v11810_v5 }
0x19d4   :  { %6410 = vmatprep.subr.bf16.mxu0 %v11816_v50 }
0x19d7   :  { %6411 = vmatpush1.bf16.msra.mxu0 %v11822_v54 }
0x19d8   :  { %6412 = vmatprep.subr.bf16.mxu0 %v11828_v57 }
0x19db   :  { %6413 = vmatpush1.bf16.msra.mxu0 %v11834_v61 }
0x19dc   :  { %6414 = vmatprep.subr.bf16.mxu0 %v11840_v22 }
0x19df   :  { %6415 = vmatpush1.bf16.msra.mxu0 %v11846_v2 }
0x19e0   :  { %6416 = vmatprep.subr.bf16.mxu0 %v11852_v7  ;;  %v9277_v7 = vld [vmem:[%s12804_s7 + $0x78] sm:$0xff]  }
0x19e1   :  { %8670 = vmatprep.subr.bf16.mxu1 %v9277_v7  ;;  %v5981_v7 = vstv %s5980_s13 }
0x19e2   :  { %vm5982_vm12 = vcmp.eq.s32.totalorder %v5981_v7, 1 }
0x19e3   :  { %6417 = vmatpush2.bf16.msra.mxu0 %v11858_v17  ;;  %v9278_v17 = vld [vmem:[%s12804_s7 + $0x38] sm:$0xff]  }
0x19e4   :  { %6418 = vmatprep.subr.bf16.mxu0 %v11864_v25  ;;  %v9279_v25 = vld [vmem:[%s12804_s7 + $0x70] sm:$0xff]   ;;  %8671 = vmatpush3.bf16.msra.mxu1 %v9278_v17 }
0x19e5   :  { %8672 = vmatprep.subr.bf16.mxu1 %v9279_v25 }
0x19e7   :  { %6419 = vmatpush2.bf16.msra.mxu0 %v11870_v15  ;;  %v9280_v15 = vld [vmem:[%s12804_s7 + $0x30] sm:$0xff]  }
0x19e8   :  { %6420 = vmatprep.subr.bf16.mxu0 %v11876_v3  ;;  %v9281_v3 = vld [vmem:[%s12804_s7 + $0x68] sm:$0xff]   ;;  %8673 = vmatpush3.bf16.msra.mxu1 %v9280_v15  ;;  %v8364_v15 = vld [vmem:[%s12800_s3 + $0x10] sm:$0xf] }
0x19e9   :  { %8674 = vmatprep.subr.bf16.mxu1 %v9281_v3 }
0x19eb   :  { %6421 = vmatpush2.bf16.msra.mxu0 %v11882_v34  ;;  %v9282_v34 = vld [vmem:[%s12804_s7 + $0x28] sm:$0xff]  }
0x19ec   :  { %6422 = vmatprep.subr.bf16.mxu0 %v11888_v1  ;;  %v9283_v1 = vld [vmem:[%s12804_s7 + $0x60] sm:$0xff]   ;;  %8675 = vmatpush3.bf16.msra.mxu1 %v9282_v34 }
0x19ed   :  { %8676 = vmatprep.subr.bf16.mxu1 %v9283_v1 }
0x19ef   :  { %6423 = vmatpush2.bf16.msra.mxu0 %v11894_v53  ;;  %v9284_v53 = vld [vmem:[%s12804_s7 + $0x20] sm:$0xff]  }
0x19f0   :  { %6424 = vmatprep.subr.bf16.mxu0 %v12044_v46  ;;  %8677 = vmatpush3.bf16.msra.mxu1 %v9284_v53 }
0x19f1   :  { %8678 = vmatprep.subr.bf16.mxu1 %v9285_v35 }
0x19f3   :  { %6425 = vmatpush2.bf16.msra.mxu0 %v12054_v0 }
0x19f4   :  { %6426 = vmatprep.subr.bf16.mxu0 %v12068_v28  ;;  %8679 = vmatpush3.bf16.msra.mxu1 %v9286_v39  ;;  %v9290_v28 = vld [vmem:[%s12804_s7 + $0x8] sm:$0xff]  }
0x19f5   :  { %8680 = vmatprep.subr.bf16.mxu1 %v9287_v62 }
0x19f7   :  { %6427 = vmatpush2.bf16.msra.mxu0 %v12078_v30  ;;  %v9291_v30 = vld [vmem:[%s12804_s7 + $0x40] sm:$0xff]  }
0x19f8   :  { %6428 = vmatprep.subr.bf16.mxu0 %v12097_v16  ;;  %v9289_v16 = vld [vmem:[%s12804_s7 + $0x48] sm:$0xff]  }
0x19fb   :  { %6429 = vmatpush2.bf16.msra.mxu0 %v12092_v58 }
0x19fc   :  { %6430 = vmatprep.subr.bf16.mxu0 %v12112_v63 }
0x19ff   :  { %6431 = vmatpush2.bf16.msra.mxu0 %v12126_v49  ;;  %v9288_v49 = vld [vmem:[%s12804_s7 + $0x10] sm:$0xff]  }
0x1a00   :  { %6609 = vmatprep.subr.bf16.mxu0 %v12144_v6  ;;  %8681 = vmatpush3.bf16.msra.mxu1 %v9288_v49  ;;  %v9292_v6 = vld [vmem:[%s12804_s7] sm:$0xff]   ;;  %v13245_v49 = vld [vmem:[#allocation45_spill] sm:$0xff] }
0x1a01   :  { %8682 = vmatprep.subr.bf16.mxu1 %v9289_v16  ;;  %v13246_v16 = vmov 0  }
0x1a04   :  { %8683 = vmatpush3.bf16.msra.mxu1 %v9290_v28  ;;  %v13251_v28 = vld [vmem:[#allocation28_spill] sm:$0xff] }
0x1a05   :  { %8684 = vmatprep.subr.bf16.mxu1 %v9291_v30  ;;  %v13252_v30 = vld [vmem:[#allocation30_spill] sm:$0xff] }
0x1a08   :  { %8685 = vmatpush3.bf16.msra.mxu1 %v9292_v6  ;;  %v13253_v6 = vld [vmem:[#allocation48_spill] sm:$0xff] }
0x1a09   :  { %6441 = vmatprep.subr.bf16.mxu1 %v11761_v43  ;;  %v13216_v43 = vld [vmem:[#allocation58_spill] sm:$0xff] }
0x1a82   :  { %v5764_v18 = vpop.f32.mrf.mxu0 }
0x1a83   :  { %v5765_v33 = vadd.f32 %v5764_v18, %v5643_v10  ;;  %v13231_v10 = vld [vmem:[#allocation31_spill] sm:$0xff]  ;;  %v13233_v18 = vld [vmem:[#allocation33_spill] sm:$0xff] }
0x1a84   :  { %v5766_v51 = vpop.f32.mrf.mxu0 }
0x1a85   :  { %8340 = vst [vmem:[%s12809_s12 + $0x40] sm:$0xff] %v5765_v33  ;;  %v5767_v36 = vadd.f32 %v5766_v51, %v5647_v20  ;;  %v13232_v20 = vld [vmem:[#allocation32_spill] sm:$0xff]  ;;  %v13235_v51 = vld [vmem:[#allocation35_spill] sm:$0xff] }
0x1a86   :  { %v5768_v32 = vpop.f32.mrf.mxu0 }
0x1a87   :  { %8341 = vst [vmem:[%s12809_s12 + $0x48] sm:$0xff] %v5767_v36  ;;  %v5776_v27 = vmax.f32 %v5765_v33, %v5767_v36  ;;  %v13237_v32 = vld [vmem:[#allocation37_spill] sm:$0xff] }
0x1a88   :  { %v5769_v5 = vpop.f32.mrf.mxu0 }
0x1a89   :  { %5777 = vmax.xlane.f32.xlu0 %v5776_v27  ;;  %v13238_v27 = vld [vmem:[#allocation38_spill] sm:$0xff]  ;;  %v13239_v5 = vld [vmem:[#allocation39_spill] sm:$0xff] }
0x1b12   :  { %v5778_v50 = vpop.xlane.xlu0 %5777 }
0x1b13   :  { %vm5779_vm4 = vcmp.eq.f32.partialorder %v5765_v33, %v5778_v50  ;;  %vm5780_vm5 = vcmp.eq.f32.partialorder %v5767_v36, %v5778_v50  ;;  %v13234_v33 = vld [vmem:[#allocation34_spill] sm:$0xff]  ;;  %v13236_v36 = vld [vmem:[#allocation36_spill] sm:$0xff] }
0x1b14   :  { %v5781_v54 = vsel %vm5779_vm4, %v10839_v29, 256  ;;  %v5782_v57 = vsel %vm5780_vm5, %v10842_v9, 256  ;;  %v13240_v50 = vld [vmem:[#allocation40_spill] sm:$0xff] }
0x1b15   :  { %vm5783_vm6 = vcmp.lt.s32.totalorder %v5781_v54, %v5782_v57 }
0x1b16   :  { %v5784_v61 = vsel %vm5783_vm6, %v5781_v54, %v5782_v57  ;;  %v13241_v54 = vld [vmem:[#allocation43_spill] sm:$0xff]  ;;  %v13242_v57 = vld [vmem:[#allocation41_spill] sm:$0xff] }
0x1b17   :  { %v5786_v22 = vshra.s32 %v5784_v61, 16  ;;  %v5785_v46 = vand.u32 65535, %v5784_v61  ;;  %v13243_v61 = vld [vmem:[#allocation42_spill] sm:$0xff] }
0x1b19   :  { %v5788_v2 = vcvt.s32.f32 %v5786_v22  ;;  %v5787_v0 = vcvt.s32.f32 %v5785_v46  ;;  %v13244_v22 = vld [vmem:[#allocation44_spill] sm:$0xff]  ;;  %v13247_v46 = vld [vmem:[#allocation46_spill] sm:$0xff] }
0x1b1b   :  { %5789 = vmin.xlane.f32.xlu1 %v5788_v2 }
0x1ba4   :  { %v5790_v63 = vpop.xlane.xlu1 %5789 }
0x1ba5   :  { %vm5791_vm7 = vcmp.eq.f32.partialorder %v5788_v2, %v5790_v63  ;;  %v5796_v45 = vcvt.f32.s32 %v5790_v63  ;;  %v13248_v63 = vld [vmem:[#allocation47_spill] sm:$0xff] }
0x1ba6   :  { %v5792_v58 = vsel %vm5791_vm7, %v5787_v0, inf  ;;  %v13249_v0 = vld [vmem:[#allocation27_spill] sm:$0xff] }
0x1ba7   :  { %5793 = vmin.xlane.f32.xlu0 %v5792_v58  ;;  %v5797_v38 = vshll.u32 %v5796_v45, 16  ;;  %v13250_v58 = vld [vmem:[#allocation29_spill] sm:$0xff] }
0x1ba8   :  { %v13254_v45 = vld [vmem:[#allocation49_spill] sm:$0xff] }
0x1c30   :  { %v5794_v42 = vpop.xlane.xlu0 %5793 }
0x1c31   :  { %v5795_v41 = vcvt.f32.s32 %v5794_v42  ;;  %v13255_v42 = vld [vmem:[#allocation50_spill] sm:$0xff] }
0x1c33   :  { %v5798_v47 = vadd.s32 %v5797_v38, %v5795_v41  ;;  %v13256_v38 = vld [vmem:[#allocation51_spill] sm:$0xff]  ;;  %v13257_v41 = vld [vmem:[#allocation52_spill] sm:$0xff] }
0x1c35   :  { %vm5799_vm8 = vcmp.eq.s32.totalorder %v10839_v29, %v5798_v47  ;;  %vm5800_vm9 = vcmp.eq.s32.totalorder %v10842_v9, %v5798_v47  ;;  %v13258_v47 = vld [vmem:[#allocation53_spill] sm:$0xff] }
0x1c36   :  { %vm8362_vm10 = vmpackc.low %vm5799_vm8, %vm5799_vm8 }
0x1c37   :  { %vm8360_vm11 = vmpackc.low %vm5800_vm9, %vm5800_vm9 }
0x1c38   :  { %8361 = vmatprep.mubr.msk.bf16.mxu1 %vm8360_vm11, %v13124_v8 }
0x1c39   :  { %8363 = vmatmul.mubr.msk.bf16.vlgmr.msra.gmra.mxu1 %vm8362_vm10, %v13124_v8 }
0x1c3a   :  { %6442 = vmatpush1.bf16.msra.mxu1 %v11904_v24  ;;  %v13225_v24 = vld [vmem:[#allocation20_spill] sm:$0xff] }
0x1c3b   :  { %6443 = vmatprep.subr.bf16.mxu1 %v13215_v23  ;;  %v13259_v23 = vld [vmem:[#allocation54_spill] sm:$0xff] }
0x1c3e   :  { %6444 = vmatpush1.bf16.msra.mxu1 %v13216_v43  ;;  %v13260_v43 = vld [vmem:[#allocation55_spill] sm:$0xff] }
0x1c3f   :  { %6445 = vmatprep.subr.bf16.mxu1 %v13217_v14  ;;  %v6051_v14 = vld [vmem:[%s12806_s9] sm:$0xf] }
0x1c42   :  { %6446 = vmatpush1.bf16.msra.mxu1 %v13218_v19  ;;  %v6056_v19 = vrot.slane %v6051_v14, %v13032_v11 }
0x1c43   :  { %6447 = vmatprep.subr.bf16.mxu1 %v13219_v37  ;;  %v6060_v37 = vrot.slane %v6051_v14, %v13033_v13 }
0x1c46   :  { %6448 = vmatpush1.bf16.msra.mxu1 %v13220_v60 }
0x1c47   :  { %6449 = vmatprep.subr.bf16.mxu1 %v13221_v40 }
0x1c4a   :  { %6450 = vmatpush1.bf16.msra.mxu1 %v13222_v4 }
0x1c4b   :  { %6451 = vmatprep.subr.bf16.mxu1 %v13223_v52 }
0x1c4e   :  { %6452 = vmatpush1.bf16.msra.mxu1 %v13224_v59 }
0x1c4f   :  { %6453 = vmatprep.subr.bf16.mxu1 %v13225_v24 }
0x1c52   :  { %6454 = vmatpush1.bf16.msra.mxu1 %v13226_v31  ;;  %v6064_v31 = vrot.slane %v6051_v14, %v13034_v26 }
0x1c53   :  { %6455 = vmatprep.subr.bf16.mxu1 %v13227_v21 }
0x1c56   :  { %6456 = vmatpush1.bf16.msra.mxu1 %v13228_v44 }
0x1c57   :  { %6457 = vmatprep.subr.bf16.mxu1 %v13229_v56 }
0x1c5a   :  { %6458 = vmatpush2.bf16.msra.mxu1 %v13230_v12 }
0x1c5b   :  { %6459 = vmatprep.subr.bf16.mxu1 %v13231_v10 }
0x1c5e   :  { %6460 = vmatpush2.bf16.msra.mxu1 %v13232_v20 }
0x1c5f   :  { %6461 = vmatprep.subr.bf16.mxu1 %v13233_v18 }
0x1c62   :  { %6462 = vmatpush2.bf16.msra.mxu1 %v13234_v33  ;;  %v6068_v33 = vrot.slane %v6051_v14, %v13035_v48  ;;  %v9299_v14 = vld [vmem:[%s12804_s7 + $0x68] sm:$0xff]  }
0x1c63   :  { %6463 = vmatprep.subr.bf16.mxu1 %v13235_v51 }
0x1c66   :  { %6464 = vmatpush2.bf16.msra.mxu1 %v13236_v36 }
0x1c67   :  { %6465 = vmatprep.subr.bf16.mxu1 %v13237_v32 }
0x1c6a   :  { %6466 = vmatpush2.bf16.msra.mxu1 %v13238_v27 }
0x1c6b   :  { %6467 = vmatprep.subr.bf16.mxu1 %v13239_v5 }
0x1c6e   :  { %6468 = vmatpush2.bf16.msra.mxu1 %v13240_v50 }
0x1c6f   :  { %6469 = vmatprep.subr.bf16.mxu1 %v13241_v54 }
0x1c72   :  { %6470 = vmatpush2.bf16.msra.mxu1 %v13242_v57 }
0x1c73   :  { %6471 = vmatprep.subr.bf16.mxu1 %v13243_v61 }
0x1c76   :  { %6472 = vmatpush2.bf16.msra.mxu1 %v13244_v22 }
0x1cf9   :  { %v8686_v2 = vpop.f32.mrf.mxu1 }
0x1cfb   :  { %v8687_v17 = vpop.f32.mrf.mxu1 }
0x1cfc   :  { %v8688_v25 = vadd.f32 %v8687_v17, %v8686_v2 }
0x1cfd   :  { %v8689_v3 = vpop.f32.mrf.mxu1 }
0x1cfe   :  { %v5979_v34 = vpack.c.bf16 %v8688_v25, %v8688_v25 }
0x1cff   :  { %v8690_v1 = vpop.f32.mrf.mxu1 }
0x1d00   :  { %v5983_v53 = vsel %vm5982_vm12, %v8364_v15, %v5979_v34 }
0x1d01   :  { %5984 = vst [vmem:[#allocation3] sm:$0xf] %v5983_v53  ;;  %v6517_v53 = vld [vmem:[%s12808_s11] sm:$0x3] }
0x1d08   :  { %v5986_v35 = vld [vmem:[#allocation3] sm:$0xff] }
0x1d09   :  { %v8367_v39 = vcombine.high %v5986_v35, %v5986_v35  ;;  %v8366_v62 = vcombine.low %v5986_v35, %v5986_v35  ;;  %v6522_v35 = vrot.slane %v6517_v53, %v13032_v11 }
0x1d0b   :  { %6432 = vmatprep.mubr.bf16.mxu0 %v8367_v39  ;;  %6473 = vmatprep.mubr.bf16.mxu1 %v8367_v39 }
0x1d0c   :  { %6433 = vmatmul.mubr.bf16.vlgmr.msra.gmra.mxu0 %v8366_v62  ;;  %6474 = vmatmul.mubr.bf16.vlgmr.msra.gmra.mxu1 %v8366_v62 }
0x1d0d   :  { %6610 = vmatpush1.bf16.msra.mxu0 %v13245_v49  ;;  %6641 = vmatprep.mubr.bf16.mxu0 %v13246_v16 }
0x1d0e   :  { %6611 = vmatprep.subr.bf16.mxu0 %v13247_v46 }
0x1d11   :  { %6612 = vmatpush1.bf16.msra.mxu0 %v13248_v63 }
0x1d12   :  { %6613 = vmatprep.subr.bf16.mxu0 %v13249_v0 }
0x1d15   :  { %6614 = vmatpush1.bf16.msra.mxu0 %v13250_v58 }
0x1d16   :  { %6615 = vmatprep.subr.bf16.mxu0 %v13251_v28 }
0x1d19   :  { %6616 = vmatpush1.bf16.msra.mxu0 %v13252_v30 }
0x1d1a   :  { %6617 = vmatprep.subr.bf16.mxu0 %v13253_v6 }
0x1d1d   :  { %6618 = vmatpush1.bf16.msra.mxu0 %v13254_v45 }
0x1d1e   :  { %6619 = vmatprep.subr.bf16.mxu0 %v13255_v42 }
0x1d21   :  { %6620 = vmatpush1.bf16.msra.mxu0 %v13256_v38 }
0x1d22   :  { %6621 = vmatprep.subr.bf16.mxu0 %v13257_v41  ;;  %v9295_v41 = vld [vmem:[%s12804_s7 + $0x78] sm:$0xff]  }
0x1d23   :  { %8692 = vmatprep.subr.bf16.mxu1 %v9295_v41  ;;  %v9334_v41 = vld [vmem:[%s12805_s8 + $0x8c] ss:$16 sps:$4 sm:$0xff]  }
0x1d25   :  { %6622 = vmatpush1.bf16.msra.mxu0 %v13258_v47  ;;  %v9296_v47 = vld [vmem:[%s12804_s7 + $0x38] sm:$0xff]  }
0x1d26   :  { %6623 = vmatprep.subr.bf16.mxu0 %v13259_v23  ;;  %v9297_v23 = vld [vmem:[%s12804_s7 + $0x70] sm:$0xff]   ;;  %8693 = vmatpush3.bf16.msra.mxu1 %v9296_v47  ;;  %v9332_v47 = vld [vmem:[%s12805_s8 + $0x88] ss:$16 sps:$4 sm:$0xff]  }
0x1d27   :  { %8694 = vmatprep.subr.bf16.mxu1 %v9297_v23  ;;  %v9340_v23 = vld [vmem:[%s12805_s8 + $0x6c] ss:$16 sps:$4 sm:$0xff]  }
0x1d29   :  { %6624 = vmatpush1.bf16.msra.mxu0 %v13260_v43  ;;  %v9298_v43 = vld [vmem:[%s12804_s7 + $0x30] sm:$0xff]  }
0x1d2a   :  { %8695 = vmatpush3.bf16.msra.mxu1 %v9298_v43  ;;  %v9338_v43 = vld [vmem:[%s12805_s8 + $0x68] ss:$16 sps:$4 sm:$0xff]  }
0x1d2b   :  { %8696 = vmatprep.subr.bf16.mxu1 %v9299_v14  ;;  %v9346_v14 = vld [vmem:[%s12805_s8 + $0x4c] ss:$16 sps:$4 sm:$0xff]  }
0x1dcc   :  { %v6434_v60 = vpop.f32.mrf.mxu0  ;;  %v6475_v40 = vpop.f32.mrf.mxu1 }
0x1dcd   :  { %v6435_v4 = vadd.f32 %v6434_v60, %v6056_v19  ;;  %v6476_v18 = vadd.f32 %v6475_v40, %v6064_v31  ;;  %v9300_v19 = vld [vmem:[%s12804_s7 + $0x28] sm:$0xff]   ;;  %v9302_v60 = vld [vmem:[%s12804_s7 + $0x20] sm:$0xff]   ;;  %v9303_v40 = vld [vmem:[%s12804_s7 + $0x58] sm:$0xff]  }
0x1dce   :  { %v6436_v52 = vpop.f32.mrf.mxu0  ;;  %v6477_v59 = vpop.f32.mrf.mxu1  ;;  %8697 = vmatpush3.bf16.msra.mxu1 %v9300_v19  ;;  %v9344_v19 = vld [vmem:[%s12805_s8 + $0x48] ss:$16 sps:$4 sm:$0xff]  }
0x1dcf   :  { %v6482_v24 = vmul.f32 0.5, %v6435_v4  ;;  %v6437_v21 = vadd.f32 %v6436_v52, %v6060_v37  ;;  %v6478_v51 = vadd.f32 %v6477_v59, %v6068_v33  ;;  %v9301_v37 = vld [vmem:[%s12804_s7 + $0x60] sm:$0xff]   ;;  %v9304_v4 = vld [vmem:[%s12804_s7 + $0x18] sm:$0xff]   ;;  %v9305_v52 = vld [vmem:[%s12804_s7 + $0x50] sm:$0xff]  }
0x1dd0   :  { %v6438_v44 = vpop.f32.mrf.mxu0  ;;  %v6479_v56 = vpop.f32.mrf.mxu1  ;;  %8698 = vmatprep.subr.bf16.mxu1 %v9301_v37  ;;  %v9306_v59 = vld [vmem:[%s12804_s7 + $0x10] sm:$0xff]   ;;  %v9352_v37 = vld [vmem:[%s12805_s8 + $0x2c] ss:$16 sps:$4 sm:$0xff]  }
0x1dd1   :  { %9579 = vtanh.f32 %v6482_v24  ;;  %v6486_v12 = vmul.f32 0.5, %v6437_v21  ;;  %v6491_v36 = vmul.f32 0.5, %v6478_v51  ;;  %v9307_v24 = vld [vmem:[%s12804_s7 + $0x48] sm:$0xff]   ;;  %v9313_v33 = vld [vmem:[%s12805_s8 + $0xe4] ss:$16 sps:$4 sm:$0xff]  }
0x1dd2   :  { %v6439_v10 = vpop.f32.mrf.mxu0  ;;  %v6480_v20 = vpop.f32.mrf.mxu1  ;;  %8699 = vmatpush3.bf16.msra.mxu1 %v9302_v60  ;;  %v9316_v51 = vld [vmem:[%s12805_s8 + $0xec] ss:$16 sps:$4 sm:$0xff]   ;;  %7279 = vmatprep.subr.bf16.mxu0 %v9313_v33  ;;  %v9350_v60 = vld [vmem:[%s12805_s8 + $0x28] ss:$16 sps:$4 sm:$0xff]  }
0x1dd3   :  { %9581 = vtanh.f32 %v6486_v12  ;;  %8700 = vmatprep.subr.bf16.mxu1 %v9303_v40  ;;  %v9308_v12 = vld [vmem:[%s12804_s7 + $0x8] sm:$0xff]   ;;  %v9309_v10 = vld [vmem:[%s12804_s7 + $0x40] sm:$0xff]  }
0x1dd4   :  { %9583 = vtanh.f32 %v6476_v18  ;;  %v9310_v20 = vld [vmem:[%s12804_s7] sm:$0xff]   ;;  %v9358_v40 = vld [vmem:[%s12805_s8 + $0xc] ss:$16 sps:$4 sm:$0xff]   ;;  %v9386_v33 = vld [vmem:[%s12805_s8 + $0x168] ss:$16 sps:$4 sm:$0xff]  }
0x1dd5   :  { %9585 = vtanh.f32 %v6491_v36  ;;  %v9311_v18 = vld [vmem:[%s12805_s8 + $0xe0] ss:$16 sps:$4 sm:$0xff]   ;;  %v9319_v36 = vld [vmem:[%s12805_s8 + $0xc4] ss:$16 sps:$4 sm:$0xff]  }
0x1dd6   :  { %8701 = vmatpush3.bf16.msra.mxu1 %v9304_v4  ;;  %v9356_v4 = vld [vmem:[%s12805_s8 + $0x8] ss:$16 sps:$4 sm:$0xff]  }
0x1dd7   :  { %8702 = vmatprep.subr.bf16.mxu1 %v9305_v52  ;;  %v9364_v52 = vld [vmem:[%s12805_s8 + $0x1ec] ss:$16 sps:$4 sm:$0xff]  }
0x1dda   :  { %8703 = vmatpush3.bf16.msra.mxu1 %v9306_v59  ;;  %v9362_v59 = vld [vmem:[%s12805_s8 + $0x1e8] ss:$16 sps:$4 sm:$0xff]  }
0x1ddb   :  { %8704 = vmatprep.subr.bf16.mxu1 %v9307_v24  ;;  %v9370_v24 = vld [vmem:[%s12805_s8 + $0x1cc] ss:$16 sps:$4 sm:$0xff]  }
0x1dde   :  { %v9580_v32 = vpop.eup %9579  ;;  %8705 = vmatpush3.bf16.msra.mxu1 %v9308_v12  ;;  %v9380_v12 = vld [vmem:[%s12805_s8 + $0x188] ss:$16 sps:$4 sm:$0xff]  }
0x1ddf   :  { %v6484_v27 = vmul.f32 0.5, %v9580_v32  ;;  %8706 = vmatprep.subr.bf16.mxu1 %v9309_v10  ;;  %v9317_v32 = vld [vmem:[%s12805_s8 + $0xc0] ss:$16 sps:$4 sm:$0xff]   ;;  %v9385_v10 = vld [vmem:[%s12805_s8 + $0x164] ss:$16 sps:$4 sm:$0xff]  }
0x1de0   :  { %v9582_v5 = vpop.eup %9581 }
0x1de1   :  { %v6485_v50 = vadd.f32 0.5, %v6484_v27  ;;  %v6488_v54 = vmul.f32 0.5, %v9582_v5  ;;  %v9584_v61 = vpop.eup %9583  ;;  %v9325_v27 = vld [vmem:[%s12805_s8 + $0xa4] ss:$16 sps:$4 sm:$0xff]   ;;  %v9323_v5 = vld [vmem:[%s12805_s8 + $0xa0] ss:$16 sps:$4 sm:$0xff]  }
0x1de2   :  { %v9586_v17 = vpop.eup %9585  ;;  %8707 = vmatpush3.bf16.msra.mxu1 %v9310_v20  ;;  %v9388_v20 = vld [vmem:[%s12805_s8 + $0x16c] ss:$16 sps:$4 sm:$0xff]  }
0x1de3   :  { %v6489_v57 = vadd.f32 0.5, %v6488_v54  ;;  %v6496_v2 = vmul.f32 %v9584_v61, %v6485_v50  ;;  %v6493_v25 = vmul.f32 0.5, %v9586_v17  ;;  %7320 = vmatprep.subr.bf16.mxu1 %v9316_v51  ;;  %v9331_v50 = vld [vmem:[%s12805_s8 + $0x84] ss:$16 sps:$4 sm:$0xff]   ;;  %v9329_v54 = vld [vmem:[%s12805_s8 + $0x80] ss:$16 sps:$4 sm:$0xff]  }
0x1de4   :  { %v9335_v61 = vld [vmem:[%s12805_s8 + $0x60] ss:$16 sps:$4 sm:$0xff]   ;;  %v9349_v17 = vld [vmem:[%s12805_s8 + $0x24] ss:$16 sps:$4 sm:$0xff]  }
0x1de5   :  { %v6495_v22 = vmul.f32 %v6489_v57, %v12246_v55  ;;  %v6494_v15 = vadd.f32 0.5, %v6493_v25  ;;  %v6526_v55 = vrot.slane %v6517_v53, %v13033_v13  ;;  %v9337_v57 = vld [vmem:[%s12805_s8 + $0x64] ss:$16 sps:$4 sm:$0xff]   ;;  %v9347_v25 = vld [vmem:[%s12805_s8 + $0x20] ss:$16 sps:$4 sm:$0xff]  }
0x1de6   :  { %v9367_v53 = vld [vmem:[%s12805_s8 + $0x1c4] ss:$16 sps:$4 sm:$0xff]  }
0x1de7   :  { %v12405_v7 = vadd.f32 %v6496_v2, %v6495_v22  ;;  %v9343_v22 = vld [vmem:[%s12805_s8 + $0x44] ss:$16 sps:$4 sm:$0xff]   ;;  %v9341_v2 = vld [vmem:[%s12805_s8 + $0x40] ss:$16 sps:$4 sm:$0xff]  }
0x1de8   :  { %v9391_v51 = vld [vmem:[%s12805_s8 + $0x144] ss:$16 sps:$4 sm:$0xff]  }
0x1de9   :  { %9587 = vtanh.f32 %v12405_v7 }
0x1df6   :  { %v9588_v3 = vpop.eup %9587 }
0x1df7   :  { %v6499_v34 = vmul.f32 %v9588_v3, %v6494_v15  ;;  %v9355_v15 = vld [vmem:[%s12805_s8 + $0x4] ss:$16 sps:$4 sm:$0xff]   ;;  %v9353_v3 = vld [vmem:[%s12805_s8] ss:$16 sps:$4 sm:$0xff]  }
0x1df9   :  { %v6500_v1 = vpack.c.bf16 %v6499_v34, %v6499_v34  ;;  %v9361_v34 = vld [vmem:[%s12805_s8 + $0x1e4] ss:$16 sps:$4 sm:$0xff]  }
0x1dfb   :  { %6642 = vmatmul.mubr.bf16.vlgmr.msra.gmra.mxu0 %v6500_v1  ;;  %6864 = vst [vmem:[#allocation3 + $0x4] sm:$0xf] %v6500_v1  ;;  %v9359_v1 = vld [vmem:[%s12805_s8 + $0x1e0] ss:$16 sps:$4 sm:$0xff]  }
0x1dfc   :  { %7280 = vmatpush1.bf16.msra.mxu0 %v9311_v18  ;;  %v9383_v18 = vld [vmem:[%s12805_s8 + $0x160] ss:$16 sps:$4 sm:$0xff]  }
0x1dfd   :  { %7281 = vmatprep.subr.bf16.mxu0 %v9319_v36  ;;  %v9394_v36 = vld [vmem:[%s12805_s8 + $0x14c] ss:$16 sps:$4 sm:$0xff]  }
0x1e00   :  { %7282 = vmatpush1.bf16.msra.mxu0 %v9317_v32  ;;  %v9389_v32 = vld [vmem:[%s12805_s8 + $0x140] ss:$16 sps:$4 sm:$0xff]  }
0x1e01   :  { %7283 = vmatprep.subr.bf16.mxu0 %v9325_v27  ;;  %v9392_v27 = vld [vmem:[%s12805_s8 + $0x148] ss:$16 sps:$4 sm:$0xff]  }
0x1e04   :  { %7284 = vmatpush1.bf16.msra.mxu0 %v9323_v5  ;;  %v9395_v5 = vld [vmem:[%s12805_s8 + $0x120] ss:$16 sps:$4 sm:$0xff]  }
0x1e05   :  { %7285 = vmatprep.subr.bf16.mxu0 %v9331_v50  ;;  %v9397_v50 = vld [vmem:[%s12805_s8 + $0x124] ss:$16 sps:$4 sm:$0xff]  }
0x1e08   :  { %7286 = vmatpush1.bf16.msra.mxu0 %v9329_v54  ;;  %v9398_v54 = vld [vmem:[%s12805_s8 + $0x128] ss:$16 sps:$4 sm:$0xff]  }
0x1e09   :  { %7287 = vmatprep.subr.bf16.mxu0 %v9337_v57  ;;  %v9400_v57 = vld [vmem:[%s12805_s8 + $0x12c] ss:$16 sps:$4 sm:$0xff]  }
0x1e0c   :  { %7288 = vmatpush1.bf16.msra.mxu0 %v9335_v61  ;;  %v9403_v61 = vld [vmem:[%s12805_s8 + $0x104] ss:$16 sps:$4 sm:$0xff]  }
0x1e0d   :  { %7289 = vmatprep.subr.bf16.mxu0 %v9343_v22  ;;  %v9406_v22 = vld [vmem:[%s12805_s8 + $0x10c] ss:$16 sps:$4 sm:$0xff]  }
0x1e10   :  { %7290 = vmatpush1.bf16.msra.mxu0 %v9341_v2  ;;  %v9401_v2 = vld [vmem:[%s12805_s8 + $0x100] ss:$16 sps:$4 sm:$0xff]  }
0x1e11   :  { %7291 = vmatprep.subr.bf16.mxu0 %v9349_v17  ;;  %v9404_v17 = vld [vmem:[%s12805_s8 + $0x108] ss:$16 sps:$4 sm:$0xff]  }
0x1e14   :  { %7292 = vmatpush1.bf16.msra.mxu0 %v9347_v25 }
0x1e15   :  { %7293 = vmatprep.subr.bf16.mxu0 %v9355_v15  ;;  %v6860_v15 = vstv %s6859_s17 }
0x1e16   :  { %vm6861_vm5 = vcmp.eq.s32.totalorder %v6860_v15, 1 }
0x1e18   :  { %7294 = vmatpush1.bf16.msra.mxu0 %v9353_v3 }
0x1e19   :  { %7295 = vmatprep.subr.bf16.mxu0 %v9361_v34 }
0x1e1c   :  { %7296 = vmatpush2.bf16.msra.mxu0 %v9359_v1  ;;  %v8472_v1 = vld [vmem:[%s12800_s3 + $0x14] sm:$0xf] }
0x1e1d   :  { %7297 = vmatprep.subr.bf16.mxu0 %v9367_v53 }
0x1ebb   :  { %v6643_v39 = vpop.f32.mrf.mxu0 }
0x1ebc   :  { %v6644_v62 = vadd.f32 %v6643_v39, %v6522_v35  ;;  %v9365_v35 = vld [vmem:[%s12805_s8 + $0x1c0] ss:$16 sps:$4 sm:$0xff]  }
0x1ebd   :  { %v6645_v49 = vpop.f32.mrf.mxu0  ;;  %7298 = vmatpush2.bf16.msra.mxu0 %v9365_v35  ;;  %v9371_v39 = vld [vmem:[%s12805_s8 + $0x1a0] ss:$16 sps:$4 sm:$0xff]  }
0x1ebe   :  { %8448 = vst [vmem:[%s12809_s12 + $0x50] sm:$0xff] %v6644_v62  ;;  %v6646_v46 = vadd.f32 %v6645_v49, %v6526_v55  ;;  %v9373_v55 = vld [vmem:[%s12805_s8 + $0x1a4] ss:$16 sps:$4 sm:$0xff]   ;;  %v9377_v49 = vld [vmem:[%s12805_s8 + $0x180] ss:$16 sps:$4 sm:$0xff]  }
0x1ebf   :  { %v6647_v63 = vpop.f32.mrf.mxu0  ;;  %7299 = vmatprep.subr.bf16.mxu0 %v9373_v55 }
0x1ec0   :  { %8449 = vst [vmem:[%s12809_s12 + $0x58] sm:$0xff] %v6646_v46  ;;  %v6655_v0 = vmax.f32 %v6644_v62, %v6646_v46 }
0x1ec1   :  { %v6648_v58 = vpop.f32.mrf.mxu0  ;;  %7300 = vmatpush2.bf16.msra.mxu0 %v9371_v39 }
0x1ec2   :  { %6656 = vmax.xlane.f32.xlu1 %v6655_v0 }
0x1f4b   :  { %v6657_v28 = vpop.xlane.xlu1 %6656 }
0x1f4c   :  { %vm6658_vm13 = vcmp.eq.f32.partialorder %v6644_v62, %v6657_v28  ;;  %vm6659_vm14 = vcmp.eq.f32.partialorder %v6646_v46, %v6657_v28  ;;  %v9379_v62 = vld [vmem:[%s12805_s8 + $0x184] ss:$16 sps:$4 sm:$0xff]  }
0x1f4d   :  { %v6660_v30 = vsel %vm6658_vm13, %v10839_v29, 256  ;;  %v6661_v6 = vsel %vm6659_vm14, %v10842_v9, 256  ;;  %7301 = vmatprep.subr.bf16.mxu0 %v9379_v62 }
0x1f4e   :  { %vm6662_vm15 = vcmp.lt.s32.totalorder %v6660_v30, %v6661_v6  ;;  %7302 = vmatpush2.bf16.msra.mxu0 %v9377_v49 }
0x1f4f   :  { %v6663_v45 = vsel %vm6662_vm15, %v6660_v30, %v6661_v6  ;;  %v9314_v30 = vld [vmem:[%s12805_s8 + $0xe8] ss:$16 sps:$4 sm:$0xff]   ;;  %v9322_v6 = vld [vmem:[%s12805_s8 + $0xcc] ss:$16 sps:$4 sm:$0xff]   ;;  %7303 = vmatprep.subr.bf16.mxu0 %v9385_v10 }
0x1f50   :  { %v6665_v42 = vshra.s32 %v6663_v45, 16  ;;  %v6664_v31 = vand.u32 65535, %v6663_v45  ;;  %v9320_v45 = vld [vmem:[%s12805_s8 + $0xc8] ss:$16 sps:$4 sm:$0xff]  }
0x1f52   :  { %v6667_v38 = vcvt.s32.f32 %v6665_v42  ;;  %v6666_v44 = vcvt.s32.f32 %v6664_v31  ;;  %v9328_v42 = vld [vmem:[%s12805_s8 + $0xac] ss:$16 sps:$4 sm:$0xff]   ;;  %v9368_v31 = vld [vmem:[%s12805_s8 + $0x1c8] ss:$16 sps:$4 sm:$0xff]   ;;  %7304 = vmatpush2.bf16.msra.mxu0 %v9383_v18 }
0x1f53   :  { %7305 = vmatprep.subr.bf16.mxu0 %v9391_v51 }
0x1f54   :  { %6668 = vmin.xlane.f32.xlu0 %v6667_v38 }
0x1f56   :  { %7306 = vmatpush2.bf16.msra.mxu0 %v9389_v32 }
0x1f57   :  { %7307 = vmatprep.subr.bf16.mxu0 %v9397_v50 }
0x1f5a   :  { %7308 = vmatpush2.bf16.msra.mxu0 %v9395_v5 }
0x1f5b   :  { %7309 = vmatprep.subr.bf16.mxu0 %v9403_v61 }
0x1f5e   :  { %7310 = vmatpush2.bf16.msra.mxu0 %v9401_v2 }
0x1fdd   :  { %v12460_v21 = vpop.xlane.xlu0 %6668 }
0x1fde   :  { %vm6670_vm0 = vcmp.eq.f32.partialorder %v6667_v38, %v12460_v21  ;;  %v6675_v46 = vcvt.f32.s32 %v12460_v21  ;;  %v9326_v38 = vld [vmem:[%s12805_s8 + $0xa8] ss:$16 sps:$4 sm:$0xff]   ;;  %v9376_v21 = vld [vmem:[%s12805_s8 + $0x1ac] ss:$16 sps:$4 sm:$0xff]  }
0x1fdf   :  { %v6671_v56 = vsel %vm6670_vm0, %v6666_v44, inf  ;;  %v9374_v44 = vld [vmem:[%s12805_s8 + $0x1a8] ss:$16 sps:$4 sm:$0xff]  }
0x1fe0   :  { %6672 = vmin.xlane.f32.xlu1 %v6671_v56  ;;  %v6676_v0 = vshll.u32 %v6675_v46, 16  ;;  %v9382_v56 = vld [vmem:[%s12805_s8 + $0x18c] ss:$16 sps:$4 sm:$0xff]  }
0x2069   :  { %v6673_v63 = vpop.xlane.xlu1 %6672 }
0x206a   :  { %v6674_v58 = vcvt.f32.s32 %v6673_v63  ;;  %v9411_v63 = vld [vmem:[%s12807_s10 + $0x74] ss:$8 sps:$4 sm:$0xff]  }
0x206b   :  { %7488 = vmatprep.subr.bf16.mxu0 %v9411_v63 }
0x206c   :  { %v6677_v28 = vadd.s32 %v6676_v0, %v6674_v58  ;;  %v9409_v0 = vld [vmem:[%s12807_s10 + $0x70] ss:$8 sps:$4 sm:$0xff]   ;;  %v9414_v58 = vld [vmem:[%s12807_s10 + $0x64] ss:$8 sps:$4 sm:$0xff]  }
0x206e   :  { %vm6678_vm1 = vcmp.eq.s32.totalorder %v10839_v29, %v6677_v28  ;;  %vm6679_vm2 = vcmp.eq.s32.totalorder %v10842_v9, %v6677_v28  ;;  %v9412_v28 = vld [vmem:[%s12807_s10 + $0x60] ss:$8 sps:$4 sm:$0xff]  }
0x206f   :  { %vm8470_vm3 = vmpackc.low %vm6678_vm1, %vm6678_vm1 }
0x2070   :  { %vm8468_vm4 = vmpackc.low %vm6679_vm2, %vm6679_vm2 }
0x2071   :  { %8469 = vmatprep.mubr.msk.bf16.mxu1 %vm8468_vm4, %v13124_v8 }
0x2072   :  { %8471 = vmatmul.mubr.msk.bf16.vlgmr.msra.gmra.mxu1 %vm8470_vm3, %v13124_v8 }
0x2073   :  { %7321 = vmatpush1.bf16.msra.mxu1 %v9314_v30  ;;  %v9415_v30 = vld [vmem:[%s12807_s10 + $0x50] ss:$8 sps:$4 sm:$0xff]  }
0x2074   :  { %7322 = vmatprep.subr.bf16.mxu1 %v9322_v6  ;;  %v9420_v6 = vld [vmem:[%s12807_s10 + $0x44] ss:$8 sps:$4 sm:$0xff]  }
0x2077   :  { %7323 = vmatpush1.bf16.msra.mxu1 %v9320_v45  ;;  %v9418_v45 = vld [vmem:[%s12807_s10 + $0x40] ss:$8 sps:$4 sm:$0xff]  }
0x2078   :  { %7324 = vmatprep.subr.bf16.mxu1 %v9328_v42  ;;  %v9423_v42 = vld [vmem:[%s12807_s10 + $0x34] ss:$8 sps:$4 sm:$0xff]  }
0x207b   :  { %7325 = vmatpush1.bf16.msra.mxu1 %v9326_v38  ;;  %v9421_v38 = vld [vmem:[%s12807_s10 + $0x30] ss:$8 sps:$4 sm:$0xff]  }
0x207c   :  { %7326 = vmatprep.subr.bf16.mxu1 %v9334_v41  ;;  %v9426_v41 = vld [vmem:[%s12807_s10 + $0x24] ss:$8 sps:$4 sm:$0xff]  }
0x207f   :  { %7327 = vmatpush1.bf16.msra.mxu1 %v9332_v47  ;;  %v9424_v47 = vld [vmem:[%s12807_s10 + $0x20] ss:$8 sps:$4 sm:$0xff]  }
0x2080   :  { %7328 = vmatprep.subr.bf16.mxu1 %v9340_v23  ;;  %v9429_v23 = vld [vmem:[%s12807_s10 + $0x14] ss:$8 sps:$4 sm:$0xff]  }
0x2083   :  { %7329 = vmatpush1.bf16.msra.mxu1 %v9338_v43  ;;  %v9427_v43 = vld [vmem:[%s12807_s10 + $0x10] ss:$8 sps:$4 sm:$0xff]  }
0x2084   :  { %7330 = vmatprep.subr.bf16.mxu1 %v9346_v14  ;;  %v9432_v14 = vld [vmem:[%s12807_s10 + $0x4] ss:$8 sps:$4 sm:$0xff]  }
0x2087   :  { %7331 = vmatpush1.bf16.msra.mxu1 %v9344_v19  ;;  %v9430_v19 = vld [vmem:[%s12807_s10] ss:$8 sps:$4 sm:$0xff]  }
0x2088   :  { %7332 = vmatprep.subr.bf16.mxu1 %v9352_v37  ;;  %v6930_v37 = vld [vmem:[%s12806_s9] sm:$0xf] }
0x208b   :  { %7333 = vmatpush1.bf16.msra.mxu1 %v9350_v60  ;;  %v6935_v60 = vrot.slane %v6930_v37, %v13032_v11 }
0x208c   :  { %7334 = vmatprep.subr.bf16.mxu1 %v9358_v40  ;;  %v6939_v40 = vrot.slane %v6930_v37, %v13033_v13 }
0x208f   :  { %7335 = vmatpush1.bf16.msra.mxu1 %v9356_v4 }
0x2090   :  { %7336 = vmatprep.subr.bf16.mxu1 %v9364_v52 }
0x2093   :  { %7337 = vmatpush2.bf16.msra.mxu1 %v9362_v59 }
0x2094   :  { %7338 = vmatprep.subr.bf16.mxu1 %v9370_v24 }
0x2097   :  { %7339 = vmatpush2.bf16.msra.mxu1 %v9368_v31 }
0x2098   :  { %7340 = vmatprep.subr.bf16.mxu1 %v9376_v21 }
0x209b   :  { %7341 = vmatpush2.bf16.msra.mxu1 %v9374_v44  ;;  %v6943_v44 = vrot.slane %v6930_v37, %v13034_v26 }
0x209c   :  { %7342 = vmatprep.subr.bf16.mxu1 %v9382_v56 }
0x209f   :  { %7343 = vmatpush2.bf16.msra.mxu1 %v9380_v12 }
0x20a0   :  { %7344 = vmatprep.subr.bf16.mxu1 %v9388_v20 }
0x20a3   :  { %7345 = vmatpush2.bf16.msra.mxu1 %v9386_v33 }
0x20a4   :  { %7346 = vmatprep.subr.bf16.mxu1 %v9394_v36  ;;  %v6947_v36 = vrot.slane %v6930_v37, %v13035_v48  ;;  %v9442_v37 = vld [vmem:[%s12804_s7 + $0x18] sm:$0xff]  }
0x20a7   :  { %7347 = vmatpush2.bf16.msra.mxu1 %v9392_v27 }
0x20a8   :  { %7348 = vmatprep.subr.bf16.mxu1 %v9400_v57 }
0x20ab   :  { %7349 = vmatpush2.bf16.msra.mxu1 %v9398_v54 }
0x20ac   :  { %7350 = vmatprep.subr.bf16.mxu1 %v9406_v22 }
0x20af   :  { %7351 = vmatpush2.bf16.msra.mxu1 %v9404_v17 }
0x2132   :  { %v8708_v25 = vpop.f32.mrf.mxu1 }
0x2134   :  { %v8709_v3 = vpop.f32.mrf.mxu1 }
0x2135   :  { %v8710_v34 = vadd.f32 %v8709_v3, %v8708_v25 }
0x2136   :  { %v8711_v53 = vpop.f32.mrf.mxu1 }
0x2137   :  { %v6858_v35 = vpack.c.bf16 %v8710_v34, %v8710_v34 }
0x2138   :  { %v8712_v55 = vpop.f32.mrf.mxu1 }
0x2139   :  { %v6862_v39 = vsel %vm6861_vm5, %v8472_v1, %v6858_v35  ;;  %v7396_v35 = vld [vmem:[%s12808_s11] sm:$0x3] }
0x213a   :  { %6863 = vst [vmem:[#allocation3] sm:$0xf] %v6862_v39  ;;  %v7401_v55 = vrot.slane %v7396_v35, %v13032_v11  ;;  %v7405_v39 = vrot.slane %v7396_v35, %v13033_v13 }
0x2141   :  { %v6865_v62 = vld [vmem:[#allocation3] sm:$0xff] }
0x2142   :  { %v8475_v49 = vcombine.high %v6865_v62, %v6865_v62  ;;  %v8474_v46 = vcombine.low %v6865_v62, %v6865_v62 }
0x2144   :  { %7311 = vmatprep.mubr.bf16.mxu0 %v8475_v49  ;;  %7352 = vmatprep.mubr.bf16.mxu1 %v8475_v49 }
0x2145   :  { %7312 = vmatmul.mubr.bf16.vlgmr.msra.gmra.mxu0 %v8474_v46  ;;  %7353 = vmatmul.mubr.bf16.vlgmr.msra.gmra.mxu1 %v8474_v46 }
0x2146   :  { %7520 = vmatprep.mubr.bf16.mxu0 %v13246_v16  ;;  %7489 = vmatpush1.bf16.msra.mxu0 %v9409_v0  ;;  %v9417_v16 = vld [vmem:[%s12807_s10 + $0x54] ss:$8 sps:$4 sm:$0xff]  }
0x2147   :  { %7490 = vmatprep.subr.bf16.mxu0 %v9414_v58 }
0x214a   :  { %7491 = vmatpush1.bf16.msra.mxu0 %v9412_v28 }
0x214b   :  { %7492 = vmatprep.subr.bf16.mxu0 %v9417_v16 }
0x214e   :  { %7493 = vmatpush1.bf16.msra.mxu0 %v9415_v30 }
0x214f   :  { %7494 = vmatprep.subr.bf16.mxu0 %v9420_v6 }
0x2152   :  { %7495 = vmatpush1.bf16.msra.mxu0 %v9418_v45  ;;  %v9433_v45 = vld [vmem:[%s12804_s7 + $0x78] sm:$0xff]  }
0x2153   :  { %7496 = vmatprep.subr.bf16.mxu0 %v9423_v42  ;;  %v9434_v42 = vld [vmem:[%s12804_s7 + $0x38] sm:$0xff]   ;;  %8714 = vmatprep.subr.bf16.mxu1 %v9433_v45 }
0x2154   :  { %8715 = vmatpush3.bf16.msra.mxu1 %v9434_v42 }
0x2156   :  { %7497 = vmatpush1.bf16.msra.mxu0 %v9421_v38  ;;  %v9435_v38 = vld [vmem:[%s12804_s7 + $0x70] sm:$0xff]  }
0x2157   :  { %7498 = vmatprep.subr.bf16.mxu0 %v9426_v41  ;;  %v9436_v41 = vld [vmem:[%s12804_s7 + $0x30] sm:$0xff]   ;;  %8716 = vmatprep.subr.bf16.mxu1 %v9435_v38 }
0x2158   :  { %8717 = vmatpush3.bf16.msra.mxu1 %v9436_v41 }
0x215a   :  { %7499 = vmatpush1.bf16.msra.mxu0 %v9424_v47  ;;  %v9437_v47 = vld [vmem:[%s12804_s7 + $0x68] sm:$0xff]  }
0x215b   :  { %7500 = vmatprep.subr.bf16.mxu0 %v9429_v23  ;;  %v9438_v23 = vld [vmem:[%s12804_s7 + $0x28] sm:$0xff]   ;;  %8718 = vmatprep.subr.bf16.mxu1 %v9437_v47 }
0x215c   :  { %8719 = vmatpush3.bf16.msra.mxu1 %v9438_v23 }
0x215e   :  { %7501 = vmatpush1.bf16.msra.mxu0 %v9427_v43  ;;  %v9439_v43 = vld [vmem:[%s12804_s7 + $0x60] sm:$0xff]  }
0x215f   :  { %7502 = vmatprep.subr.bf16.mxu0 %v9432_v14  ;;  %v9440_v14 = vld [vmem:[%s12804_s7 + $0x20] sm:$0xff]   ;;  %8720 = vmatprep.subr.bf16.mxu1 %v9439_v43 }
0x2160   :  { %8721 = vmatpush3.bf16.msra.mxu1 %v9440_v14 }
0x2162   :  { %7503 = vmatpush1.bf16.msra.mxu0 %v9430_v19  ;;  %v9441_v19 = vld [vmem:[%s12804_s7 + $0x58] sm:$0xff]  }
0x2163   :  { %8722 = vmatprep.subr.bf16.mxu1 %v9441_v19 }
0x2164   :  { %8723 = vmatpush3.bf16.msra.mxu1 %v9442_v37 }
0x2205   :  { %v7313_v4 = vpop.f32.mrf.mxu0  ;;  %v7354_v52 = vpop.f32.mrf.mxu1 }
0x2206   :  { %v7314_v59 = vadd.f32 %v7313_v4, %v6935_v60  ;;  %v7355_v51 = vadd.f32 %v7354_v52, %v6943_v44  ;;  %v9443_v60 = vld [vmem:[%s12804_s7 + $0x50] sm:$0xff]   ;;  %v9445_v4 = vld [vmem:[%s12804_s7 + $0x48] sm:$0xff]   ;;  %v9447_v44 = vld [vmem:[%s12804_s7 + $0x40] sm:$0xff]  }
0x2207   :  { %v7315_v24 = vpop.f32.mrf.mxu0  ;;  %v7356_v31 = vpop.f32.mrf.mxu1  ;;  %8724 = vmatprep.subr.bf16.mxu1 %v9443_v60 }
0x2208   :  { %v7361_v21 = vmul.f32 0.5, %v7314_v59  ;;  %v7316_v56 = vadd.f32 %v7315_v24, %v6939_v40  ;;  %v7357_v32 = vadd.f32 %v7356_v31, %v6947_v36  ;;  %v9444_v40 = vld [vmem:[%s12804_s7 + $0x10] sm:$0xff]  }
0x2209   :  { %v7317_v12 = vpop.f32.mrf.mxu0  ;;  %v7358_v10 = vpop.f32.mrf.mxu1  ;;  %8725 = vmatpush3.bf16.msra.mxu1 %v9444_v40 }
0x220a   :  { %9589 = vtanh.f32 %v7361_v21  ;;  %v7365_v20 = vmul.f32 0.5, %v7316_v56  ;;  %v7370_v27 = vmul.f32 0.5, %v7357_v32  ;;  %8726 = vmatprep.subr.bf16.mxu1 %v9445_v4  ;;  %v9446_v21 = vld [vmem:[%s12804_s7 + $0x8] sm:$0xff]   ;;  %v9448_v56 = vld [vmem:[%s12804_s7] sm:$0xff]   ;;  %s7738_s7 = scalar_select %p7736_p7, 1, 0 }
0x220b   :  { %v7318_v18 = vpop.f32.mrf.mxu0  ;;  %v7359_v33 = vpop.f32.mrf.mxu1 }
0x220c   :  { %9591 = vtanh.f32 %v7365_v20  ;;  %v7739_v36 = vstv %s7738_s7 }
0x220d   :  { %9593 = vtanh.f32 %v7355_v51  ;;  %8727 = vmatpush3.bf16.msra.mxu1 %v9446_v21  ;;  %vm7740_vm14 = vcmp.eq.s32.totalorder %v7739_v36, 1 }
0x220e   :  { %9595 = vtanh.f32 %v7370_v27  ;;  %8728 = vmatprep.subr.bf16.mxu1 %v9447_v44 }
0x2211   :  { %8729 = vmatpush3.bf16.msra.mxu1 %v9448_v56 }
0x2217   :  { %v9590_v5 = vpop.eup %9589 }
0x2218   :  { %v7363_v50 = vmul.f32 0.5, %v9590_v5  ;;  %v8580_v5 = vld [vmem:[%s12800_s3 + $0x18] sm:$0xf] }
0x2219   :  { %v9592_v54 = vpop.eup %9591 }
0x221a   :  { %v7364_v57 = vadd.f32 0.5, %v7363_v50  ;;  %v7367_v61 = vmul.f32 0.5, %v9592_v54  ;;  %v9594_v22 = vpop.eup %9593 }
0x221b   :  { %v9596_v15 = vpop.eup %9595 }
0x221c   :  { %v7368_v26 = vadd.f32 0.5, %v7367_v61  ;;  %v7375_v17 = vmul.f32 %v9594_v22, %v7364_v57  ;;  %v7372_v3 = vmul.f32 0.5, %v9596_v15 }
0x221e   :  { %v7374_v2 = vmul.f32 %v7368_v26, %v12405_v7  ;;  %v7373_v34 = vadd.f32 0.5, %v7372_v3 }
0x2220   :  { %v7376_v25 = vadd.f32 %v7375_v17, %v7374_v2 }
0x2222   :  { %9597 = vtanh.f32 %v7376_v25 }
0x222f   :  { %v9598_v48 = vpop.eup %9597 }
0x2230   :  { %v7378_v1 = vmul.f32 %v9598_v48, %v7373_v34 }
0x2232   :  { %v7379_v53 = vpack.c.bf16 %v7378_v1, %v7378_v1 }
0x2234   :  { %7521 = vmatmul.mubr.bf16.vlgmr.msra.gmra.mxu0 %v7379_v53 }
0x22f4   :  { %v7522_v62 = vpop.f32.mrf.mxu0 }
0x22f5   :  { %v7523_v7 = vadd.f32 %v7522_v62, %v7401_v55 }
0x22f6   :  { %v7524_v49 = vpop.f32.mrf.mxu0 }
0x22f7   :  { %8556 = vst [vmem:[%s12809_s12 + $0x60] sm:$0xff] %v7523_v7  ;;  %v7525_v46 = vadd.f32 %v7524_v49, %v7405_v39 }
0x22f8   :  { %v7526_v63 = vpop.f32.mrf.mxu0 }
0x22f9   :  { %8557 = vst [vmem:[%s12809_s12 + $0x68] sm:$0xff] %v7525_v46  ;;  %v7534_v0 = vmax.f32 %v7523_v7, %v7525_v46 }
0x22fa   :  { %v7527_v58 = vpop.f32.mrf.mxu0 }
0x22fb   :  { %7535 = vmax.xlane.f32.xlu0 %v7534_v0 }
0x2384   :  { %v7536_v28 = vpop.xlane.xlu0 %7535 }
0x2385   :  { %vm7537_vm6 = vcmp.eq.f32.partialorder %v7523_v7, %v7536_v28  ;;  %vm7538_vm7 = vcmp.eq.f32.partialorder %v7525_v46, %v7536_v28 }
0x2386   :  { %v7539_v11 = vsel %vm7537_vm6, %v10839_v29, 256  ;;  %v7540_v13 = vsel %vm7538_vm7, %v10842_v9, 256 }
0x2387   :  { %vm7541_vm8 = vcmp.lt.s32.totalorder %v7539_v11, %v7540_v13 }
0x2388   :  { %v7542_v16 = vsel %vm7541_vm8, %v7539_v11, %v7540_v13 }
0x2389   :  { %v7544_v30 = vshra.s32 %v7542_v16, 16  ;;  %v7543_v52 = vand.u32 65535, %v7542_v16 }
0x238b   :  { %v7546_v6 = vcvt.s32.f32 %v7544_v30  ;;  %v7545_v24 = vcvt.s32.f32 %v7543_v52 }
0x238d   :  { %7547 = vmin.xlane.f32.xlu1 %v7546_v6 }
0x2416   :  { %v7548_v59 = vpop.xlane.xlu1 %7547 }
0x2417   :  { %vm7549_vm9 = vcmp.eq.f32.partialorder %v7546_v6, %v7548_v59  ;;  %v7554_v12 = vcvt.f32.s32 %v7548_v59 }
0x2418   :  { %v7550_v31 = vsel %vm7549_vm9, %v7545_v24, inf }
0x2419   :  { %7551 = vmin.xlane.f32.xlu0 %v7550_v31  ;;  %v7555_v20 = vshll.u32 %v7554_v12, 16 }
0x24a2   :  { %v7552_v10 = vpop.xlane.xlu0 %7551 }
0x24a3   :  { %v7553_v18 = vcvt.f32.s32 %v7552_v10 }
0x24a5   :  { %v7556_v33 = vadd.s32 %v7555_v20, %v7553_v18 }
0x24a7   :  { %vm7557_vm10 = vcmp.eq.s32.totalorder %v10839_v29, %v7556_v33  ;;  %vm7558_vm11 = vcmp.eq.s32.totalorder %v10842_v9, %v7556_v33 }
0x24a8   :  { %vm8578_vm12 = vmpackc.low %vm7557_vm10, %vm7557_vm10 }
0x24a9   :  { %vm8576_vm13 = vmpackc.low %vm7558_vm11, %vm7558_vm11 }
0x24aa   :  { %8577 = vmatprep.mubr.msk.bf16.mxu1 %vm8576_vm13, %v13124_v8 }
0x24ab   :  { %8579 = vmatmul.mubr.msk.bf16.vlgmr.msra.gmra.mxu1 %vm8578_vm12, %v13124_v8 }
0x256b   :  { %v8730_v51 = vpop.f32.mrf.mxu1 }
0x256d   :  { %v8731_v32 = vpop.f32.mrf.mxu1 }
0x256e   :  { %v8732_v27 = vadd.f32 %v8731_v32, %v8730_v51 }
0x256f   :  { %v8733_v29 = vpop.f32.mrf.mxu1 }
0x2570   :  { %v7737_v9 = vpack.c.bf16 %v8732_v27, %v8732_v27 }
0x2571   :  { %v8734_v50 = vpop.f32.mrf.mxu1 }
0x2572   :  { %v7741_v54 = vsel %vm7740_vm14, %v8580_v5, %v7737_v9 }
0x2573   :  { %7742 = vst [vmem:[#allocation3] sm:$0xf] %v7741_v54 }
0x2574   :  { %7747 = vsyncpa [#allocation7], 1 }
0x2575   :  { %7748 = vsyncpa [#allocation9], 1 }

</bundles_post_ra>
